<compile_context>
chip_gen: v7x
topology: tpu7x:2x2x1
jax: 0.10.0
libtpu: 0.0.40
codegen_flags: <defaults>
</compile_context>

<pallas_src>
import functools

import jax
import jax.numpy as jnp
from jax.experimental import pallas as pl
from jax.experimental.pallas import tpu as pltpu


_PARALLEL = pltpu.CompilerParams(dimension_semantics=("parallel",))


# -----------------------------------------------------------------------------
# Kernels
# -----------------------------------------------------------------------------
def _conv3x3_bn_relu_kernel(x_ref, w_ref, scale_ref, shift_ref, o_ref, *,
                            wp, hout):
    """3x3 conv + folded BN + ReLU on one image (one grid step).

    x_ref:     (1, Hpad*Wpad, Cin)  f32   flattened zero-padded image
    w_ref:     (9, Cin, Cout)       bf16  tap-major weights (VMEM-resident)
    scale_ref: (1, Cout)            f32   folded BN scale
    shift_ref: (1, Cout)            f32   folded BN shift (incl. conv bias)
    o_ref:     (1, Hout*Wpad, Cout) f32   columns w >= Wout are wrap-around
                                          garbage, sliced off by the wrapper.
    """
    cout = o_ref.shape[-1]
    nrows = hout * wp
    acc = jnp.zeros((nrows, cout), jnp.float32)
    for ky in range(3):
        for kx in range(3):
            r0 = ky * wp + kx
            # Row h*wp + w of this contiguous window is x_pad[h+ky, w+kx, :].
            patch = x_ref[0, r0:r0 + nrows, :].astype(jnp.bfloat16)
            acc = acc + jnp.dot(patch, w_ref[ky * 3 + kx],
                                preferred_element_type=jnp.float32)
    act = jnp.maximum(acc * scale_ref[...] + shift_ref[...], 0.0)
    o_ref[0] = act.astype(o_ref.dtype)


def _maxpool2x2_kernel(x_ref, o_ref):
    """2x2 / stride-2 max pool on one image.

    x_ref: (1, Ho, 2, Wo, 2*C) f32   ((N,H,W,C) regrouped by the wrapper)
    o_ref: (1, Ho, Wo, C)      f32
    """
    c = o_ref.shape[-1]
    x = x_ref[...]
    hpair = jnp.maximum(x[0, :, 0, :, :], x[0, :, 1, :, :])      # H-pair max
    o_ref[0] = jnp.maximum(hpair[:, :, :c], hpair[:, :, c:]).astype(o_ref.dtype)


def _fc_head_kernel(x_ref, w1_ref, b1_ref, w2_ref, b2_ref, o_ref):
    """fc1 -> Dropout2d(0.25)[eval: identity] -> fc2 (no activation).

    x_ref:  (TB, Din) f32
    w1_ref: (Din, Dh) bf16 (resident)   b1_ref: (1, Dh) f32
    w2_ref: (Dh, Do)  bf16 (resident)   b2_ref: (1, Do) f32
    o_ref:  (TB, Do)  f32   (lane-padded Do, real columns sliced by wrapper)
    """
    x = x_ref[...].astype(jnp.bfloat16)
    h = jnp.dot(x, w1_ref[...], preferred_element_type=jnp.float32) + b1_ref[...]
    # TODO(synk): training-mode dropout would use pltpu.prng_seed +
    #             pltpu.stateful_bernoulli here; eval mode is the identity.
    h = h.astype(jnp.bfloat16)
    out = jnp.dot(h, w2_ref[...], preferred_element_type=jnp.float32) + b2_ref[...]
    o_ref[...] = out.astype(o_ref.dtype)


# -----------------------------------------------------------------------------
# Wrappers
# -----------------------------------------------------------------------------
def conv3x3_bn_relu(x, w9, scale, shift, *, same_pad):
    """x: (N,H,W,Cin) f32, w9: (9,Cin,Cout) bf16, scale/shift: (1,Cout) f32."""
    n, h, w, cin = x.shape
    cout = w9.shape[-1]
    if same_pad:   # Conv2d(padding=1): (1,1) real pad + 1 bottom slack row
        xp = jnp.pad(x, ((0, 0), (1, 2), (1, 1), (0, 0)))
        hout, wout = h, w
    else:          # Conv2d(padding=0): 1 bottom slack row only
        xp = jnp.pad(x, ((0, 0), (0, 1), (0, 0), (0, 0)))
        hout, wout = h - 2, w - 2
    hp, wp = xp.shape[1], xp.shape[2]
    rin, nrows = hp * wp, hout * wp
    x2d = xp.reshape(n, rin, cin)

    kernel = functools.partial(_conv3x3_bn_relu_kernel, wp=wp, hout=hout)
    flops = 2 * n * nrows * 9 * cin * cout
    bytes_acc = 4 * (x2d.size + n * nrows * cout) + 2 * w9.size
    out2d = pl.pallas_call(
        kernel,
        grid=(n,),
        in_specs=[
            pl.BlockSpec((1, rin, cin), lambda i: (i, 0, 0)),
            pl.BlockSpec((9, cin, cout), lambda i: (0, 0, 0)),   # resident
            pl.BlockSpec((1, cout), lambda i: (0, 0)),           # resident
            pl.BlockSpec((1, cout), lambda i: (0, 0)),           # resident
        ],
        out_specs=pl.BlockSpec((1, nrows, cout), lambda i: (i, 0, 0)),
        out_shape=jax.ShapeDtypeStruct((n, nrows, cout), jnp.float32),
        compiler_params=_PARALLEL,
        cost_estimate=pl.CostEstimate(flops=flops, transcendentals=0,
                                      bytes_accessed=bytes_acc),
    )(x2d, w9, scale, shift)
    # Drop the 2 wrap-around columns per row and restore (N, Hout, Wout, Cout).
    return out2d.reshape(n, hout, wp, cout)[:, :, :wout, :]


def maxpool2x2(x):
    """2x2 stride-2 max pool; x: (N,H,W,C) f32 with even H, W."""
    n, h, w, c = x.shape
    ho, wo = h // 2, w // 2
    xr = x.reshape(n, ho, 2, wo, 2 * c)   # free row-major regrouping
    return pl.pallas_call(
        _maxpool2x2_kernel,
        grid=(n,),
        in_specs=[pl.BlockSpec((1, ho, 2, wo, 2 * c),
                               lambda i: (i, 0, 0, 0, 0))],
        out_specs=pl.BlockSpec((1, ho, wo, c), lambda i: (i, 0, 0, 0)),
        out_shape=jax.ShapeDtypeStruct((n, ho, wo, c), x.dtype),
        compiler_params=_PARALLEL,
    )(xr)


def fc_head(x, w1, b1, w2, b2):
    """x: (N, Din) f32; weights bf16, lane-padded; returns (N, Do_pad) f32."""
    n, din = x.shape
    dh, do = w1.shape[1], w2.shape[1]
    tb = n if n <= 512 else (512 if n % 512 == 0 else n)   # batch tile
    flops = 2 * n * (din * dh + dh * do)
    bytes_acc = 4 * (x.size + n * do) + 2 * (w1.size + w2.size)
    return pl.pallas_call(
        _fc_head_kernel,
        grid=(n // tb,),
        in_specs=[
            pl.BlockSpec((tb, din), lambda i: (i, 0)),
            pl.BlockSpec((din, dh), lambda i: (0, 0)),   # resident fc1 weight
            pl.BlockSpec((1, dh), lambda i: (0, 0)),
            pl.BlockSpec((dh, do), lambda i: (0, 0)),    # resident fc2 weight
            pl.BlockSpec((1, do), lambda i: (0, 0)),
        ],
        out_specs=pl.BlockSpec((tb, do), lambda i: (i, 0)),
        out_shape=jax.ShapeDtypeStruct((n, do), jnp.float32),
        compiler_params=_PARALLEL,
        cost_estimate=pl.CostEstimate(flops=flops, transcendentals=0,
                                      bytes_accessed=bytes_acc),
    )(x, w1, b1, w2, b2)


def _pad_last_dim(x, target):
    pad = target - x.shape[-1]
    if pad == 0:
        return x
    cfg = [(0, 0)] * (x.ndim - 1) + [(0, pad)]
    return jnp.pad(x, cfg)


def homemade_cnn_forward(x_nhwc, params):
    """Eval-mode forward pass of homemade_CNN (NHWC activations)."""
    x = _pad_last_dim(x_nhwc.astype(jnp.float32), params["cin_padded"])
    # layer1: Conv(3->32, pad=1) + BN + ReLU + MaxPool(2)
    x = conv3x3_bn_relu(x, *params["layer1"], same_pad=True)
    x = maxpool2x2(x)
    # layer{2..}: Conv(32->32, pad=1) + Dropout2d(0.01)[eval=id] + BN + ReLU
    for layer in params["mid"]:
        x = conv3x3_bn_relu(x, *layer, same_pad=True)
    # layer0: Conv(32->64, valid) + BN + ReLU + MaxPool(2)
    x = conv3x3_bn_relu(x, *params["layer0"], same_pad=False)
    x = maxpool2x2(x)
    # Flatten (NHWC order == PyTorch's NCHW flatten up to a fixed feature
    # permutation, which is absorbed by fc1's weights).
    x = x.reshape(x.shape[0], -1)
    out = fc_head(x, *params["fc"])
    return out[:, :params["out_features"]]


# -----------------------------------------------------------------------------
# Deterministic parameter construction (mirrors nn.Conv2d / nn.Linear init
# ranges; BN params folded into eval-mode scale/shift).
# -----------------------------------------------------------------------------
def _uniform(key, shape, bound):
    return jax.random.uniform(key, shape, jnp.float32, -bound, bound)


def _fold_bn(conv_bias, gamma, beta, mean, var, eps=1e-5):
    scale = gamma / jnp.sqrt(var + eps)
    shift = beta + (conv_bias - mean) * scale
    return (scale.reshape(1, -1).astype(jnp.float32),
            shift.reshape(1, -1).astype(jnp.float32))


def _make_conv_bn(key, cin, cout, cin_pad):
    kw, kb, kg, kbe, km, kv = jax.random.split(key, 6)
    bound = (cin * 9) ** -0.5
    w = _uniform(kw, (9, cin, cout), bound)            # tap-major (ky*3+kx, Cin, Cout)
    b = _uniform(kb, (cout,), bound)
    gamma = jax.random.uniform(kg, (cout,), jnp.float32, 0.5, 1.5)
    beta = 0.1 * jax.random.normal(kbe, (cout,), jnp.float32)
    mean = 0.1 * jax.random.normal(km, (cout,), jnp.float32)
    var = jax.random.uniform(kv, (cout,), jnp.float32, 0.5, 1.5)
    scale, shift = _fold_bn(b, gamma, beta, mean, var)
    if cin_pad > cin:
        w = jnp.pad(w, ((0, 0), (0, cin_pad - cin), (0, 0)))
    return w.astype(jnp.bfloat16), scale, shift


def _make_fc(key, din, dout, din_pad, dout_pad):
    kw, kb = jax.random.split(key)
    bound = din ** -0.5
    w = _uniform(kw, (din, dout), bound)
    b = _uniform(kb, (dout,), bound)
    w = jnp.pad(w, ((0, din_pad - din), (0, dout_pad - dout)))
    b = jnp.pad(b, ((0, dout_pad - dout),)).reshape(1, -1)
    return w.astype(jnp.bfloat16), b.astype(jnp.float32)


def build_params(key, *, num_layers, in_ch, img_hw, hidden=600, out_features=120):
    assert img_hw % 4 == 0, "spatial size must survive two 2x2 pools"
    s1 = img_hw // 2          # after layer1 pool
    s0 = (s1 - 2) // 2        # after layer0 valid conv + pool
    flat = 64 * s0 * s0       # fc1 in_features (193600 for 224x224 input)

    cin_pad = ((in_ch + 7) // 8) * 8
    hidden_pad = ((hidden + 127) // 128) * 128        # 600 -> 640
    out_pad = ((out_features + 127) // 128) * 128     # 120 -> 128

    keys = jax.random.split(key, num_layers + 4)
    params = {"cin_padded": cin_pad, "out_features": out_features}
    params["layer1"] = _make_conv_bn(keys[0], in_ch, 32, cin_pad)
    params["mid"] = [_make_conv_bn(keys[1 + i], 32, 32, 32)
                     for i in range(num_layers)]
    params["layer0"] = _make_conv_bn(keys[1 + num_layers], 32, 64, 32)
    w1, b1 = _make_fc(keys[2 + num_layers], flat, hidden, flat, hidden_pad)
    w2, b2 = _make_fc(keys[3 + num_layers], hidden, out_features,
                      hidden_pad, out_pad)
    params["fc"] = (w1, b1, w2, b2)
    return params


# -----------------------------------------------------------------------------
# Pure-JAX reference (same math, same bf16 cast points) for validation.
# -----------------------------------------------------------------------------
def reference_forward(x_nhwc, params):
    def conv_ref(x, w9, scale, shift, same):
        n, h, w, _ = x.shape
        cout = w9.shape[-1]
        if same:
            xp = jnp.pad(x, ((0, 0), (1, 1), (1, 1), (0, 0)))
            hout, wout = h, w
        else:
            xp = x
            hout, wout = h - 2, w - 2
        acc = jnp.zeros((n, hout, wout, cout), jnp.float32)
        for ky in range(3):
            for kx in range(3):
                patch = xp[:, ky:ky + hout, kx:kx + wout, :].astype(jnp.bfloat16)
                acc = acc + jnp.einsum("nhwc,co->nhwo", patch, w9[ky * 3 + kx],
                                       preferred_element_type=jnp.float32)
        return jnp.maximum(acc * scale + shift, 0.0)

    def pool_ref(x):
        n, h, w, c = x.shape
        return jnp.max(x.reshape(n, h // 2, 2, w // 2, 2, c), axis=(2, 4))

    x = _pad_last_dim(x_nhwc.astype(jnp.float32), params["cin_padded"])
    x = pool_ref(conv_ref(x, *params["layer1"], True))
    for layer in params["mid"]:
        x = conv_ref(x, *layer, True)
    x = pool_ref(conv_ref(x, *params["layer0"], False))
    x = x.reshape(x.shape[0], -1)
    w1, b1, w2, b2 = params["fc"]
    h = jnp.dot(x.astype(jnp.bfloat16), w1,
                preferred_element_type=jnp.float32) + b1
    out = jnp.dot(h.astype(jnp.bfloat16), w2,
                  preferred_element_type=jnp.float32) + b2
    return out[:, :params["out_features"]]


if __name__ == "__main__":
    # Small shapes consistent with the module (the real model expects 224x224
    # RGB so that fc1 sees 64*55*55=193600 features; here 36x36 -> 64*8*8=4096).
    BATCH, IN_CH, IMG = 2, 3, 36
    NUM_LAYERS = 1   # homemade_CNN(num_layers=1) default

    root = jax.random.PRNGKey(0)
    k_x, k_p = jax.random.split(root)
    x = jax.random.normal(k_x, (BATCH, IMG, IMG, IN_CH), jnp.float32)   # NHWC

    params = build_params(k_p, num_layers=NUM_LAYERS, in_ch=IN_CH, img_hw=IMG)

    out = homemade_cnn_forward(x, params)
    out = jax.block_until_ready(out)
    assert out.shape == (BATCH, 120), out.shape

    ref = jax.block_until_ready(reference_forward(x, params))
    max_err = float(jnp.max(jnp.abs(out - ref)))
    assert jnp.allclose(out, ref, atol=2e-2, rtol=2e-2), max_err

    print("KERNEL_OK")
</pallas_src>

<mosaic_0001>
module attributes {stable_mosaic.version = 11 : i64} {
  func.func @_conv3x3_bn_relu_kernel(%arg0: i32, %arg1: memref<1x1482x8xf32, #tpu.memory_space<vmem>>, %arg2: memref<9x8x32xbf16, #tpu.memory_space<vmem>>, %arg3: memref<1x32xf32, #tpu.memory_space<vmem>>, %arg4: memref<1x32xf32, #tpu.memory_space<vmem>>, %arg5: memref<1x1368x32xf32, #tpu.memory_space<vmem>>) attributes {dimension_semantics = [#tpu.dimension_semantics<parallel>], iteration_bounds = array<i64: 2>, scalar_prefetch = 0 : i64, scratch_operands = 0 : i64, tpu.core_type = #tpu.core_type<tc>, window_params = [{transform_indices = @transform_0, window_bounds = array<i64: 1, 1482, 8>}, {pipeline_mode = #tpu.pipeline_mode<synchronous>, transform_indices = @transform_1, window_bounds = array<i64: 9, 8, 32>}, {pipeline_mode = #tpu.pipeline_mode<synchronous>, transform_indices = @transform_2, window_bounds = array<i64: 1, 32>}, {pipeline_mode = #tpu.pipeline_mode<synchronous>, transform_indices = @transform_3, window_bounds = array<i64: 1, 32>}, {transform_indices = @transform_4, window_bounds = array<i64: 1, 1368, 32>}]} {
    %cst = arith.constant 0.000000e+00 : f32
    %0 = vector.broadcast %cst : f32 to vector<1368x32xf32>
    %c0 = arith.constant 0 : index
    %c0_0 = arith.constant 0 : index
    %c0_1 = arith.constant 0 : index
    %1 = vector.load %arg1[%c0, %c0_0, %c0_1] : memref<1x1482x8xf32, #tpu.memory_space<vmem>>, vector<1x1368x8xf32>
    %2 = vector.shape_cast %1 : vector<1x1368x8xf32> to vector<1368x8xf32>
    %3 = arith.truncf %2 : vector<1368x8xf32> to vector<1368x8xbf16>
    %c0_2 = arith.constant 0 : index
    %c0_3 = arith.constant 0 : index
    %c0_4 = arith.constant 0 : index
    %4 = vector.load %arg2[%c0_2, %c0_3, %c0_4] : memref<9x8x32xbf16, #tpu.memory_space<vmem>>, vector<1x8x32xbf16>
    %5 = vector.shape_cast %4 : vector<1x8x32xbf16> to vector<8x32xbf16>
    %cst_5 = arith.constant dense<0.000000e+00> : vector<1368x32xf32>
    %6 = tpu.matmul %3, %5, %cst_5 {dimension_numbers = #tpu.dot_dimension_numbers<[1], [0], [0], [1], [0, 0, 1, 1], [], []>} : vector<1368x8xbf16>, vector<8x32xbf16>, vector<1368x32xf32> -> vector<1368x32xf32>
    %7 = arith.addf %0, %6 : vector<1368x32xf32>
    %c0_6 = arith.constant 0 : index
    %c1 = arith.constant 1 : index
    %c0_7 = arith.constant 0 : index
    %8 = vector.load %arg1[%c0_6, %c1, %c0_7] : memref<1x1482x8xf32, #tpu.memory_space<vmem>>, vector<1x1368x8xf32>
    %9 = vector.shape_cast %8 : vector<1x1368x8xf32> to vector<1368x8xf32>
    %10 = arith.truncf %9 : vector<1368x8xf32> to vector<1368x8xbf16>
    %c1_8 = arith.constant 1 : index
    %c0_9 = arith.constant 0 : index
    %c0_10 = arith.constant 0 : index
    %11 = vector.load %arg2[%c1_8, %c0_9, %c0_10] : memref<9x8x32xbf16, #tpu.memory_space<vmem>>, vector<1x8x32xbf16>
    %12 = vector.shape_cast %11 : vector<1x8x32xbf16> to vector<8x32xbf16>
    %cst_11 = arith.constant dense<0.000000e+00> : vector<1368x32xf32>
    %13 = tpu.matmul %10, %12, %cst_11 {dimension_numbers = #tpu.dot_dimension_numbers<[1], [0], [0], [1], [0, 0, 1, 1], [], []>} : vector<1368x8xbf16>, vector<8x32xbf16>, vector<1368x32xf32> -> vector<1368x32xf32>
    %14 = arith.addf %7, %13 : vector<1368x32xf32>
    %c0_12 = arith.constant 0 : index
    %c2 = arith.constant 2 : index
    %c0_13 = arith.constant 0 : index
    %15 = vector.load %arg1[%c0_12, %c2, %c0_13] : memref<1x1482x8xf32, #tpu.memory_space<vmem>>, vector<1x1368x8xf32>
    %16 = vector.shape_cast %15 : vector<1x1368x8xf32> to vector<1368x8xf32>
    %17 = arith.truncf %16 : vector<1368x8xf32> to vector<1368x8xbf16>
    %c2_14 = arith.constant 2 : index
    %c0_15 = arith.constant 0 : index
    %c0_16 = arith.constant 0 : index
    %18 = vector.load %arg2[%c2_14, %c0_15, %c0_16] : memref<9x8x32xbf16, #tpu.memory_space<vmem>>, vector<1x8x32xbf16>
    %19 = vector.shape_cast %18 : vector<1x8x32xbf16> to vector<8x32xbf16>
    %cst_17 = arith.constant dense<0.000000e+00> : vector<1368x32xf32>
    %20 = tpu.matmul %17, %19, %cst_17 {dimension_numbers = #tpu.dot_dimension_numbers<[1], [0], [0], [1], [0, 0, 1, 1], [], []>} : vector<1368x8xbf16>, vector<8x32xbf16>, vector<1368x32xf32> -> vector<1368x32xf32>
    %21 = arith.addf %14, %20 : vector<1368x32xf32>
    %c0_18 = arith.constant 0 : index
    %c38 = arith.constant 38 : index
    %c0_19 = arith.constant 0 : index
    %22 = vector.load %arg1[%c0_18, %c38, %c0_19] : memref<1x1482x8xf32, #tpu.memory_space<vmem>>, vector<1x1368x8xf32>
    %23 = vector.shape_cast %22 : vector<1x1368x8xf32> to vector<1368x8xf32>
    %24 = arith.truncf %23 : vector<1368x8xf32> to vector<1368x8xbf16>
    %c3 = arith.constant 3 : index
    %c0_20 = arith.constant 0 : index
    %c0_21 = arith.constant 0 : index
    %25 = vector.load %arg2[%c3, %c0_20, %c0_21] : memref<9x8x32xbf16, #tpu.memory_space<vmem>>, vector<1x8x32xbf16>
    %26 = vector.shape_cast %25 : vector<1x8x32xbf16> to vector<8x32xbf16>
    %cst_22 = arith.constant dense<0.000000e+00> : vector<1368x32xf32>
    %27 = tpu.matmul %24, %26, %cst_22 {dimension_numbers = #tpu.dot_dimension_numbers<[1], [0], [0], [1], [0, 0, 1, 1], [], []>} : vector<1368x8xbf16>, vector<8x32xbf16>, vector<1368x32xf32> -> vector<1368x32xf32>
    %28 = arith.addf %21, %27 : vector<1368x32xf32>
    %c0_23 = arith.constant 0 : index
    %c39 = arith.constant 39 : index
    %c0_24 = arith.constant 0 : index
    %29 = vector.load %arg1[%c0_23, %c39, %c0_24] : memref<1x1482x8xf32, #tpu.memory_space<vmem>>, vector<1x1368x8xf32>
    %30 = vector.shape_cast %29 : vector<1x1368x8xf32> to vector<1368x8xf32>
    %31 = arith.truncf %30 : vector<1368x8xf32> to vector<1368x8xbf16>
    %c4 = arith.constant 4 : index
    %c0_25 = arith.constant 0 : index
    %c0_26 = arith.constant 0 : index
    %32 = vector.load %arg2[%c4, %c0_25, %c0_26] : memref<9x8x32xbf16, #tpu.memory_space<vmem>>, vector<1x8x32xbf16>
    %33 = vector.shape_cast %32 : vector<1x8x32xbf16> to vector<8x32xbf16>
    %cst_27 = arith.constant dense<0.000000e+00> : vector<1368x32xf32>
    %34 = tpu.matmul %31, %33, %cst_27 {dimension_numbers = #tpu.dot_dimension_numbers<[1], [0], [0], [1], [0, 0, 1, 1], [], []>} : vector<1368x8xbf16>, vector<8x32xbf16>, vector<1368x32xf32> -> vector<1368x32xf32>
    %35 = arith.addf %28, %34 : vector<1368x32xf32>
    %c0_28 = arith.constant 0 : index
    %c40 = arith.constant 40 : index
    %c0_29 = arith.constant 0 : index
    %36 = vector.load %arg1[%c0_28, %c40, %c0_29] : memref<1x1482x8xf32, #tpu.memory_space<vmem>>, vector<1x1368x8xf32>
    %37 = vector.shape_cast %36 : vector<1x1368x8xf32> to vector<1368x8xf32>
    %38 = arith.truncf %37 : vector<1368x8xf32> to vector<1368x8xbf16>
    %c5 = arith.constant 5 : index
    %c0_30 = arith.constant 0 : index
    %c0_31 = arith.constant 0 : index
    %39 = vector.load %arg2[%c5, %c0_30, %c0_31] : memref<9x8x32xbf16, #tpu.memory_space<vmem>>, vector<1x8x32xbf16>
    %40 = vector.shape_cast %39 : vector<1x8x32xbf16> to vector<8x32xbf16>
    %cst_32 = arith.constant dense<0.000000e+00> : vector<1368x32xf32>
    %41 = tpu.matmul %38, %40, %cst_32 {dimension_numbers = #tpu.dot_dimension_numbers<[1], [0], [0], [1], [0, 0, 1, 1], [], []>} : vector<1368x8xbf16>, vector<8x32xbf16>, vector<1368x32xf32> -> vector<1368x32xf32>
    %42 = arith.addf %35, %41 : vector<1368x32xf32>
    %c0_33 = arith.constant 0 : index
    %c76 = arith.constant 76 : index
    %c0_34 = arith.constant 0 : index
    %43 = vector.load %arg1[%c0_33, %c76, %c0_34] : memref<1x1482x8xf32, #tpu.memory_space<vmem>>, vector<1x1368x8xf32>
    %44 = vector.shape_cast %43 : vector<1x1368x8xf32> to vector<1368x8xf32>
    %45 = arith.truncf %44 : vector<1368x8xf32> to vector<1368x8xbf16>
    %c6 = arith.constant 6 : index
    %c0_35 = arith.constant 0 : index
    %c0_36 = arith.constant 0 : index
    %46 = vector.load %arg2[%c6, %c0_35, %c0_36] : memref<9x8x32xbf16, #tpu.memory_space<vmem>>, vector<1x8x32xbf16>
    %47 = vector.shape_cast %46 : vector<1x8x32xbf16> to vector<8x32xbf16>
    %cst_37 = arith.constant dense<0.000000e+00> : vector<1368x32xf32>
    %48 = tpu.matmul %45, %47, %cst_37 {dimension_numbers = #tpu.dot_dimension_numbers<[1], [0], [0], [1], [0, 0, 1, 1], [], []>} : vector<1368x8xbf16>, vector<8x32xbf16>, vector<1368x32xf32> -> vector<1368x32xf32>
    %49 = arith.addf %42, %48 : vector<1368x32xf32>
    %c0_38 = arith.constant 0 : index
    %c77 = arith.constant 77 : index
    %c0_39 = arith.constant 0 : index
    %50 = vector.load %arg1[%c0_38, %c77, %c0_39] : memref<1x1482x8xf32, #tpu.memory_space<vmem>>, vector<1x1368x8xf32>
    %51 = vector.shape_cast %50 : vector<1x1368x8xf32> to vector<1368x8xf32>
    %52 = arith.truncf %51 : vector<1368x8xf32> to vector<1368x8xbf16>
    %c7 = arith.constant 7 : index
    %c0_40 = arith.constant 0 : index
    %c0_41 = arith.constant 0 : index
    %53 = vector.load %arg2[%c7, %c0_40, %c0_41] : memref<9x8x32xbf16, #tpu.memory_space<vmem>>, vector<1x8x32xbf16>
    %54 = vector.shape_cast %53 : vector<1x8x32xbf16> to vector<8x32xbf16>
    %cst_42 = arith.constant dense<0.000000e+00> : vector<1368x32xf32>
    %55 = tpu.matmul %52, %54, %cst_42 {dimension_numbers = #tpu.dot_dimension_numbers<[1], [0], [0], [1], [0, 0, 1, 1], [], []>} : vector<1368x8xbf16>, vector<8x32xbf16>, vector<1368x32xf32> -> vector<1368x32xf32>
    %56 = arith.addf %49, %55 : vector<1368x32xf32>
    %c0_43 = arith.constant 0 : index
    %c78 = arith.constant 78 : index
    %c0_44 = arith.constant 0 : index
    %57 = vector.load %arg1[%c0_43, %c78, %c0_44] : memref<1x1482x8xf32, #tpu.memory_space<vmem>>, vector<1x1368x8xf32>
    %58 = vector.shape_cast %57 : vector<1x1368x8xf32> to vector<1368x8xf32>
    %59 = arith.truncf %58 : vector<1368x8xf32> to vector<1368x8xbf16>
    %c8 = arith.constant 8 : index
    %c0_45 = arith.constant 0 : index
    %c0_46 = arith.constant 0 : index
    %60 = vector.load %arg2[%c8, %c0_45, %c0_46] : memref<9x8x32xbf16, #tpu.memory_space<vmem>>, vector<1x8x32xbf16>
    %61 = vector.shape_cast %60 : vector<1x8x32xbf16> to vector<8x32xbf16>
    %cst_47 = arith.constant dense<0.000000e+00> : vector<1368x32xf32>
    %62 = tpu.matmul %59, %61, %cst_47 {dimension_numbers = #tpu.dot_dimension_numbers<[1], [0], [0], [1], [0, 0, 1, 1], [], []>} : vector<1368x8xbf16>, vector<8x32xbf16>, vector<1368x32xf32> -> vector<1368x32xf32>
    %63 = arith.addf %56, %62 : vector<1368x32xf32>
    %c0_48 = arith.constant 0 : index
    %c0_49 = arith.constant 0 : index
    %64 = vector.load %arg3[%c0_48, %c0_49] : memref<1x32xf32, #tpu.memory_space<vmem>>, vector<1x32xf32>
    %65 = vector.broadcast %64 : vector<1x32xf32> to vector<1368x32xf32>
    %66 = arith.mulf %63, %65 : vector<1368x32xf32>
    %c0_50 = arith.constant 0 : index
    %c0_51 = arith.constant 0 : index
    %67 = vector.load %arg4[%c0_50, %c0_51] : memref<1x32xf32, #tpu.memory_space<vmem>>, vector<1x32xf32>
    %68 = vector.broadcast %67 : vector<1x32xf32> to vector<1368x32xf32>
    %69 = arith.addf %66, %68 : vector<1368x32xf32>
    %cst_52 = arith.constant 0.000000e+00 : f32
    %70 = vector.broadcast %cst_52 : f32 to vector<1368x32xf32>
    %71 = arith.maximumf %69, %70 : vector<1368x32xf32>
    %c0_53 = arith.constant 0 : index
    %c0_54 = arith.constant 0 : index
    %c0_55 = arith.constant 0 : index
    %72 = vector.load %arg5[%c0_53, %c0_54, %c0_55] : memref<1x1368x32xf32, #tpu.memory_space<vmem>>, vector<1x1368x32xf32>
    %73 = vector.shape_cast %72 : vector<1x1368x32xf32> to vector<1368x32xf32>
    %74 = vector.shape_cast %71 : vector<1368x32xf32> to vector<1x1368x32xf32>
    tpu.vector_store %arg5[%c0_53, %c0_54, %c0_55], %74 {strides = array<i32>} : memref<1x1368x32xf32, #tpu.memory_space<vmem>>, vector<1x1368x32xf32>,
    return
  }
  func.func @transform_0(%arg0: i32) -> (i32, i32, i32) {
    %c0_i32 = arith.constant 0 : i32
    %c0_i32_0 = arith.constant 0 : i32
    %c0_i32_1 = arith.constant 0 : i32
    return %arg0, %c0_i32, %c0_i32_0 : i32, i32, i32
  }
  func.func @transform_1(%arg0: i32) -> (i32, i32, i32) {
    %c0_i32 = arith.constant 0 : i32
    %c0_i32_0 = arith.constant 0 : i32
    %c0_i32_1 = arith.constant 0 : i32
    %c0_i32_2 = arith.constant 0 : i32
    return %c0_i32, %c0_i32_0, %c0_i32_1 : i32, i32, i32
  }
  func.func @transform_2(%arg0: i32) -> (i32, i32) {
    %c0_i32 = arith.constant 0 : i32
    %c0_i32_0 = arith.constant 0 : i32
    %c0_i32_1 = arith.constant 0 : i32
    return %c0_i32, %c0_i32_0 : i32, i32
  }
  func.func @transform_3(%arg0: i32) -> (i32, i32) {
    %c0_i32 = arith.constant 0 : i32
    %c0_i32_0 = arith.constant 0 : i32
    %c0_i32_1 = arith.constant 0 : i32
    return %c0_i32, %c0_i32_0 : i32, i32
  }
  func.func @transform_4(%arg0: i32) -> (i32, i32, i32) {
    %c0_i32 = arith.constant 0 : i32
    %c0_i32_0 = arith.constant 0 : i32
    %c0_i32_1 = arith.constant 0 : i32
    return %arg0, %c0_i32, %c0_i32_0 : i32, i32, i32
  }
}

</mosaic_0001>

<bundles_post_ra>
// kernel: tpu_custom_call.1
= control target key start
LH: loop header
LB: loop body
LE: loop exit
PB: predicated region body
PF: predicated region fallthrough
CT: control target
= control target key end

     0   :  { %s17888_s15 = smov 0   ;;  %s22148_s0 = inlined_call_operand.vmem [shape: f32[2,1482,8], index: 0, kind: input, shape index: {}]   ;;  %s22149_s1 = inlined_call_operand.vmem [shape: bf16[9,8,32], index: 1, kind: input, shape index: {}]   ;;  %s22150_s2 = inlined_call_operand.vmem [shape: f32[1,32], index: 2, kind: input, shape index: {}]   ;;  %s22151_s3 = inlined_call_operand.vmem [shape: f32[1,32], index: 3, kind: input, shape index: {}]   ;;  %s22152_s4 = inlined_call_operand.vmem [shape: f32[2,1368,32], index: 4, kind: output, shape index: {}]  }
   0x1 LB: > { %s13311_s16 = sadd.s32 4294967295, %s17861_s15   ;;  %p13315_p0 = scmp.ge.s32.totalorder %s17861_s15, 1  ;;  %s17861_s15 = sphi %s17888_s15, %s14_s15  }
   0x2   : > { %p162_p1 = scmp.lt.s32.totalorder %s17861_s15, 3 }
   0x4   : > { %p163_p2 = pnand %p13315_p0, %p162_p1 }
   0x6   : > { %166 = sbr.rel (%p163_p2) target bundleno = 1792 (0x700), region = 36 }
   0xd   : > { %vm975_vm0 = vcmask 1043456   ;;  %v13665_v0 = vld [vmem:[%s22149_s1 + $0x10] sm:$0xf]  ;;  %v13318_v1 = vld [vmem:[%s22149_s1 + $0x4] sm:$0xf]  ;;  %p188_p3 = scmp.lt.s32.totalorder %s13311_s16, 1 }
   0xe   : > { %17834 = vmatprep.subr.msk.bf16.mxu0 %vm975_vm0, %v13665_v0  ;;  %17830 = vmatprep.subr.msk.bf16.mxu1 %vm975_vm0, %v13318_v1  ;;  %v17905_v2 = vsel %vm975_vm0, %v13665_v0, 0  ;;  %v977_v3 = vsel %vm975_vm0, %v13318_v1, 0  ;;  %v13752_v4 = vld [vmem:[%s22149_s1 + $0x14] sm:$0xf]  ;;  %v456_v5 = vld [vmem:[%s22149_s1] sm:$0xf] }
   0xf   : > { %22254 = vst [vmem:[#allocation2_spill] sm:$0xff] %v17905_v2  ;;  %15584 = vmatpush3.bf16.msra.mxu0 %v17905_v2  ;;  %14888 = vmatpush3.bf16.msra.mxu1 %v977_v3  ;;  %s22569_s16 = smov (!%p188_p3, %s13311_s16), 1  ;;  %vm716_vm1 = vcmask 64512   ;;  %v1958_v18 = vsel %vm975_vm0, %v456_v5, 0  ;;  %v7431_v20 = vsel %vm975_vm0, %v13752_v4, 0  ;;  %vm13084_vm2 = vcmask 261120  }
  0x10   : > { %17836 = vmatprep.subr.msk.bf16.mxu0 %vm975_vm0, %v13752_v4  ;;  %17831 = vmatprep.subr.msk.bf16.mxu1 %vm975_vm0, %v456_v5  ;;  %s17840_s25 = smul.u32 1488, %s22569_s16 }
  0x11   : > { %s17841_s19 = smul.u32 1368, %s22569_s16 }
  0x12   : > { %s17923_s28 = scalar_lea.vmem %s22148_s0, %s17840_s25 }
  0x13   : > { %v457_v6 = vld [vmem:[%s17923_s28 + $0x1] sm:$0xff]  ;;  %v458_v7 = vld [vmem:[%s17923_s28 + $0x9] sm:$0xff]  ;;  %v459_v11 = vld [vmem:[%s17923_s28 + $0x11] sm:$0xff]  ;;  %s21194_s23 = scalar_lea.vmem %s22152_s4, %s17841_s19 }
  0x14   : > { %v5502_v8 = vld [vmem:[%s17923_s28 + $0x27] sm:$0xff]  ;;  %v628_v9 = vpack.c.bf16 %v458_v7, %v457_v6  ;;  %v5503_v10 = vld [vmem:[%s17923_s28 + $0x2f] sm:$0xff]  ;;  %v460_v12 = vld [vmem:[%s17923_s28 + $0x19] sm:$0xff] }
  0x15   : > { %v5673_v13 = vpack.c.bf16 %v5503_v10, %v5502_v8  ;;  %v629_v14 = vpack.c.bf16 %v460_v12, %v459_v11  ;;  %v5504_v15 = vld [vmem:[%s17923_s28 + $0x37] sm:$0xff]  ;;  %v5505_v16 = vld [vmem:[%s17923_s28 + $0x3f] sm:$0xff]  ;;  %v462_v21 = vld [vmem:[%s17923_s28 + $0x29] sm:$0xff] }
  0x16   : > { %v461_v17 = vld [vmem:[%s17923_s28 + $0x21] sm:$0xff]  ;;  %14889 = vmatprep.mubr.msk.bf16.mxu1 %vm716_vm1, %v628_v9  ;;  %v5674_v19 = vpack.c.bf16 %v5505_v16, %v5504_v15  ;;  %v5507_v23 = vld [vmem:[%s17923_s28 + $0x4f] sm:$0xff]  ;;  %v464_v27 = vld [vmem:[%s17923_s28 + $0x39] sm:$0xff] }
  0x17   : > { %v5506_v22 = vld [vmem:[%s17923_s28 + $0x47] sm:$0xff]  ;;  %15585 = vmatprep.mubr.msk.bf16.mxu0 %vm716_vm1, %v5673_v13  ;;  %14890 = vmatmul.mubr.msk.bf16.vlgmr.msra.gmra.mrb[0].mxu1 %vm716_vm1, %v629_v14  ;;  %v630_v24 = vpack.c.bf16 %v462_v21, %v461_v17  ;;  %v463_v26 = vld [vmem:[%s17923_s28 + $0x31] sm:$0xff]  ;;  %v5509_v29 = vld [vmem:[%s17923_s28 + $0x5f] sm:$0xff] }
  0x18   : > { %v5675_v25 = vpack.c.bf16 %v5507_v23, %v5506_v22  ;;  %15586 = vmatmul.mubr.msk.bf16.vlgmr.msra.gmra.mrb[0].mxu0 %vm716_vm1, %v5674_v19  ;;  %15062 = vmatpush3.bf16.msra.mxu1 %v1958_v18  ;;  %v5508_v28 = vld [vmem:[%s17923_s28 + $0x57] sm:$0xff]  ;;  %v465_v30 = vld [vmem:[%s17923_s28 + $0x41] sm:$0xff]  ;;  %v466_v31 = vld [vmem:[%s17923_s28 + $0x49] sm:$0xff]  ;;  %v631_v34 = vpack.c.bf16 %v464_v27, %v463_v26 }
  0x19   : > { %15758 = vmatpush3.bf16.msra.mxu0 %v7431_v20  ;;  %14893 = vmatprep.mubr.msk.bf16.mxu1 %vm716_vm1, %v630_v24  ;;  %v5510_v32 = vld [vmem:[%s17923_s28 + $0x67] sm:$0xff]  ;;  %v5511_v33 = vld [vmem:[%s17923_s28 + $0x6f] sm:$0xff]  ;;  %v5676_v35 = vpack.c.bf16 %v5509_v29, %v5508_v28  ;;  %v632_v36 = vpack.c.bf16 %v466_v31, %v465_v30  ;;  %v468_v39 = vld [vmem:[%s17923_s28 + $0x59] sm:$0xff] }
  0x1a   : > { %15589 = vmatprep.mubr.msk.bf16.mxu0 %vm716_vm1, %v5675_v25  ;;  %v5677_v37 = vpack.c.bf16 %v5511_v33, %v5510_v32  ;;  %v467_v38 = vld [vmem:[%s17923_s28 + $0x51] sm:$0xff]  ;;  %v5513_v41 = vld [vmem:[%s17923_s28 + $0x7f] sm:$0xff]  ;;  %v470_v43 = vld [vmem:[%s17923_s28 + $0x69] sm:$0xff] }
  0x1b   : > { %v5512_v40 = vld [vmem:[%s17923_s28 + $0x77] sm:$0xff]  ;;  %v469_v42 = vld [vmem:[%s17923_s28 + $0x61] sm:$0xff]  ;;  %v5515_v45 = vld [vmem:[%s17923_s28 + $0x8f] sm:$0xff]  ;;  %v633_v46 = vpack.c.bf16 %v468_v39, %v467_v38 }
  0x1c   : > { %v5514_v44 = vld [vmem:[%s17923_s28 + $0x87] sm:$0xff]  ;;  %v5678_v47 = vpack.c.bf16 %v5513_v41, %v5512_v40  ;;  %v634_v48 = vpack.c.bf16 %v470_v43, %v469_v42  ;;  %v471_v50 = vld [vmem:[%s17923_s28 + $0x71] sm:$0xff]  ;;  %v472_v51 = vld [vmem:[%s17923_s28 + $0x79] sm:$0xff] }
  0x1d   : > { %v5679_v49 = vpack.c.bf16 %v5515_v45, %v5514_v44  ;;  %v5516_v52 = vld [vmem:[%s17923_s28 + $0x97] sm:$0xff]  ;;  %v5517_v53 = vld [vmem:[%s17923_s28 + $0x9f] sm:$0xff]  ;;  %v474_v55 = vld [vmem:[%s17923_s28 + $0x89] sm:$0xff]  ;;  %v635_v58 = vpack.c.bf16 %v472_v51, %v471_v50 }
  0x1e   : > { %v473_v54 = vld [vmem:[%s17923_s28 + $0x81] sm:$0xff]  ;;  %v5519_v57 = vld [vmem:[%s17923_s28 + $0xaf] sm:$0xff]  ;;  %v5680_v59 = vpack.c.bf16 %v5517_v53, %v5516_v52  ;;  %v476_v63 = vld [vmem:[%s17923_s28 + $0x99] sm:$0xff] }
  0x1f   : > { %14894 = vmatmul.mubr.msk.bf16.gmra.mrb[4].mxu1 %vm716_vm1, %v631_v34  ;;  %v5518_v56 = vld [vmem:[%s17923_s28 + $0xa7] sm:$0xff]  ;;  %v636_v60 = vpack.c.bf16 %v474_v55, %v473_v54  ;;  %v475_v62 = vld [vmem:[%s17923_s28 + $0x91] sm:$0xff]  ;;  %v5521_v1 = vld [vmem:[%s17923_s28 + $0xbf] sm:$0xff] }
  0x20   : > { %15590 = vmatmul.mubr.msk.bf16.gmra.mrb[4].mxu0 %vm716_vm1, %v5676_v35  ;;  %14897 = vmatprep.mubr.msk.bf16.mxu1 %vm716_vm1, %v632_v36  ;;  %v5681_v61 = vpack.c.bf16 %v5519_v57, %v5518_v56  ;;  %v5520_v0 = vld [vmem:[%s17923_s28 + $0xb7] sm:$0xff]  ;;  %v477_v3 = vld [vmem:[%s17923_s28 + $0xa1] sm:$0xff]  ;;  %v478_v4 = vld [vmem:[%s17923_s28 + $0xa9] sm:$0xff]  ;;  %v637_v7 = vpack.c.bf16 %v476_v63, %v475_v62 }
  0x21   : > { %15593 = vmatprep.mubr.msk.bf16.mxu0 %vm716_vm1, %v5677_v37  ;;  %v5522_v5 = vld [vmem:[%s17923_s28 + $0xc7] sm:$0xff]  ;;  %v5523_v6 = vld [vmem:[%s17923_s28 + $0xcf] sm:$0xff]  ;;  %v5682_v8 = vpack.c.bf16 %v5521_v1, %v5520_v0  ;;  %v638_v9 = vpack.c.bf16 %v478_v4, %v477_v3  ;;  %v480_v12 = vld [vmem:[%s17923_s28 + $0xb9] sm:$0xff] }
  0x22   : > { %v5683_v10 = vpack.c.bf16 %v5523_v6, %v5522_v5  ;;  %v479_v11 = vld [vmem:[%s17923_s28 + $0xb1] sm:$0xff]  ;;  %v5525_v14 = vld [vmem:[%s17923_s28 + $0xdf] sm:$0xff]  ;;  %v482_v16 = vld [vmem:[%s17923_s28 + $0xc9] sm:$0xff] }
  0x23   : > { %v5524_v13 = vld [vmem:[%s17923_s28 + $0xd7] sm:$0xff]  ;;  %v481_v15 = vld [vmem:[%s17923_s28 + $0xc1] sm:$0xff]  ;;  %v5527_v18 = vld [vmem:[%s17923_s28 + $0xef] sm:$0xff]  ;;  %v639_v19 = vpack.c.bf16 %v480_v12, %v479_v11 }
  0x24   : > { %v5526_v17 = vld [vmem:[%s17923_s28 + $0xe7] sm:$0xff]  ;;  %v5684_v20 = vpack.c.bf16 %v5525_v14, %v5524_v13  ;;  %v640_v21 = vpack.c.bf16 %v482_v16, %v481_v15  ;;  %v483_v23 = vld [vmem:[%s17923_s28 + $0xd1] sm:$0xff]  ;;  %v484_v24 = vld [vmem:[%s17923_s28 + $0xd9] sm:$0xff] }
  0x25   : > { %v5685_v22 = vpack.c.bf16 %v5527_v18, %v5526_v17  ;;  %v5528_v25 = vld [vmem:[%s17923_s28 + $0xf7] sm:$0xff]  ;;  %v5529_v26 = vld [vmem:[%s17923_s28 + $0xff] sm:$0xff]  ;;  %v486_v28 = vld [vmem:[%s17923_s28 + $0xe9] sm:$0xff]  ;;  %v641_v31 = vpack.c.bf16 %v484_v24, %v483_v23 }
  0x26   : > { %v485_v27 = vld [vmem:[%s17923_s28 + $0xe1] sm:$0xff]  ;;  %v5531_v30 = vld [vmem:[%s17923_s28 + $0x10f] sm:$0xff]  ;;  %v5686_v32 = vpack.c.bf16 %v5529_v26, %v5528_v25  ;;  %v488_v36 = vld [vmem:[%s17923_s28 + $0xf9] sm:$0xff] }
  0x27   : > { %14898 = vmatmul.mubr.msk.bf16.gmra.mrb[8].mxu1 %vm716_vm1, %v633_v46  ;;  %v5530_v29 = vld [vmem:[%s17923_s28 + $0x107] sm:$0xff]  ;;  %v642_v33 = vpack.c.bf16 %v486_v28, %v485_v27  ;;  %v487_v35 = vld [vmem:[%s17923_s28 + $0xf1] sm:$0xff]  ;;  %v5533_v38 = vld [vmem:[%s17923_s28 + $0x11f] sm:$0xff] }
  0x28   : > { %15594 = vmatmul.mubr.msk.bf16.gmra.mrb[8].mxu0 %vm716_vm1, %v5678_v47  ;;  %14901 = vmatprep.mubr.msk.bf16.mxu1 %vm716_vm1, %v634_v48  ;;  %v5687_v34 = vpack.c.bf16 %v5531_v30, %v5530_v29  ;;  %v5532_v37 = vld [vmem:[%s17923_s28 + $0x117] sm:$0xff]  ;;  %v489_v39 = vld [vmem:[%s17923_s28 + $0x101] sm:$0xff]  ;;  %v490_v40 = vld [vmem:[%s17923_s28 + $0x109] sm:$0xff]  ;;  %v643_v43 = vpack.c.bf16 %v488_v36, %v487_v35 }
  0x29   : > { %15597 = vmatprep.mubr.msk.bf16.mxu0 %vm716_vm1, %v5679_v49  ;;  %v5534_v41 = vld [vmem:[%s17923_s28 + $0x127] sm:$0xff]  ;;  %v5535_v42 = vld [vmem:[%s17923_s28 + $0x12f] sm:$0xff]  ;;  %v5688_v44 = vpack.c.bf16 %v5533_v38, %v5532_v37  ;;  %v644_v45 = vpack.c.bf16 %v490_v40, %v489_v39  ;;  %v18029_v47 = vld [vmem:[%s22149_s1 + $0x18] sm:$0xf] }
  0x2a   : > { %v5689_v46 = vpack.c.bf16 %v5535_v42, %v5534_v41  ;;  %v491_v48 = vld [vmem:[%s17923_s28 + $0x111] sm:$0xff]  ;;  %v492_v49 = vld [vmem:[%s17923_s28 + $0x119] sm:$0xff]  ;;  %v493_v52 = vld [vmem:[%s17923_s28 + $0x121] sm:$0xff]  ;;  %17837 = vmatprep.subr.msk.bf16.mxu0 %vm975_vm0, %v18029_v47 }
  0x2b   : > { %v5536_v50 = vld [vmem:[%s17923_s28 + $0x137] sm:$0xff]  ;;  %v5537_v51 = vld [vmem:[%s17923_s28 + $0x13f] sm:$0xff]  ;;  %v494_v53 = vld [vmem:[%s17923_s28 + $0x129] sm:$0xff]  ;;  %v645_v56 = vpack.c.bf16 %v492_v49, %v491_v48 }
  0x2c   : > { %v5538_v54 = vld [vmem:[%s17923_s28 + $0x147] sm:$0xff]  ;;  %v5539_v55 = vld [vmem:[%s17923_s28 + $0x14f] sm:$0xff]  ;;  %v5690_v57 = vpack.c.bf16 %v5537_v51, %v5536_v50  ;;  %v5540_v62 = vld [vmem:[%s17923_s28 + $0x157] sm:$0xff] }
  0x2d   : > { %v5541_v63 = vld [vmem:[%s17923_s28 + $0x15f] sm:$0xff]  ;;  %v498_v1 = vld [vmem:[%s17923_s28 + $0x149] sm:$0xff]  ;;  %v5544_v11 = vld [vmem:[%s17923_s28 + $0x177] sm:$0xff] }
  0x2e   : > { %v497_v0 = vld [vmem:[%s17923_s28 + $0x141] sm:$0xff]  ;;  %v5543_v4 = vld [vmem:[%s17923_s28 + $0x16f] sm:$0xff]  ;;  %v5692_v6 = vpack.c.bf16 %v5541_v63, %v5540_v62  ;;  %v5548_v23 = vld [vmem:[%s17923_s28 + $0x197] sm:$0xff] }
  0x2f   : > { %14902 = vmatmul.mubr.msk.bf16.gmra.mrb[12].mxu1 %vm716_vm1, %v635_v58  ;;  %v646_v58 = vpack.c.bf16 %v494_v53, %v493_v52  ;;  %v5542_v3 = vld [vmem:[%s17923_s28 + $0x167] sm:$0xff]  ;;  %v5545_v12 = vld [vmem:[%s17923_s28 + $0x17f] sm:$0xff]  ;;  %v5547_v16 = vld [vmem:[%s17923_s28 + $0x18f] sm:$0xff] }
  0x30   : > { %15598 = vmatmul.mubr.msk.bf16.gmra.mrb[12].mxu0 %vm716_vm1, %v5680_v59  ;;  %14905 = vmatprep.mubr.msk.bf16.mxu1 %vm716_vm1, %v636_v60  ;;  %v5691_v59 = vpack.c.bf16 %v5539_v55, %v5538_v54  ;;  %v495_v60 = vld [vmem:[%s17923_s28 + $0x131] sm:$0xff]  ;;  %v501_v13 = vld [vmem:[%s17923_s28 + $0x161] sm:$0xff]  ;;  %v502_v14 = vld [vmem:[%s17923_s28 + $0x169] sm:$0xff]  ;;  %v5694_v18 = vpack.c.bf16 %v5545_v12, %v5544_v11 }
  0x31   : > { %15601 = vmatprep.mubr.msk.bf16.mxu0 %vm716_vm1, %v5681_v61  ;;  %v496_v61 = vld [vmem:[%s17923_s28 + $0x139] sm:$0xff]  ;;  %v5546_v15 = vld [vmem:[%s17923_s28 + $0x187] sm:$0xff]  ;;  %v5551_v28 = vld [vmem:[%s17923_s28 + $0x1af] sm:$0xff] }
  0x32   : > { %v647_v5 = vpack.c.bf16 %v496_v61, %v495_v60  ;;  %v5549_v24 = vld [vmem:[%s17923_s28 + $0x19f] sm:$0xff]  ;;  %v506_v26 = vld [vmem:[%s17923_s28 + $0x189] sm:$0xff]  ;;  %v5552_v35 = vld [vmem:[%s17923_s28 + $0x1b7] sm:$0xff] }
  0x33   : > { %v505_v25 = vld [vmem:[%s17923_s28 + $0x181] sm:$0xff]  ;;  %v5696_v30 = vpack.c.bf16 %v5549_v24, %v5548_v23  ;;  %v510_v38 = vld [vmem:[%s17923_s28 + $0x1a9] sm:$0xff]  ;;  %v5556_v48 = vld [vmem:[%s17923_s28 + $0x1d7] sm:$0xff] }
  0x34   : > { %v5550_v27 = vld [vmem:[%s17923_s28 + $0x1a7] sm:$0xff]  ;;  %v5553_v36 = vld [vmem:[%s17923_s28 + $0x1bf] sm:$0xff]  ;;  %v5555_v40 = vld [vmem:[%s17923_s28 + $0x1cf] sm:$0xff] }
  0x35   : > { %v509_v37 = vld [vmem:[%s17923_s28 + $0x1a1] sm:$0xff]  ;;  %v5698_v42 = vpack.c.bf16 %v5553_v36, %v5552_v35  ;;  %v514_v51 = vld [vmem:[%s17923_s28 + $0x1c9] sm:$0xff]  ;;  %v5560_v60 = vld [vmem:[%s17923_s28 + $0x1f7] sm:$0xff] }
  0x36   : > { %v5554_v39 = vld [vmem:[%s17923_s28 + $0x1c7] sm:$0xff]  ;;  %v5557_v49 = vld [vmem:[%s17923_s28 + $0x1df] sm:$0xff]  ;;  %v5559_v53 = vld [vmem:[%s17923_s28 + $0x1ef] sm:$0xff] }
  0x37   : > { %14906 = vmatmul.mubr.msk.bf16.gmra.mrb[16].mxu1 %vm716_vm1, %v637_v7  ;;  %v648_v7 = vpack.c.bf16 %v498_v1, %v497_v0  ;;  %v513_v50 = vld [vmem:[%s17923_s28 + $0x1c1] sm:$0xff]  ;;  %v5700_v55 = vpack.c.bf16 %v5557_v49, %v5556_v48  ;;  %v518_v63 = vld [vmem:[%s17923_s28 + $0x1e9] sm:$0xff]  ;;  %v599_v2 = vld [vmem:[%s17923_s28 + $0x471] sm:$0xff] }
  0x38   : > { %15602 = vmatmul.mubr.msk.bf16.gmra.mrb[16].mxu0 %vm716_vm1, %v5682_v8  ;;  %14909 = vmatprep.mubr.msk.bf16.mxu1 %vm716_vm1, %v638_v9  ;;  %v5693_v8 = vpack.c.bf16 %v5543_v4, %v5542_v3  ;;  %v499_v9 = vld [vmem:[%s17923_s28 + $0x151] sm:$0xff]  ;;  %v5558_v52 = vld [vmem:[%s17923_s28 + $0x1e7] sm:$0xff]  ;;  %v5561_v61 = vld [vmem:[%s17923_s28 + $0x1ff] sm:$0xff] }
  0x39   : > { %15605 = vmatprep.mubr.msk.bf16.mxu0 %vm716_vm1, %v5683_v10  ;;  %v500_v10 = vld [vmem:[%s17923_s28 + $0x159] sm:$0xff]  ;;  %v517_v62 = vld [vmem:[%s17923_s28 + $0x1e1] sm:$0xff]  ;;  %v5563_v1 = vld [vmem:[%s17923_s28 + $0x20f] sm:$0xff]  ;;  %v5702_v4 = vpack.c.bf16 %v5561_v61, %v5560_v60 }
  0x3a   : > { %v649_v17 = vpack.c.bf16 %v500_v10, %v499_v9  ;;  %v5562_v0 = vld [vmem:[%s17923_s28 + $0x207] sm:$0xff]  ;;  %v5564_v9 = vld [vmem:[%s17923_s28 + $0x217] sm:$0xff]  ;;  %v5565_v10 = vld [vmem:[%s17923_s28 + $0x21f] sm:$0xff] }
  0x3b   : > { %v521_v11 = vld [vmem:[%s17923_s28 + $0x201] sm:$0xff]  ;;  %v522_v12 = vld [vmem:[%s17923_s28 + $0x209] sm:$0xff] }
  0x3c   : > { %v525_v23 = vld [vmem:[%s17923_s28 + $0x221] sm:$0xff]  ;;  %v526_v24 = vld [vmem:[%s17923_s28 + $0x229] sm:$0xff] }
  0x3d   : > { %v529_v35 = vld [vmem:[%s17923_s28 + $0x241] sm:$0xff]  ;;  %v530_v36 = vld [vmem:[%s17923_s28 + $0x249] sm:$0xff] }
  0x3e   : > { %v533_v48 = vld [vmem:[%s17923_s28 + $0x261] sm:$0xff]  ;;  %v534_v49 = vld [vmem:[%s17923_s28 + $0x269] sm:$0xff] }
  0x3f   : > { %14910 = vmatmul.mubr.msk.bf16.gmra.mrb[20].mxu1 %vm716_vm1, %v639_v19  ;;  %v650_v19 = vpack.c.bf16 %v502_v14, %v501_v13  ;;  %v5566_v13 = vld [vmem:[%s17923_s28 + $0x227] sm:$0xff]  ;;  %v5567_v14 = vld [vmem:[%s17923_s28 + $0x22f] sm:$0xff] }
  0x40   : > { %15606 = vmatmul.mubr.msk.bf16.gmra.mrb[20].mxu0 %vm716_vm1, %v5684_v20  ;;  %14913 = vmatprep.mubr.msk.bf16.mxu1 %vm716_vm1, %v640_v21  ;;  %v5695_v20 = vpack.c.bf16 %v5547_v16, %v5546_v15  ;;  %v503_v21 = vld [vmem:[%s17923_s28 + $0x171] sm:$0xff]  ;;  %v5704_v16 = vpack.c.bf16 %v5565_v10, %v5564_v9  ;;  %v537_v60 = vld [vmem:[%s17923_s28 + $0x281] sm:$0xff]  ;;  %v538_v61 = vld [vmem:[%s17923_s28 + $0x289] sm:$0xff] }
  0x41   : > { %15609 = vmatprep.mubr.msk.bf16.mxu0 %vm716_vm1, %v5685_v22  ;;  %v504_v22 = vld [vmem:[%s17923_s28 + $0x179] sm:$0xff]  ;;  %v541_v9 = vld [vmem:[%s17923_s28 + $0x2a1] sm:$0xff]  ;;  %v542_v10 = vld [vmem:[%s17923_s28 + $0x2a9] sm:$0xff] }
  0x42   : > { %v651_v29 = vpack.c.bf16 %v504_v22, %v503_v21  ;;  %v5568_v21 = vld [vmem:[%s17923_s28 + $0x237] sm:$0xff]  ;;  %v5569_v22 = vld [vmem:[%s17923_s28 + $0x23f] sm:$0xff] }
  0x47   : > { %14914 = vmatmul.mubr.msk.bf16.gmra.mrb[24].mxu1 %vm716_vm1, %v641_v31  ;;  %v652_v31 = vpack.c.bf16 %v506_v26, %v505_v25  ;;  %v5570_v25 = vld [vmem:[%s17923_s28 + $0x247] sm:$0xff]  ;;  %v5571_v26 = vld [vmem:[%s17923_s28 + $0x24f] sm:$0xff] }
  0x48   : > { %15610 = vmatmul.mubr.msk.bf16.gmra.mrb[24].mxu0 %vm716_vm1, %v5686_v32  ;;  %14917 = vmatprep.mubr.msk.bf16.mxu1 %vm716_vm1, %v642_v33  ;;  %v5697_v32 = vpack.c.bf16 %v5551_v28, %v5550_v27  ;;  %v507_v33 = vld [vmem:[%s17923_s28 + $0x191] sm:$0xff]  ;;  %v5706_v28 = vpack.c.bf16 %v5569_v22, %v5568_v21  ;;  %v545_v21 = vld [vmem:[%s17923_s28 + $0x2c1] sm:$0xff]  ;;  %v546_v22 = vld [vmem:[%s17923_s28 + $0x2c9] sm:$0xff] }
  0x49   : > { %15613 = vmatprep.mubr.msk.bf16.mxu0 %vm716_vm1, %v5687_v34  ;;  %v508_v34 = vld [vmem:[%s17923_s28 + $0x199] sm:$0xff] }
  0x4a   : > { %v653_v41 = vpack.c.bf16 %v508_v34, %v507_v33  ;;  %v5572_v33 = vld [vmem:[%s17923_s28 + $0x257] sm:$0xff]  ;;  %v5573_v34 = vld [vmem:[%s17923_s28 + $0x25f] sm:$0xff] }
  0x4f   : > { %14918 = vmatmul.mubr.msk.bf16.gmra.mrb[28].mxu1 %vm716_vm1, %v643_v43  ;;  %v654_v43 = vpack.c.bf16 %v510_v38, %v509_v37  ;;  %v5574_v37 = vld [vmem:[%s17923_s28 + $0x267] sm:$0xff]  ;;  %v5575_v38 = vld [vmem:[%s17923_s28 + $0x26f] sm:$0xff] }
  0x50   : > { %15614 = vmatmul.mubr.msk.bf16.gmra.mrb[28].mxu0 %vm716_vm1, %v5688_v44  ;;  %14921 = vmatprep.mubr.msk.bf16.mxu1 %vm716_vm1, %v644_v45  ;;  %v5699_v44 = vpack.c.bf16 %v5555_v40, %v5554_v39  ;;  %v511_v45 = vld [vmem:[%s17923_s28 + $0x1b1] sm:$0xff]  ;;  %v5708_v40 = vpack.c.bf16 %v5573_v34, %v5572_v33  ;;  %v549_v33 = vld [vmem:[%s17923_s28 + $0x2e1] sm:$0xff]  ;;  %v550_v34 = vld [vmem:[%s17923_s28 + $0x2e9] sm:$0xff] }
  0x51   : > { %15617 = vmatprep.mubr.msk.bf16.mxu0 %vm716_vm1, %v5689_v46  ;;  %v512_v46 = vld [vmem:[%s17923_s28 + $0x1b9] sm:$0xff] }
  0x52   : > { %v655_v54 = vpack.c.bf16 %v512_v46, %v511_v45  ;;  %v5576_v45 = vld [vmem:[%s17923_s28 + $0x277] sm:$0xff]  ;;  %v5577_v46 = vld [vmem:[%s17923_s28 + $0x27f] sm:$0xff] }
  0x57   : > { %14922 = vmatmul.mubr.msk.bf16.gmra.mrb[32].mxu1 %vm716_vm1, %v645_v56  ;;  %v656_v56 = vpack.c.bf16 %v514_v51, %v513_v50  ;;  %v5578_v50 = vld [vmem:[%s17923_s28 + $0x287] sm:$0xff]  ;;  %v5579_v51 = vld [vmem:[%s17923_s28 + $0x28f] sm:$0xff] }
  0x58   : > { %15618 = vmatmul.mubr.msk.bf16.gmra.mrb[32].mxu0 %vm716_vm1, %v5690_v57  ;;  %14925 = vmatprep.mubr.msk.bf16.mxu1 %vm716_vm1, %v646_v58  ;;  %v5701_v57 = vpack.c.bf16 %v5559_v53, %v5558_v52  ;;  %v515_v58 = vld [vmem:[%s17923_s28 + $0x1d1] sm:$0xff]  ;;  %v5710_v53 = vpack.c.bf16 %v5577_v46, %v5576_v45  ;;  %v18242_v45 = vld [vmem:[%s17923_s28 + $0x60] sm:$0xff]  ;;  %v554_v46 = vld [vmem:[%s17923_s28 + $0x309] sm:$0xff] }
  0x59   : > { %15621 = vmatprep.mubr.msk.bf16.mxu0 %vm716_vm1, %v5691_v59  ;;  %v516_v59 = vld [vmem:[%s17923_s28 + $0x1d9] sm:$0xff] }
  0x5a   : > { %v657_v3 = vpack.c.bf16 %v516_v59, %v515_v58  ;;  %v5580_v58 = vld [vmem:[%s17923_s28 + $0x297] sm:$0xff]  ;;  %v5581_v59 = vld [vmem:[%s17923_s28 + $0x29f] sm:$0xff] }
  0x5f   : > { %14926 = vmatmul.mubr.msk.bf16.gmra.mrb[36].mxu1 %vm716_vm1, %v647_v5  ;;  %v658_v5 = vpack.c.bf16 %v518_v63, %v517_v62  ;;  %v5582_v62 = vld [vmem:[%s17923_s28 + $0x2a7] sm:$0xff]  ;;  %v5583_v63 = vld [vmem:[%s17923_s28 + $0x2af] sm:$0xff] }
  0x60   : > { %15622 = vmatmul.mubr.msk.bf16.gmra.mrb[36].mxu0 %vm716_vm1, %v5692_v6  ;;  %14929 = vmatprep.mubr.msk.bf16.mxu1 %vm716_vm1, %v648_v7  ;;  %v5703_v6 = vpack.c.bf16 %v5563_v1, %v5562_v0  ;;  %v519_v7 = vld [vmem:[%s17923_s28 + $0x1f1] sm:$0xff]  ;;  %v5712_v1 = vpack.c.bf16 %v5581_v59, %v5580_v58  ;;  %v557_v58 = vld [vmem:[%s17923_s28 + $0x321] sm:$0xff]  ;;  %v558_v59 = vld [vmem:[%s17923_s28 + $0x329] sm:$0xff] }
  0x61   : > { %15625 = vmatprep.mubr.msk.bf16.mxu0 %vm716_vm1, %v5693_v8  ;;  %v520_v8 = vld [vmem:[%s17923_s28 + $0x1f9] sm:$0xff] }
  0x62   : > { %v659_v15 = vpack.c.bf16 %v520_v8, %v519_v7  ;;  %v5584_v7 = vld [vmem:[%s17923_s28 + $0x2b7] sm:$0xff]  ;;  %v5585_v8 = vld [vmem:[%s17923_s28 + $0x2bf] sm:$0xff] }
  0x67   : > { %14930 = vmatmul.mubr.msk.bf16.gmra.mrb[40].mxu1 %vm716_vm1, %v649_v17  ;;  %v660_v17 = vpack.c.bf16 %v522_v12, %v521_v11  ;;  %v5586_v11 = vld [vmem:[%s17923_s28 + $0x2c7] sm:$0xff]  ;;  %v5587_v12 = vld [vmem:[%s17923_s28 + $0x2cf] sm:$0xff] }
  0x68   : > { %15626 = vmatmul.mubr.msk.bf16.gmra.mrb[40].mxu0 %vm716_vm1, %v5694_v18  ;;  %14933 = vmatprep.mubr.msk.bf16.mxu1 %vm716_vm1, %v650_v19  ;;  %v5705_v18 = vpack.c.bf16 %v5567_v14, %v5566_v13  ;;  %v523_v19 = vld [vmem:[%s17923_s28 + $0x211] sm:$0xff]  ;;  %v5714_v14 = vpack.c.bf16 %v5585_v8, %v5584_v7  ;;  %v561_v7 = vld [vmem:[%s17923_s28 + $0x341] sm:$0xff]  ;;  %v562_v8 = vld [vmem:[%s17923_s28 + $0x349] sm:$0xff] }
  0x69   : > { %15629 = vmatprep.mubr.msk.bf16.mxu0 %vm716_vm1, %v5695_v20  ;;  %v524_v20 = vld [vmem:[%s17923_s28 + $0x219] sm:$0xff] }
  0x6a   : > { %v661_v27 = vpack.c.bf16 %v524_v20, %v523_v19  ;;  %v5588_v19 = vld [vmem:[%s17923_s28 + $0x2d7] sm:$0xff]  ;;  %v5589_v20 = vld [vmem:[%s17923_s28 + $0x2df] sm:$0xff] }
  0x6f   : > { %14934 = vmatmul.mubr.msk.bf16.gmra.mrb[44].mxu1 %vm716_vm1, %v651_v29  ;;  %v662_v29 = vpack.c.bf16 %v526_v24, %v525_v23  ;;  %v18199_v23 = vld [vmem:[%s17923_s28 + $0x28] sm:$0xff]  ;;  %v18202_v24 = vld [vmem:[%s17923_s28 + $0x30] sm:$0xff] }
  0x70   : > { %15630 = vmatmul.mubr.msk.bf16.gmra.mrb[44].mxu0 %vm716_vm1, %v5696_v30  ;;  %14937 = vmatprep.mubr.msk.bf16.mxu1 %vm716_vm1, %v652_v31  ;;  %v5707_v30 = vpack.c.bf16 %v5571_v26, %v5570_v25  ;;  %v527_v31 = vld [vmem:[%s17923_s28 + $0x231] sm:$0xff]  ;;  %v5716_v26 = vpack.c.bf16 %v5589_v20, %v5588_v19  ;;  %v565_v19 = vld [vmem:[%s17923_s28 + $0x361] sm:$0xff]  ;;  %v566_v20 = vld [vmem:[%s17923_s28 + $0x369] sm:$0xff] }
  0x71   : > { %15633 = vmatprep.mubr.msk.bf16.mxu0 %vm716_vm1, %v5697_v32  ;;  %v528_v32 = vld [vmem:[%s17923_s28 + $0x239] sm:$0xff] }
  0x72   : > { %v663_v39 = vpack.c.bf16 %v528_v32, %v527_v31  ;;  %v18212_v31 = vld [vmem:[%s17923_s28 + $0x38] sm:$0xff]  ;;  %v18216_v32 = vld [vmem:[%s17923_s28 + $0x40] sm:$0xff] }
  0x77   : > { %14938 = vmatmul.mubr.msk.bf16.gmra.mrb[48].mxu1 %vm716_vm1, %v653_v41  ;;  %v664_v41 = vpack.c.bf16 %v530_v36, %v529_v35  ;;  %v18221_v35 = vld [vmem:[%s17923_s28 + $0x48] sm:$0xff]  ;;  %v18224_v36 = vld [vmem:[%s17923_s28 + $0x50] sm:$0xff] }
  0x78   : > { %15634 = vmatmul.mubr.msk.bf16.gmra.mrb[48].mxu0 %vm716_vm1, %v5698_v42  ;;  %14941 = vmatprep.mubr.msk.bf16.mxu1 %vm716_vm1, %v654_v43  ;;  %v5709_v42 = vpack.c.bf16 %v5575_v38, %v5574_v37  ;;  %v531_v43 = vld [vmem:[%s17923_s28 + $0x251] sm:$0xff]  ;;  %v7085_v38 = vpack.c.bf16 %v18216_v32, %v18212_v31 }
  0x79   : > { %15637 = vmatprep.mubr.msk.bf16.mxu0 %vm716_vm1, %v5699_v44  ;;  %v532_v44 = vld [vmem:[%s17923_s28 + $0x259] sm:$0xff] }
  0x7a   : > { %v665_v52 = vpack.c.bf16 %v532_v44, %v531_v43  ;;  %v552_v43 = vld [vmem:[%s17923_s28 + $0x2f9] sm:$0xff] }
  0x7b   : > { %v18238_v44 = vld [vmem:[%s17923_s28 + $0x58] sm:$0xff] }
  0x7f   : > { %14942 = vmatmul.mubr.msk.bf16.gmra.mrb[52].mxu1 %vm716_vm1, %v655_v54  ;;  %v666_v54 = vpack.c.bf16 %v534_v49, %v533_v48  ;;  %v18247_v48 = vld [vmem:[%s17923_s28 + $0x68] sm:$0xff]  ;;  %v18250_v49 = vld [vmem:[%s17923_s28 + $0x70] sm:$0xff] }
  0x80   : > { %15638 = vmatmul.mubr.msk.bf16.gmra.mrb[52].mxu0 %vm716_vm1, %v5700_v55  ;;  %14945 = vmatprep.mubr.msk.bf16.mxu1 %vm716_vm1, %v656_v56  ;;  %v5711_v55 = vpack.c.bf16 %v5579_v51, %v5578_v50  ;;  %v535_v56 = vld [vmem:[%s17923_s28 + $0x271] sm:$0xff]  ;;  %v7087_v51 = vpack.c.bf16 %v18242_v45, %v18238_v44 }
  0x81   : > { %15641 = vmatprep.mubr.msk.bf16.mxu0 %vm716_vm1, %v5701_v57  ;;  %v536_v57 = vld [vmem:[%s17923_s28 + $0x279] sm:$0xff] }
  0x82   : > { %v667_v0 = vpack.c.bf16 %v536_v57, %v535_v56  ;;  %v18262_v56 = vld [vmem:[%s17923_s28 + $0x78] sm:$0xff]  ;;  %v18266_v57 = vld [vmem:[%s17923_s28 + $0x80] sm:$0xff] }
  0x87   : > { %14946 = vmatmul.mubr.msk.bf16.gmra.mrb[56].mxu1 %vm716_vm1, %v657_v3  ;;  %v668_v3 = vpack.c.bf16 %v538_v61, %v537_v60  ;;  %v18271_v60 = vld [vmem:[%s17923_s28 + $0x88] sm:$0xff]  ;;  %v18274_v61 = vld [vmem:[%s17923_s28 + $0x90] sm:$0xff] }
  0x88   : > { %15642 = vmatmul.mubr.msk.bf16.gmra.mrb[56].mxu0 %vm716_vm1, %v5702_v4  ;;  %14949 = vmatprep.mubr.msk.bf16.mxu1 %vm716_vm1, %v658_v5  ;;  %v5713_v4 = vpack.c.bf16 %v5583_v63, %v5582_v62  ;;  %v539_v5 = vld [vmem:[%s17923_s28 + $0x291] sm:$0xff]  ;;  %v7089_v63 = vpack.c.bf16 %v18266_v57, %v18262_v56 }
  0x89   : > { %15645 = vmatprep.mubr.msk.bf16.mxu0 %vm716_vm1, %v5703_v6  ;;  %v540_v6 = vld [vmem:[%s17923_s28 + $0x299] sm:$0xff] }
  0x8a   : > { %v669_v13 = vpack.c.bf16 %v540_v6, %v539_v5  ;;  %v18286_v5 = vld [vmem:[%s17923_s28 + $0x98] sm:$0xff]  ;;  %v18290_v6 = vld [vmem:[%s17923_s28 + $0xa0] sm:$0xff] }
  0x8f   : > { %14950 = vmatmul.mubr.msk.bf16.gmra.mrb[60].mxu1 %vm716_vm1, %v659_v15  ;;  %v670_v15 = vpack.c.bf16 %v542_v10, %v541_v9  ;;  %v18295_v9 = vld [vmem:[%s17923_s28 + $0xa8] sm:$0xff]  ;;  %v18298_v10 = vld [vmem:[%s17923_s28 + $0xb0] sm:$0xff] }
  0x90   : > { %15646 = vmatmul.mubr.msk.bf16.gmra.mrb[60].mxu0 %vm716_vm1, %v5704_v16  ;;  %14953 = vmatprep.mubr.msk.bf16.mxu1 %vm716_vm1, %v660_v17  ;;  %v5715_v16 = vpack.c.bf16 %v5587_v12, %v5586_v11  ;;  %v543_v17 = vld [vmem:[%s17923_s28 + $0x2b1] sm:$0xff]  ;;  %v7091_v12 = vpack.c.bf16 %v18290_v6, %v18286_v5 }
  0x91   : > { %15649 = vmatprep.mubr.msk.bf16.mxu0 %vm716_vm1, %v5705_v18  ;;  %v544_v18 = vld [vmem:[%s17923_s28 + $0x2b9] sm:$0xff] }
  0x92   : > { %v671_v25 = vpack.c.bf16 %v544_v18, %v543_v17  ;;  %v18310_v17 = vld [vmem:[%s17923_s28 + $0xb8] sm:$0xff]  ;;  %v18314_v18 = vld [vmem:[%s17923_s28 + $0xc0] sm:$0xff] }
  0x97   : > { %14954 = vmatmul.mubr.msk.bf16.gmra.mrb[64].mxu1 %vm716_vm1, %v661_v27  ;;  %v672_v27 = vpack.c.bf16 %v546_v22, %v545_v21  ;;  %v18319_v21 = vld [vmem:[%s17923_s28 + $0xc8] sm:$0xff]  ;;  %v18322_v22 = vld [vmem:[%s17923_s28 + $0xd0] sm:$0xff] }
  0x98   : > { %15650 = vmatmul.mubr.msk.bf16.gmra.mrb[64].mxu0 %vm716_vm1, %v5706_v28  ;;  %14957 = vmatprep.mubr.msk.bf16.mxu1 %vm716_vm1, %v662_v29  ;;  %v7084_v28 = vpack.c.bf16 %v18202_v24, %v18199_v23  ;;  %v547_v29 = vld [vmem:[%s17923_s28 + $0x2d1] sm:$0xff] }
  0x99   : > { %15653 = vmatprep.mubr.msk.bf16.mxu0 %vm716_vm1, %v5707_v30  ;;  %v548_v30 = vld [vmem:[%s17923_s28 + $0x2d9] sm:$0xff] }
  0x9a   : > { %v673_v37 = vpack.c.bf16 %v548_v30, %v547_v29  ;;  %v567_v29 = vld [vmem:[%s17923_s28 + $0x371] sm:$0xff]  ;;  %v568_v30 = vld [vmem:[%s17923_s28 + $0x379] sm:$0xff] }
  0x9f   : > { %14958 = vmatmul.mubr.msk.bf16.gmra.mrb[68].mxu1 %vm716_vm1, %v663_v39  ;;  %v674_v39 = vpack.c.bf16 %v550_v34, %v549_v33  ;;  %v18334_v33 = vld [vmem:[%s17923_s28 + $0xd8] sm:$0xff]  ;;  %v18338_v34 = vld [vmem:[%s17923_s28 + $0xe0] sm:$0xff] }
  0xa0   : > { %15654 = vmatmul.mubr.msk.bf16.gmra.mrb[68].mxu0 %vm716_vm1, %v5708_v40  ;;  %14961 = vmatprep.mubr.msk.bf16.mxu1 %vm716_vm1, %v664_v41  ;;  %v7086_v40 = vpack.c.bf16 %v18224_v36, %v18221_v35  ;;  %v8842_v41 = vsel %vm975_vm0, %v18029_v47, 0  ;;  %v553_v47 = vld [vmem:[%s17923_s28 + $0x301] sm:$0xff] }
  0xa1   : > { %15657 = vmatprep.mubr.msk.bf16.mxu0 %vm716_vm1, %v5709_v42  ;;  %v551_v42 = vld [vmem:[%s17923_s28 + $0x2f1] sm:$0xff] }
  0xa2   : > { %v675_v50 = vpack.c.bf16 %v552_v43, %v551_v42  ;;  %v7095_v42 = vpack.c.bf16 %v18338_v34, %v18334_v33 }
  0xa7   : > { %14962 = vmatmul.mubr.msk.bf16.gmra.mrb[72].mxu1 %vm716_vm1, %v665_v52  ;;  %v676_v52 = vpack.c.bf16 %v554_v46, %v553_v47  ;;  %v571_v46 = vld [vmem:[%s17923_s28 + $0x391] sm:$0xff] }
  0xa8   : > { %15658 = vmatmul.mubr.msk.bf16.gmra.mrb[72].mxu0 %vm716_vm1, %v5710_v53  ;;  %14965 = vmatprep.mubr.msk.bf16.mxu1 %vm716_vm1, %v666_v54  ;;  %v7088_v53 = vpack.c.bf16 %v18250_v49, %v18247_v48  ;;  %v555_v54 = vld [vmem:[%s17923_s28 + $0x311] sm:$0xff] }
  0xa9   : > { %15661 = vmatprep.mubr.msk.bf16.mxu0 %vm716_vm1, %v5711_v55  ;;  %v556_v55 = vld [vmem:[%s17923_s28 + $0x319] sm:$0xff] }
  0xaa   : > { %v677_v62 = vpack.c.bf16 %v556_v55, %v555_v54  ;;  %v573_v54 = vld [vmem:[%s17923_s28 + $0x3a1] sm:$0xff]  ;;  %v574_v55 = vld [vmem:[%s17923_s28 + $0x3a9] sm:$0xff] }
  0xaf   : > { %14966 = vmatmul.mubr.msk.bf16.gmra.mrb[76].mxu1 %vm716_vm1, %v667_v0  ;;  %v678_v0 = vpack.c.bf16 %v558_v59, %v557_v58  ;;  %v18374_v58 = vld [vmem:[%s17923_s28 + $0x108] sm:$0xff]  ;;  %v18377_v59 = vld [vmem:[%s17923_s28 + $0x110] sm:$0xff] }
  0xb0   : > { %15662 = vmatmul.mubr.msk.bf16.gmra.mrb[76].mxu0 %vm716_vm1, %v5712_v1  ;;  %14969 = vmatprep.mubr.msk.bf16.mxu1 %vm716_vm1, %v668_v3  ;;  %v7090_v1 = vpack.c.bf16 %v18274_v61, %v18271_v60  ;;  %v559_v3 = vld [vmem:[%s17923_s28 + $0x331] sm:$0xff] }
  0xb1   : > { %15665 = vmatprep.mubr.msk.bf16.mxu0 %vm716_vm1, %v5713_v4  ;;  %v560_v4 = vld [vmem:[%s17923_s28 + $0x339] sm:$0xff] }
  0xb2   : > { %v679_v11 = vpack.c.bf16 %v560_v4, %v559_v3  ;;  %v575_v3 = vld [vmem:[%s17923_s28 + $0x3b1] sm:$0xff]  ;;  %v576_v4 = vld [vmem:[%s17923_s28 + $0x3b9] sm:$0xff] }
  0xb7   : > { %14970 = vmatmul.mubr.msk.bf16.gmra.mrb[80].mxu1 %vm716_vm1, %v669_v13  ;;  %v680_v13 = vpack.c.bf16 %v562_v8, %v561_v7  ;;  %v18389_v7 = vld [vmem:[%s17923_s28 + $0x118] sm:$0xff]  ;;  %v18393_v8 = vld [vmem:[%s17923_s28 + $0x120] sm:$0xff] }
  0xb8   : > { %15666 = vmatmul.mubr.msk.bf16.gmra.mrb[80].mxu0 %vm716_vm1, %v5714_v14  ;;  %14973 = vmatprep.mubr.msk.bf16.mxu1 %vm716_vm1, %v670_v15  ;;  %v7092_v14 = vpack.c.bf16 %v18298_v10, %v18295_v9  ;;  %v563_v15 = vld [vmem:[%s17923_s28 + $0x351] sm:$0xff] }
  0xb9   : > { %15669 = vmatprep.mubr.msk.bf16.mxu0 %vm716_vm1, %v5715_v16  ;;  %v564_v16 = vld [vmem:[%s17923_s28 + $0x359] sm:$0xff] }
  0xbf   : > { %14974 = vmatmul.mubr.msk.bf16.gmra.mrb[84].mxu1 %vm716_vm1, %v671_v25  ;;  %v681_v25 = vpack.c.bf16 %v564_v16, %v563_v15  ;;  %v687_v15 = vpack.c.bf16 %v576_v4, %v575_v3  ;;  %v7099_v16 = vpack.c.bf16 %v18393_v8, %v18389_v7 }
  0xc0   : > { %15670 = vmatmul.mubr.msk.bf16.gmra.mrb[84].mxu0 %vm716_vm1, %v5716_v26  ;;  %14977 = vmatprep.mubr.msk.bf16.mxu1 %vm716_vm1, %v672_v27  ;;  %v7093_v26 = vpack.c.bf16 %v18314_v18, %v18310_v17  ;;  %v682_v27 = vpack.c.bf16 %v566_v20, %v565_v19 }
  0xc1   : > { %15759 = vmatprep.mubr.msk.bf16.mxu0 %vm716_vm1, %v7084_v28  ;;  %v7094_v28 = vpack.c.bf16 %v18322_v22, %v18319_v21 }
  0xc7   : > { %14978 = vmatmul.mubr.msk.bf16.gmra.mrb[88].mxu1 %vm716_vm1, %v673_v37  ;;  %v569_v37 = vld [vmem:[%s17923_s28 + $0x381] sm:$0xff] }
  0xc8   : > { %15760 = vmatmul.mubr.msk.bf16.vlgmr.msra.gmra.mrb[0].mxu0 %vm716_vm1, %v7085_v38  ;;  %14981 = vmatprep.mubr.msk.bf16.mxu1 %vm716_vm1, %v674_v39  ;;  %v570_v38 = vld [vmem:[%s17923_s28 + $0x389] sm:$0xff] }
  0xc9   : > { %15932 = vmatpush3.bf16.msra.mxu0 %v8842_v41  ;;  %15763 = vmatprep.mubr.msk.bf16.mxu0 %vm716_vm1, %v7086_v40  ;;  %v18343_v39 = vld [vmem:[%s17923_s28 + $0xe8] sm:$0xff]  ;;  %v18346_v40 = vld [vmem:[%s17923_s28 + $0xf0] sm:$0xff]  ;;  %v683_v41 = vpack.c.bf16 %v568_v30, %v567_v29  ;;  %v684_v43 = vpack.c.bf16 %v570_v38, %v569_v37 }
  0xca   : > { %v7096_v47 = vpack.c.bf16 %v18346_v40, %v18343_v39  ;;  %v581_v29 = vld [vmem:[%s17923_s28 + $0x3e1] sm:$0xff]  ;;  %v582_v30 = vld [vmem:[%s17923_s28 + $0x3e9] sm:$0xff] }
  0xcb   : > { %v18422_v37 = vld [vmem:[%s17923_s28 + $0x148] sm:$0xff]  ;;  %v18425_v38 = vld [vmem:[%s17923_s28 + $0x150] sm:$0xff] }
  0xcf   : > { %14982 = vmatmul.mubr.msk.bf16.gmra.mrb[92].mxu1 %vm716_vm1, %v675_v50  ;;  %v572_v50 = vld [vmem:[%s17923_s28 + $0x399] sm:$0xff] }
  0xd0   : > { %15764 = vmatmul.mubr.msk.bf16.gmra.mrb[4].mxu0 %vm716_vm1, %v7087_v51  ;;  %14985 = vmatprep.mubr.msk.bf16.mxu1 %vm716_vm1, %v676_v52  ;;  %v18358_v51 = vld [vmem:[%s17923_s28 + $0xf8] sm:$0xff]  ;;  %v18363_v52 = vld [vmem:[%s22149_s1 + $0x8] sm:$0xf] }
  0xd1   : > { %15767 = vmatprep.mubr.msk.bf16.mxu0 %vm716_vm1, %v7088_v53  ;;  %v18367_v53 = vld [vmem:[%s17923_s28 + $0x100] sm:$0xff]  ;;  %17832 = vmatprep.subr.msk.bf16.mxu1 %vm975_vm0, %v18363_v52 }
  0xd7   : > { %14986 = vmatmul.mubr.msk.bf16.gmra.mrb[96].mxu1 %vm716_vm1, %v677_v62  ;;  %v685_v62 = vpack.c.bf16 %v572_v50, %v571_v46  ;;  %v583_v46 = vld [vmem:[%s17923_s28 + $0x3f1] sm:$0xff]  ;;  %v584_v50 = vld [vmem:[%s17923_s28 + $0x3f9] sm:$0xff] }
  0xd8   : > { %15768 = vmatmul.mubr.msk.bf16.gmra.mrb[8].mxu0 %vm716_vm1, %v7089_v63  ;;  %14989 = vmatprep.mubr.msk.bf16.mxu1 %vm716_vm1, %v678_v0  ;;  %v7097_v63 = vpack.c.bf16 %v18367_v53, %v18358_v51  ;;  %v686_v0 = vpack.c.bf16 %v574_v55, %v573_v54  ;;  %v18437_v54 = vld [vmem:[%s17923_s28 + $0x158] sm:$0xff]  ;;  %v18441_v55 = vld [vmem:[%s17923_s28 + $0x160] sm:$0xff]  ;;  %v691_v3 = vpack.c.bf16 %v584_v50, %v583_v46 }
  0xd9   : > { %15771 = vmatprep.mubr.msk.bf16.mxu0 %vm716_vm1, %v7090_v1  ;;  %v7098_v1 = vpack.c.bf16 %v18377_v59, %v18374_v58  ;;  %v7103_v4 = vpack.c.bf16 %v18441_v55, %v18437_v54  ;;  %v591_v46 = vld [vmem:[%s17923_s28 + $0x431] sm:$0xff]  ;;  %v592_v50 = vld [vmem:[%s17923_s28 + $0x439] sm:$0xff] }
  0xdf   : > { %14990 = vmatmul.mubr.msk.bf16.gmra.mrb[100].mxu1 %vm716_vm1, %v679_v11  ;;  %v577_v11 = vld [vmem:[%s17923_s28 + $0x3c1] sm:$0xff] }
  0xe0   : > { %15772 = vmatmul.mubr.msk.bf16.gmra.mrb[12].mxu0 %vm716_vm1, %v7091_v12  ;;  %14993 = vmatprep.mubr.msk.bf16.mxu1 %vm716_vm1, %v680_v13  ;;  %v578_v12 = vld [vmem:[%s17923_s28 + $0x3c9] sm:$0xff] }
  0xe1   : > { %15775 = vmatprep.mubr.msk.bf16.mxu0 %vm716_vm1, %v7092_v14  ;;  %v18398_v13 = vld [vmem:[%s17923_s28 + $0x128] sm:$0xff]  ;;  %v18401_v14 = vld [vmem:[%s17923_s28 + $0x130] sm:$0xff]  ;;  %v688_v19 = vpack.c.bf16 %v578_v12, %v577_v11 }
  0xe2   : > { %v7100_v20 = vpack.c.bf16 %v18401_v14, %v18398_v13 }
  0xe7   : > { %14994 = vmatmul.mubr.msk.bf16.gmra.mrb[104].mxu1 %vm716_vm1, %v681_v25  ;;  %v579_v25 = vld [vmem:[%s17923_s28 + $0x3d1] sm:$0xff] }
  0xe8   : > { %15776 = vmatmul.mubr.msk.bf16.gmra.mrb[16].mxu0 %vm716_vm1, %v7093_v26  ;;  %14997 = vmatprep.mubr.msk.bf16.mxu1 %vm716_vm1, %v682_v27  ;;  %v580_v26 = vld [vmem:[%s17923_s28 + $0x3d9] sm:$0xff] }
  0xe9   : > { %15779 = vmatprep.mubr.msk.bf16.mxu0 %vm716_vm1, %v7094_v28  ;;  %v18413_v27 = vld [vmem:[%s17923_s28 + $0x138] sm:$0xff]  ;;  %v18417_v28 = vld [vmem:[%s17923_s28 + $0x140] sm:$0xff] }
  0xef   : > { %14998 = vmatmul.mubr.msk.bf16.gmra.mrb[108].mxu1 %vm716_vm1, %v683_v41  ;;  %v689_v41 = vpack.c.bf16 %v580_v26, %v579_v25  ;;  %v589_v25 = vld [vmem:[%s17923_s28 + $0x421] sm:$0xff]  ;;  %v590_v26 = vld [vmem:[%s17923_s28 + $0x429] sm:$0xff] }
  0xf0   : > { %15780 = vmatmul.mubr.msk.bf16.gmra.mrb[20].mxu0 %vm716_vm1, %v7095_v42  ;;  %15001 = vmatprep.mubr.msk.bf16.mxu1 %vm716_vm1, %v684_v43  ;;  %v7101_v42 = vpack.c.bf16 %v18417_v28, %v18413_v27  ;;  %v690_v43 = vpack.c.bf16 %v582_v30, %v581_v29  ;;  %v18470_v29 = vld [vmem:[%s17923_s28 + $0x188] sm:$0xff]  ;;  %v18473_v30 = vld [vmem:[%s17923_s28 + $0x190] sm:$0xff] }
  0xf1   : > { %15783 = vmatprep.mubr.msk.bf16.mxu0 %vm716_vm1, %v7096_v47  ;;  %v7102_v47 = vpack.c.bf16 %v18425_v38, %v18422_v37 }
  0xf7   : > { %15002 = vmatmul.mubr.msk.bf16.gmra.mrb[112].mxu1 %vm716_vm1, %v685_v62  ;;  %v585_v62 = vld [vmem:[%s17923_s28 + $0x401] sm:$0xff] }
  0xf8   : > { %15784 = vmatmul.mubr.msk.bf16.gmra.mrb[24].mxu0 %vm716_vm1, %v7097_v63  ;;  %15005 = vmatprep.mubr.msk.bf16.mxu1 %vm716_vm1, %v686_v0  ;;  %v586_v63 = vld [vmem:[%s17923_s28 + $0x409] sm:$0xff] }
  0xf9   : > { %15787 = vmatprep.mubr.msk.bf16.mxu0 %vm716_vm1, %v7098_v1  ;;  %v18446_v0 = vld [vmem:[%s17923_s28 + $0x168] sm:$0xff]  ;;  %v18449_v1 = vld [vmem:[%s17923_s28 + $0x170] sm:$0xff]  ;;  %v692_v11 = vpack.c.bf16 %v586_v63, %v585_v62  ;;  %v18485_v62 = vld [vmem:[%s17923_s28 + $0x198] sm:$0xff] }
  0xfa   : > { %v7104_v12 = vpack.c.bf16 %v18449_v1, %v18446_v0  ;;  %v18489_v63 = vld [vmem:[%s17923_s28 + $0x1a0] sm:$0xff] }
  0xff   : > { %15006 = vmatmul.mubr.msk.bf16.gmra.mrb[116].mxu1 %vm716_vm1, %v687_v15  ;;  %v587_v15 = vld [vmem:[%s17923_s28 + $0x411] sm:$0xff] }
 0x100   : > { %15788 = vmatmul.mubr.msk.bf16.gmra.mrb[28].mxu0 %vm716_vm1, %v7099_v16  ;;  %15009 = vmatprep.mubr.msk.bf16.mxu1 %vm716_vm1, %v688_v19  ;;  %v588_v16 = vld [vmem:[%s17923_s28 + $0x419] sm:$0xff] }
 0x101   : > { %15791 = vmatprep.mubr.msk.bf16.mxu0 %vm716_vm1, %v7100_v20  ;;  %v18461_v19 = vld [vmem:[%s17923_s28 + $0x178] sm:$0xff]  ;;  %v18465_v20 = vld [vmem:[%s17923_s28 + $0x180] sm:$0xff] }
 0x107   : > { %15010 = vmatmul.mubr.msk.bf16.gmra.mrb[120].mxu1 %vm716_vm1, %v689_v41  ;;  %v693_v41 = vpack.c.bf16 %v588_v16, %v587_v15  ;;  %v695_v15 = vpack.c.bf16 %v592_v50, %v591_v46  ;;  %v7107_v16 = vpack.c.bf16 %v18489_v63, %v18485_v62  ;;  %v597_v46 = vld [vmem:[%s17923_s28 + $0x461] sm:$0xff]  ;;  %v598_v50 = vld [vmem:[%s17923_s28 + $0x469] sm:$0xff] }
 0x108   : > { %15792 = vmatmul.mubr.msk.bf16.gmra.mrb[32].mxu0 %vm716_vm1, %v7101_v42  ;;  %15013 = vmatprep.mubr.msk.bf16.mxu1 %vm716_vm1, %v690_v43  ;;  %v7105_v42 = vpack.c.bf16 %v18465_v20, %v18461_v19  ;;  %v694_v43 = vpack.c.bf16 %v590_v26, %v589_v25 }
 0x109   : > { %15795 = vmatprep.mubr.msk.bf16.mxu0 %vm716_vm1, %v7102_v47  ;;  %v7106_v47 = vpack.c.bf16 %v18473_v30, %v18470_v29 }
 0x10f   : > { %15014 = vmatmul.mubr.msk.bf16.gmra.mrb[124].mxu1 %vm716_vm1, %v691_v3  ;;  %v593_v3 = vld [vmem:[%s17923_s28 + $0x441] sm:$0xff] }
 0x110   : > { %15796 = vmatmul.mubr.msk.bf16.gmra.mrb[36].mxu0 %vm716_vm1, %v7103_v4  ;;  %15017 = vmatprep.mubr.msk.bf16.mxu1 %vm716_vm1, %v692_v11  ;;  %v594_v4 = vld [vmem:[%s17923_s28 + $0x449] sm:$0xff] }
 0x111   : > { %15799 = vmatprep.mubr.msk.bf16.mxu0 %vm716_vm1, %v7104_v12  ;;  %v18494_v11 = vld [vmem:[%s17923_s28 + $0x1a8] sm:$0xff]  ;;  %v18497_v12 = vld [vmem:[%s17923_s28 + $0x1b0] sm:$0xff]  ;;  %v696_v25 = vpack.c.bf16 %v594_v4, %v593_v3 }
 0x112   : > { %22255 = vst [vmem:[#allocation3_spill] sm:$0xff] %v18494_v11  ;;  %22256 = vst [vmem:[#allocation4_spill] sm:$0xff] %v18497_v12  ;;  %v7108_v26 = vpack.c.bf16 %v18497_v12, %v18494_v11  ;;  %v18518_v3 = vld [vmem:[%s17923_s28 + $0x1c8] sm:$0xff]  ;;  %v18521_v4 = vld [vmem:[%s17923_s28 + $0x1d0] sm:$0xff] }
 0x113   : > { %22259 = vst [vmem:[#allocation7_spill] sm:$0xff] %v18518_v3  ;;  %22260 = vst [vmem:[#allocation8_spill] sm:$0xff] %v18521_v4  ;;  %v600_v12 = vld [vmem:[%s17923_s28 + $0x479] sm:$0xff] }
 0x114   : > { %v18533_v11 = vld [vmem:[%s17923_s28 + $0x1d8] sm:$0xff] }
 0x115   : > { %22261 = vst [vmem:[#allocation9_spill] sm:$0xff] %v18533_v11 }
 0x117   : > { %15018 = vmatmul.mubr.msk.bf16.gmra.mrb[128].mxu1 %vm716_vm1, %v693_v41  ;;  %v595_v41 = vld [vmem:[%s17923_s28 + $0x451] sm:$0xff] }
 0x118   : > { %15800 = vmatmul.mubr.msk.bf16.gmra.mrb[40].mxu0 %vm716_vm1, %v7105_v42  ;;  %15021 = vmatprep.mubr.msk.bf16.mxu1 %vm716_vm1, %v694_v43  ;;  %v596_v42 = vld [vmem:[%s17923_s28 + $0x459] sm:$0xff] }
 0x119   : > { %15803 = vmatprep.mubr.msk.bf16.mxu0 %vm716_vm1, %v7106_v47  ;;  %v18509_v43 = vld [vmem:[%s17923_s28 + $0x1b8] sm:$0xff]  ;;  %v18513_v47 = vld [vmem:[%s17923_s28 + $0x1c0] sm:$0xff] }
 0x11a   : > { %22257 = vst [vmem:[#allocation5_spill] sm:$0xff] %v18509_v43  ;;  %22258 = vst [vmem:[#allocation6_spill] sm:$0xff] %v18513_v47 }
 0x11f   : > { %15022 = vmatmul.mubr.msk.bf16.gmra.mrb[132].mxu1 %vm716_vm1, %v695_v15  ;;  %v697_v15 = vpack.c.bf16 %v596_v42, %v595_v41  ;;  %v18537_v41 = vld [vmem:[%s17923_s28 + $0x1e0] sm:$0xff] }
 0x120   : > { %15804 = vmatmul.mubr.msk.bf16.gmra.mrb[44].mxu0 %vm716_vm1, %v7107_v16  ;;  %15025 = vmatprep.mubr.msk.bf16.mxu1 %vm716_vm1, %v696_v25  ;;  %v7109_v16 = vpack.c.bf16 %v18513_v47, %v18509_v43  ;;  %v698_v25 = vpack.c.bf16 %v598_v50, %v597_v46  ;;  %22262 = vst [vmem:[#allocation10_spill] sm:$0xff] %v18537_v41  ;;  %v601_v42 = vld [vmem:[%s17923_s28 + $0x481] sm:$0xff]  ;;  %v602_v46 = vld [vmem:[%s17923_s28 + $0x489] sm:$0xff]  ;;  %v604_v47 = vld [vmem:[%s17923_s28 + $0x499] sm:$0xff] }
 0x121   : > { %15807 = vmatprep.mubr.msk.bf16.mxu0 %vm716_vm1, %v7108_v26  ;;  %v7110_v26 = vpack.c.bf16 %v18521_v4, %v18518_v3  ;;  %v18542_v50 = vld [vmem:[%s17923_s28 + $0x1e8] sm:$0xff]  ;;  %v700_v4 = vpack.c.bf16 %v602_v46, %v601_v42  ;;  %v603_v3 = vld [vmem:[%s17923_s28 + $0x491] sm:$0xff] }
 0x122   : > { %22263 = vst [vmem:[#allocation11_spill] sm:$0xff] %v18542_v50  ;;  %v18557_v43 = vld [vmem:[%s17923_s28 + $0x1f8] sm:$0xff]  ;;  %v606_v42 = vld [vmem:[%s17923_s28 + $0x4a9] sm:$0xff] }
 0x123   : > { %22265 = vst [vmem:[#allocation13_spill] sm:$0xff] %v18557_v43  ;;  %v18566_v46 = vld [vmem:[%s17923_s28 + $0x208] sm:$0xff] }
 0x124   : > { %22267 = vst [vmem:[#allocation15_spill] sm:$0xff] %v18566_v46 }
 0x127   : > { %15026 = vmatmul.mubr.msk.bf16.gmra.mrb[136].mxu1 %vm716_vm1, %v697_v15  ;;  %v18545_v15 = vld [vmem:[%s17923_s28 + $0x1f0] sm:$0xff] }
 0x128   : > { %15808 = vmatmul.mubr.msk.bf16.gmra.mrb[48].mxu0 %vm716_vm1, %v7109_v16  ;;  %15029 = vmatprep.mubr.msk.bf16.mxu1 %vm716_vm1, %v698_v25  ;;  %22264 = vst [vmem:[#allocation12_spill] sm:$0xff] %v18545_v15  ;;  %v699_v16 = vpack.c.bf16 %v600_v12, %v599_v2  ;;  %v7111_v25 = vpack.c.bf16 %v18537_v41, %v18533_v11  ;;  %v18561_v2 = vld [vmem:[%s17923_s28 + $0x200] sm:$0xff]  ;;  %v18581_v11 = vld [vmem:[%s17923_s28 + $0x218] sm:$0xff] }
 0x129   : > { %15811 = vmatprep.mubr.msk.bf16.mxu0 %vm716_vm1, %v7110_v26  ;;  %v7112_v26 = vpack.c.bf16 %v18545_v15, %v18542_v50  ;;  %22266 = vst [vmem:[#allocation14_spill] sm:$0xff] %v18561_v2  ;;  %v605_v12 = vld [vmem:[%s17923_s28 + $0x4a1] sm:$0xff]  ;;  %v607_v50 = vld [vmem:[%s17923_s28 + $0x4b1] sm:$0xff]  ;;  %v608_v41 = vld [vmem:[%s17923_s28 + $0x4b9] sm:$0xff] }
 0x12a   : > { %v702_v15 = vpack.c.bf16 %v606_v42, %v605_v12  ;;  %22269 = vst [vmem:[#allocation17_spill] sm:$0xff] %v18581_v11  ;;  %v610_v12 = vld [vmem:[%s17923_s28 + $0x4c9] sm:$0xff] }
 0x12b   : > { %v18590_v42 = vld [vmem:[%s17923_s28 + $0x228] sm:$0xff] }
 0x12c   : > { %22271 = vst [vmem:[#allocation19_spill] sm:$0xff] %v18590_v42 }
 0x12f   : > { %15030 = vmatmul.mubr.msk.bf16.gmra.mrb[140].mxu1 %vm716_vm1, %v699_v16  ;;  %v701_v16 = vpack.c.bf16 %v604_v47, %v603_v3  ;;  %v18585_v47 = vld [vmem:[%s17923_s28 + $0x220] sm:$0xff] }
 0x130   : > { %15812 = vmatmul.mubr.msk.bf16.gmra.mrb[52].mxu0 %vm716_vm1, %v7111_v25  ;;  %15033 = vmatprep.mubr.msk.bf16.mxu1 %vm716_vm1, %v700_v4  ;;  %v18569_v4 = vld [vmem:[%s17923_s28 + $0x210] sm:$0xff]  ;;  %v7113_v25 = vpack.c.bf16 %v18561_v2, %v18557_v43  ;;  %22270 = vst [vmem:[#allocation18_spill] sm:$0xff] %v18585_v47  ;;  %v609_v3 = vld [vmem:[%s17923_s28 + $0x4c1] sm:$0xff]  ;;  %v612_v2 = vld [vmem:[%s17923_s28 + $0x4d9] sm:$0xff] }
 0x131   : > { %15815 = vmatprep.mubr.msk.bf16.mxu0 %vm716_vm1, %v7112_v26  ;;  %22268 = vst [vmem:[#allocation16_spill] sm:$0xff] %v18569_v4  ;;  %v7114_v26 = vpack.c.bf16 %v18569_v4, %v18566_v46  ;;  %v704_v4 = vpack.c.bf16 %v610_v12, %v609_v3  ;;  %v611_v46 = vld [vmem:[%s17923_s28 + $0x4d1] sm:$0xff]  ;;  %v614_v3 = vld [vmem:[%s17923_s28 + $0x4e9] sm:$0xff] }
 0x132   : > { %v18605_v43 = vld [vmem:[%s17923_s28 + $0x238] sm:$0xff]  ;;  %v18614_v12 = vld [vmem:[%s17923_s28 + $0x248] sm:$0xff] }
 0x133   : > { %22273 = vst [vmem:[#allocation21_spill] sm:$0xff] %v18605_v43  ;;  %22275 = vst [vmem:[#allocation23_spill] sm:$0xff] %v18614_v12 }
 0x137   : > { %15034 = vmatmul.mubr.msk.bf16.gmra.mrb[144].mxu1 %vm716_vm1, %v701_v16  ;;  %v703_v16 = vpack.c.bf16 %v608_v41, %v607_v50  ;;  %v18609_v41 = vld [vmem:[%s17923_s28 + $0x240] sm:$0xff] }
 0x138   : > { %15816 = vmatmul.mubr.msk.bf16.gmra.mrb[56].mxu0 %vm716_vm1, %v7113_v25  ;;  %15037 = vmatprep.mubr.msk.bf16.mxu1 %vm716_vm1, %v702_v15  ;;  %v18593_v15 = vld [vmem:[%s17923_s28 + $0x230] sm:$0xff]  ;;  %v7115_v25 = vpack.c.bf16 %v18585_v47, %v18581_v11  ;;  %22274 = vst [vmem:[#allocation22_spill] sm:$0xff] %v18609_v41  ;;  %v613_v50 = vld [vmem:[%s17923_s28 + $0x4e1] sm:$0xff]  ;;  %v616_v47 = vld [vmem:[%s17923_s28 + $0x4f9] sm:$0xff] }
 0x139   : > { %15819 = vmatprep.mubr.msk.bf16.mxu0 %vm716_vm1, %v7114_v26  ;;  %22272 = vst [vmem:[#allocation20_spill] sm:$0xff] %v18593_v15  ;;  %v7116_v26 = vpack.c.bf16 %v18593_v15, %v18590_v42  ;;  %v706_v15 = vpack.c.bf16 %v614_v3, %v613_v50  ;;  %v615_v42 = vld [vmem:[%s17923_s28 + $0x4f1] sm:$0xff]  ;;  %v618_v50 = vld [vmem:[%s17923_s28 + $0x509] sm:$0xff] }
 0x13a   : > { %v18629_v11 = vld [vmem:[%s17923_s28 + $0x258] sm:$0xff]  ;;  %v18638_v3 = vld [vmem:[%s17923_s28 + $0x268] sm:$0xff] }
 0x13b   : > { %22277 = vst [vmem:[#allocation25_spill] sm:$0xff] %v18629_v11  ;;  %22279 = vst [vmem:[#allocation27_spill] sm:$0xff] %v18638_v3 }
 0x13f   : > { %15038 = vmatmul.mubr.msk.bf16.gmra.mrb[148].mxu1 %vm716_vm1, %v703_v16  ;;  %v705_v16 = vpack.c.bf16 %v612_v2, %v611_v46  ;;  %v18633_v2 = vld [vmem:[%s17923_s28 + $0x260] sm:$0xff] }
 0x140   : > { %15820 = vmatmul.mubr.msk.bf16.gmra.mrb[60].mxu0 %vm716_vm1, %v7115_v25  ;;  %15041 = vmatprep.mubr.msk.bf16.mxu1 %vm716_vm1, %v704_v4  ;;  %v18617_v4 = vld [vmem:[%s17923_s28 + $0x250] sm:$0xff]  ;;  %v7117_v25 = vpack.c.bf16 %v18609_v41, %v18605_v43  ;;  %22278 = vst [vmem:[#allocation26_spill] sm:$0xff] %v18633_v2  ;;  %v617_v46 = vld [vmem:[%s17923_s28 + $0x501] sm:$0xff]  ;;  %v620_v41 = vld [vmem:[%s17923_s28 + $0x519] sm:$0xff] }
 0x141   : > { %15823 = vmatprep.mubr.msk.bf16.mxu0 %vm716_vm1, %v7116_v26  ;;  %22276 = vst [vmem:[#allocation24_spill] sm:$0xff] %v18617_v4  ;;  %v7118_v26 = vpack.c.bf16 %v18617_v4, %v18614_v12  ;;  %v708_v4 = vpack.c.bf16 %v618_v50, %v617_v46  ;;  %v619_v12 = vld [vmem:[%s17923_s28 + $0x511] sm:$0xff]  ;;  %v622_v46 = vld [vmem:[%s17923_s28 + $0x529] sm:$0xff] }
 0x142   : > { %v18653_v43 = vld [vmem:[%s17923_s28 + $0x278] sm:$0xff]  ;;  %v18662_v50 = vld [vmem:[%s17923_s28 + $0x288] sm:$0xff] }
 0x143   : > { %22282 = vst [vmem:[#allocation30_spill] sm:$0xff] %v18662_v50 }
 0x147   : > { %15042 = vmatmul.mubr.msk.bf16.gmra.mrb[152].mxu1 %vm716_vm1, %v705_v16  ;;  %v707_v16 = vpack.c.bf16 %v616_v47, %v615_v42  ;;  %v18657_v47 = vld [vmem:[%s17923_s28 + $0x280] sm:$0xff] }
 0x148   : > { %15824 = vmatmul.mubr.msk.bf16.gmra.mrb[64].mxu0 %vm716_vm1, %v7117_v25  ;;  %15045 = vmatprep.mubr.msk.bf16.mxu1 %vm716_vm1, %v706_v15  ;;  %v18641_v15 = vld [vmem:[%s17923_s28 + $0x270] sm:$0xff]  ;;  %v7119_v25 = vpack.c.bf16 %v18633_v2, %v18629_v11  ;;  %22281 = vst [vmem:[#allocation29_spill] sm:$0xff] %v18657_v47  ;;  %v621_v42 = vld [vmem:[%s17923_s28 + $0x521] sm:$0xff]  ;;  %v624_v2 = vld [vmem:[%s17923_s28 + $0x539] sm:$0xff] }
 0x149   : > { %15827 = vmatprep.mubr.msk.bf16.mxu0 %vm716_vm1, %v7118_v26  ;;  %22280 = vst [vmem:[#allocation28_spill] sm:$0xff] %v18641_v15  ;;  %v7120_v26 = vpack.c.bf16 %v18641_v15, %v18638_v3  ;;  %v710_v15 = vpack.c.bf16 %v622_v46, %v621_v42  ;;  %v623_v3 = vld [vmem:[%s17923_s28 + $0x531] sm:$0xff]  ;;  %v626_v42 = vld [vmem:[%s17923_s28 + $0x549] sm:$0xff] }
 0x14a   : > { %v18677_v11 = vld [vmem:[%s17923_s28 + $0x298] sm:$0xff]  ;;  %v18686_v46 = vld [vmem:[%s17923_s28 + $0x2a8] sm:$0xff] }
 0x14b   : > { %22284 = vst [vmem:[#allocation32_spill] sm:$0xff] %v18677_v11  ;;  %22286 = vst [vmem:[#allocation34_spill] sm:$0xff] %v18686_v46 }
 0x14f   : > { %15046 = vmatmul.mubr.msk.bf16.gmra.mrb[156].mxu1 %vm716_vm1, %v707_v16  ;;  %v709_v16 = vpack.c.bf16 %v620_v41, %v619_v12  ;;  %v18681_v41 = vld [vmem:[%s17923_s28 + $0x2a0] sm:$0xff] }
 0x150   : > { %15828 = vmatmul.mubr.msk.bf16.gmra.mrb[68].mxu0 %vm716_vm1, %v7119_v25  ;;  %15049 = vmatprep.mubr.msk.bf16.mxu1 %vm716_vm1, %v708_v4  ;;  %v18665_v4 = vld [vmem:[%s17923_s28 + $0x290] sm:$0xff]  ;;  %v7121_v25 = vpack.c.bf16 %v18657_v47, %v18653_v43  ;;  %22285 = vst [vmem:[#allocation33_spill] sm:$0xff] %v18681_v41  ;;  %v625_v12 = vld [vmem:[%s17923_s28 + $0x541] sm:$0xff]  ;;  %v18700_v47 = vld [vmem:[%s17923_s28 + $0x2b8] sm:$0xff] }
 0x151   : > { %15831 = vmatprep.mubr.msk.bf16.mxu0 %vm716_vm1, %v7120_v26  ;;  %22283 = vst [vmem:[#allocation31_spill] sm:$0xff] %v18665_v4  ;;  %v7122_v26 = vpack.c.bf16 %v18665_v4, %v18662_v50  ;;  %v712_v4 = vpack.c.bf16 %v626_v42, %v625_v12  ;;  %v627_v50 = vld [vmem:[%s17923_s28 + $0x551] sm:$0xff]  ;;  %v200_v12 = vld [vmem:[%s17923_s28 + $0x8] sm:$0xff] }
 0x152   : > { %v18709_v42 = vld [vmem:[%s17923_s28 + $0x2c8] sm:$0xff] }
 0x153   : > { %22288 = vst [vmem:[#allocation36_spill] sm:$0xff] %v18709_v42 }
 0x157   : > { %15050 = vmatmul.mubr.msk.bf16.gmra.mrb[160].mxu1 %vm716_vm1, %v709_v16  ;;  %v711_v16 = vpack.c.bf16 %v624_v2, %v623_v3  ;;  %v18704_v2 = vld [vmem:[%s17923_s28 + $0x2c0] sm:$0xff] }
 0x158   : > { %15832 = vmatmul.mubr.msk.bf16.gmra.mrb[72].mxu0 %vm716_vm1, %v7121_v25  ;;  %15053 = vmatprep.mubr.msk.bf16.mxu1 %vm716_vm1, %v710_v15  ;;  %v18689_v15 = vld [vmem:[%s17923_s28 + $0x2b0] sm:$0xff]  ;;  %v7123_v25 = vpack.c.bf16 %v18681_v41, %v18677_v11  ;;  %v199_v3 = vld [vmem:[%s17923_s28] sm:$0xff]  ;;  %v202_v41 = vld [vmem:[%s17923_s28 + $0x18] sm:$0xff] }
 0x159   : > { %15835 = vmatprep.mubr.msk.bf16.mxu0 %vm716_vm1, %v7122_v26  ;;  %22287 = vst [vmem:[#allocation35_spill] sm:$0xff] %v18689_v15  ;;  %v7124_v26 = vpack.c.bf16 %v18689_v15, %v18686_v46  ;;  %v370_v15 = vpack.c.bf16 %v200_v12, %v199_v3  ;;  %v201_v46 = vld [vmem:[%s17923_s28 + $0x10] sm:$0xff]  ;;  %v18725_v11 = vld [vmem:[%s17923_s28 + $0x2d8] sm:$0xff]  ;;  %v203_v3 = vld [vmem:[%s17923_s28 + $0x20] sm:$0xff] }
 0x15a   : > { %v18732_v12 = vld [vmem:[%s17923_s28 + $0x2e8] sm:$0xff] }
 0x15f   : > { %15054 = vmatmul.mubr.msk.bf16.gmra.mrb[164].mxu1 %vm716_vm1, %v711_v16  ;;  %v18712_v16 = vld [vmem:[%s17923_s28 + $0x2d0] sm:$0xff] }
 0x160   : > { %15836 = vmatmul.mubr.msk.bf16.gmra.mrb[76].mxu0 %vm716_vm1, %v7123_v25  ;;  %15057 = vmatprep.mubr.msk.bf16.mxu1 %vm716_vm1, %v712_v4  ;;  %22289 = vst [vmem:[#allocation37_spill] sm:$0xff] %v18712_v16  ;;  %v713_v4 = vpack.c.bf16 %v627_v50, %v627_v50  ;;  %v7125_v25 = vpack.c.bf16 %v18704_v2, %v18700_v47  ;;  %v18728_v50 = vld [vmem:[%s17923_s28 + $0x2e0] sm:$0xff] }
 0x161   : > { %15839 = vmatprep.mubr.msk.bf16.mxu0 %vm716_vm1, %v7124_v26  ;;  %v7126_v26 = vpack.c.bf16 %v18712_v16, %v18709_v42  ;;  %v372_v16 = vpack.c.bf16 %v18199_v23, %v203_v3  ;;  %v3198_v42 = vsel %vm975_vm0, %v18363_v52, 0  ;;  %v18749_v23 = vld [vmem:[%s17923_s28 + $0x2f8] sm:$0xff]  ;;  %v18758_v52 = vld [vmem:[%s17923_s28 + $0x310] sm:$0xff]  ;;  %v373_v3 = vpack.c.bf16 %v18212_v31, %v18202_v24  ;;  %v18776_v31 = vld [vmem:[%s17923_s28 + $0x320] sm:$0xff] }
 0x162   : > { %v18773_v24 = vld [vmem:[%s17923_s28 + $0x318] sm:$0xff] }
 0x167   : > { %15058 = vmatmul.mubr.msk.bf16.gmra.mrb[168].mxu1 %vm716_vm1, %v713_v4  ;;  %v18735_v4 = vld [vmem:[%s17923_s28 + $0x2f0] sm:$0xff] }
 0x168   : > { %15840 = vmatmul.mubr.msk.bf16.gmra.mrb[80].mxu0 %vm716_vm1, %v7125_v25  ;;  %15063 = vmatprep.mubr.msk.bf16.mxu1 %vm716_vm1, %v370_v15  ;;  %v371_v25 = vpack.c.bf16 %v202_v41, %v201_v46  ;;  %v7127_v15 = vpack.c.bf16 %v18728_v50, %v18725_v11  ;;  %v18752_v41 = vld [vmem:[%s17923_s28 + $0x300] sm:$0xff]  ;;  %v18755_v46 = vld [vmem:[%s17923_s28 + $0x308] sm:$0xff] }
 0x169   : > { %15843 = vmatprep.mubr.msk.bf16.mxu0 %vm716_vm1, %v7126_v26  ;;  %v7128_v26 = vpack.c.bf16 %v18735_v4, %v18732_v12 }
 0x16f   : > { %15064 = vmatmul.mubr.msk.bf16.vlgmr.msra.gmra.mrb[0].mxu1 %vm716_vm1, %v371_v25  ;;  %v374_v25 = vpack.c.bf16 %v18221_v35, %v18216_v32  ;;  %v18779_v32 = vld [vmem:[%s17923_s28 + $0x328] sm:$0xff]  ;;  %v18782_v35 = vld [vmem:[%s17923_s28 + $0x330] sm:$0xff] }
 0x170   : > { %15844 = vmatmul.mubr.msk.bf16.gmra.mrb[84].mxu0 %vm716_vm1, %v7127_v15  ;;  %15067 = vmatprep.mubr.msk.bf16.mxu1 %vm716_vm1, %v372_v16  ;;  %v7129_v16 = vpack.c.bf16 %v18752_v41, %v18749_v23  ;;  %v375_v15 = vpack.c.bf16 %v18238_v44, %v18224_v36  ;;  %v18797_v36 = vld [vmem:[%s17923_s28 + $0x338] sm:$0xff]  ;;  %v18800_v44 = vld [vmem:[%s17923_s28 + $0x340] sm:$0xff] }
 0x171   : > { %15847 = vmatprep.mubr.msk.bf16.mxu0 %vm716_vm1, %v7128_v26  ;;  %15236 = vmatpush3.bf16.msra.mxu1 %v3198_v42  ;;  %v7130_v42 = vpack.c.bf16 %v18758_v52, %v18755_v46  ;;  %v7131_v26 = vpack.c.bf16 %v18776_v31, %v18773_v24 }
 0x177   : > { %15068 = vmatmul.mubr.msk.bf16.gmra.mrb[4].mxu1 %vm716_vm1, %v373_v3  ;;  %v376_v3 = vpack.c.bf16 %v18247_v48, %v18242_v45  ;;  %v18803_v45 = vld [vmem:[%s17923_s28 + $0x348] sm:$0xff]  ;;  %v18806_v48 = vld [vmem:[%s17923_s28 + $0x350] sm:$0xff] }
 0x178   : > { %15848 = vmatmul.mubr.msk.bf16.gmra.mrb[88].mxu0 %vm716_vm1, %v7129_v16  ;;  %15071 = vmatprep.mubr.msk.bf16.mxu1 %vm716_vm1, %v374_v25  ;;  %v7132_v16 = vpack.c.bf16 %v18782_v35, %v18779_v32  ;;  %v377_v25 = vpack.c.bf16 %v18262_v56, %v18250_v49  ;;  %v18821_v49 = vld [vmem:[%s17923_s28 + $0x358] sm:$0xff]  ;;  %v18824_v56 = vld [vmem:[%s17923_s28 + $0x360] sm:$0xff] }
 0x179   : > { %15851 = vmatprep.mubr.msk.bf16.mxu0 %vm716_vm1, %v7130_v42  ;;  %v7133_v42 = vpack.c.bf16 %v18800_v44, %v18797_v36 }
 0x17f   : > { %15072 = vmatmul.mubr.msk.bf16.gmra.mrb[8].mxu1 %vm716_vm1, %v375_v15  ;;  %v378_v15 = vpack.c.bf16 %v18271_v60, %v18266_v57  ;;  %v18827_v57 = vld [vmem:[%s17923_s28 + $0x368] sm:$0xff]  ;;  %v18830_v60 = vld [vmem:[%s17923_s28 + $0x370] sm:$0xff] }
 0x180   : > { %15852 = vmatmul.mubr.msk.bf16.gmra.mrb[92].mxu0 %vm716_vm1, %v7131_v26  ;;  %15075 = vmatprep.mubr.msk.bf16.mxu1 %vm716_vm1, %v376_v3  ;;  %v7134_v26 = vpack.c.bf16 %v18806_v48, %v18803_v45  ;;  %v379_v3 = vpack.c.bf16 %v18286_v5, %v18274_v61  ;;  %v18845_v61 = vld [vmem:[%s17923_s28 + $0x378] sm:$0xff]  ;;  %v18848_v5 = vld [vmem:[%s17923_s28 + $0x380] sm:$0xff] }
 0x181   : > { %15855 = vmatprep.mubr.msk.bf16.mxu0 %vm716_vm1, %v7132_v16  ;;  %v7135_v16 = vpack.c.bf16 %v18824_v56, %v18821_v49 }
 0x187   : > { %15076 = vmatmul.mubr.msk.bf16.gmra.mrb[12].mxu1 %vm716_vm1, %v377_v25  ;;  %v380_v25 = vpack.c.bf16 %v18295_v9, %v18290_v6  ;;  %v18851_v6 = vld [vmem:[%s17923_s28 + $0x388] sm:$0xff]  ;;  %v18854_v9 = vld [vmem:[%s17923_s28 + $0x390] sm:$0xff] }
 0x188   : > { %15856 = vmatmul.mubr.msk.bf16.gmra.mrb[96].mxu0 %vm716_vm1, %v7133_v42  ;;  %15079 = vmatprep.mubr.msk.bf16.mxu1 %vm716_vm1, %v378_v15  ;;  %v7136_v42 = vpack.c.bf16 %v18830_v60, %v18827_v57  ;;  %v381_v15 = vpack.c.bf16 %v18310_v17, %v18298_v10  ;;  %v18869_v10 = vld [vmem:[%s17923_s28 + $0x398] sm:$0xff]  ;;  %v18872_v17 = vld [vmem:[%s17923_s28 + $0x3a0] sm:$0xff] }
 0x189   : > { %15859 = vmatprep.mubr.msk.bf16.mxu0 %vm716_vm1, %v7134_v26  ;;  %v7137_v26 = vpack.c.bf16 %v18848_v5, %v18845_v61 }
 0x18f   : > { %15080 = vmatmul.mubr.msk.bf16.gmra.mrb[16].mxu1 %vm716_vm1, %v379_v3  ;;  %v382_v3 = vpack.c.bf16 %v18319_v21, %v18314_v18  ;;  %v18877_v18 = vld [vmem:[%s22149_s1 + $0x1c] sm:$0xf]  ;;  %v18880_v21 = vld [vmem:[%s17923_s28 + $0x3a8] sm:$0xff] }
 0x190   : > { %15860 = vmatmul.mubr.msk.bf16.gmra.mrb[100].mxu0 %vm716_vm1, %v7135_v16  ;;  %15083 = vmatprep.mubr.msk.bf16.mxu1 %vm716_vm1, %v380_v25  ;;  %v7138_v16 = vpack.c.bf16 %v18854_v9, %v18851_v6  ;;  %v18883_v25 = vld [vmem:[%s17923_s28 + $0x3b0] sm:$0xff] }
 0x191   : > { %15863 = vmatprep.mubr.msk.bf16.mxu0 %vm716_vm1, %v7136_v42  ;;  %17838 = vmatprep.subr.msk.bf16.mxu0 %vm975_vm0, %v18877_v18  ;;  %v383_v42 = vpack.c.bf16 %v18334_v33, %v18322_v22  ;;  %v18900_v22 = vld [vmem:[%s17923_s28 + $0x3b8] sm:$0xff]  ;;  %v18903_v33 = vld [vmem:[%s17923_s28 + $0x3c0] sm:$0xff] }
 0x197   : > { %15084 = vmatmul.mubr.msk.bf16.gmra.mrb[20].mxu1 %vm716_vm1, %v381_v15  ;;  %v7139_v15 = vpack.c.bf16 %v18872_v17, %v18869_v10 }
 0x198   : > { %15864 = vmatmul.mubr.msk.bf16.gmra.mrb[104].mxu0 %vm716_vm1, %v7137_v26  ;;  %15087 = vmatprep.mubr.msk.bf16.mxu1 %vm716_vm1, %v382_v3  ;;  %v384_v26 = vpack.c.bf16 %v18343_v39, %v18338_v34  ;;  %v7140_v3 = vpack.c.bf16 %v18883_v25, %v18880_v21  ;;  %v18906_v34 = vld [vmem:[%s17923_s28 + $0x3c8] sm:$0xff]  ;;  %v18909_v39 = vld [vmem:[%s17923_s28 + $0x3d0] sm:$0xff] }
 0x199   : > { %15867 = vmatprep.mubr.msk.bf16.mxu0 %vm716_vm1, %v7138_v16  ;;  %v385_v16 = vpack.c.bf16 %v18358_v51, %v18346_v40  ;;  %v18924_v40 = vld [vmem:[%s17923_s28 + $0x3d8] sm:$0xff]  ;;  %v18927_v51 = vld [vmem:[%s17923_s28 + $0x3e0] sm:$0xff] }
 0x19f   : > { %15088 = vmatmul.mubr.msk.bf16.gmra.mrb[24].mxu1 %vm716_vm1, %v383_v42  ;;  %v7141_v42 = vpack.c.bf16 %v18903_v33, %v18900_v22 }
 0x1a0   : > { %15868 = vmatmul.mubr.msk.bf16.gmra.mrb[108].mxu0 %vm716_vm1, %v7139_v15  ;;  %15091 = vmatprep.mubr.msk.bf16.mxu1 %vm716_vm1, %v384_v26  ;;  %v386_v15 = vpack.c.bf16 %v18374_v58, %v18367_v53  ;;  %v7142_v26 = vpack.c.bf16 %v18909_v39, %v18906_v34  ;;  %v18930_v53 = vld [vmem:[%s17923_s28 + $0x3e8] sm:$0xff]  ;;  %v18933_v58 = vld [vmem:[%s17923_s28 + $0x3f0] sm:$0xff] }
 0x1a1   : > { %15871 = vmatprep.mubr.msk.bf16.mxu0 %vm716_vm1, %v7140_v3  ;;  %v387_v3 = vpack.c.bf16 %v18389_v7, %v18377_v59  ;;  %v18948_v59 = vld [vmem:[%s17923_s28 + $0x3f8] sm:$0xff]  ;;  %v18951_v7 = vld [vmem:[%s17923_s28 + $0x400] sm:$0xff] }
 0x1a7   : > { %15092 = vmatmul.mubr.msk.bf16.gmra.mrb[28].mxu1 %vm716_vm1, %v385_v16  ;;  %v7143_v16 = vpack.c.bf16 %v18927_v51, %v18924_v40 }
 0x1a8   : > { %15872 = vmatmul.mubr.msk.bf16.gmra.mrb[112].mxu0 %vm716_vm1, %v7141_v42  ;;  %15095 = vmatprep.mubr.msk.bf16.mxu1 %vm716_vm1, %v386_v15  ;;  %v388_v42 = vpack.c.bf16 %v18398_v13, %v18393_v8  ;;  %v7144_v15 = vpack.c.bf16 %v18933_v58, %v18930_v53  ;;  %v18954_v8 = vld [vmem:[%s17923_s28 + $0x408] sm:$0xff]  ;;  %v18957_v13 = vld [vmem:[%s17923_s28 + $0x410] sm:$0xff] }
 0x1a9   : > { %15875 = vmatprep.mubr.msk.bf16.mxu0 %vm716_vm1, %v7142_v26  ;;  %v389_v26 = vpack.c.bf16 %v18413_v27, %v18401_v14  ;;  %v18972_v14 = vld [vmem:[%s17923_s28 + $0x418] sm:$0xff]  ;;  %v18975_v27 = vld [vmem:[%s17923_s28 + $0x420] sm:$0xff] }
 0x1af   : > { %15096 = vmatmul.mubr.msk.bf16.gmra.mrb[32].mxu1 %vm716_vm1, %v387_v3  ;;  %v7145_v3 = vpack.c.bf16 %v18951_v7, %v18948_v59 }
 0x1b0   : > { %15876 = vmatmul.mubr.msk.bf16.gmra.mrb[116].mxu0 %vm716_vm1, %v7143_v16  ;;  %15099 = vmatprep.mubr.msk.bf16.mxu1 %vm716_vm1, %v388_v42  ;;  %v390_v16 = vpack.c.bf16 %v18422_v37, %v18417_v28  ;;  %v7146_v42 = vpack.c.bf16 %v18957_v13, %v18954_v8  ;;  %v18978_v28 = vld [vmem:[%s17923_s28 + $0x428] sm:$0xff]  ;;  %v18981_v37 = vld [vmem:[%s17923_s28 + $0x430] sm:$0xff] }
 0x1b1   : > { %15879 = vmatprep.mubr.msk.bf16.mxu0 %vm716_vm1, %v7144_v15  ;;  %v391_v15 = vpack.c.bf16 %v18437_v54, %v18425_v38  ;;  %v18996_v38 = vld [vmem:[%s17923_s28 + $0x438] sm:$0xff]  ;;  %v18999_v54 = vld [vmem:[%s17923_s28 + $0x440] sm:$0xff] }
 0x1b7   : > { %15100 = vmatmul.mubr.msk.bf16.gmra.mrb[36].mxu1 %vm716_vm1, %v389_v26  ;;  %v7147_v26 = vpack.c.bf16 %v18975_v27, %v18972_v14 }
 0x1b8   : > { %15880 = vmatmul.mubr.msk.bf16.gmra.mrb[120].mxu0 %vm716_vm1, %v7145_v3  ;;  %15103 = vmatprep.mubr.msk.bf16.mxu1 %vm716_vm1, %v390_v16  ;;  %v392_v3 = vpack.c.bf16 %v18446_v0, %v18441_v55  ;;  %v7148_v16 = vpack.c.bf16 %v18981_v37, %v18978_v28  ;;  %v19002_v55 = vld [vmem:[%s17923_s28 + $0x448] sm:$0xff]  ;;  %v19005_v0 = vld [vmem:[%s17923_s28 + $0x450] sm:$0xff] }
 0x1b9   : > { %15883 = vmatprep.mubr.msk.bf16.mxu0 %vm716_vm1, %v7146_v42  ;;  %22290 = vst [vmem:[#allocation38_spill] sm:$0xff] %v19002_v55  ;;  %22291 = vst [vmem:[#allocation39_spill] sm:$0xff] %v19005_v0  ;;  %v393_v42 = vpack.c.bf16 %v18461_v19, %v18449_v1  ;;  %v19020_v1 = vld [vmem:[%s17923_s28 + $0x458] sm:$0xff]  ;;  %v19023_v19 = vld [vmem:[%s17923_s28 + $0x460] sm:$0xff] }
 0x1ba   : > { %22292 = vst [vmem:[#allocation40_spill] sm:$0xff] %v19020_v1  ;;  %22293 = vst [vmem:[#allocation41_spill] sm:$0xff] %v19023_v19 }
 0x1bf   : > { %15104 = vmatmul.mubr.msk.bf16.gmra.mrb[40].mxu1 %vm716_vm1, %v391_v15  ;;  %v7149_v15 = vpack.c.bf16 %v18999_v54, %v18996_v38 }
 0x1c0   : > { %15884 = vmatmul.mubr.msk.bf16.gmra.mrb[124].mxu0 %vm716_vm1, %v7147_v26  ;;  %15107 = vmatprep.mubr.msk.bf16.mxu1 %vm716_vm1, %v392_v3  ;;  %v394_v26 = vpack.c.bf16 %v18470_v29, %v18465_v20  ;;  %v7150_v3 = vpack.c.bf16 %v19005_v0, %v19002_v55  ;;  %v19026_v20 = vld [vmem:[%s17923_s28 + $0x468] sm:$0xff]  ;;  %v19029_v29 = vld [vmem:[%s17923_s28 + $0x470] sm:$0xff] }
 0x1c1   : > { %15887 = vmatprep.mubr.msk.bf16.mxu0 %vm716_vm1, %v7148_v16  ;;  %22294 = vst [vmem:[#allocation42_spill] sm:$0xff] %v19026_v20  ;;  %22295 = vst [vmem:[#allocation43_spill] sm:$0xff] %v19029_v29  ;;  %v395_v16 = vpack.c.bf16 %v18485_v62, %v18473_v30  ;;  %v19044_v30 = vld [vmem:[%s17923_s28 + $0x478] sm:$0xff]  ;;  %v19047_v62 = vld [vmem:[%s17923_s28 + $0x480] sm:$0xff] }
 0x1c2   : > { %22298 = vst [vmem:[#allocation44_spill] sm:$0xff] %v19047_v62 }
 0x1c7   : > { %15108 = vmatmul.mubr.msk.bf16.gmra.mrb[44].mxu1 %vm716_vm1, %v393_v42  ;;  %v7151_v42 = vpack.c.bf16 %v19023_v19, %v19020_v1  ;;  %v22303_v19 = vld [vmem:[#allocation6_spill] sm:$0xff] }
 0x1c8   : > { %15888 = vmatmul.mubr.msk.bf16.gmra.mrb[128].mxu0 %vm716_vm1, %v7149_v15  ;;  %15111 = vmatprep.mubr.msk.bf16.mxu1 %vm716_vm1, %v394_v26  ;;  %v22296_v15 = vld [vmem:[#allocation3_spill] sm:$0xff] }
 0x1c9   : > { %15891 = vmatprep.mubr.msk.bf16.mxu0 %vm716_vm1, %v7150_v3  ;;  %v396_v26 = vpack.c.bf16 %v22296_v15, %v18489_v63  ;;  %v7152_v3 = vpack.c.bf16 %v19029_v29, %v19026_v20  ;;  %22297 = vst [vmem:[#allocation3_spill] sm:$0xff] %v19044_v30  ;;  %v19050_v63 = vld [vmem:[%s17923_s28 + $0x488] sm:$0xff]  ;;  %v19053_v15 = vld [vmem:[%s17923_s28 + $0x490] sm:$0xff] }
 0x1ca   : > { %22299 = vst [vmem:[#allocation45_spill] sm:$0xff] %v19050_v63  ;;  %22300 = vst [vmem:[#allocation46_spill] sm:$0xff] %v19053_v15  ;;  %v22301_v29 = vld [vmem:[#allocation4_spill] sm:$0xff] }
 0x1cf   : > { %15112 = vmatmul.mubr.msk.bf16.gmra.mrb[48].mxu1 %vm716_vm1, %v395_v16  ;;  %v22302_v16 = vld [vmem:[#allocation5_spill] sm:$0xff] }
 0x1d0   : > { %15892 = vmatmul.mubr.msk.bf16.gmra.mrb[132].mxu0 %vm716_vm1, %v7151_v42  ;;  %15115 = vmatprep.mubr.msk.bf16.mxu1 %vm716_vm1, %v396_v26  ;;  %v397_v20 = vpack.c.bf16 %v22302_v16, %v22301_v29  ;;  %v7153_v42 = vpack.c.bf16 %v19047_v62, %v19044_v30  ;;  %v22304_v26 = vld [vmem:[#allocation7_spill] sm:$0xff]  ;;  %v19068_v29 = vld [vmem:[%s17923_s28 + $0x498] sm:$0xff]  ;;  %v19071_v16 = vld [vmem:[%s17923_s28 + $0x4a0] sm:$0xff] }
 0x1d1   : > { %15895 = vmatprep.mubr.msk.bf16.mxu0 %vm716_vm1, %v7152_v3  ;;  %v398_v1 = vpack.c.bf16 %v22304_v26, %v22303_v19  ;;  %v7154_v3 = vpack.c.bf16 %v19053_v15, %v19050_v63  ;;  %22305 = vst [vmem:[#allocation4_spill] sm:$0xff] %v19068_v29  ;;  %22306 = vst [vmem:[#allocation5_spill] sm:$0xff] %v19071_v16  ;;  %v19074_v19 = vld [vmem:[%s17923_s28 + $0x4a8] sm:$0xff]  ;;  %v19077_v26 = vld [vmem:[%s17923_s28 + $0x4b0] sm:$0xff] }
 0x1d2   : > { %22307 = vst [vmem:[#allocation6_spill] sm:$0xff] %v19074_v19  ;;  %22308 = vst [vmem:[#allocation7_spill] sm:$0xff] %v19077_v26  ;;  %v22309_v15 = vld [vmem:[#allocation8_spill] sm:$0xff]  ;;  %v22311_v62 = vld [vmem:[#allocation10_spill] sm:$0xff] }
 0x1d7   : > { %15116 = vmatmul.mubr.msk.bf16.gmra.mrb[52].mxu1 %vm716_vm1, %v397_v20  ;;  %v22310_v20 = vld [vmem:[#allocation9_spill] sm:$0xff] }
 0x1d8   : > { %15896 = vmatmul.mubr.msk.bf16.gmra.mrb[136].mxu0 %vm716_vm1, %v7153_v42  ;;  %15119 = vmatprep.mubr.msk.bf16.mxu1 %vm716_vm1, %v398_v1  ;;  %v399_v63 = vpack.c.bf16 %v22310_v20, %v22309_v15  ;;  %v7155_v42 = vpack.c.bf16 %v19071_v16, %v19068_v29  ;;  %v22312_v1 = vld [vmem:[#allocation11_spill] sm:$0xff]  ;;  %v19092_v15 = vld [vmem:[%s17923_s28 + $0x4b8] sm:$0xff]  ;;  %v19095_v20 = vld [vmem:[%s17923_s28 + $0x4c0] sm:$0xff] }
 0x1d9   : > { %15899 = vmatprep.mubr.msk.bf16.mxu0 %vm716_vm1, %v7154_v3  ;;  %v400_v30 = vpack.c.bf16 %v22312_v1, %v22311_v62  ;;  %v7156_v3 = vpack.c.bf16 %v19077_v26, %v19074_v19  ;;  %22313 = vst [vmem:[#allocation8_spill] sm:$0xff] %v19092_v15  ;;  %22314 = vst [vmem:[#allocation9_spill] sm:$0xff] %v19095_v20  ;;  %v19098_v62 = vld [vmem:[%s17923_s28 + $0x4c8] sm:$0xff]  ;;  %v19101_v1 = vld [vmem:[%s17923_s28 + $0x4d0] sm:$0xff] }
 0x1da   : > { %22315 = vst [vmem:[#allocation10_spill] sm:$0xff] %v19098_v62  ;;  %22316 = vst [vmem:[#allocation11_spill] sm:$0xff] %v19101_v1  ;;  %v22317_v26 = vld [vmem:[#allocation12_spill] sm:$0xff]  ;;  %v22319_v16 = vld [vmem:[#allocation14_spill] sm:$0xff] }
 0x1df   : > { %15120 = vmatmul.mubr.msk.bf16.gmra.mrb[56].mxu1 %vm716_vm1, %v399_v63  ;;  %v22318_v63 = vld [vmem:[#allocation13_spill] sm:$0xff] }
 0x1e0   : > { %15900 = vmatmul.mubr.msk.bf16.gmra.mrb[140].mxu0 %vm716_vm1, %v7155_v42  ;;  %15123 = vmatprep.mubr.msk.bf16.mxu1 %vm716_vm1, %v400_v30  ;;  %v401_v19 = vpack.c.bf16 %v22318_v63, %v22317_v26  ;;  %v7157_v42 = vpack.c.bf16 %v19095_v20, %v19092_v15  ;;  %v22320_v30 = vld [vmem:[#allocation15_spill] sm:$0xff]  ;;  %v19116_v26 = vld [vmem:[%s17923_s28 + $0x4d8] sm:$0xff]  ;;  %v19119_v63 = vld [vmem:[%s17923_s28 + $0x4e0] sm:$0xff] }
 0x1e1   : > { %15903 = vmatprep.mubr.msk.bf16.mxu0 %vm716_vm1, %v7156_v3  ;;  %v402_v29 = vpack.c.bf16 %v22320_v30, %v22319_v16  ;;  %v7158_v3 = vpack.c.bf16 %v19101_v1, %v19098_v62  ;;  %22321 = vst [vmem:[#allocation12_spill] sm:$0xff] %v19116_v26  ;;  %22322 = vst [vmem:[#allocation13_spill] sm:$0xff] %v19119_v63  ;;  %v19122_v16 = vld [vmem:[%s17923_s28 + $0x4e8] sm:$0xff]  ;;  %v19125_v30 = vld [vmem:[%s17923_s28 + $0x4f0] sm:$0xff] }
 0x1e2   : > { %22323 = vst [vmem:[#allocation14_spill] sm:$0xff] %v19122_v16  ;;  %22324 = vst [vmem:[#allocation15_spill] sm:$0xff] %v19125_v30  ;;  %v22325_v1 = vld [vmem:[#allocation16_spill] sm:$0xff]  ;;  %v22327_v20 = vld [vmem:[#allocation18_spill] sm:$0xff] }
 0x1e7   : > { %15124 = vmatmul.mubr.msk.bf16.gmra.mrb[60].mxu1 %vm716_vm1, %v401_v19  ;;  %v22326_v19 = vld [vmem:[#allocation17_spill] sm:$0xff] }
 0x1e8   : > { %15904 = vmatmul.mubr.msk.bf16.gmra.mrb[144].mxu0 %vm716_vm1, %v7157_v42  ;;  %15127 = vmatprep.mubr.msk.bf16.mxu1 %vm716_vm1, %v402_v29  ;;  %v403_v62 = vpack.c.bf16 %v22326_v19, %v22325_v1  ;;  %v7159_v42 = vpack.c.bf16 %v19119_v63, %v19116_v26  ;;  %v22328_v29 = vld [vmem:[#allocation19_spill] sm:$0xff]  ;;  %v19140_v1 = vld [vmem:[%s17923_s28 + $0x4f8] sm:$0xff]  ;;  %v19143_v19 = vld [vmem:[%s17923_s28 + $0x500] sm:$0xff] }
 0x1e9   : > { %15907 = vmatprep.mubr.msk.bf16.mxu0 %vm716_vm1, %v7158_v3  ;;  %v404_v15 = vpack.c.bf16 %v22328_v29, %v22327_v20  ;;  %v7160_v3 = vpack.c.bf16 %v19125_v30, %v19122_v16  ;;  %22329 = vst [vmem:[#allocation16_spill] sm:$0xff] %v19140_v1  ;;  %22330 = vst [vmem:[#allocation17_spill] sm:$0xff] %v19143_v19  ;;  %v19146_v20 = vld [vmem:[%s17923_s28 + $0x508] sm:$0xff]  ;;  %v19149_v29 = vld [vmem:[%s17923_s28 + $0x510] sm:$0xff] }
 0x1ea   : > { %22331 = vst [vmem:[#allocation18_spill] sm:$0xff] %v19146_v20  ;;  %22332 = vst [vmem:[#allocation19_spill] sm:$0xff] %v19149_v29  ;;  %v22333_v30 = vld [vmem:[#allocation20_spill] sm:$0xff]  ;;  %v22335_v63 = vld [vmem:[#allocation22_spill] sm:$0xff] }
 0x1ef   : > { %15128 = vmatmul.mubr.msk.bf16.gmra.mrb[64].mxu1 %vm716_vm1, %v403_v62  ;;  %v22334_v62 = vld [vmem:[#allocation21_spill] sm:$0xff] }
 0x1f0   : > { %15908 = vmatmul.mubr.msk.bf16.gmra.mrb[148].mxu0 %vm716_vm1, %v7159_v42  ;;  %15131 = vmatprep.mubr.msk.bf16.mxu1 %vm716_vm1, %v404_v15  ;;  %v405_v16 = vpack.c.bf16 %v22334_v62, %v22333_v30  ;;  %v7161_v42 = vpack.c.bf16 %v19143_v19, %v19140_v1  ;;  %v22336_v15 = vld [vmem:[#allocation23_spill] sm:$0xff]  ;;  %v19164_v30 = vld [vmem:[%s17923_s28 + $0x518] sm:$0xff]  ;;  %v19167_v62 = vld [vmem:[%s17923_s28 + $0x520] sm:$0xff] }
 0x1f1   : > { %15911 = vmatprep.mubr.msk.bf16.mxu0 %vm716_vm1, %v7160_v3  ;;  %v406_v26 = vpack.c.bf16 %v22336_v15, %v22335_v63  ;;  %v7162_v3 = vpack.c.bf16 %v19149_v29, %v19146_v20  ;;  %22337 = vst [vmem:[#allocation20_spill] sm:$0xff] %v19164_v30  ;;  %22338 = vst [vmem:[#allocation21_spill] sm:$0xff] %v19167_v62  ;;  %v19170_v63 = vld [vmem:[%s17923_s28 + $0x528] sm:$0xff]  ;;  %v19173_v15 = vld [vmem:[%s17923_s28 + $0x530] sm:$0xff] }
 0x1f2   : > { %22339 = vst [vmem:[#allocation22_spill] sm:$0xff] %v19170_v63  ;;  %22340 = vst [vmem:[#allocation23_spill] sm:$0xff] %v19173_v15  ;;  %v22341_v29 = vld [vmem:[#allocation24_spill] sm:$0xff]  ;;  %v22343_v19 = vld [vmem:[#allocation26_spill] sm:$0xff] }
 0x1f7   : > { %15132 = vmatmul.mubr.msk.bf16.gmra.mrb[68].mxu1 %vm716_vm1, %v405_v16  ;;  %v22342_v16 = vld [vmem:[#allocation25_spill] sm:$0xff] }
 0x1f8   : > { %15912 = vmatmul.mubr.msk.bf16.gmra.mrb[152].mxu0 %vm716_vm1, %v7161_v42  ;;  %15135 = vmatprep.mubr.msk.bf16.mxu1 %vm716_vm1, %v406_v26  ;;  %v407_v20 = vpack.c.bf16 %v22342_v16, %v22341_v29  ;;  %v7163_v42 = vpack.c.bf16 %v19167_v62, %v19164_v30  ;;  %v22344_v26 = vld [vmem:[#allocation27_spill] sm:$0xff]  ;;  %v19188_v29 = vld [vmem:[%s17923_s28 + $0x538] sm:$0xff]  ;;  %v19191_v16 = vld [vmem:[%s17923_s28 + $0x540] sm:$0xff] }
 0x1f9   : > { %15915 = vmatprep.mubr.msk.bf16.mxu0 %vm716_vm1, %v7162_v3  ;;  %v408_v1 = vpack.c.bf16 %v22344_v26, %v22343_v19  ;;  %v7164_v3 = vpack.c.bf16 %v19173_v15, %v19170_v63  ;;  %22345 = vst [vmem:[#allocation24_spill] sm:$0xff] %v19188_v29  ;;  %22346 = vst [vmem:[#allocation25_spill] sm:$0xff] %v19191_v16  ;;  %v19194_v19 = vld [vmem:[%s17923_s28 + $0x548] sm:$0xff]  ;;  %v19197_v26 = vld [vmem:[%s17923_s28 + $0x550] sm:$0xff] }
 0x1fa   : > { %22347 = vst [vmem:[#allocation26_spill] sm:$0xff] %v19194_v19  ;;  %22348 = vst [vmem:[#allocation27_spill] sm:$0xff] %v19197_v26  ;;  %v22349_v15 = vld [vmem:[#allocation28_spill] sm:$0xff]  ;;  %v22350_v63 = vld [vmem:[#allocation29_spill] sm:$0xff] }
 0x1fb   : > { %v22352_v30 = vld [vmem:[#allocation31_spill] sm:$0xff] }
 0x1ff   : > { %15136 = vmatmul.mubr.msk.bf16.gmra.mrb[72].mxu1 %vm716_vm1, %v407_v20  ;;  %v409_v20 = vpack.c.bf16 %v18653_v43, %v22349_v15  ;;  %v7079_v43 = vld [vmem:[%s17923_s28 + $0x558] sm:$0xff]  ;;  %v7080_v15 = vld [vmem:[%s17923_s28 + $0x560] sm:$0xff] }
 0x200   : > { %15916 = vmatmul.mubr.msk.bf16.gmra.mrb[156].mxu0 %vm716_vm1, %v7163_v42  ;;  %15139 = vmatprep.mubr.msk.bf16.mxu1 %vm716_vm1, %v408_v1  ;;  %v7165_v42 = vpack.c.bf16 %v19191_v16, %v19188_v29  ;;  %v22351_v1 = vld [vmem:[#allocation30_spill] sm:$0xff]  ;;  %v7081_v16 = vld [vmem:[%s17923_s28 + $0x568] sm:$0xff]  ;;  %v7082_v29 = vld [vmem:[%s17923_s28 + $0x570] sm:$0xff]  ;;  %v7167_v0 = vpack.c.bf16 %v7080_v15, %v7079_v43 }
 0x201   : > { %15919 = vmatprep.mubr.msk.bf16.mxu0 %vm716_vm1, %v7164_v3  ;;  %v410_v62 = vpack.c.bf16 %v22351_v1, %v22350_v63  ;;  %v7166_v3 = vpack.c.bf16 %v19197_v26, %v19194_v19  ;;  %v22353_v63 = vld [vmem:[#allocation32_spill] sm:$0xff]  ;;  %v22354_v26 = vld [vmem:[#allocation33_spill] sm:$0xff]  ;;  %v22355_v19 = vld [vmem:[#allocation34_spill] sm:$0xff]  ;;  %v7168_v55 = vpack.c.bf16 %v7082_v29, %v7081_v16 }
 0x202   : > { %v411_v1 = vpack.c.bf16 %v22353_v63, %v22352_v30  ;;  %v8325_v30 = vld [vmem:[%s17923_s28 + $0x54] sm:$0xff] }
 0x203   : > { %v22357_v29 = vld [vmem:[#allocation36_spill] sm:$0xff]  ;;  %v22358_v63 = vld [vmem:[#allocation37_spill] sm:$0xff] }
 0x204   : > { %v414_v16 = vpack.c.bf16 %v22357_v29, %v18704_v2  ;;  %v8329_v15 = vld [vmem:[%s17923_s28 + $0x74] sm:$0xff]  ;;  %v415_v2 = vpack.c.bf16 %v18725_v11, %v22358_v63  ;;  %v8330_v11 = vld [vmem:[%s17923_s28 + $0x7c] sm:$0xff] }
 0x205   : > { %v8334_v29 = vld [vmem:[%s17923_s28 + $0x9c] sm:$0xff] }
 0x207   : > { %15140 = vmatmul.mubr.msk.bf16.gmra.mrb[76].mxu1 %vm716_vm1, %v409_v20  ;;  %v412_v20 = vpack.c.bf16 %v22355_v19, %v22354_v26 }
 0x208   : > { %15920 = vmatmul.mubr.msk.bf16.gmra.mrb[160].mxu0 %vm716_vm1, %v7165_v42  ;;  %15143 = vmatprep.mubr.msk.bf16.mxu1 %vm716_vm1, %v410_v62  ;;  %v7083_v62 = vld [vmem:[%s17923_s28 + $0x578] sm:$0xff]  ;;  %v8324_v42 = vld [vmem:[%s17923_s28 + $0x4c] sm:$0xff] }
 0x209   : > { %15923 = vmatprep.mubr.msk.bf16.mxu0 %vm716_vm1, %v7166_v3  ;;  %v22356_v3 = vld [vmem:[#allocation35_spill] sm:$0xff]  ;;  %v7169_v19 = vpack.c.bf16 %v7083_v62, %v7083_v62  ;;  %v8495_v26 = vpack.c.bf16 %v8325_v30, %v8324_v42  ;;  %v10253_v42 = vsel %vm975_vm0, %v18877_v18, 0  ;;  %v417_v18 = vpack.c.bf16 %v18749_v23, %v18735_v4  ;;  %v8337_v23 = vld [vmem:[%s17923_s28 + $0xb4] sm:$0xff] }
 0x20a   : > { %v413_v43 = vpack.c.bf16 %v18700_v47, %v22356_v3  ;;  %v8328_v47 = vld [vmem:[%s17923_s28 + $0x6c] sm:$0xff]  ;;  %v8331_v30 = vld [vmem:[%s17923_s28 + $0x84] sm:$0xff] }
 0x20b   : > { %v8497_v62 = vpack.c.bf16 %v8329_v15, %v8328_v47  ;;  %v8498_v3 = vpack.c.bf16 %v8331_v30, %v8330_v11  ;;  %v8336_v4 = vld [vmem:[%s17923_s28 + $0xac] sm:$0xff]  ;;  %v8339_v47 = vld [vmem:[%s17923_s28 + $0xc4] sm:$0xff]  ;;  %v422_v15 = vpack.c.bf16 %v18803_v45, %v18800_v44  ;;  %v423_v44 = vpack.c.bf16 %v18821_v49, %v18806_v48  ;;  %v8349_v49 = vld [vmem:[%s17923_s28 + $0x114] sm:$0xff] }
 0x20c   : > { %v8347_v11 = vld [vmem:[%s17923_s28 + $0x104] sm:$0xff]  ;;  %v8348_v48 = vld [vmem:[%s17923_s28 + $0x10c] sm:$0xff]  ;;  %v426_v30 = vpack.c.bf16 %v18851_v6, %v18848_v5  ;;  %v8353_v6 = vld [vmem:[%s17923_s28 + $0x134] sm:$0xff] }
 0x20d   : > { %v8352_v5 = vld [vmem:[%s17923_s28 + $0x12c] sm:$0xff] }
 0x20f   : > { %15144 = vmatmul.mubr.msk.bf16.gmra.mrb[80].mxu1 %vm716_vm1, %v411_v1 }
 0x210   : > { %15924 = vmatmul.mubr.msk.bf16.gmra.mrb[164].mxu0 %vm716_vm1, %v7167_v0  ;;  %15147 = vmatprep.mubr.msk.bf16.mxu1 %vm716_vm1, %v412_v20  ;;  %v8327_v0 = vld [vmem:[%s17923_s28 + $0x64] sm:$0xff]  ;;  %v416_v20 = vpack.c.bf16 %v18732_v12, %v18728_v50  ;;  %v8332_v50 = vld [vmem:[%s17923_s28 + $0x8c] sm:$0xff]  ;;  %v8333_v12 = vld [vmem:[%s17923_s28 + $0x94] sm:$0xff] }
 0x211   : > { %15927 = vmatprep.mubr.msk.bf16.mxu0 %vm716_vm1, %v7168_v55  ;;  %v8326_v55 = vld [vmem:[%s17923_s28 + $0x5c] sm:$0xff] }
 0x212   : > { %v8496_v1 = vpack.c.bf16 %v8327_v0, %v8326_v55  ;;  %v8501_v55 = vpack.c.bf16 %v8337_v23, %v8336_v4  ;;  %v8338_v0 = vld [vmem:[%s17923_s28 + $0xbc] sm:$0xff]  ;;  %v430_v4 = vpack.c.bf16 %v18906_v34, %v18903_v33  ;;  %v431_v33 = vpack.c.bf16 %v18924_v40, %v18909_v39  ;;  %v8364_v39 = vld [vmem:[%s17923_s28 + $0x18c] sm:$0xff]  ;;  %v8365_v40 = vld [vmem:[%s17923_s28 + $0x194] sm:$0xff] }
 0x217   : > { %15148 = vmatmul.mubr.msk.bf16.gmra.mrb[84].mxu1 %vm716_vm1, %v413_v43  ;;  %v418_v43 = vpack.c.bf16 %v18755_v46, %v18752_v41  ;;  %v419_v41 = vpack.c.bf16 %v18773_v24, %v18758_v52  ;;  %v8340_v52 = vld [vmem:[%s17923_s28 + $0xcc] sm:$0xff]  ;;  %v8341_v24 = vld [vmem:[%s17923_s28 + $0xd4] sm:$0xff] }
 0x218   : > { %15928 = vmatmul.mubr.msk.bf16.gmra.mrb[168].mxu0 %vm716_vm1, %v7169_v19  ;;  %15151 = vmatprep.mubr.msk.bf16.mxu1 %vm716_vm1, %v414_v16  ;;  %v8499_v19 = vpack.c.bf16 %v8333_v12, %v8332_v50  ;;  %v8335_v16 = vld [vmem:[%s17923_s28 + $0xa4] sm:$0xff]  ;;  %v8503_v63 = vpack.c.bf16 %v8341_v24, %v8340_v52  ;;  %v8507_v50 = vpack.c.bf16 %v8349_v49, %v8348_v48  ;;  %v19310_v12 = vld [vmem:[%s22149_s1 + $0xc] sm:$0xf]  ;;  %v22362_v48 = vld [vmem:[#allocation41_spill] sm:$0xff] }
 0x219   : > { %15933 = vmatprep.mubr.msk.bf16.mxu0 %vm716_vm1, %v8495_v26  ;;  %v8500_v46 = vpack.c.bf16 %v8335_v16, %v8334_v29  ;;  %v420_v26 = vpack.c.bf16 %v18779_v32, %v18776_v31  ;;  %v421_v31 = vpack.c.bf16 %v18797_v36, %v18782_v35  ;;  %v8502_v32 = vpack.c.bf16 %v8339_v47, %v8338_v0  ;;  %v8344_v35 = vld [vmem:[%s17923_s28 + $0xec] sm:$0xff]  ;;  %v8345_v36 = vld [vmem:[%s17923_s28 + $0xf4] sm:$0xff]  ;;  %v8354_v29 = vld [vmem:[%s17923_s28 + $0x13c] sm:$0xff] }
 0x21a   : > { %17833 = vmatprep.subr.msk.bf16.mxu1 %vm975_vm0, %v19310_v12  ;;  %v8355_v16 = vld [vmem:[%s17923_s28 + $0x144] sm:$0xff]  ;;  %v8362_v0 = vld [vmem:[%s17923_s28 + $0x17c] sm:$0xff]  ;;  %v434_v52 = vpack.c.bf16 %v18954_v8, %v18951_v7  ;;  %v8515_v24 = vpack.c.bf16 %v8365_v40, %v8364_v39  ;;  %v435_v7 = vpack.c.bf16 %v18972_v14, %v18957_v13  ;;  %v8372_v13 = vld [vmem:[%s17923_s28 + $0x1cc] sm:$0xff] }
 0x21b   : > { %v8363_v47 = vld [vmem:[%s17923_s28 + $0x184] sm:$0xff]  ;;  %v8373_v14 = vld [vmem:[%s17923_s28 + $0x1d4] sm:$0xff] }
 0x21c   : > { %v22363_v49 = vld [vmem:[#allocation42_spill] sm:$0xff]  ;;  %v22372_v39 = vld [vmem:[#allocation7_spill] sm:$0xff]  ;;  %v22373_v40 = vld [vmem:[#allocation8_spill] sm:$0xff] }
 0x21f   : > { %15152 = vmatmul.mubr.msk.bf16.gmra.mrb[88].mxu1 %vm716_vm1, %v415_v2  ;;  %v8342_v2 = vld [vmem:[%s17923_s28 + $0xdc] sm:$0xff] }
 0x220   : > { %15934 = vmatmul.mubr.msk.bf16.vlgmr.msra.gmra.mrb[0].mxu0 %vm716_vm1, %v8496_v1  ;;  %15155 = vmatprep.mubr.msk.bf16.mxu1 %vm716_vm1, %v416_v20  ;;  %v8343_v1 = vld [vmem:[%s17923_s28 + $0xe4] sm:$0xff]  ;;  %v424_v20 = vpack.c.bf16 %v18827_v57, %v18824_v56  ;;  %v425_v56 = vpack.c.bf16 %v18845_v61, %v18830_v60  ;;  %v8350_v60 = vld [vmem:[%s17923_s28 + $0x11c] sm:$0xff] }
 0x221   : > { %16106 = vmatpush3.bf16.msra.mxu0 %v10253_v42  ;;  %15937 = vmatprep.mubr.msk.bf16.mxu0 %vm716_vm1, %v8497_v62  ;;  %v8504_v45 = vpack.c.bf16 %v8343_v1, %v8342_v2  ;;  %v8505_v62 = vpack.c.bf16 %v8345_v36, %v8344_v35  ;;  %v8346_v42 = vld [vmem:[%s17923_s28 + $0xfc] sm:$0xff]  ;;  %v8351_v61 = vld [vmem:[%s17923_s28 + $0x124] sm:$0xff] }
 0x222   : > { %v8506_v57 = vpack.c.bf16 %v8347_v11, %v8346_v42  ;;  %v8370_v2 = vld [vmem:[%s17923_s28 + $0x1bc] sm:$0xff]  ;;  %v8371_v1 = vld [vmem:[%s17923_s28 + $0x1c4] sm:$0xff]  ;;  %v22361_v42 = vld [vmem:[#allocation40_spill] sm:$0xff] }
 0x223   : > { %v22359_v35 = vld [vmem:[#allocation38_spill] sm:$0xff] }
 0x224   : > { %v438_v36 = vpack.c.bf16 %v22359_v35, %v18999_v54  ;;  %v8394_v35 = vld [vmem:[%s17923_s28 + $0x27c] sm:$0xff] }
 0x227   : > { %15156 = vmatmul.mubr.msk.bf16.gmra.mrb[92].mxu1 %vm716_vm1, %v417_v18  ;;  %v427_v18 = vpack.c.bf16 %v18869_v10, %v18854_v9  ;;  %v8356_v9 = vld [vmem:[%s17923_s28 + $0x14c] sm:$0xff]  ;;  %v8357_v10 = vld [vmem:[%s17923_s28 + $0x154] sm:$0xff] }
 0x228   : > { %15938 = vmatmul.mubr.msk.bf16.gmra.mrb[4].mxu0 %vm716_vm1, %v8498_v3  ;;  %15159 = vmatprep.mubr.msk.bf16.mxu1 %vm716_vm1, %v418_v43  ;;  %v8508_v3 = vpack.c.bf16 %v8351_v61, %v8350_v60  ;;  %v428_v43 = vpack.c.bf16 %v18880_v21, %v18872_v17  ;;  %v429_v17 = vpack.c.bf16 %v18900_v22, %v18883_v25  ;;  %v8360_v25 = vld [vmem:[%s17923_s28 + $0x16c] sm:$0xff]  ;;  %v8361_v22 = vld [vmem:[%s17923_s28 + $0x174] sm:$0xff] }
 0x229   : > { %15941 = vmatprep.mubr.msk.bf16.mxu0 %vm716_vm1, %v8499_v19  ;;  %v8509_v19 = vpack.c.bf16 %v8353_v6, %v8352_v5  ;;  %v8510_v21 = vpack.c.bf16 %v8355_v16, %v8354_v29  ;;  %v8511_v23 = vpack.c.bf16 %v8357_v10, %v8356_v9  ;;  %v8380_v60 = vld [vmem:[%s17923_s28 + $0x20c] sm:$0xff]  ;;  %v8381_v61 = vld [vmem:[%s17923_s28 + $0x214] sm:$0xff]  ;;  %v8382_v9 = vld [vmem:[%s17923_s28 + $0x21c] sm:$0xff] }
 0x22a   : > { %v22364_v5 = vld [vmem:[#allocation43_spill] sm:$0xff]  ;;  %v8523_v16 = vpack.c.bf16 %v8381_v61, %v8380_v60  ;;  %v22385_v60 = vld [vmem:[#allocation20_spill] sm:$0xff] }
 0x22b   : > { %v22365_v6 = vld [vmem:[#allocation3_spill] sm:$0xff] }
 0x22c   : > { %v8383_v10 = vld [vmem:[%s17923_s28 + $0x224] sm:$0xff] }
 0x22f   : > { %15160 = vmatmul.mubr.msk.bf16.gmra.mrb[96].mxu1 %vm716_vm1, %v419_v41  ;;  %v8358_v41 = vld [vmem:[%s17923_s28 + $0x15c] sm:$0xff] }
 0x230   : > { %15942 = vmatmul.mubr.msk.bf16.gmra.mrb[8].mxu0 %vm716_vm1, %v8500_v46  ;;  %15163 = vmatprep.mubr.msk.bf16.mxu1 %vm716_vm1, %v420_v26  ;;  %v8359_v46 = vld [vmem:[%s17923_s28 + $0x164] sm:$0xff]  ;;  %v432_v26 = vpack.c.bf16 %v18930_v53, %v18927_v51  ;;  %v433_v51 = vpack.c.bf16 %v18948_v59, %v18933_v58  ;;  %v8514_v53 = vpack.c.bf16 %v8363_v47, %v8362_v0  ;;  %v8368_v58 = vld [vmem:[%s17923_s28 + $0x1ac] sm:$0xff]  ;;  %v8369_v59 = vld [vmem:[%s17923_s28 + $0x1b4] sm:$0xff] }
 0x231   : > { %15945 = vmatprep.mubr.msk.bf16.mxu0 %vm716_vm1, %v8501_v55  ;;  %v8512_v34 = vpack.c.bf16 %v8359_v46, %v8358_v41  ;;  %v8513_v55 = vpack.c.bf16 %v8361_v22, %v8360_v25  ;;  %v8524_v46 = vpack.c.bf16 %v8383_v10, %v8382_v9  ;;  %v22370_v25 = vld [vmem:[#allocation5_spill] sm:$0xff]  ;;  %v22371_v22 = vld [vmem:[#allocation6_spill] sm:$0xff]  ;;  %v8388_v0 = vld [vmem:[%s17923_s28 + $0x24c] sm:$0xff] }
 0x232   : > { %v8389_v47 = vld [vmem:[%s17923_s28 + $0x254] sm:$0xff]  ;;  %v22388_v10 = vld [vmem:[#allocation23_spill] sm:$0xff] }
 0x233   : > { %v8405_v9 = vld [vmem:[%s17923_s28 + $0x2d4] sm:$0xff] }
 0x237   : > { %15164 = vmatmul.mubr.msk.bf16.gmra.mrb[100].mxu1 %vm716_vm1, %v421_v31  ;;  %v8366_v31 = vld [vmem:[%s17923_s28 + $0x19c] sm:$0xff] }
 0x238   : > { %15946 = vmatmul.mubr.msk.bf16.gmra.mrb[12].mxu0 %vm716_vm1, %v8502_v32  ;;  %15167 = vmatprep.mubr.msk.bf16.mxu1 %vm716_vm1, %v422_v15  ;;  %v8367_v32 = vld [vmem:[%s17923_s28 + $0x1a4] sm:$0xff]  ;;  %v436_v15 = vpack.c.bf16 %v18978_v28, %v18975_v27  ;;  %v437_v27 = vpack.c.bf16 %v18996_v38, %v18981_v37  ;;  %v8518_v28 = vpack.c.bf16 %v8371_v1, %v8370_v2  ;;  %v8376_v37 = vld [vmem:[%s17923_s28 + $0x1ec] sm:$0xff]  ;;  %v8377_v38 = vld [vmem:[%s17923_s28 + $0x1f4] sm:$0xff] }
 0x239   : > { %15949 = vmatprep.mubr.msk.bf16.mxu0 %vm716_vm1, %v8503_v63  ;;  %v8516_v8 = vpack.c.bf16 %v8367_v32, %v8366_v31  ;;  %v8517_v63 = vpack.c.bf16 %v8369_v59, %v8368_v58  ;;  %v8527_v32 = vpack.c.bf16 %v8389_v47, %v8388_v0  ;;  %v8390_v58 = vld [vmem:[%s17923_s28 + $0x25c] sm:$0xff]  ;;  %v8391_v59 = vld [vmem:[%s17923_s28 + $0x264] sm:$0xff]  ;;  %v8409_v0 = vld [vmem:[%s17923_s28 + $0x2f4] sm:$0xff] }
 0x23a   : > { %v8528_v1 = vpack.c.bf16 %v8391_v59, %v8390_v58  ;;  %v22392_v47 = vld [vmem:[#allocation27_spill] sm:$0xff] }
 0x23b   : > { %v2684_v58 = vld [vmem:[%s17923_s28 + $0x22] sm:$0xff]  ;;  %v2685_v59 = vld [vmem:[%s17923_s28 + $0x2a] sm:$0xff] }
 0x23f   : > { %15168 = vmatmul.mubr.msk.bf16.gmra.mrb[104].mxu1 %vm716_vm1, %v423_v44  ;;  %v8519_v44 = vpack.c.bf16 %v8373_v14, %v8372_v13  ;;  %v22378_v13 = vld [vmem:[#allocation13_spill] sm:$0xff]  ;;  %v22379_v14 = vld [vmem:[#allocation14_spill] sm:$0xff] }
 0x240   : > { %15950 = vmatmul.mubr.msk.bf16.gmra.mrb[16].mxu0 %vm716_vm1, %v8504_v45  ;;  %15171 = vmatprep.mubr.msk.bf16.mxu1 %vm716_vm1, %v424_v20  ;;  %v8374_v45 = vld [vmem:[%s17923_s28 + $0x1dc] sm:$0xff]  ;;  %v8375_v20 = vld [vmem:[%s17923_s28 + $0x1e4] sm:$0xff] }
 0x241   : > { %15953 = vmatprep.mubr.msk.bf16.mxu0 %vm716_vm1, %v8505_v62  ;;  %v22360_v62 = vld [vmem:[#allocation39_spill] sm:$0xff]  ;;  %v8520_v11 = vpack.c.bf16 %v8375_v20, %v8374_v45  ;;  %v8397_v45 = vld [vmem:[%s17923_s28 + $0x294] sm:$0xff] }
 0x242   : > { %v439_v54 = vpack.c.bf16 %v22361_v42, %v22360_v62  ;;  %v22380_v20 = vld [vmem:[#allocation15_spill] sm:$0xff]  ;;  %v22382_v42 = vld [vmem:[#allocation17_spill] sm:$0xff] }
 0x247   : > { %15172 = vmatmul.mubr.msk.bf16.gmra.mrb[108].mxu1 %vm716_vm1, %v425_v56  ;;  %v440_v56 = vpack.c.bf16 %v22363_v49, %v22362_v48  ;;  %v8398_v49 = vld [vmem:[%s17923_s28 + $0x29c] sm:$0xff] }
 0x248   : > { %15954 = vmatmul.mubr.msk.bf16.gmra.mrb[20].mxu0 %vm716_vm1, %v8506_v57  ;;  %15175 = vmatprep.mubr.msk.bf16.mxu1 %vm716_vm1, %v426_v30  ;;  %v8521_v57 = vpack.c.bf16 %v8377_v38, %v8376_v37  ;;  %v8378_v30 = vld [vmem:[%s17923_s28 + $0x1fc] sm:$0xff]  ;;  %v22381_v37 = vld [vmem:[#allocation16_spill] sm:$0xff] }
 0x249   : > { %15957 = vmatprep.mubr.msk.bf16.mxu0 %vm716_vm1, %v8507_v50  ;;  %v8379_v50 = vld [vmem:[%s17923_s28 + $0x204] sm:$0xff]  ;;  %v449_v38 = vpack.c.bf16 %v22381_v37, %v22380_v20  ;;  %v17850_v20 = vld [vmem:[%s22149_s1 + $0x10] sm:$0xf] }
 0x24f   : > { %15176 = vmatmul.mubr.msk.bf16.gmra.mrb[112].mxu1 %vm716_vm1, %v427_v18  ;;  %v441_v18 = vpack.c.bf16 %v22365_v6, %v22364_v5  ;;  %v22386_v6 = vld [vmem:[#allocation21_spill] sm:$0xff] }
 0x250   : > { %15958 = vmatmul.mubr.msk.bf16.gmra.mrb[24].mxu0 %vm716_vm1, %v8508_v3  ;;  %15179 = vmatprep.mubr.msk.bf16.mxu1 %vm716_vm1, %v428_v43  ;;  %v8522_v3 = vpack.c.bf16 %v8379_v50, %v8378_v30  ;;  %v22366_v43 = vld [vmem:[#allocation44_spill] sm:$0xff]  ;;  %v22384_v50 = vld [vmem:[#allocation19_spill] sm:$0xff] }
 0x251   : > { %15961 = vmatprep.mubr.msk.bf16.mxu0 %vm716_vm1, %v8509_v19  ;;  %v22367_v19 = vld [vmem:[#allocation45_spill] sm:$0xff]  ;;  %v451_v61 = vpack.c.bf16 %v22385_v60, %v22384_v50 }
 0x252   : > { %v442_v29 = vpack.c.bf16 %v22367_v19, %v22366_v43  ;;  %v8401_v30 = vld [vmem:[%s17923_s28 + $0x2b4] sm:$0xff]  ;;  %v8402_v19 = vld [vmem:[%s17923_s28 + $0x2bc] sm:$0xff] }
 0x253   : > { %v8421_v50 = vld [vmem:[%s17923_s28 + $0x354] sm:$0xff] }
 0x257   : > { %15180 = vmatmul.mubr.msk.bf16.gmra.mrb[116].mxu1 %vm716_vm1, %v429_v17  ;;  %v8384_v17 = vld [vmem:[%s17923_s28 + $0x22c] sm:$0xff] }
 0x258   : > { %15962 = vmatmul.mubr.msk.bf16.gmra.mrb[28].mxu0 %vm716_vm1, %v8510_v21  ;;  %15183 = vmatprep.mubr.msk.bf16.mxu1 %vm716_vm1, %v430_v4  ;;  %v8385_v21 = vld [vmem:[%s17923_s28 + $0x234] sm:$0xff]  ;;  %v22368_v4 = vld [vmem:[#allocation46_spill] sm:$0xff] }
 0x259   : > { %15965 = vmatprep.mubr.msk.bf16.mxu0 %vm716_vm1, %v8511_v23  ;;  %v22369_v23 = vld [vmem:[#allocation4_spill] sm:$0xff] }
 0x25a   : > { %v443_v41 = vpack.c.bf16 %v22369_v23, %v22368_v4  ;;  %v22390_v23 = vld [vmem:[#allocation25_spill] sm:$0xff] }
 0x25f   : > { %15184 = vmatmul.mubr.msk.bf16.gmra.mrb[120].mxu1 %vm716_vm1, %v431_v33  ;;  %v444_v33 = vpack.c.bf16 %v22371_v22, %v22370_v25  ;;  %v8406_v22 = vld [vmem:[%s17923_s28 + $0x2dc] sm:$0xff] }
 0x260   : > { %15966 = vmatmul.mubr.msk.bf16.gmra.mrb[32].mxu0 %vm716_vm1, %v8512_v34  ;;  %15187 = vmatprep.mubr.msk.bf16.mxu1 %vm716_vm1, %v432_v26  ;;  %v8525_v34 = vpack.c.bf16 %v8385_v21, %v8384_v17  ;;  %v8386_v26 = vld [vmem:[%s17923_s28 + $0x23c] sm:$0xff]  ;;  %v22389_v17 = vld [vmem:[#allocation24_spill] sm:$0xff] }
 0x261   : > { %15969 = vmatprep.mubr.msk.bf16.mxu0 %vm716_vm1, %v8513_v55  ;;  %v8387_v55 = vld [vmem:[%s17923_s28 + $0x244] sm:$0xff]  ;;  %v453_v21 = vpack.c.bf16 %v22389_v17, %v22388_v10  ;;  %v8425_v10 = vld [vmem:[%s17923_s28 + $0x374] sm:$0xff] }
 0x267   : > { %15188 = vmatmul.mubr.msk.bf16.gmra.mrb[124].mxu1 %vm716_vm1, %v433_v51  ;;  %v445_v51 = vpack.c.bf16 %v22373_v40, %v22372_v39  ;;  %v455_v39 = vpack.c.bf16 %v22392_v47, %v22392_v47 }
 0x268   : > { %15970 = vmatmul.mubr.msk.bf16.gmra.mrb[36].mxu0 %vm716_vm1, %v8514_v53  ;;  %15191 = vmatprep.mubr.msk.bf16.mxu1 %vm716_vm1, %v434_v52  ;;  %v8526_v53 = vpack.c.bf16 %v8387_v55, %v8386_v26  ;;  %v22374_v52 = vld [vmem:[#allocation9_spill] sm:$0xff]  ;;  %v2681_v26 = vld [vmem:[%s17923_s28 + $0xa] sm:$0xff] }
 0x269   : > { %15973 = vmatprep.mubr.msk.bf16.mxu0 %vm716_vm1, %v8515_v24  ;;  %v22375_v24 = vld [vmem:[#allocation10_spill] sm:$0xff]  ;;  %v8408_v55 = vld [vmem:[%s17923_s28 + $0x2ec] sm:$0xff] }
 0x26a   : > { %v446_v31 = vpack.c.bf16 %v22375_v24, %v22374_v52  ;;  %v2682_v52 = vld [vmem:[%s17923_s28 + $0x12] sm:$0xff]  ;;  %v2683_v24 = vld [vmem:[%s17923_s28 + $0x1a] sm:$0xff] }
 0x26f   : > { %15192 = vmatmul.mubr.msk.bf16.gmra.mrb[128].mxu1 %vm716_vm1, %v435_v7  ;;  %v8392_v7 = vld [vmem:[%s17923_s28 + $0x26c] sm:$0xff] }
 0x270   : > { %15974 = vmatmul.mubr.msk.bf16.gmra.mrb[40].mxu0 %vm716_vm1, %v8516_v8  ;;  %15195 = vmatprep.mubr.msk.bf16.mxu1 %vm716_vm1, %v436_v15  ;;  %v8393_v8 = vld [vmem:[%s17923_s28 + $0x274] sm:$0xff]  ;;  %v22376_v15 = vld [vmem:[#allocation11_spill] sm:$0xff] }
 0x271   : > { %15977 = vmatprep.mubr.msk.bf16.mxu0 %vm716_vm1, %v8517_v63  ;;  %v22377_v63 = vld [vmem:[#allocation12_spill] sm:$0xff] }
 0x272   : > { %v447_v2 = vpack.c.bf16 %v22377_v63, %v22376_v15  ;;  %v2852_v15 = vpack.c.bf16 %v2683_v24, %v2682_v52  ;;  %v8430_v52 = vld [vmem:[%s17923_s28 + $0x39c] sm:$0xff]  ;;  %v8431_v24 = vld [vmem:[%s17923_s28 + $0x3a4] sm:$0xff] }
 0x277   : > { %15196 = vmatmul.mubr.msk.bf16.gmra.mrb[132].mxu1 %vm716_vm1, %v437_v27  ;;  %v448_v27 = vpack.c.bf16 %v22379_v14, %v22378_v13  ;;  %v4609_v13 = vsel %vm975_vm0, %v19310_v12, 0  ;;  %v2686_v14 = vld [vmem:[%s17923_s28 + $0x32] sm:$0xff] }
 0x278   : > { %15978 = vmatmul.mubr.msk.bf16.gmra.mrb[44].mxu0 %vm716_vm1, %v8518_v28  ;;  %15199 = vmatprep.mubr.msk.bf16.mxu1 %vm716_vm1, %v438_v36  ;;  %v8529_v28 = vpack.c.bf16 %v8393_v8, %v8392_v7  ;;  %v8395_v36 = vld [vmem:[%s17923_s28 + $0x284] sm:$0xff]  ;;  %v8412_v7 = vld [vmem:[%s17923_s28 + $0x30c] sm:$0xff]  ;;  %v8413_v8 = vld [vmem:[%s17923_s28 + $0x314] sm:$0xff] }
 0x279   : > { %15981 = vmatprep.mubr.msk.bf16.mxu0 %vm716_vm1, %v8519_v44  ;;  %v8396_v44 = vld [vmem:[%s17923_s28 + $0x28c] sm:$0xff]  ;;  %v8530_v62 = vpack.c.bf16 %v8395_v36, %v8394_v35  ;;  %v8415_v35 = vld [vmem:[%s17923_s28 + $0x324] sm:$0xff] }
 0x27a   : > { %v8531_v48 = vpack.c.bf16 %v8397_v45, %v8396_v44  ;;  %v2688_v36 = vld [vmem:[%s17923_s28 + $0x42] sm:$0xff]  ;;  %v2689_v44 = vld [vmem:[%s17923_s28 + $0x4a] sm:$0xff]  ;;  %v8417_v45 = vld [vmem:[%s17923_s28 + $0x334] sm:$0xff] }
 0x27b   : > { %v8416_v12 = vld [vmem:[%s17923_s28 + $0x32c] sm:$0xff] }
 0x27f   : > { %15200 = vmatmul.mubr.msk.bf16.gmra.mrb[136].mxu1 %vm716_vm1, %v439_v54  ;;  %v22383_v54 = vld [vmem:[#allocation18_spill] sm:$0xff] }
 0x280   : > { %15982 = vmatmul.mubr.msk.bf16.gmra.mrb[48].mxu0 %vm716_vm1, %v8520_v11  ;;  %15203 = vmatprep.mubr.msk.bf16.mxu1 %vm716_vm1, %v440_v56  ;;  %v450_v11 = vpack.c.bf16 %v22383_v54, %v22382_v42  ;;  %v8399_v56 = vld [vmem:[%s17923_s28 + $0x2a4] sm:$0xff]  ;;  %v8541_v42 = vpack.c.bf16 %v8417_v45, %v8416_v12  ;;  %v2690_v54 = vld [vmem:[%s17923_s28 + $0x52] sm:$0xff] }
 0x281   : > { %15985 = vmatprep.mubr.msk.bf16.mxu0 %vm716_vm1, %v8521_v57  ;;  %v8400_v57 = vld [vmem:[%s17923_s28 + $0x2ac] sm:$0xff]  ;;  %v8532_v5 = vpack.c.bf16 %v8399_v56, %v8398_v49  ;;  %v8419_v49 = vld [vmem:[%s17923_s28 + $0x344] sm:$0xff] }
 0x282   : > { %v8533_v43 = vpack.c.bf16 %v8401_v30, %v8400_v57  ;;  %v2692_v56 = vld [vmem:[%s17923_s28 + $0x62] sm:$0xff]  ;;  %v2693_v57 = vld [vmem:[%s17923_s28 + $0x6a] sm:$0xff] }
 0x283   : > { %v8420_v30 = vld [vmem:[%s17923_s28 + $0x34c] sm:$0xff] }
 0x287   : > { %15204 = vmatmul.mubr.msk.bf16.gmra.mrb[140].mxu1 %vm716_vm1, %v441_v18  ;;  %v22387_v18 = vld [vmem:[#allocation22_spill] sm:$0xff] }
 0x288   : > { %15986 = vmatmul.mubr.msk.bf16.gmra.mrb[52].mxu0 %vm716_vm1, %v8522_v3  ;;  %15207 = vmatprep.mubr.msk.bf16.mxu1 %vm716_vm1, %v442_v29  ;;  %v452_v3 = vpack.c.bf16 %v22387_v18, %v22386_v6  ;;  %v8403_v29 = vld [vmem:[%s17923_s28 + $0x2c4] sm:$0xff]  ;;  %v8543_v6 = vpack.c.bf16 %v8421_v50, %v8420_v30  ;;  %v2694_v18 = vld [vmem:[%s17923_s28 + $0x72] sm:$0xff] }
 0x289   : > { %15989 = vmatprep.mubr.msk.bf16.mxu0 %vm716_vm1, %v8523_v16  ;;  %v8404_v16 = vld [vmem:[%s17923_s28 + $0x2cc] sm:$0xff]  ;;  %v8534_v4 = vpack.c.bf16 %v8403_v29, %v8402_v19  ;;  %v8423_v19 = vld [vmem:[%s17923_s28 + $0x364] sm:$0xff] }
 0x28a   : > { %v8535_v25 = vpack.c.bf16 %v8405_v9, %v8404_v16  ;;  %v2696_v29 = vld [vmem:[%s17923_s28 + $0x82] sm:$0xff]  ;;  %v2697_v16 = vld [vmem:[%s17923_s28 + $0x8a] sm:$0xff] }
 0x28b   : > { %v8424_v9 = vld [vmem:[%s17923_s28 + $0x36c] sm:$0xff] }
 0x28f   : > { %15208 = vmatmul.mubr.msk.bf16.gmra.mrb[144].mxu1 %vm716_vm1, %v443_v41  ;;  %v22391_v41 = vld [vmem:[#allocation26_spill] sm:$0xff] }
 0x290   : > { %15990 = vmatmul.mubr.msk.bf16.gmra.mrb[56].mxu0 %vm716_vm1, %v8524_v46  ;;  %15211 = vmatprep.mubr.msk.bf16.mxu1 %vm716_vm1, %v444_v33  ;;  %v454_v46 = vpack.c.bf16 %v22391_v41, %v22390_v23  ;;  %v8407_v33 = vld [vmem:[%s17923_s28 + $0x2e4] sm:$0xff]  ;;  %v8545_v23 = vpack.c.bf16 %v8425_v10, %v8424_v9  ;;  %v2698_v41 = vld [vmem:[%s17923_s28 + $0x92] sm:$0xff] }
 0x291   : > { %15993 = vmatprep.mubr.msk.bf16.mxu0 %vm716_vm1, %v8525_v34  ;;  %v2680_v34 = vld [vmem:[%s17923_s28 + $0x2] sm:$0xff]  ;;  %v8536_v40 = vpack.c.bf16 %v8407_v33, %v8406_v22 }
 0x292   : > { %v8427_v22 = vld [vmem:[%s17923_s28 + $0x384] sm:$0xff] }
 0x293   : > { %v2700_v33 = vld [vmem:[%s17923_s28 + $0xa2] sm:$0xff] }
 0x297   : > { %15212 = vmatmul.mubr.msk.bf16.gmra.mrb[148].mxu1 %vm716_vm1, %v445_v51  ;;  %v2851_v51 = vpack.c.bf16 %v2681_v26, %v2680_v34  ;;  %v2701_v34 = vld [vmem:[%s17923_s28 + $0xaa] sm:$0xff] }
 0x298   : > { %15994 = vmatmul.mubr.msk.bf16.gmra.mrb[60].mxu0 %vm716_vm1, %v8526_v53  ;;  %15215 = vmatprep.mubr.msk.bf16.mxu1 %vm716_vm1, %v446_v31  ;;  %v8537_v53 = vpack.c.bf16 %v8409_v0, %v8408_v55  ;;  %v8410_v31 = vld [vmem:[%s17923_s28 + $0x2fc] sm:$0xff]  ;;  %v8428_v26 = vld [vmem:[%s17923_s28 + $0x38c] sm:$0xff]  ;;  %v8429_v55 = vld [vmem:[%s17923_s28 + $0x394] sm:$0xff] }
 0x299   : > { %15997 = vmatprep.mubr.msk.bf16.mxu0 %vm716_vm1, %v8527_v32  ;;  %v8411_v32 = vld [vmem:[%s17923_s28 + $0x304] sm:$0xff] }
 0x29a   : > { %v8538_v63 = vpack.c.bf16 %v8411_v32, %v8410_v31  ;;  %v2704_v31 = vld [vmem:[%s17923_s28 + $0xc2] sm:$0xff]  ;;  %v2705_v32 = vld [vmem:[%s17923_s28 + $0xca] sm:$0xff] }
 0x29f   : > { %15216 = vmatmul.mubr.msk.bf16.gmra.mrb[152].mxu1 %vm716_vm1, %v447_v2  ;;  %v2853_v2 = vpack.c.bf16 %v2685_v59, %v2684_v58  ;;  %v8432_v58 = vld [vmem:[%s17923_s28 + $0x3ac] sm:$0xff]  ;;  %v8433_v59 = vld [vmem:[%s17923_s28 + $0x3b4] sm:$0xff] }
 0x2a0   : > { %15998 = vmatmul.mubr.msk.bf16.gmra.mrb[64].mxu0 %vm716_vm1, %v8528_v1  ;;  %15219 = vmatprep.mubr.msk.bf16.mxu1 %vm716_vm1, %v448_v27  ;;  %v8539_v1 = vpack.c.bf16 %v8413_v8, %v8412_v7  ;;  %v2687_v27 = vld [vmem:[%s17923_s28 + $0x3a] sm:$0xff]  ;;  %v8548_v8 = vpack.c.bf16 %v8431_v24, %v8430_v52  ;;  %v2725_v52 = vld [vmem:[%s17923_s28 + $0x16a] sm:$0xff] }
 0x2a1   : > { %16001 = vmatprep.mubr.msk.bf16.mxu0 %vm716_vm1, %v8529_v28  ;;  %v8414_v28 = vld [vmem:[%s17923_s28 + $0x31c] sm:$0xff]  ;;  %v2854_v37 = vpack.c.bf16 %v2687_v27, %v2686_v14  ;;  %v8435_v14 = vld [vmem:[%s17923_s28 + $0x3c4] sm:$0xff]  ;;  %v8452_v24 = vld [vmem:[%s17923_s28 + $0x44c] sm:$0xff] }
 0x2a2   : > { %v2708_v27 = vld [vmem:[%s17923_s28 + $0xe2] sm:$0xff] }
 0x2a7   : > { %15220 = vmatmul.mubr.msk.bf16.gmra.mrb[156].mxu1 %vm716_vm1, %v449_v38  ;;  %v8540_v38 = vpack.c.bf16 %v8415_v35, %v8414_v28  ;;  %v2709_v28 = vld [vmem:[%s17923_s28 + $0xea] sm:$0xff]  ;;  %v19582_v35 = vld [vmem:[%s22149_s1 + $0x20] sm:$0xf] }
 0x2a8   : > { %16002 = vmatmul.mubr.msk.bf16.gmra.mrb[68].mxu0 %vm716_vm1, %v8530_v62  ;;  %15223 = vmatprep.mubr.msk.bf16.mxu1 %vm716_vm1, %v450_v11  ;;  %v2855_v62 = vpack.c.bf16 %v2689_v44, %v2688_v36  ;;  %v2691_v11 = vld [vmem:[%s17923_s28 + $0x5a] sm:$0xff]  ;;  %v8436_v36 = vld [vmem:[%s17923_s28 + $0x3cc] sm:$0xff] }
 0x2a9   : > { %16005 = vmatprep.mubr.msk.bf16.mxu0 %vm716_vm1, %v8531_v48  ;;  %v8418_v48 = vld [vmem:[%s17923_s28 + $0x33c] sm:$0xff]  ;;  %v2856_v60 = vpack.c.bf16 %v2691_v11, %v2690_v54  ;;  %v8437_v44 = vld [vmem:[%s17923_s28 + $0x3d4] sm:$0xff]  ;;  %17839 = vmatprep.subr.msk.bf16.mxu0 %vm975_vm0, %v19582_v35  ;;  %v8439_v54 = vld [vmem:[%s17923_s28 + $0x3e4] sm:$0xff] }
 0x2aa   : > { %v2712_v11 = vld [vmem:[%s17923_s28 + $0x102] sm:$0xff] }
 0x2af   : > { %15224 = vmatmul.mubr.msk.bf16.gmra.mrb[160].mxu1 %vm716_vm1, %v451_v61  ;;  %v8542_v61 = vpack.c.bf16 %v8419_v49, %v8418_v48  ;;  %v2713_v48 = vld [vmem:[%s17923_s28 + $0x10a] sm:$0xff] }
 0x2b0   : > { %16006 = vmatmul.mubr.msk.bf16.gmra.mrb[72].mxu0 %vm716_vm1, %v8532_v5  ;;  %15227 = vmatprep.mubr.msk.bf16.mxu1 %vm716_vm1, %v452_v3  ;;  %v2857_v5 = vpack.c.bf16 %v2693_v57, %v2692_v56  ;;  %v2695_v3 = vld [vmem:[%s17923_s28 + $0x7a] sm:$0xff]  ;;  %v8440_v49 = vld [vmem:[%s17923_s28 + $0x3ec] sm:$0xff]  ;;  %v2867_v50 = vpack.c.bf16 %v2713_v48, %v2712_v11 }
 0x2b1   : > { %16009 = vmatprep.mubr.msk.bf16.mxu0 %vm716_vm1, %v8533_v43  ;;  %v8422_v43 = vld [vmem:[%s17923_s28 + $0x35c] sm:$0xff]  ;;  %v2858_v17 = vpack.c.bf16 %v2695_v3, %v2694_v18  ;;  %v8441_v56 = vld [vmem:[%s17923_s28 + $0x3f4] sm:$0xff]  ;;  %v8443_v18 = vld [vmem:[%s17923_s28 + $0x404] sm:$0xff] }
 0x2b2   : > { %v2716_v3 = vld [vmem:[%s17923_s28 + $0x122] sm:$0xff]  ;;  %v8461_v11 = vld [vmem:[%s17923_s28 + $0x494] sm:$0xff] }
 0x2b7   : > { %15228 = vmatmul.mubr.msk.bf16.gmra.mrb[164].mxu1 %vm716_vm1, %v453_v21  ;;  %v8544_v21 = vpack.c.bf16 %v8423_v19, %v8422_v43  ;;  %v2717_v43 = vld [vmem:[%s17923_s28 + $0x12a] sm:$0xff] }
 0x2b8   : > { %16010 = vmatmul.mubr.msk.bf16.gmra.mrb[76].mxu0 %vm716_vm1, %v8534_v4  ;;  %15231 = vmatprep.mubr.msk.bf16.mxu1 %vm716_vm1, %v454_v46  ;;  %v2859_v4 = vpack.c.bf16 %v2697_v16, %v2696_v29  ;;  %v2699_v46 = vld [vmem:[%s17923_s28 + $0x9a] sm:$0xff]  ;;  %v8444_v19 = vld [vmem:[%s17923_s28 + $0x40c] sm:$0xff]  ;;  %v2869_v10 = vpack.c.bf16 %v2717_v43, %v2716_v3 }
 0x2b9   : > { %16013 = vmatprep.mubr.msk.bf16.mxu0 %vm716_vm1, %v8535_v25  ;;  %v8426_v25 = vld [vmem:[%s17923_s28 + $0x37c] sm:$0xff]  ;;  %v2860_v0 = vpack.c.bf16 %v2699_v46, %v2698_v41  ;;  %v8445_v29 = vld [vmem:[%s17923_s28 + $0x414] sm:$0xff]  ;;  %v8447_v41 = vld [vmem:[%s17923_s28 + $0x424] sm:$0xff] }
 0x2ba   : > { %v8546_v47 = vpack.c.bf16 %v8427_v22, %v8426_v25  ;;  %v2720_v46 = vld [vmem:[%s17923_s28 + $0x142] sm:$0xff]  ;;  %v2721_v25 = vld [vmem:[%s17923_s28 + $0x14a] sm:$0xff]  ;;  %v8465_v3 = vld [vmem:[%s17923_s28 + $0x4b4] sm:$0xff] }
 0x2bb   : > { %v8448_v22 = vld [vmem:[%s17923_s28 + $0x42c] sm:$0xff] }
 0x2bf   : > { %15232 = vmatmul.mubr.msk.bf16.gmra.mrb[168].mxu1 %vm716_vm1, %v455_v39  ;;  %v2861_v39 = vpack.c.bf16 %v2701_v34, %v2700_v33  ;;  %v8449_v33 = vld [vmem:[%s17923_s28 + $0x434] sm:$0xff] }
 0x2c0   : > { %16014 = vmatmul.mubr.msk.bf16.gmra.mrb[80].mxu0 %vm716_vm1, %v8536_v40  ;;  %15237 = vmatprep.mubr.msk.bf16.mxu1 %vm716_vm1, %v2851_v51  ;;  %v8547_v40 = vpack.c.bf16 %v8429_v55, %v8428_v26  ;;  %v2702_v51 = vld [vmem:[%s17923_s28 + $0xb2] sm:$0xff]  ;;  %v2871_v55 = vpack.c.bf16 %v2721_v25, %v2720_v46 }
 0x2c1   : > { %16017 = vmatprep.mubr.msk.bf16.mxu0 %vm716_vm1, %v8537_v53  ;;  %v2703_v53 = vld [vmem:[%s17923_s28 + $0xba] sm:$0xff] }
 0x2c2   : > { %v2862_v7 = vpack.c.bf16 %v2703_v53, %v2702_v51  ;;  %v8451_v51 = vld [vmem:[%s17923_s28 + $0x444] sm:$0xff]  ;;  %v8469_v46 = vld [vmem:[%s17923_s28 + $0x4d4] sm:$0xff] }
 0x2c3   : > { %v2724_v53 = vld [vmem:[%s17923_s28 + $0x162] sm:$0xff] }
 0x2c7   : > { %15238 = vmatmul.mubr.msk.bf16.vlgmr.msra.gmra.mrb[0].mxu1 %vm716_vm1, %v2852_v15  ;;  %v2863_v15 = vpack.c.bf16 %v2705_v32, %v2704_v31  ;;  %v8453_v31 = vld [vmem:[%s17923_s28 + $0x454] sm:$0xff] }
 0x2c8   : > { %16018 = vmatmul.mubr.msk.bf16.gmra.mrb[84].mxu0 %vm716_vm1, %v8538_v63  ;;  %15241 = vmatprep.mubr.msk.bf16.mxu1 %vm716_vm1, %v2853_v2  ;;  %v8549_v63 = vpack.c.bf16 %v8433_v59, %v8432_v58  ;;  %v2706_v2 = vld [vmem:[%s17923_s28 + $0xd2] sm:$0xff]  ;;  %v2873_v59 = vpack.c.bf16 %v2725_v52, %v2724_v53 }
 0x2c9   : > { %16021 = vmatprep.mubr.msk.bf16.mxu0 %vm716_vm1, %v8539_v1  ;;  %15410 = vmatpush3.bf16.msra.mxu1 %v4609_v13  ;;  %v2707_v1 = vld [vmem:[%s17923_s28 + $0xda] sm:$0xff] }
 0x2ca   : > { %17835 = vmatprep.subr.msk.bf16.mxu1 %vm975_vm0, %v17850_v20  ;;  %v8434_v13 = vld [vmem:[%s17923_s28 + $0x3bc] sm:$0xff]  ;;  %v2864_v12 = vpack.c.bf16 %v2707_v1, %v2706_v2  ;;  %v2865_v20 = vpack.c.bf16 %v2709_v28, %v2708_v27  ;;  %v8455_v2 = vld [vmem:[%s17923_s28 + $0x464] sm:$0xff]  ;;  %v8457_v27 = vld [vmem:[%s17923_s28 + $0x474] sm:$0xff] }
 0x2cb   : > { %v8550_v45 = vpack.c.bf16 %v8435_v14, %v8434_v13  ;;  %v2728_v1 = vld [vmem:[%s17923_s28 + $0x182] sm:$0xff]  ;;  %v2729_v13 = vld [vmem:[%s17923_s28 + $0x18a] sm:$0xff]  ;;  %v8473_v53 = vld [vmem:[%s17923_s28 + $0x4f4] sm:$0xff] }
 0x2cc   : > { %v8456_v14 = vld [vmem:[%s17923_s28 + $0x46c] sm:$0xff] }
 0x2cf   : > { %15242 = vmatmul.mubr.msk.bf16.gmra.mrb[4].mxu1 %vm716_vm1, %v2854_v37  ;;  %v8551_v37 = vpack.c.bf16 %v8437_v44, %v8436_v36  ;;  %v2875_v44 = vpack.c.bf16 %v2729_v13, %v2728_v1  ;;  %v8477_v1 = vld [vmem:[%s17923_s28 + $0x514] sm:$0xff] }
 0x2d0   : > { %16022 = vmatmul.mubr.msk.bf16.gmra.mrb[88].mxu0 %vm716_vm1, %v8540_v38  ;;  %15245 = vmatprep.mubr.msk.bf16.mxu1 %vm716_vm1, %v2855_v62  ;;  %v2710_v38 = vld [vmem:[%s17923_s28 + $0xf2] sm:$0xff]  ;;  %v2711_v62 = vld [vmem:[%s17923_s28 + $0xfa] sm:$0xff] }
 0x2d1   : > { %16025 = vmatprep.mubr.msk.bf16.mxu0 %vm716_vm1, %v8541_v42  ;;  %v8438_v42 = vld [vmem:[%s17923_s28 + $0x3dc] sm:$0xff]  ;;  %v2866_v57 = vpack.c.bf16 %v2711_v62, %v2710_v38  ;;  %v8459_v38 = vld [vmem:[%s17923_s28 + $0x484] sm:$0xff] }
 0x2d2   : > { %v8552_v30 = vpack.c.bf16 %v8439_v54, %v8438_v42  ;;  %v2732_v62 = vld [vmem:[%s17923_s28 + $0x1a2] sm:$0xff]  ;;  %v2733_v42 = vld [vmem:[%s17923_s28 + $0x1aa] sm:$0xff] }
 0x2d3   : > { %v8460_v54 = vld [vmem:[%s17923_s28 + $0x48c] sm:$0xff] }
 0x2d7   : > { %15246 = vmatmul.mubr.msk.bf16.gmra.mrb[8].mxu1 %vm716_vm1, %v2856_v60  ;;  %v8553_v60 = vpack.c.bf16 %v8441_v56, %v8440_v49  ;;  %v2877_v56 = vpack.c.bf16 %v2733_v42, %v2732_v62  ;;  %v8481_v62 = vld [vmem:[%s17923_s28 + $0x534] sm:$0xff] }
 0x2d8   : > { %16026 = vmatmul.mubr.msk.bf16.gmra.mrb[92].mxu0 %vm716_vm1, %v8542_v61  ;;  %15249 = vmatprep.mubr.msk.bf16.mxu1 %vm716_vm1, %v2857_v5  ;;  %v2714_v61 = vld [vmem:[%s17923_s28 + $0x112] sm:$0xff]  ;;  %v2715_v5 = vld [vmem:[%s17923_s28 + $0x11a] sm:$0xff] }
 0x2d9   : > { %16029 = vmatprep.mubr.msk.bf16.mxu0 %vm716_vm1, %v8543_v6  ;;  %v8442_v6 = vld [vmem:[%s17923_s28 + $0x3fc] sm:$0xff]  ;;  %v2868_v16 = vpack.c.bf16 %v2715_v5, %v2714_v61  ;;  %v8463_v61 = vld [vmem:[%s17923_s28 + $0x4a4] sm:$0xff] }
 0x2da   : > { %v8554_v9 = vpack.c.bf16 %v8443_v18, %v8442_v6  ;;  %v2736_v5 = vld [vmem:[%s17923_s28 + $0x1c2] sm:$0xff]  ;;  %v2737_v6 = vld [vmem:[%s17923_s28 + $0x1ca] sm:$0xff] }
 0x2db   : > { %v8464_v18 = vld [vmem:[%s17923_s28 + $0x4ac] sm:$0xff] }
 0x2df   : > { %15250 = vmatmul.mubr.msk.bf16.gmra.mrb[12].mxu1 %vm716_vm1, %v2858_v17  ;;  %v8555_v17 = vpack.c.bf16 %v8445_v29, %v8444_v19  ;;  %v2879_v29 = vpack.c.bf16 %v2737_v6, %v2736_v5  ;;  %v8485_v5 = vld [vmem:[%s17923_s28 + $0x554] sm:$0xff] }
 0x2e0   : > { %16030 = vmatmul.mubr.msk.bf16.gmra.mrb[96].mxu0 %vm716_vm1, %v8544_v21  ;;  %15253 = vmatprep.mubr.msk.bf16.mxu1 %vm716_vm1, %v2859_v4  ;;  %v2718_v21 = vld [vmem:[%s17923_s28 + $0x132] sm:$0xff]  ;;  %v2719_v4 = vld [vmem:[%s17923_s28 + $0x13a] sm:$0xff] }
 0x2e1   : > { %16033 = vmatprep.mubr.msk.bf16.mxu0 %vm716_vm1, %v8545_v23  ;;  %v8446_v23 = vld [vmem:[%s17923_s28 + $0x41c] sm:$0xff]  ;;  %v2870_v34 = vpack.c.bf16 %v2719_v4, %v2718_v21  ;;  %v8467_v21 = vld [vmem:[%s17923_s28 + $0x4c4] sm:$0xff] }
 0x2e2   : > { %v8556_v26 = vpack.c.bf16 %v8447_v41, %v8446_v23  ;;  %v2740_v4 = vld [vmem:[%s17923_s28 + $0x1e2] sm:$0xff]  ;;  %v2741_v23 = vld [vmem:[%s17923_s28 + $0x1ea] sm:$0xff] }
 0x2e3   : > { %v8468_v41 = vld [vmem:[%s17923_s28 + $0x4cc] sm:$0xff] }
 0x2e7   : > { %15254 = vmatmul.mubr.msk.bf16.gmra.mrb[16].mxu1 %vm716_vm1, %v2860_v0  ;;  %v8557_v0 = vpack.c.bf16 %v8449_v33, %v8448_v22  ;;  %v2881_v33 = vpack.c.bf16 %v2741_v23, %v2740_v4  ;;  %v8489_v4 = vld [vmem:[%s17923_s28 + $0x574] sm:$0xff] }
 0x2e8   : > { %16034 = vmatmul.mubr.msk.bf16.gmra.mrb[100].mxu0 %vm716_vm1, %v8546_v47  ;;  %15257 = vmatprep.mubr.msk.bf16.mxu1 %vm716_vm1, %v2861_v39  ;;  %v2722_v47 = vld [vmem:[%s17923_s28 + $0x152] sm:$0xff]  ;;  %v2723_v39 = vld [vmem:[%s17923_s28 + $0x15a] sm:$0xff] }
 0x2e9   : > { %16037 = vmatprep.mubr.msk.bf16.mxu0 %vm716_vm1, %v8547_v40  ;;  %v8450_v40 = vld [vmem:[%s17923_s28 + $0x43c] sm:$0xff]  ;;  %v2872_v32 = vpack.c.bf16 %v2723_v39, %v2722_v47  ;;  %v8471_v47 = vld [vmem:[%s17923_s28 + $0x4e4] sm:$0xff] }
 0x2ea   : > { %v8558_v58 = vpack.c.bf16 %v8451_v51, %v8450_v40  ;;  %v2744_v39 = vld [vmem:[%s17923_s28 + $0x202] sm:$0xff]  ;;  %v2745_v40 = vld [vmem:[%s17923_s28 + $0x20a] sm:$0xff] }
 0x2eb   : > { %v8472_v51 = vld [vmem:[%s17923_s28 + $0x4ec] sm:$0xff] }
 0x2ef   : > { %15258 = vmatmul.mubr.msk.bf16.gmra.mrb[20].mxu1 %vm716_vm1, %v2862_v7  ;;  %v8559_v7 = vpack.c.bf16 %v8453_v31, %v8452_v24  ;;  %v2883_v31 = vpack.c.bf16 %v2745_v40, %v2744_v39  ;;  %v8493_v39 = vld [vmem:[%s17923_s28 + $0x594] sm:$0xff] }
 0x2f0   : > { %16038 = vmatmul.mubr.msk.bf16.gmra.mrb[104].mxu0 %vm716_vm1, %v8548_v8  ;;  %15261 = vmatprep.mubr.msk.bf16.mxu1 %vm716_vm1, %v2863_v15  ;;  %v2726_v8 = vld [vmem:[%s17923_s28 + $0x172] sm:$0xff]  ;;  %v2727_v15 = vld [vmem:[%s17923_s28 + $0x17a] sm:$0xff] }
 0x2f1   : > { %16041 = vmatprep.mubr.msk.bf16.mxu0 %vm716_vm1, %v8549_v63  ;;  %v8454_v63 = vld [vmem:[%s17923_s28 + $0x45c] sm:$0xff]  ;;  %v2874_v28 = vpack.c.bf16 %v2727_v15, %v2726_v8  ;;  %v8475_v8 = vld [vmem:[%s17923_s28 + $0x504] sm:$0xff] }
 0x2f2   : > { %v8560_v36 = vpack.c.bf16 %v8455_v2, %v8454_v63  ;;  %v2748_v15 = vld [vmem:[%s17923_s28 + $0x222] sm:$0xff]  ;;  %v2749_v63 = vld [vmem:[%s17923_s28 + $0x22a] sm:$0xff] }
 0x2f3   : > { %v8476_v2 = vld [vmem:[%s17923_s28 + $0x50c] sm:$0xff] }
 0x2f7   : > { %15262 = vmatmul.mubr.msk.bf16.gmra.mrb[24].mxu1 %vm716_vm1, %v2864_v12  ;;  %v8561_v12 = vpack.c.bf16 %v8457_v27, %v8456_v14  ;;  %v2885_v27 = vpack.c.bf16 %v2749_v63, %v2748_v15 }
 0x2f8   : > { %16042 = vmatmul.mubr.msk.bf16.gmra.mrb[108].mxu0 %vm716_vm1, %v8550_v45  ;;  %15265 = vmatprep.mubr.msk.bf16.mxu1 %vm716_vm1, %v2865_v20  ;;  %v2730_v45 = vld [vmem:[%s17923_s28 + $0x192] sm:$0xff]  ;;  %v2731_v20 = vld [vmem:[%s17923_s28 + $0x19a] sm:$0xff] }
 0x2f9   : > { %16045 = vmatprep.mubr.msk.bf16.mxu0 %vm716_vm1, %v8551_v37  ;;  %v8458_v37 = vld [vmem:[%s17923_s28 + $0x47c] sm:$0xff]  ;;  %v2876_v48 = vpack.c.bf16 %v2731_v20, %v2730_v45  ;;  %v8479_v45 = vld [vmem:[%s17923_s28 + $0x524] sm:$0xff] }
 0x2fa   : > { %v8562_v49 = vpack.c.bf16 %v8459_v38, %v8458_v37  ;;  %v2752_v20 = vld [vmem:[%s17923_s28 + $0x242] sm:$0xff]  ;;  %v2753_v37 = vld [vmem:[%s17923_s28 + $0x24a] sm:$0xff] }
 0x2fb   : > { %v8480_v38 = vld [vmem:[%s17923_s28 + $0x52c] sm:$0xff] }
 0x2ff   : > { %15266 = vmatmul.mubr.msk.bf16.gmra.mrb[28].mxu1 %vm716_vm1, %v2866_v57  ;;  %v8563_v57 = vpack.c.bf16 %v8461_v11, %v8460_v54  ;;  %v2887_v11 = vpack.c.bf16 %v2753_v37, %v2752_v20 }
 0x300   : > { %16046 = vmatmul.mubr.msk.bf16.gmra.mrb[112].mxu0 %vm716_vm1, %v8552_v30  ;;  %15269 = vmatprep.mubr.msk.bf16.mxu1 %vm716_vm1, %v2867_v50  ;;  %v2734_v30 = vld [vmem:[%s17923_s28 + $0x1b2] sm:$0xff]  ;;  %v2735_v50 = vld [vmem:[%s17923_s28 + $0x1ba] sm:$0xff] }
 0x301   : > { %16049 = vmatprep.mubr.msk.bf16.mxu0 %vm716_vm1, %v8553_v60  ;;  %v8462_v60 = vld [vmem:[%s17923_s28 + $0x49c] sm:$0xff]  ;;  %v2878_v43 = vpack.c.bf16 %v2735_v50, %v2734_v30  ;;  %v8483_v30 = vld [vmem:[%s17923_s28 + $0x544] sm:$0xff] }
 0x302   : > { %v8564_v19 = vpack.c.bf16 %v8463_v61, %v8462_v60  ;;  %v2756_v50 = vld [vmem:[%s17923_s28 + $0x262] sm:$0xff]  ;;  %v2757_v60 = vld [vmem:[%s17923_s28 + $0x26a] sm:$0xff] }
 0x303   : > { %v8484_v61 = vld [vmem:[%s17923_s28 + $0x54c] sm:$0xff] }
 0x307   : > { %15270 = vmatmul.mubr.msk.bf16.gmra.mrb[32].mxu1 %vm716_vm1, %v2868_v16  ;;  %v8565_v16 = vpack.c.bf16 %v8465_v3, %v8464_v18  ;;  %v2889_v3 = vpack.c.bf16 %v2757_v60, %v2756_v50 }
 0x308   : > { %16050 = vmatmul.mubr.msk.bf16.gmra.mrb[116].mxu0 %vm716_vm1, %v8554_v9  ;;  %15273 = vmatprep.mubr.msk.bf16.mxu1 %vm716_vm1, %v2869_v10  ;;  %v2738_v9 = vld [vmem:[%s17923_s28 + $0x1d2] sm:$0xff]  ;;  %v2739_v10 = vld [vmem:[%s17923_s28 + $0x1da] sm:$0xff] }
 0x309   : > { %16053 = vmatprep.mubr.msk.bf16.mxu0 %vm716_vm1, %v8555_v17  ;;  %v8466_v17 = vld [vmem:[%s17923_s28 + $0x4bc] sm:$0xff]  ;;  %v2880_v25 = vpack.c.bf16 %v2739_v10, %v2738_v9  ;;  %v8487_v9 = vld [vmem:[%s17923_s28 + $0x564] sm:$0xff] }
 0x30a   : > { %v8566_v22 = vpack.c.bf16 %v8467_v21, %v8466_v17  ;;  %v2760_v10 = vld [vmem:[%s17923_s28 + $0x282] sm:$0xff]  ;;  %v2761_v17 = vld [vmem:[%s17923_s28 + $0x28a] sm:$0xff] }
 0x30b   : > { %v8488_v21 = vld [vmem:[%s17923_s28 + $0x56c] sm:$0xff] }
 0x30f   : > { %15274 = vmatmul.mubr.msk.bf16.gmra.mrb[36].mxu1 %vm716_vm1, %v2870_v34  ;;  %v8567_v34 = vpack.c.bf16 %v8469_v46, %v8468_v41  ;;  %v2891_v46 = vpack.c.bf16 %v2761_v17, %v2760_v10 }
 0x310   : > { %16054 = vmatmul.mubr.msk.bf16.gmra.mrb[120].mxu0 %vm716_vm1, %v8556_v26  ;;  %15277 = vmatprep.mubr.msk.bf16.mxu1 %vm716_vm1, %v2871_v55  ;;  %v2742_v26 = vld [vmem:[%s17923_s28 + $0x1f2] sm:$0xff]  ;;  %v2743_v55 = vld [vmem:[%s17923_s28 + $0x1fa] sm:$0xff] }
 0x311   : > { %16057 = vmatprep.mubr.msk.bf16.mxu0 %vm716_vm1, %v8557_v0  ;;  %v8470_v0 = vld [vmem:[%s17923_s28 + $0x4dc] sm:$0xff]  ;;  %v2882_v52 = vpack.c.bf16 %v2743_v55, %v2742_v26  ;;  %v8491_v26 = vld [vmem:[%s17923_s28 + $0x584] sm:$0xff] }
 0x312   : > { %v8568_v24 = vpack.c.bf16 %v8471_v47, %v8470_v0  ;;  %v2764_v55 = vld [vmem:[%s17923_s28 + $0x2a2] sm:$0xff]  ;;  %v2765_v0 = vld [vmem:[%s17923_s28 + $0x2aa] sm:$0xff] }
 0x313   : > { %v8492_v47 = vld [vmem:[%s17923_s28 + $0x58c] sm:$0xff] }
 0x317   : > { %15278 = vmatmul.mubr.msk.bf16.gmra.mrb[40].mxu1 %vm716_vm1, %v2872_v32  ;;  %v8569_v32 = vpack.c.bf16 %v8473_v53, %v8472_v51  ;;  %v2893_v53 = vpack.c.bf16 %v2765_v0, %v2764_v55 }
 0x318   : > { %16058 = vmatmul.mubr.msk.bf16.gmra.mrb[124].mxu0 %vm716_vm1, %v8558_v58  ;;  %15281 = vmatprep.mubr.msk.bf16.mxu1 %vm716_vm1, %v2873_v59  ;;  %v2746_v58 = vld [vmem:[%s17923_s28 + $0x212] sm:$0xff]  ;;  %v2747_v59 = vld [vmem:[%s17923_s28 + $0x21a] sm:$0xff] }
 0x319   : > { %16061 = vmatprep.mubr.msk.bf16.mxu0 %vm716_vm1, %v8559_v7  ;;  %v8474_v7 = vld [vmem:[%s17923_s28 + $0x4fc] sm:$0xff]  ;;  %v2884_v13 = vpack.c.bf16 %v2747_v59, %v2746_v58  ;;  %v2769_v59 = vld [vmem:[%s17923_s28 + $0x2ca] sm:$0xff] }
 0x31a   : > { %v8570_v14 = vpack.c.bf16 %v8475_v8, %v8474_v7  ;;  %v2768_v58 = vld [vmem:[%s17923_s28 + $0x2c2] sm:$0xff]  ;;  %v9735_v7 = vld [vmem:[%s17923_s28 + $0x4d] sm:$0xff]  ;;  %v9736_v8 = vld [vmem:[%s17923_s28 + $0x55] sm:$0xff] }
 0x31f   : > { %15282 = vmatmul.mubr.msk.bf16.gmra.mrb[44].mxu1 %vm716_vm1, %v2874_v28  ;;  %v8571_v28 = vpack.c.bf16 %v8477_v1, %v8476_v2  ;;  %v2895_v2 = vpack.c.bf16 %v2769_v59, %v2768_v58  ;;  %v9906_v1 = vpack.c.bf16 %v9736_v8, %v9735_v7  ;;  %v9756_v58 = vld [vmem:[%s17923_s28 + $0xf5] sm:$0xff] }
 0x320   : > { %16062 = vmatmul.mubr.msk.bf16.gmra.mrb[128].mxu0 %vm716_vm1, %v8560_v36  ;;  %15285 = vmatprep.mubr.msk.bf16.mxu1 %vm716_vm1, %v2875_v44  ;;  %v2750_v36 = vld [vmem:[%s17923_s28 + $0x232] sm:$0xff]  ;;  %v2751_v44 = vld [vmem:[%s17923_s28 + $0x23a] sm:$0xff] }
 0x321   : > { %16065 = vmatprep.mubr.msk.bf16.mxu0 %vm716_vm1, %v8561_v12  ;;  %v8478_v12 = vld [vmem:[%s17923_s28 + $0x51c] sm:$0xff]  ;;  %v2886_v42 = vpack.c.bf16 %v2751_v44, %v2750_v36  ;;  %v2773_v44 = vld [vmem:[%s17923_s28 + $0x2ea] sm:$0xff] }
 0x322   : > { %v8572_v54 = vpack.c.bf16 %v8479_v45, %v8478_v12  ;;  %v2772_v36 = vld [vmem:[%s17923_s28 + $0x2e2] sm:$0xff]  ;;  %v9739_v12 = vld [vmem:[%s17923_s28 + $0x6d] sm:$0xff]  ;;  %v9740_v45 = vld [vmem:[%s17923_s28 + $0x75] sm:$0xff] }
 0x327   : > { %15286 = vmatmul.mubr.msk.bf16.gmra.mrb[48].mxu1 %vm716_vm1, %v2876_v48  ;;  %v8573_v48 = vpack.c.bf16 %v8481_v62, %v8480_v38  ;;  %v2897_v38 = vpack.c.bf16 %v2773_v44, %v2772_v36  ;;  %v9908_v62 = vpack.c.bf16 %v9740_v45, %v9739_v12  ;;  %v9760_v36 = vld [vmem:[%s17923_s28 + $0x115] sm:$0xff] }
 0x328   : > { %16066 = vmatmul.mubr.msk.bf16.gmra.mrb[132].mxu0 %vm716_vm1, %v8562_v49  ;;  %15289 = vmatprep.mubr.msk.bf16.mxu1 %vm716_vm1, %v2877_v56  ;;  %v2754_v49 = vld [vmem:[%s17923_s28 + $0x252] sm:$0xff]  ;;  %v2755_v56 = vld [vmem:[%s17923_s28 + $0x25a] sm:$0xff] }
 0x329   : > { %16069 = vmatprep.mubr.msk.bf16.mxu0 %vm716_vm1, %v8563_v57  ;;  %v8482_v57 = vld [vmem:[%s17923_s28 + $0x53c] sm:$0xff]  ;;  %v2888_v6 = vpack.c.bf16 %v2755_v56, %v2754_v49  ;;  %v9742_v49 = vld [vmem:[%s17923_s28 + $0x85] sm:$0xff] }
 0x32a   : > { %v8574_v18 = vpack.c.bf16 %v8483_v30, %v8482_v57  ;;  %v2776_v56 = vld [vmem:[%s17923_s28 + $0x302] sm:$0xff]  ;;  %v9743_v57 = vld [vmem:[%s17923_s28 + $0x8d] sm:$0xff]  ;;  %v9744_v30 = vld [vmem:[%s17923_s28 + $0x95] sm:$0xff] }
 0x32f   : > { %15290 = vmatmul.mubr.msk.bf16.gmra.mrb[52].mxu1 %vm716_vm1, %v2878_v43  ;;  %v8575_v43 = vpack.c.bf16 %v8485_v5, %v8484_v61  ;;  %v9910_v5 = vpack.c.bf16 %v9744_v30, %v9743_v57 }
 0x330   : > { %16070 = vmatmul.mubr.msk.bf16.gmra.mrb[136].mxu0 %vm716_vm1, %v8564_v19  ;;  %15293 = vmatprep.mubr.msk.bf16.mxu1 %vm716_vm1, %v2879_v29  ;;  %v2758_v19 = vld [vmem:[%s17923_s28 + $0x272] sm:$0xff]  ;;  %v2759_v29 = vld [vmem:[%s17923_s28 + $0x27a] sm:$0xff] }
 0x331   : > { %16073 = vmatprep.mubr.msk.bf16.mxu0 %vm716_vm1, %v8565_v16  ;;  %v8486_v16 = vld [vmem:[%s17923_s28 + $0x55c] sm:$0xff]  ;;  %v2890_v23 = vpack.c.bf16 %v2759_v29, %v2758_v19  ;;  %v2781_v29 = vld [vmem:[%s17923_s28 + $0x32a] sm:$0xff] }
 0x332   : > { %v8576_v41 = vpack.c.bf16 %v8487_v9, %v8486_v16  ;;  %v2780_v19 = vld [vmem:[%s17923_s28 + $0x322] sm:$0xff]  ;;  %v9747_v16 = vld [vmem:[%s17923_s28 + $0xad] sm:$0xff]  ;;  %v9748_v9 = vld [vmem:[%s17923_s28 + $0xb5] sm:$0xff] }
 0x337   : > { %15294 = vmatmul.mubr.msk.bf16.gmra.mrb[56].mxu1 %vm716_vm1, %v2880_v25  ;;  %v8577_v25 = vpack.c.bf16 %v8489_v4, %v8488_v21  ;;  %v2901_v21 = vpack.c.bf16 %v2781_v29, %v2780_v19  ;;  %v9912_v4 = vpack.c.bf16 %v9748_v9, %v9747_v16 }
 0x338   : > { %16074 = vmatmul.mubr.msk.bf16.gmra.mrb[140].mxu0 %vm716_vm1, %v8566_v22  ;;  %15297 = vmatprep.mubr.msk.bf16.mxu1 %vm716_vm1, %v2881_v33  ;;  %v2762_v22 = vld [vmem:[%s17923_s28 + $0x292] sm:$0xff]  ;;  %v2763_v33 = vld [vmem:[%s17923_s28 + $0x29a] sm:$0xff] }
 0x339   : > { %16077 = vmatprep.mubr.msk.bf16.mxu0 %vm716_vm1, %v8567_v34  ;;  %v8490_v34 = vld [vmem:[%s17923_s28 + $0x57c] sm:$0xff]  ;;  %v2892_v40 = vpack.c.bf16 %v2763_v33, %v2762_v22  ;;  %v2785_v33 = vld [vmem:[%s17923_s28 + $0x34a] sm:$0xff] }
 0x33a   : > { %v8578_v51 = vpack.c.bf16 %v8491_v26, %v8490_v34  ;;  %v2784_v22 = vld [vmem:[%s17923_s28 + $0x342] sm:$0xff]  ;;  %v9751_v34 = vld [vmem:[%s17923_s28 + $0xcd] sm:$0xff]  ;;  %v9752_v26 = vld [vmem:[%s17923_s28 + $0xd5] sm:$0xff] }
 0x33f   : > { %15298 = vmatmul.mubr.msk.bf16.gmra.mrb[60].mxu1 %vm716_vm1, %v2882_v52  ;;  %v8579_v52 = vpack.c.bf16 %v8493_v39, %v8492_v47  ;;  %v2903_v47 = vpack.c.bf16 %v2785_v33, %v2784_v22  ;;  %v9914_v39 = vpack.c.bf16 %v9752_v26, %v9751_v34 }
 0x340   : > { %16078 = vmatmul.mubr.msk.bf16.gmra.mrb[144].mxu0 %vm716_vm1, %v8568_v24  ;;  %15301 = vmatprep.mubr.msk.bf16.mxu1 %vm716_vm1, %v2883_v31  ;;  %v2766_v24 = vld [vmem:[%s17923_s28 + $0x2b2] sm:$0xff]  ;;  %v2767_v31 = vld [vmem:[%s17923_s28 + $0x2ba] sm:$0xff] }
 0x341   : > { %16081 = vmatprep.mubr.msk.bf16.mxu0 %vm716_vm1, %v8569_v32  ;;  %v8494_v32 = vld [vmem:[%s17923_s28 + $0x59c] sm:$0xff]  ;;  %v2894_v15 = vpack.c.bf16 %v2767_v31, %v2766_v24  ;;  %v2789_v31 = vld [vmem:[%s17923_s28 + $0x36a] sm:$0xff] }
 0x342   : > { %v8580_v63 = vpack.c.bf16 %v8494_v32, %v8494_v32  ;;  %v2788_v24 = vld [vmem:[%s17923_s28 + $0x362] sm:$0xff]  ;;  %v9755_v32 = vld [vmem:[%s17923_s28 + $0xed] sm:$0xff] }
 0x343   : > { %v2905_v8 = vpack.c.bf16 %v2789_v31, %v2788_v24 }
 0x347   : > { %15302 = vmatmul.mubr.msk.bf16.gmra.mrb[64].mxu1 %vm716_vm1, %v2884_v13  ;;  %v2770_v13 = vld [vmem:[%s17923_s28 + $0x2d2] sm:$0xff] }
 0x348   : > { %16082 = vmatmul.mubr.msk.bf16.gmra.mrb[148].mxu0 %vm716_vm1, %v8570_v14  ;;  %15305 = vmatprep.mubr.msk.bf16.mxu1 %vm716_vm1, %v2885_v27  ;;  %v2771_v14 = vld [vmem:[%s17923_s28 + $0x2da] sm:$0xff] }
 0x349   : > { %16085 = vmatprep.mubr.msk.bf16.mxu0 %vm716_vm1, %v8571_v28  ;;  %v9737_v27 = vld [vmem:[%s17923_s28 + $0x5d] sm:$0xff]  ;;  %v9738_v28 = vld [vmem:[%s17923_s28 + $0x65] sm:$0xff]  ;;  %v2896_v20 = vpack.c.bf16 %v2771_v14, %v2770_v13 }
 0x34a   : > { %v9907_v37 = vpack.c.bf16 %v9738_v28, %v9737_v27  ;;  %v9758_v13 = vld [vmem:[%s17923_s28 + $0x105] sm:$0xff]  ;;  %v9759_v28 = vld [vmem:[%s17923_s28 + $0x10d] sm:$0xff] }
 0x34b   : > { %v2792_v14 = vld [vmem:[%s17923_s28 + $0x382] sm:$0xff]  ;;  %v2793_v27 = vld [vmem:[%s17923_s28 + $0x38a] sm:$0xff] }
 0x34c   : > { %v2907_v45 = vpack.c.bf16 %v2793_v27, %v2792_v14 }
 0x34f   : > { %15306 = vmatmul.mubr.msk.bf16.gmra.mrb[68].mxu1 %vm716_vm1, %v2886_v42  ;;  %v11664_v42 = vsel %vm975_vm0, %v19582_v35, 0  ;;  %v2777_v35 = vld [vmem:[%s17923_s28 + $0x30a] sm:$0xff] }
 0x350   : > { %16086 = vmatmul.mubr.msk.bf16.gmra.mrb[152].mxu0 %vm716_vm1, %v8572_v54  ;;  %15309 = vmatprep.mubr.msk.bf16.mxu1 %vm716_vm1, %v2887_v11  ;;  %v2774_v54 = vld [vmem:[%s17923_s28 + $0x2f2] sm:$0xff]  ;;  %v2775_v11 = vld [vmem:[%s17923_s28 + $0x2fa] sm:$0xff]  ;;  %v2899_v61 = vpack.c.bf16 %v2777_v35, %v2776_v56 }
 0x351   : > { %16089 = vmatprep.mubr.msk.bf16.mxu0 %vm716_vm1, %v8573_v48  ;;  %v9741_v48 = vld [vmem:[%s17923_s28 + $0x7d] sm:$0xff]  ;;  %v2898_v50 = vpack.c.bf16 %v2775_v11, %v2774_v54  ;;  %v2797_v11 = vld [vmem:[%s17923_s28 + $0x3aa] sm:$0xff] }
 0x352   : > { %v9909_v60 = vpack.c.bf16 %v9742_v49, %v9741_v48  ;;  %v2796_v54 = vld [vmem:[%s17923_s28 + $0x3a2] sm:$0xff]  ;;  %v9763_v48 = vld [vmem:[%s17923_s28 + $0x12d] sm:$0xff]  ;;  %v9764_v49 = vld [vmem:[%s17923_s28 + $0x135] sm:$0xff] }
 0x353   : > { %v2909_v57 = vpack.c.bf16 %v2797_v11, %v2796_v54  ;;  %v9920_v30 = vpack.c.bf16 %v9764_v49, %v9763_v48 }
 0x357   : > { %15310 = vmatmul.mubr.msk.bf16.gmra.mrb[72].mxu1 %vm716_vm1, %v2888_v6  ;;  %v2778_v6 = vld [vmem:[%s17923_s28 + $0x312] sm:$0xff] }
 0x358   : > { %16090 = vmatmul.mubr.msk.bf16.gmra.mrb[156].mxu0 %vm716_vm1, %v8574_v18  ;;  %15313 = vmatprep.mubr.msk.bf16.mxu1 %vm716_vm1, %v2889_v3  ;;  %v2779_v18 = vld [vmem:[%s17923_s28 + $0x31a] sm:$0xff] }
 0x359   : > { %16093 = vmatprep.mubr.msk.bf16.mxu0 %vm716_vm1, %v8575_v43  ;;  %v9745_v3 = vld [vmem:[%s17923_s28 + $0x9d] sm:$0xff]  ;;  %v9746_v43 = vld [vmem:[%s17923_s28 + $0xa5] sm:$0xff]  ;;  %v2900_v10 = vpack.c.bf16 %v2779_v18, %v2778_v6 }
 0x35a   : > { %v9911_v17 = vpack.c.bf16 %v9746_v43, %v9745_v3  ;;  %v2800_v6 = vld [vmem:[%s17923_s28 + $0x3c2] sm:$0xff]  ;;  %v2801_v18 = vld [vmem:[%s17923_s28 + $0x3ca] sm:$0xff]  ;;  %v9768_v43 = vld [vmem:[%s17923_s28 + $0x155] sm:$0xff] }
 0x35b   : > { %v9767_v3 = vld [vmem:[%s17923_s28 + $0x14d] sm:$0xff]  ;;  %v2911_v16 = vpack.c.bf16 %v2801_v18, %v2800_v6 }
 0x35c   : > { %v9922_v9 = vpack.c.bf16 %v9768_v43, %v9767_v3 }
 0x35f   : > { %15314 = vmatmul.mubr.msk.bf16.gmra.mrb[76].mxu1 %vm716_vm1, %v2890_v23  ;;  %v2782_v23 = vld [vmem:[%s17923_s28 + $0x332] sm:$0xff] }
 0x360   : > { %16094 = vmatmul.mubr.msk.bf16.gmra.mrb[160].mxu0 %vm716_vm1, %v8576_v41  ;;  %15317 = vmatprep.mubr.msk.bf16.mxu1 %vm716_vm1, %v2891_v46  ;;  %v2783_v41 = vld [vmem:[%s17923_s28 + $0x33a] sm:$0xff] }
 0x361   : > { %16097 = vmatprep.mubr.msk.bf16.mxu0 %vm716_vm1, %v8577_v25  ;;  %v9749_v46 = vld [vmem:[%s17923_s28 + $0xbd] sm:$0xff]  ;;  %v9750_v25 = vld [vmem:[%s17923_s28 + $0xc5] sm:$0xff]  ;;  %v2902_v55 = vpack.c.bf16 %v2783_v41, %v2782_v23 }
 0x362   : > { %v9913_v0 = vpack.c.bf16 %v9750_v25, %v9749_v46  ;;  %v2804_v23 = vld [vmem:[%s17923_s28 + $0x3e2] sm:$0xff]  ;;  %v2805_v41 = vld [vmem:[%s17923_s28 + $0x3ea] sm:$0xff]  ;;  %v9772_v25 = vld [vmem:[%s17923_s28 + $0x175] sm:$0xff] }
 0x363   : > { %v9771_v46 = vld [vmem:[%s17923_s28 + $0x16d] sm:$0xff]  ;;  %v2913_v34 = vpack.c.bf16 %v2805_v41, %v2804_v23 }
 0x364   : > { %v9924_v26 = vpack.c.bf16 %v9772_v25, %v9771_v46 }
 0x367   : > { %15318 = vmatmul.mubr.msk.bf16.gmra.mrb[80].mxu1 %vm716_vm1, %v2892_v40  ;;  %v2786_v40 = vld [vmem:[%s17923_s28 + $0x352] sm:$0xff] }
 0x368   : > { %16098 = vmatmul.mubr.msk.bf16.gmra.mrb[164].mxu0 %vm716_vm1, %v8578_v51  ;;  %15321 = vmatprep.mubr.msk.bf16.mxu1 %vm716_vm1, %v2893_v53  ;;  %v2787_v51 = vld [vmem:[%s17923_s28 + $0x35a] sm:$0xff] }
 0x369   : > { %16101 = vmatprep.mubr.msk.bf16.mxu0 %vm716_vm1, %v8579_v52  ;;  %v9753_v53 = vld [vmem:[%s17923_s28 + $0xdd] sm:$0xff]  ;;  %v9754_v52 = vld [vmem:[%s17923_s28 + $0xe5] sm:$0xff]  ;;  %v2904_v59 = vpack.c.bf16 %v2787_v51, %v2786_v40 }
 0x36a   : > { %v9915_v7 = vpack.c.bf16 %v9754_v52, %v9753_v53  ;;  %v2808_v40 = vld [vmem:[%s17923_s28 + $0x402] sm:$0xff]  ;;  %v2809_v51 = vld [vmem:[%s17923_s28 + $0x40a] sm:$0xff]  ;;  %v9776_v52 = vld [vmem:[%s17923_s28 + $0x195] sm:$0xff] }
 0x36b   : > { %v9775_v53 = vld [vmem:[%s17923_s28 + $0x18d] sm:$0xff] }
 0x36f   : > { %15322 = vmatmul.mubr.msk.bf16.gmra.mrb[84].mxu1 %vm716_vm1, %v2894_v15  ;;  %v9916_v15 = vpack.c.bf16 %v9756_v58, %v9755_v32  ;;  %v2915_v32 = vpack.c.bf16 %v2809_v51, %v2808_v40  ;;  %v9926_v58 = vpack.c.bf16 %v9776_v52, %v9775_v53 }
 0x370   : > { %16102 = vmatmul.mubr.msk.bf16.gmra.mrb[168].mxu0 %vm716_vm1, %v8580_v63  ;;  %15325 = vmatprep.mubr.msk.bf16.mxu1 %vm716_vm1, %v2895_v2  ;;  %v2790_v63 = vld [vmem:[%s17923_s28 + $0x372] sm:$0xff]  ;;  %v2791_v2 = vld [vmem:[%s17923_s28 + $0x37a] sm:$0xff] }
 0x371   : > { %16107 = vmatprep.mubr.msk.bf16.mxu0 %vm716_vm1, %v9906_v1  ;;  %v9757_v1 = vld [vmem:[%s17923_s28 + $0xfd] sm:$0xff]  ;;  %v2906_v44 = vpack.c.bf16 %v2791_v2, %v2790_v63  ;;  %v2813_v2 = vld [vmem:[%s17923_s28 + $0x42a] sm:$0xff] }
 0x372   : > { %v9917_v12 = vpack.c.bf16 %v9758_v13, %v9757_v1  ;;  %v2812_v63 = vld [vmem:[%s17923_s28 + $0x422] sm:$0xff]  ;;  %v9779_v1 = vld [vmem:[%s17923_s28 + $0x1ad] sm:$0xff]  ;;  %v9780_v13 = vld [vmem:[%s17923_s28 + $0x1b5] sm:$0xff] }
 0x377   : > { %15326 = vmatmul.mubr.msk.bf16.gmra.mrb[88].mxu1 %vm716_vm1, %v2896_v20  ;;  %v9918_v20 = vpack.c.bf16 %v9760_v36, %v9759_v28  ;;  %v2917_v28 = vpack.c.bf16 %v2813_v2, %v2812_v63  ;;  %v9928_v36 = vpack.c.bf16 %v9780_v13, %v9779_v1 }
 0x378   : > { %16108 = vmatmul.mubr.msk.bf16.vlgmr.msra.gmra.mrb[0].mxu0 %vm716_vm1, %v9907_v37  ;;  %15329 = vmatprep.mubr.msk.bf16.mxu1 %vm716_vm1, %v2897_v38  ;;  %v2794_v37 = vld [vmem:[%s17923_s28 + $0x392] sm:$0xff]  ;;  %v2795_v38 = vld [vmem:[%s17923_s28 + $0x39a] sm:$0xff] }
 0x379   : > { %16280 = vmatpush3.bf16.msra.mxu0 %v11664_v42  ;;  %16111 = vmatprep.mubr.msk.bf16.mxu0 %vm716_vm1, %v9908_v62  ;;  %v9761_v62 = vld [vmem:[%s17923_s28 + $0x11d] sm:$0xff]  ;;  %v9762_v42 = vld [vmem:[%s17923_s28 + $0x125] sm:$0xff]  ;;  %v2908_v56 = vpack.c.bf16 %v2795_v38, %v2794_v37 }
 0x37a   : > { %v9919_v35 = vpack.c.bf16 %v9762_v42, %v9761_v62  ;;  %v2816_v37 = vld [vmem:[%s17923_s28 + $0x442] sm:$0xff]  ;;  %v2817_v38 = vld [vmem:[%s17923_s28 + $0x44a] sm:$0xff]  ;;  %v9784_v42 = vld [vmem:[%s17923_s28 + $0x1d5] sm:$0xff] }
 0x37b   : > { %v9783_v62 = vld [vmem:[%s17923_s28 + $0x1cd] sm:$0xff]  ;;  %v2919_v48 = vpack.c.bf16 %v2817_v38, %v2816_v37 }
 0x37c   : > { %v9930_v49 = vpack.c.bf16 %v9784_v42, %v9783_v62 }
 0x37f   : > { %15330 = vmatmul.mubr.msk.bf16.gmra.mrb[92].mxu1 %vm716_vm1, %v2898_v50  ;;  %v2798_v50 = vld [vmem:[%s17923_s28 + $0x3b2] sm:$0xff] }
 0x380   : > { %16112 = vmatmul.mubr.msk.bf16.gmra.mrb[4].mxu0 %vm716_vm1, %v9909_v60  ;;  %15333 = vmatprep.mubr.msk.bf16.mxu1 %vm716_vm1, %v2899_v61  ;;  %v2799_v60 = vld [vmem:[%s17923_s28 + $0x3ba] sm:$0xff] }
 0x381   : > { %16115 = vmatprep.mubr.msk.bf16.mxu0 %vm716_vm1, %v9910_v5  ;;  %v9765_v61 = vld [vmem:[%s17923_s28 + $0x13d] sm:$0xff]  ;;  %v9766_v5 = vld [vmem:[%s17923_s28 + $0x145] sm:$0xff]  ;;  %v2910_v19 = vpack.c.bf16 %v2799_v60, %v2798_v50 }
 0x382   : > { %v9921_v29 = vpack.c.bf16 %v9766_v5, %v9765_v61  ;;  %v2820_v50 = vld [vmem:[%s17923_s28 + $0x462] sm:$0xff]  ;;  %v2821_v60 = vld [vmem:[%s17923_s28 + $0x46a] sm:$0xff]  ;;  %v9788_v5 = vld [vmem:[%s17923_s28 + $0x1f5] sm:$0xff] }
 0x383   : > { %v9787_v61 = vld [vmem:[%s17923_s28 + $0x1ed] sm:$0xff]  ;;  %v2921_v3 = vpack.c.bf16 %v2821_v60, %v2820_v50 }
 0x384   : > { %v9932_v43 = vpack.c.bf16 %v9788_v5, %v9787_v61 }
 0x387   : > { %15334 = vmatmul.mubr.msk.bf16.gmra.mrb[96].mxu1 %vm716_vm1, %v2900_v10  ;;  %v2802_v10 = vld [vmem:[%s17923_s28 + $0x3d2] sm:$0xff] }
 0x388   : > { %16116 = vmatmul.mubr.msk.bf16.gmra.mrb[8].mxu0 %vm716_vm1, %v9911_v17  ;;  %15337 = vmatprep.mubr.msk.bf16.mxu1 %vm716_vm1, %v2901_v21  ;;  %v2803_v17 = vld [vmem:[%s17923_s28 + $0x3da] sm:$0xff] }
 0x389   : > { %16119 = vmatprep.mubr.msk.bf16.mxu0 %vm716_vm1, %v9912_v4  ;;  %v9769_v21 = vld [vmem:[%s17923_s28 + $0x15d] sm:$0xff]  ;;  %v9770_v4 = vld [vmem:[%s17923_s28 + $0x165] sm:$0xff]  ;;  %v2912_v22 = vpack.c.bf16 %v2803_v17, %v2802_v10 }
 0x38a   : > { %v9923_v33 = vpack.c.bf16 %v9770_v4, %v9769_v21  ;;  %v2824_v10 = vld [vmem:[%s17923_s28 + $0x482] sm:$0xff]  ;;  %v2825_v17 = vld [vmem:[%s17923_s28 + $0x48a] sm:$0xff]  ;;  %v9792_v4 = vld [vmem:[%s17923_s28 + $0x215] sm:$0xff] }
 0x38b   : > { %v9791_v21 = vld [vmem:[%s17923_s28 + $0x20d] sm:$0xff]  ;;  %v2923_v46 = vpack.c.bf16 %v2825_v17, %v2824_v10 }
 0x38c   : > { %v9934_v25 = vpack.c.bf16 %v9792_v4, %v9791_v21 }
 0x38f   : > { %15338 = vmatmul.mubr.msk.bf16.gmra.mrb[100].mxu1 %vm716_vm1, %v2902_v55  ;;  %v2806_v55 = vld [vmem:[%s17923_s28 + $0x3f2] sm:$0xff] }
 0x390   : > { %16120 = vmatmul.mubr.msk.bf16.gmra.mrb[12].mxu0 %vm716_vm1, %v9913_v0  ;;  %15341 = vmatprep.mubr.msk.bf16.mxu1 %vm716_vm1, %v2903_v47  ;;  %v2807_v0 = vld [vmem:[%s17923_s28 + $0x3fa] sm:$0xff] }
 0x391   : > { %16123 = vmatprep.mubr.msk.bf16.mxu0 %vm716_vm1, %v9914_v39  ;;  %v9773_v47 = vld [vmem:[%s17923_s28 + $0x17d] sm:$0xff]  ;;  %v9774_v39 = vld [vmem:[%s17923_s28 + $0x185] sm:$0xff]  ;;  %v2914_v24 = vpack.c.bf16 %v2807_v0, %v2806_v55 }
 0x392   : > { %v9925_v31 = vpack.c.bf16 %v9774_v39, %v9773_v47  ;;  %v2828_v55 = vld [vmem:[%s17923_s28 + $0x4a2] sm:$0xff]  ;;  %v2829_v0 = vld [vmem:[%s17923_s28 + $0x4aa] sm:$0xff]  ;;  %v9796_v39 = vld [vmem:[%s17923_s28 + $0x235] sm:$0xff] }
 0x393   : > { %v9795_v47 = vld [vmem:[%s17923_s28 + $0x22d] sm:$0xff]  ;;  %v2925_v53 = vpack.c.bf16 %v2829_v0, %v2828_v55 }
 0x394   : > { %v9936_v52 = vpack.c.bf16 %v9796_v39, %v9795_v47 }
 0x397   : > { %15342 = vmatmul.mubr.msk.bf16.gmra.mrb[104].mxu1 %vm716_vm1, %v2904_v59  ;;  %v2810_v59 = vld [vmem:[%s17923_s28 + $0x412] sm:$0xff] }
 0x398   : > { %16124 = vmatmul.mubr.msk.bf16.gmra.mrb[16].mxu0 %vm716_vm1, %v9915_v7  ;;  %15345 = vmatprep.mubr.msk.bf16.mxu1 %vm716_vm1, %v2905_v8  ;;  %v2811_v7 = vld [vmem:[%s17923_s28 + $0x41a] sm:$0xff] }
 0x399   : > { %16127 = vmatprep.mubr.msk.bf16.mxu0 %vm716_vm1, %v9916_v15  ;;  %v9777_v8 = vld [vmem:[%s17923_s28 + $0x19d] sm:$0xff]  ;;  %v9778_v15 = vld [vmem:[%s17923_s28 + $0x1a5] sm:$0xff]  ;;  %v2916_v14 = vpack.c.bf16 %v2811_v7, %v2810_v59 }
 0x39a   : > { %v9927_v27 = vpack.c.bf16 %v9778_v15, %v9777_v8  ;;  %v2832_v59 = vld [vmem:[%s17923_s28 + $0x4c2] sm:$0xff]  ;;  %v2833_v7 = vld [vmem:[%s17923_s28 + $0x4ca] sm:$0xff]  ;;  %v9800_v15 = vld [vmem:[%s17923_s28 + $0x255] sm:$0xff] }
 0x39b   : > { %v9799_v8 = vld [vmem:[%s17923_s28 + $0x24d] sm:$0xff]  ;;  %v2927_v1 = vpack.c.bf16 %v2833_v7, %v2832_v59 }
 0x39c   : > { %v9938_v13 = vpack.c.bf16 %v9800_v15, %v9799_v8  ;;  %v4093_v15 = vld [vmem:[%s17923_s28 + $0x36] sm:$0xff] }
 0x39f   : > { %15346 = vmatmul.mubr.msk.bf16.gmra.mrb[108].mxu1 %vm716_vm1, %v2906_v44  ;;  %v2814_v44 = vld [vmem:[%s17923_s28 + $0x432] sm:$0xff] }
 0x3a0   : > { %16128 = vmatmul.mubr.msk.bf16.gmra.mrb[20].mxu0 %vm716_vm1, %v9917_v12  ;;  %15349 = vmatprep.mubr.msk.bf16.mxu1 %vm716_vm1, %v2907_v45  ;;  %v2815_v12 = vld [vmem:[%s17923_s28 + $0x43a] sm:$0xff] }
 0x3a1   : > { %16131 = vmatprep.mubr.msk.bf16.mxu0 %vm716_vm1, %v9918_v20  ;;  %v9781_v45 = vld [vmem:[%s17923_s28 + $0x1bd] sm:$0xff]  ;;  %v9782_v20 = vld [vmem:[%s17923_s28 + $0x1c5] sm:$0xff]  ;;  %v2918_v54 = vpack.c.bf16 %v2815_v12, %v2814_v44 }
 0x3a2   : > { %v9929_v11 = vpack.c.bf16 %v9782_v20, %v9781_v45  ;;  %v2836_v44 = vld [vmem:[%s17923_s28 + $0x4e2] sm:$0xff]  ;;  %v2837_v12 = vld [vmem:[%s17923_s28 + $0x4ea] sm:$0xff]  ;;  %v9804_v20 = vld [vmem:[%s17923_s28 + $0x275] sm:$0xff] }
 0x3a3   : > { %v9803_v45 = vld [vmem:[%s17923_s28 + $0x26d] sm:$0xff]  ;;  %v2929_v62 = vpack.c.bf16 %v2837_v12, %v2836_v44 }
 0x3a4   : > { %v9940_v42 = vpack.c.bf16 %v9804_v20, %v9803_v45  ;;  %v20039_v20 = vld [vmem:[%s17923_s28 + $0x56] sm:$0xff] }
 0x3a7   : > { %15350 = vmatmul.mubr.msk.bf16.gmra.mrb[112].mxu1 %vm716_vm1, %v2908_v56  ;;  %v2818_v56 = vld [vmem:[%s17923_s28 + $0x452] sm:$0xff] }
 0x3a8   : > { %16132 = vmatmul.mubr.msk.bf16.gmra.mrb[24].mxu0 %vm716_vm1, %v9919_v35  ;;  %15353 = vmatprep.mubr.msk.bf16.mxu1 %vm716_vm1, %v2909_v57  ;;  %v2819_v35 = vld [vmem:[%s17923_s28 + $0x45a] sm:$0xff] }
 0x3a9   : > { %16135 = vmatprep.mubr.msk.bf16.mxu0 %vm716_vm1, %v9920_v30  ;;  %v9785_v57 = vld [vmem:[%s17923_s28 + $0x1dd] sm:$0xff]  ;;  %v9786_v30 = vld [vmem:[%s17923_s28 + $0x1e5] sm:$0xff]  ;;  %v2920_v6 = vpack.c.bf16 %v2819_v35, %v2818_v56 }
 0x3aa   : > { %v9931_v18 = vpack.c.bf16 %v9786_v30, %v9785_v57  ;;  %v2840_v56 = vld [vmem:[%s17923_s28 + $0x502] sm:$0xff]  ;;  %v2841_v35 = vld [vmem:[%s17923_s28 + $0x50a] sm:$0xff]  ;;  %v9808_v30 = vld [vmem:[%s17923_s28 + $0x295] sm:$0xff] }
 0x3ab   : > { %v9807_v57 = vld [vmem:[%s17923_s28 + $0x28d] sm:$0xff]  ;;  %v2931_v61 = vpack.c.bf16 %v2841_v35, %v2840_v56 }
 0x3ac   : > { %v9942_v5 = vpack.c.bf16 %v9808_v30, %v9807_v57 }
 0x3af   : > { %15354 = vmatmul.mubr.msk.bf16.gmra.mrb[116].mxu1 %vm716_vm1, %v2910_v19  ;;  %v2822_v19 = vld [vmem:[%s17923_s28 + $0x472] sm:$0xff] }
 0x3b0   : > { %16136 = vmatmul.mubr.msk.bf16.gmra.mrb[28].mxu0 %vm716_vm1, %v9921_v29  ;;  %15357 = vmatprep.mubr.msk.bf16.mxu1 %vm716_vm1, %v2911_v16  ;;  %v2823_v29 = vld [vmem:[%s17923_s28 + $0x47a] sm:$0xff] }
 0x3b1   : > { %16139 = vmatprep.mubr.msk.bf16.mxu0 %vm716_vm1, %v9922_v9  ;;  %v9789_v16 = vld [vmem:[%s17923_s28 + $0x1fd] sm:$0xff]  ;;  %v9790_v9 = vld [vmem:[%s17923_s28 + $0x205] sm:$0xff]  ;;  %v2922_v23 = vpack.c.bf16 %v2823_v29, %v2822_v19 }
 0x3b2   : > { %v9933_v41 = vpack.c.bf16 %v9790_v9, %v9789_v16  ;;  %v2844_v19 = vld [vmem:[%s17923_s28 + $0x522] sm:$0xff]  ;;  %v2845_v29 = vld [vmem:[%s17923_s28 + $0x52a] sm:$0xff]  ;;  %v9812_v9 = vld [vmem:[%s17923_s28 + $0x2b5] sm:$0xff] }
 0x3b3   : > { %v9811_v16 = vld [vmem:[%s17923_s28 + $0x2ad] sm:$0xff]  ;;  %v2933_v21 = vpack.c.bf16 %v2845_v29, %v2844_v19 }
 0x3b4   : > { %v9944_v4 = vpack.c.bf16 %v9812_v9, %v9811_v16 }
 0x3b7   : > { %15358 = vmatmul.mubr.msk.bf16.gmra.mrb[120].mxu1 %vm716_vm1, %v2912_v22  ;;  %v2826_v22 = vld [vmem:[%s17923_s28 + $0x492] sm:$0xff] }
 0x3b8   : > { %16140 = vmatmul.mubr.msk.bf16.gmra.mrb[32].mxu0 %vm716_vm1, %v9923_v33  ;;  %15361 = vmatprep.mubr.msk.bf16.mxu1 %vm716_vm1, %v2913_v34  ;;  %v2827_v33 = vld [vmem:[%s17923_s28 + $0x49a] sm:$0xff] }
 0x3b9   : > { %16143 = vmatprep.mubr.msk.bf16.mxu0 %vm716_vm1, %v9924_v26  ;;  %v9793_v34 = vld [vmem:[%s17923_s28 + $0x21d] sm:$0xff]  ;;  %v9794_v26 = vld [vmem:[%s17923_s28 + $0x225] sm:$0xff]  ;;  %v2924_v40 = vpack.c.bf16 %v2827_v33, %v2826_v22 }
 0x3ba   : > { %v9935_v51 = vpack.c.bf16 %v9794_v26, %v9793_v34  ;;  %v2848_v22 = vld [vmem:[%s17923_s28 + $0x542] sm:$0xff]  ;;  %v2849_v33 = vld [vmem:[%s17923_s28 + $0x54a] sm:$0xff]  ;;  %v9816_v26 = vld [vmem:[%s17923_s28 + $0x2d5] sm:$0xff] }
 0x3bb   : > { %v9815_v34 = vld [vmem:[%s17923_s28 + $0x2cd] sm:$0xff]  ;;  %v2935_v47 = vpack.c.bf16 %v2849_v33, %v2848_v22 }
 0x3bc   : > { %v9946_v39 = vpack.c.bf16 %v9816_v26, %v9815_v34 }
 0x3bf   : > { %15362 = vmatmul.mubr.msk.bf16.gmra.mrb[124].mxu1 %vm716_vm1, %v2914_v24  ;;  %v2830_v24 = vld [vmem:[%s17923_s28 + $0x4b2] sm:$0xff] }
 0x3c0   : > { %16144 = vmatmul.mubr.msk.bf16.gmra.mrb[36].mxu0 %vm716_vm1, %v9925_v31  ;;  %15365 = vmatprep.mubr.msk.bf16.mxu1 %vm716_vm1, %v2915_v32  ;;  %v2831_v31 = vld [vmem:[%s17923_s28 + $0x4ba] sm:$0xff] }
 0x3c1   : > { %16147 = vmatprep.mubr.msk.bf16.mxu0 %vm716_vm1, %v9926_v58  ;;  %v9797_v32 = vld [vmem:[%s17923_s28 + $0x23d] sm:$0xff]  ;;  %v9798_v58 = vld [vmem:[%s17923_s28 + $0x245] sm:$0xff]  ;;  %v2926_v63 = vpack.c.bf16 %v2831_v31, %v2830_v24  ;;  %v4092_v24 = vld [vmem:[%s17923_s28 + $0x2e] sm:$0xff] }
 0x3c2   : > { %v9937_v2 = vpack.c.bf16 %v9798_v58, %v9797_v32  ;;  %v9819_v31 = vld [vmem:[%s17923_s28 + $0x2ed] sm:$0xff]  ;;  %v9820_v32 = vld [vmem:[%s17923_s28 + $0x2f5] sm:$0xff] }
 0x3c3   : > { %v9948_v8 = vpack.c.bf16 %v9820_v32, %v9819_v31 }
 0x3c7   : > { %15366 = vmatmul.mubr.msk.bf16.gmra.mrb[128].mxu1 %vm716_vm1, %v2916_v14  ;;  %v2834_v14 = vld [vmem:[%s17923_s28 + $0x4d2] sm:$0xff] }
 0x3c8   : > { %16148 = vmatmul.mubr.msk.bf16.gmra.mrb[40].mxu0 %vm716_vm1, %v9927_v27  ;;  %15369 = vmatprep.mubr.msk.bf16.mxu1 %vm716_vm1, %v2917_v28  ;;  %v2835_v27 = vld [vmem:[%s17923_s28 + $0x4da] sm:$0xff] }
 0x3c9   : > { %16151 = vmatprep.mubr.msk.bf16.mxu0 %vm716_vm1, %v9928_v36  ;;  %v9801_v28 = vld [vmem:[%s17923_s28 + $0x25d] sm:$0xff]  ;;  %v9802_v36 = vld [vmem:[%s17923_s28 + $0x265] sm:$0xff]  ;;  %v2928_v37 = vpack.c.bf16 %v2835_v27, %v2834_v14  ;;  %v20030_v14 = vld [vmem:[%s17923_s28 + $0x4e] sm:$0xff] }
 0x3ca   : > { %v9939_v38 = vpack.c.bf16 %v9802_v36, %v9801_v28  ;;  %v9823_v27 = vld [vmem:[%s17923_s28 + $0x30d] sm:$0xff]  ;;  %v9824_v28 = vld [vmem:[%s17923_s28 + $0x315] sm:$0xff] }
 0x3cb   : > { %v9950_v45 = vpack.c.bf16 %v9824_v28, %v9823_v27 }
 0x3cf   : > { %15370 = vmatmul.mubr.msk.bf16.gmra.mrb[132].mxu1 %vm716_vm1, %v2918_v54  ;;  %v2838_v54 = vld [vmem:[%s17923_s28 + $0x4f2] sm:$0xff] }
 0x3d0   : > { %16152 = vmatmul.mubr.msk.bf16.gmra.mrb[44].mxu0 %vm716_vm1, %v9929_v11  ;;  %15373 = vmatprep.mubr.msk.bf16.mxu1 %vm716_vm1, %v2919_v48  ;;  %v2839_v11 = vld [vmem:[%s17923_s28 + $0x4fa] sm:$0xff] }
 0x3d1   : > { %16155 = vmatprep.mubr.msk.bf16.mxu0 %vm716_vm1, %v9930_v49  ;;  %v9805_v48 = vld [vmem:[%s17923_s28 + $0x27d] sm:$0xff]  ;;  %v9806_v49 = vld [vmem:[%s17923_s28 + $0x285] sm:$0xff]  ;;  %v2930_v50 = vpack.c.bf16 %v2839_v11, %v2838_v54  ;;  %v20052_v11 = vld [vmem:[%s17923_s28 + $0x6e] sm:$0xff] }
 0x3d2   : > { %v9941_v60 = vpack.c.bf16 %v9806_v49, %v9805_v48  ;;  %v20049_v54 = vld [vmem:[%s17923_s28 + $0x66] sm:$0xff]  ;;  %v9828_v49 = vld [vmem:[%s17923_s28 + $0x335] sm:$0xff] }
 0x3d3   : > { %v9827_v48 = vld [vmem:[%s17923_s28 + $0x32d] sm:$0xff]  ;;  %v4266_v57 = vpack.c.bf16 %v20052_v11, %v20049_v54 }
 0x3d4   : > { %v9952_v30 = vpack.c.bf16 %v9828_v49, %v9827_v48  ;;  %v20172_v48 = vld [vmem:[%s17923_s28 + $0x10e] sm:$0xff] }
 0x3d5   : > { %v9847_v49 = vld [vmem:[%s17923_s28 + $0x3cd] sm:$0xff] }
 0x3d7   : > { %15374 = vmatmul.mubr.msk.bf16.gmra.mrb[136].mxu1 %vm716_vm1, %v2920_v6  ;;  %v2842_v6 = vld [vmem:[%s17923_s28 + $0x512] sm:$0xff] }
 0x3d8   : > { %16156 = vmatmul.mubr.msk.bf16.gmra.mrb[48].mxu0 %vm716_vm1, %v9931_v18  ;;  %15377 = vmatprep.mubr.msk.bf16.mxu1 %vm716_vm1, %v2921_v3  ;;  %v2843_v18 = vld [vmem:[%s17923_s28 + $0x51a] sm:$0xff] }
 0x3d9   : > { %16159 = vmatprep.mubr.msk.bf16.mxu0 %vm716_vm1, %v9932_v43  ;;  %v9809_v3 = vld [vmem:[%s17923_s28 + $0x29d] sm:$0xff]  ;;  %v9810_v43 = vld [vmem:[%s17923_s28 + $0x2a5] sm:$0xff]  ;;  %v2932_v10 = vpack.c.bf16 %v2843_v18, %v2842_v6  ;;  %v20076_v18 = vld [vmem:[%s17923_s28 + $0x8e] sm:$0xff] }
 0x3da   : > { %v9943_v17 = vpack.c.bf16 %v9810_v43, %v9809_v3  ;;  %v20073_v6 = vld [vmem:[%s17923_s28 + $0x86] sm:$0xff]  ;;  %v9832_v43 = vld [vmem:[%s17923_s28 + $0x355] sm:$0xff] }
 0x3db   : > { %v9831_v3 = vld [vmem:[%s17923_s28 + $0x34d] sm:$0xff]  ;;  %v4268_v16 = vpack.c.bf16 %v20076_v18, %v20073_v6 }
 0x3dc   : > { %v9954_v9 = vpack.c.bf16 %v9832_v43, %v9831_v3  ;;  %v20187_v3 = vld [vmem:[%s17923_s28 + $0x11e] sm:$0xff] }
 0x3dd   : > { %v9849_v43 = vld [vmem:[%s17923_s28 + $0x3dd] sm:$0xff] }
 0x3df   : > { %15378 = vmatmul.mubr.msk.bf16.gmra.mrb[140].mxu1 %vm716_vm1, %v2922_v23  ;;  %v2846_v23 = vld [vmem:[%s17923_s28 + $0x532] sm:$0xff] }
 0x3e0   : > { %16160 = vmatmul.mubr.msk.bf16.gmra.mrb[52].mxu0 %vm716_vm1, %v9933_v41  ;;  %15381 = vmatprep.mubr.msk.bf16.mxu1 %vm716_vm1, %v2923_v46  ;;  %v2847_v41 = vld [vmem:[%s17923_s28 + $0x53a] sm:$0xff] }
 0x3e1   : > { %16163 = vmatprep.mubr.msk.bf16.mxu0 %vm716_vm1, %v9934_v25  ;;  %v9813_v46 = vld [vmem:[%s17923_s28 + $0x2bd] sm:$0xff]  ;;  %v9814_v25 = vld [vmem:[%s17923_s28 + $0x2c5] sm:$0xff]  ;;  %v2934_v55 = vpack.c.bf16 %v2847_v41, %v2846_v23  ;;  %v20100_v41 = vld [vmem:[%s17923_s28 + $0xae] sm:$0xff] }
 0x3e2   : > { %v9945_v0 = vpack.c.bf16 %v9814_v25, %v9813_v46  ;;  %v20097_v23 = vld [vmem:[%s17923_s28 + $0xa6] sm:$0xff]  ;;  %v9836_v25 = vld [vmem:[%s17923_s28 + $0x375] sm:$0xff] }
 0x3e3   : > { %v9835_v46 = vld [vmem:[%s17923_s28 + $0x36d] sm:$0xff]  ;;  %v4270_v34 = vpack.c.bf16 %v20100_v41, %v20097_v23 }
 0x3e4   : > { %v9956_v26 = vpack.c.bf16 %v9836_v25, %v9835_v46 }
 0x3e7   : > { %15382 = vmatmul.mubr.msk.bf16.gmra.mrb[144].mxu1 %vm716_vm1, %v2924_v40  ;;  %v2850_v40 = vld [vmem:[%s17923_s28 + $0x552] sm:$0xff] }
 0x3e8   : > { %16164 = vmatmul.mubr.msk.bf16.gmra.mrb[56].mxu0 %vm716_vm1, %v9935_v51  ;;  %15385 = vmatprep.mubr.msk.bf16.mxu1 %vm716_vm1, %v2925_v53  ;;  %v9817_v51 = vld [vmem:[%s17923_s28 + $0x2dd] sm:$0xff]  ;;  %v9818_v53 = vld [vmem:[%s17923_s28 + $0x2e5] sm:$0xff]  ;;  %v2936_v58 = vpack.c.bf16 %v2850_v40, %v2850_v40 }
 0x3e9   : > { %16167 = vmatprep.mubr.msk.bf16.mxu0 %vm716_vm1, %v9936_v52  ;;  %v4091_v52 = vld [vmem:[%s17923_s28 + $0x26] sm:$0xff]  ;;  %v9947_v59 = vpack.c.bf16 %v9818_v53, %v9817_v51  ;;  %v20124_v51 = vld [vmem:[%s17923_s28 + $0xce] sm:$0xff] }
 0x3ea   : > { %v4262_v7 = vpack.c.bf16 %v4092_v24, %v4091_v52  ;;  %v20121_v40 = vld [vmem:[%s17923_s28 + $0xc6] sm:$0xff]  ;;  %v9840_v52 = vld [vmem:[%s17923_s28 + $0x395] sm:$0xff] }
 0x3eb   : > { %v9839_v53 = vld [vmem:[%s17923_s28 + $0x38d] sm:$0xff]  ;;  %v4272_v32 = vpack.c.bf16 %v20124_v51, %v20121_v40 }
 0x3ef   : > { %15386 = vmatmul.mubr.msk.bf16.gmra.mrb[148].mxu1 %vm716_vm1, %v2926_v63  ;;  %v4094_v63 = vld [vmem:[%s17923_s28 + $0x3e] sm:$0xff] }
 0x3f0   : > { %16168 = vmatmul.mubr.msk.bf16.gmra.mrb[60].mxu0 %vm716_vm1, %v9937_v2  ;;  %15389 = vmatprep.mubr.msk.bf16.mxu1 %vm716_vm1, %v2927_v1  ;;  %v9821_v2 = vld [vmem:[%s17923_s28 + $0x2fd] sm:$0xff]  ;;  %v9822_v1 = vld [vmem:[%s17923_s28 + $0x305] sm:$0xff]  ;;  %v4263_v36 = vpack.c.bf16 %v4094_v63, %v4093_v15 }
 0x3f1   : > { %16171 = vmatprep.mubr.msk.bf16.mxu0 %vm716_vm1, %v9938_v13  ;;  %v4095_v13 = vld [vmem:[%s17923_s28 + $0x46] sm:$0xff]  ;;  %v9949_v44 = vpack.c.bf16 %v9822_v1, %v9821_v2  ;;  %v20148_v2 = vld [vmem:[%s17923_s28 + $0xee] sm:$0xff] }
 0x3f2   : > { %v4264_v12 = vpack.c.bf16 %v20030_v14, %v4095_v13  ;;  %v9842_v15 = vld [vmem:[%s17923_s28 + $0x3a5] sm:$0xff]  ;;  %v9843_v1 = vld [vmem:[%s17923_s28 + $0x3ad] sm:$0xff]  ;;  %v9844_v13 = vld [vmem:[%s17923_s28 + $0x3b5] sm:$0xff] }
 0x3f3   : > { %v20145_v63 = vld [vmem:[%s17923_s28 + $0xe6] sm:$0xff] }
 0x3f7   : > { %15390 = vmatmul.mubr.msk.bf16.gmra.mrb[152].mxu1 %vm716_vm1, %v2928_v37  ;;  %v20042_v37 = vld [vmem:[%s17923_s28 + $0x5e] sm:$0xff] }
 0x3f8   : > { %16172 = vmatmul.mubr.msk.bf16.gmra.mrb[64].mxu0 %vm716_vm1, %v9939_v38  ;;  %15393 = vmatprep.mubr.msk.bf16.mxu1 %vm716_vm1, %v2929_v62  ;;  %v9825_v38 = vld [vmem:[%s17923_s28 + $0x31d] sm:$0xff]  ;;  %v4265_v56 = vpack.c.bf16 %v20042_v37, %v20039_v20 }
 0x3f9   : > { %16175 = vmatprep.mubr.msk.bf16.mxu0 %vm716_vm1, %v9940_v42  ;;  %v22393_v62 = vld [vmem:[#allocation2_spill] sm:$0xff] }
 0x3fa   : > { %v9826_v42 = vld [vmem:[%s17923_s28 + $0x325] sm:$0xff] }
 0x3fb   : > { %v9951_v35 = vpack.c.bf16 %v9826_v42, %v9825_v38  ;;  %v9845_v38 = vld [vmem:[%s17923_s28 + $0x3bd] sm:$0xff]  ;;  %v20169_v42 = vld [vmem:[%s17923_s28 + $0x106] sm:$0xff] }
 0x3ff   : > { %15394 = vmatmul.mubr.msk.bf16.gmra.mrb[156].mxu1 %vm716_vm1, %v2930_v50  ;;  %v20064_v50 = vld [vmem:[%s17923_s28 + $0x76] sm:$0xff] }
 0x400   : > { %16176 = vmatmul.mubr.msk.bf16.gmra.mrb[68].mxu0 %vm716_vm1, %v9941_v60  ;;  %15397 = vmatprep.mubr.msk.bf16.mxu1 %vm716_vm1, %v2931_v61  ;;  %v20067_v60 = vld [vmem:[%s17923_s28 + $0x7e] sm:$0xff] }
 0x401   : > { %16179 = vmatprep.mubr.msk.bf16.mxu0 %vm716_vm1, %v9942_v5  ;;  %v9829_v61 = vld [vmem:[%s17923_s28 + $0x33d] sm:$0xff]  ;;  %v9830_v5 = vld [vmem:[%s17923_s28 + $0x345] sm:$0xff]  ;;  %v4267_v19 = vpack.c.bf16 %v20067_v60, %v20064_v50 }
 0x402   : > { %v9953_v29 = vpack.c.bf16 %v9830_v5, %v9829_v61  ;;  %v20184_v5 = vld [vmem:[%s17923_s28 + $0x116] sm:$0xff] }
 0x407   : > { %15398 = vmatmul.mubr.msk.bf16.gmra.mrb[160].mxu1 %vm716_vm1, %v2932_v10  ;;  %v20088_v10 = vld [vmem:[%s17923_s28 + $0x96] sm:$0xff] }
 0x408   : > { %16180 = vmatmul.mubr.msk.bf16.gmra.mrb[72].mxu0 %vm716_vm1, %v9943_v17  ;;  %15401 = vmatprep.mubr.msk.bf16.mxu1 %vm716_vm1, %v2933_v21  ;;  %v20091_v17 = vld [vmem:[%s17923_s28 + $0x9e] sm:$0xff] }
 0x409   : > { %16183 = vmatprep.mubr.msk.bf16.mxu0 %vm716_vm1, %v9944_v4  ;;  %v9833_v21 = vld [vmem:[%s17923_s28 + $0x35d] sm:$0xff]  ;;  %v9834_v4 = vld [vmem:[%s17923_s28 + $0x365] sm:$0xff]  ;;  %v4269_v22 = vpack.c.bf16 %v20091_v17, %v20088_v10 }
 0x40a   : > { %v9955_v33 = vpack.c.bf16 %v9834_v4, %v9833_v21  ;;  %v9852_v21 = vld [vmem:[%s17923_s28 + $0x3f5] sm:$0xff]  ;;  %v4277_v4 = vpack.c.bf16 %v20187_v3, %v20184_v5 }
 0x40f   : > { %15402 = vmatmul.mubr.msk.bf16.gmra.mrb[164].mxu1 %vm716_vm1, %v2934_v55  ;;  %v20112_v55 = vld [vmem:[%s17923_s28 + $0xb6] sm:$0xff] }
 0x410   : > { %16184 = vmatmul.mubr.msk.bf16.gmra.mrb[76].mxu0 %vm716_vm1, %v9945_v0  ;;  %15405 = vmatprep.mubr.msk.bf16.mxu1 %vm716_vm1, %v2935_v47  ;;  %v20115_v0 = vld [vmem:[%s17923_s28 + $0xbe] sm:$0xff] }
 0x411   : > { %16187 = vmatprep.mubr.msk.bf16.mxu0 %vm716_vm1, %v9946_v39  ;;  %v9837_v47 = vld [vmem:[%s17923_s28 + $0x37d] sm:$0xff]  ;;  %v9838_v39 = vld [vmem:[%s17923_s28 + $0x385] sm:$0xff]  ;;  %v4271_v24 = vpack.c.bf16 %v20115_v0, %v20112_v55 }
 0x412   : > { %v9957_v31 = vpack.c.bf16 %v9838_v39, %v9837_v47  ;;  %v9854_v47 = vld [vmem:[%s17923_s28 + $0x405] sm:$0xff] }
 0x413   : > { %v20217_v39 = vld [vmem:[%s17923_s28 + $0x146] sm:$0xff] }
 0x417   : > { %15406 = vmatmul.mubr.msk.bf16.gmra.mrb[168].mxu1 %vm716_vm1, %v2936_v58  ;;  %v9958_v58 = vpack.c.bf16 %v9840_v52, %v9839_v53  ;;  %v20220_v53 = vld [vmem:[%s17923_s28 + $0x14e] sm:$0xff] }
 0x418   : > { %16188 = vmatmul.mubr.msk.bf16.gmra.mrb[80].mxu0 %vm716_vm1, %v9947_v59  ;;  %15411 = vmatprep.mubr.msk.bf16.mxu1 %vm716_vm1, %v4262_v7  ;;  %v20136_v59 = vld [vmem:[%s17923_s28 + $0xd6] sm:$0xff]  ;;  %v20139_v7 = vld [vmem:[%s17923_s28 + $0xde] sm:$0xff]  ;;  %v9855_v52 = vld [vmem:[%s17923_s28 + $0x40d] sm:$0xff] }
 0x419   : > { %16191 = vmatprep.mubr.msk.bf16.mxu0 %vm716_vm1, %v9948_v8  ;;  %v9841_v8 = vld [vmem:[%s17923_s28 + $0x39d] sm:$0xff]  ;;  %v4273_v27 = vpack.c.bf16 %v20139_v7, %v20136_v59 }
 0x41a   : > { %v9959_v28 = vpack.c.bf16 %v9842_v15, %v9841_v8  ;;  %v20232_v15 = vld [vmem:[%s17923_s28 + $0x156] sm:$0xff] }
 0x41f   : > { %15412 = vmatmul.mubr.msk.bf16.vlgmr.msra.gmra.mrb[0].mxu1 %vm716_vm1, %v4263_v36  ;;  %v4274_v36 = vpack.c.bf16 %v20148_v2, %v20145_v63 }
 0x420   : > { %16192 = vmatmul.mubr.msk.bf16.gmra.mrb[84].mxu0 %vm716_vm1, %v9949_v44  ;;  %15415 = vmatprep.mubr.msk.bf16.mxu1 %vm716_vm1, %v4264_v12  ;;  %v9960_v44 = vpack.c.bf16 %v9844_v13, %v9843_v1  ;;  %v20160_v12 = vld [vmem:[%s17923_s28 + $0xf6] sm:$0xff]  ;;  %v20235_v1 = vld [vmem:[%s17923_s28 + $0x15e] sm:$0xff] }
 0x421   : > { %16195 = vmatprep.mubr.msk.bf16.mxu0 %vm716_vm1, %v9950_v45  ;;  %16454 = vmatpush3.bf16.msra.mxu1 %v22393_v62  ;;  %v20163_v45 = vld [vmem:[%s17923_s28 + $0xfe] sm:$0xff] }
 0x422   : > { %v9846_v62 = vld [vmem:[%s17923_s28 + $0x3c5] sm:$0xff]  ;;  %v9857_v13 = vld [vmem:[%s17923_s28 + $0x41d] sm:$0xff] }
 0x427   : > { %15416 = vmatmul.mubr.msk.bf16.gmra.mrb[4].mxu1 %vm716_vm1, %v4265_v56  ;;  %v9848_v56 = vld [vmem:[%s17923_s28 + $0x3d5] sm:$0xff] }
 0x428   : > { %16196 = vmatmul.mubr.msk.bf16.gmra.mrb[88].mxu0 %vm716_vm1, %v9951_v35  ;;  %15419 = vmatprep.mubr.msk.bf16.mxu1 %vm716_vm1, %v4266_v57  ;;  %v4275_v35 = vpack.c.bf16 %v20163_v45, %v20160_v12  ;;  %v9961_v57 = vpack.c.bf16 %v9846_v62, %v9845_v38  ;;  %v9962_v61 = vpack.c.bf16 %v9848_v56, %v9847_v49  ;;  %v9860_v38 = vld [vmem:[%s17923_s28 + $0x435] sm:$0xff] }
 0x429   : > { %16199 = vmatprep.mubr.msk.bf16.mxu0 %vm716_vm1, %v9952_v30  ;;  %v4276_v30 = vpack.c.bf16 %v20172_v48, %v20169_v42  ;;  %v4281_v62 = vpack.c.bf16 %v20235_v1, %v20232_v15 }
 0x42f   : > { %15420 = vmatmul.mubr.msk.bf16.gmra.mrb[8].mxu1 %vm716_vm1, %v4267_v19  ;;  %v9850_v19 = vld [vmem:[%s17923_s28 + $0x3e5] sm:$0xff] }
 0x430   : > { %16200 = vmatmul.mubr.msk.bf16.gmra.mrb[92].mxu0 %vm716_vm1, %v9953_v29  ;;  %15423 = vmatprep.mubr.msk.bf16.mxu1 %vm716_vm1, %v4268_v16  ;;  %v20193_v29 = vld [vmem:[%s17923_s28 + $0x126] sm:$0xff]  ;;  %v20196_v16 = vld [vmem:[%s17923_s28 + $0x12e] sm:$0xff]  ;;  %v9963_v46 = vpack.c.bf16 %v9850_v19, %v9849_v43 }
 0x431   : > { %16203 = vmatprep.mubr.msk.bf16.mxu0 %vm716_vm1, %v9954_v9  ;;  %v9851_v9 = vld [vmem:[%s17923_s28 + $0x3ed] sm:$0xff]  ;;  %v4278_v25 = vpack.c.bf16 %v20196_v16, %v20193_v29  ;;  %v9862_v43 = vld [vmem:[%s17923_s28 + $0x445] sm:$0xff] }
 0x432   : > { %v20265_v19 = vld [vmem:[%s17923_s28 + $0x186] sm:$0xff] }
 0x437   : > { %15424 = vmatmul.mubr.msk.bf16.gmra.mrb[12].mxu1 %vm716_vm1, %v4269_v22  ;;  %v9964_v22 = vpack.c.bf16 %v9852_v21, %v9851_v9  ;;  %v20268_v9 = vld [vmem:[%s17923_s28 + $0x18e] sm:$0xff] }
 0x438   : > { %16204 = vmatmul.mubr.msk.bf16.gmra.mrb[96].mxu0 %vm716_vm1, %v9955_v33  ;;  %15427 = vmatprep.mubr.msk.bf16.mxu1 %vm716_vm1, %v4270_v34  ;;  %v20208_v33 = vld [vmem:[%s17923_s28 + $0x136] sm:$0xff]  ;;  %v20211_v34 = vld [vmem:[%s17923_s28 + $0x13e] sm:$0xff]  ;;  %v9863_v21 = vld [vmem:[%s17923_s28 + $0x44d] sm:$0xff] }
 0x439   : > { %16207 = vmatprep.mubr.msk.bf16.mxu0 %vm716_vm1, %v9956_v26  ;;  %v9853_v26 = vld [vmem:[%s17923_s28 + $0x3fd] sm:$0xff] }
 0x43f   : > { %15428 = vmatmul.mubr.msk.bf16.gmra.mrb[16].mxu1 %vm716_vm1, %v4271_v24  ;;  %v9856_v24 = vld [vmem:[%s17923_s28 + $0x415] sm:$0xff] }
 0x440   : > { %16208 = vmatmul.mubr.msk.bf16.gmra.mrb[100].mxu0 %vm716_vm1, %v9957_v31  ;;  %15431 = vmatprep.mubr.msk.bf16.mxu1 %vm716_vm1, %v4272_v32  ;;  %v4279_v31 = vpack.c.bf16 %v20211_v34, %v20208_v33  ;;  %v9965_v32 = vpack.c.bf16 %v9854_v47, %v9853_v26  ;;  %v9966_v8 = vpack.c.bf16 %v9856_v24, %v9855_v52  ;;  %v20280_v47 = vld [vmem:[%s17923_s28 + $0x196] sm:$0xff]  ;;  %v20283_v52 = vld [vmem:[%s17923_s28 + $0x19e] sm:$0xff] }
 0x441   : > { %16211 = vmatprep.mubr.msk.bf16.mxu0 %vm716_vm1, %v9958_v58  ;;  %v4280_v58 = vpack.c.bf16 %v20220_v53, %v20217_v39  ;;  %v9865_v24 = vld [vmem:[%s17923_s28 + $0x45d] sm:$0xff] }
 0x447   : > { %15432 = vmatmul.mubr.msk.bf16.gmra.mrb[20].mxu1 %vm716_vm1, %v4273_v27  ;;  %v9858_v27 = vld [vmem:[%s17923_s28 + $0x425] sm:$0xff] }
 0x448   : > { %16212 = vmatmul.mubr.msk.bf16.gmra.mrb[104].mxu0 %vm716_vm1, %v9959_v28  ;;  %15435 = vmatprep.mubr.msk.bf16.mxu1 %vm716_vm1, %v4274_v36  ;;  %v20241_v28 = vld [vmem:[%s17923_s28 + $0x166] sm:$0xff]  ;;  %v20244_v36 = vld [vmem:[%s17923_s28 + $0x16e] sm:$0xff]  ;;  %v9967_v49 = vpack.c.bf16 %v9858_v27, %v9857_v13  ;;  %v4285_v27 = vpack.c.bf16 %v20283_v52, %v20280_v47 }
 0x449   : > { %16215 = vmatprep.mubr.msk.bf16.mxu0 %vm716_vm1, %v9960_v44  ;;  %v9859_v44 = vld [vmem:[%s17923_s28 + $0x42d] sm:$0xff]  ;;  %v4282_v56 = vpack.c.bf16 %v20244_v36, %v20241_v28  ;;  %v9868_v13 = vld [vmem:[%s17923_s28 + $0x475] sm:$0xff] }
 0x44f   : > { %15436 = vmatmul.mubr.msk.bf16.gmra.mrb[24].mxu1 %vm716_vm1, %v4275_v35  ;;  %v9968_v35 = vpack.c.bf16 %v9860_v38, %v9859_v44 }
 0x450   : > { %16216 = vmatmul.mubr.msk.bf16.gmra.mrb[108].mxu0 %vm716_vm1, %v9961_v57  ;;  %15439 = vmatprep.mubr.msk.bf16.mxu1 %vm716_vm1, %v4276_v30  ;;  %v20256_v57 = vld [vmem:[%s17923_s28 + $0x176] sm:$0xff]  ;;  %v20259_v30 = vld [vmem:[%s17923_s28 + $0x17e] sm:$0xff] }
 0x451   : > { %16219 = vmatprep.mubr.msk.bf16.mxu0 %vm716_vm1, %v9962_v61  ;;  %v9861_v61 = vld [vmem:[%s17923_s28 + $0x43d] sm:$0xff] }
 0x457   : > { %15440 = vmatmul.mubr.msk.bf16.gmra.mrb[28].mxu1 %vm716_vm1, %v4277_v4  ;;  %v9864_v4 = vld [vmem:[%s17923_s28 + $0x455] sm:$0xff] }
 0x458   : > { %16220 = vmatmul.mubr.msk.bf16.gmra.mrb[112].mxu0 %vm716_vm1, %v9963_v46  ;;  %15443 = vmatprep.mubr.msk.bf16.mxu1 %vm716_vm1, %v4278_v25  ;;  %v4283_v46 = vpack.c.bf16 %v20259_v30, %v20256_v57  ;;  %v9969_v25 = vpack.c.bf16 %v9862_v43, %v9861_v61  ;;  %v9970_v26 = vpack.c.bf16 %v9864_v4, %v9863_v21  ;;  %v9870_v61 = vld [vmem:[%s17923_s28 + $0x485] sm:$0xff]  ;;  %v20316_v21 = vld [vmem:[%s17923_s28 + $0x1ce] sm:$0xff] }
 0x459   : > { %16223 = vmatprep.mubr.msk.bf16.mxu0 %vm716_vm1, %v9964_v22  ;;  %v4284_v22 = vpack.c.bf16 %v20268_v9, %v20265_v19  ;;  %v20313_v43 = vld [vmem:[%s17923_s28 + $0x1c6] sm:$0xff] }
 0x45a   : > { %v9871_v4 = vld [vmem:[%s17923_s28 + $0x48d] sm:$0xff] }
 0x45f   : > { %15444 = vmatmul.mubr.msk.bf16.gmra.mrb[32].mxu1 %vm716_vm1, %v4279_v31  ;;  %v9866_v31 = vld [vmem:[%s17923_s28 + $0x465] sm:$0xff] }
 0x460   : > { %16224 = vmatmul.mubr.msk.bf16.gmra.mrb[116].mxu0 %vm716_vm1, %v9965_v32  ;;  %15447 = vmatprep.mubr.msk.bf16.mxu1 %vm716_vm1, %v4280_v58  ;;  %v20289_v32 = vld [vmem:[%s17923_s28 + $0x1a6] sm:$0xff]  ;;  %v20292_v58 = vld [vmem:[%s17923_s28 + $0x1ae] sm:$0xff]  ;;  %v9971_v44 = vpack.c.bf16 %v9866_v31, %v9865_v24  ;;  %v20328_v31 = vld [vmem:[%s17923_s28 + $0x1d6] sm:$0xff] }
 0x461   : > { %16227 = vmatprep.mubr.msk.bf16.mxu0 %vm716_vm1, %v9966_v8  ;;  %v9867_v8 = vld [vmem:[%s17923_s28 + $0x46d] sm:$0xff]  ;;  %v4286_v38 = vpack.c.bf16 %v20292_v58, %v20289_v32  ;;  %22394 = vst [vmem:[#allocation28_spill] sm:$0xff] %v20328_v31 }
 0x467   : > { %15448 = vmatmul.mubr.msk.bf16.gmra.mrb[36].mxu1 %vm716_vm1, %v4281_v62  ;;  %v9972_v62 = vpack.c.bf16 %v9868_v13, %v9867_v8  ;;  %v20331_v8 = vld [vmem:[%s17923_s28 + $0x1de] sm:$0xff] }
 0x468   : > { %16228 = vmatmul.mubr.msk.bf16.gmra.mrb[120].mxu0 %vm716_vm1, %v9967_v49  ;;  %15451 = vmatprep.mubr.msk.bf16.mxu1 %vm716_vm1, %v4282_v56  ;;  %v20304_v49 = vld [vmem:[%s17923_s28 + $0x1b6] sm:$0xff]  ;;  %v20307_v56 = vld [vmem:[%s17923_s28 + $0x1be] sm:$0xff]  ;;  %22395 = vst [vmem:[#allocation29_spill] sm:$0xff] %v20331_v8 }
 0x469   : > { %16231 = vmatprep.mubr.msk.bf16.mxu0 %vm716_vm1, %v9968_v35  ;;  %v9869_v35 = vld [vmem:[%s17923_s28 + $0x47d] sm:$0xff] }
 0x46a   : > { %v9873_v13 = vld [vmem:[%s17923_s28 + $0x49d] sm:$0xff] }
 0x46f   : > { %15452 = vmatmul.mubr.msk.bf16.gmra.mrb[40].mxu1 %vm716_vm1, %v4283_v46  ;;  %v9872_v46 = vld [vmem:[%s17923_s28 + $0x495] sm:$0xff] }
 0x470   : > { %16232 = vmatmul.mubr.msk.bf16.gmra.mrb[124].mxu0 %vm716_vm1, %v9969_v25  ;;  %15455 = vmatprep.mubr.msk.bf16.mxu1 %vm716_vm1, %v4284_v22  ;;  %v4287_v25 = vpack.c.bf16 %v20307_v56, %v20304_v49  ;;  %v9973_v22 = vpack.c.bf16 %v9870_v61, %v9869_v35  ;;  %v9974_v24 = vpack.c.bf16 %v9872_v46, %v9871_v4  ;;  %v9876_v35 = vld [vmem:[%s17923_s28 + $0x4b5] sm:$0xff] }
 0x471   : > { %16235 = vmatprep.mubr.msk.bf16.mxu0 %vm716_vm1, %v9970_v26  ;;  %v4288_v26 = vpack.c.bf16 %v20316_v21, %v20313_v43  ;;  %v4289_v61 = vpack.c.bf16 %v20331_v8, %v20328_v31  ;;  %v20379_v8 = vld [vmem:[%s17923_s28 + $0x21e] sm:$0xff] }
 0x472   : > { %22403 = vst [vmem:[#allocation37_spill] sm:$0xff] %v20379_v8  ;;  %v9881_v31 = vld [vmem:[%s17923_s28 + $0x4dd] sm:$0xff] }
 0x477   : > { %15456 = vmatmul.mubr.msk.bf16.gmra.mrb[44].mxu1 %vm716_vm1, %v4285_v27  ;;  %v9874_v27 = vld [vmem:[%s17923_s28 + $0x4a5] sm:$0xff] }
 0x478   : > { %16236 = vmatmul.mubr.msk.bf16.gmra.mrb[128].mxu0 %vm716_vm1, %v9971_v44  ;;  %15459 = vmatprep.mubr.msk.bf16.mxu1 %vm716_vm1, %v4286_v38  ;;  %v20337_v44 = vld [vmem:[%s17923_s28 + $0x1e6] sm:$0xff]  ;;  %v20340_v38 = vld [vmem:[%s17923_s28 + $0x1ee] sm:$0xff]  ;;  %v9975_v4 = vpack.c.bf16 %v9874_v27, %v9873_v13 }
 0x479   : > { %16239 = vmatprep.mubr.msk.bf16.mxu0 %vm716_vm1, %v9972_v62  ;;  %22396 = vst [vmem:[#allocation30_spill] sm:$0xff] %v20337_v44  ;;  %22397 = vst [vmem:[#allocation31_spill] sm:$0xff] %v20340_v38  ;;  %v9875_v62 = vld [vmem:[%s17923_s28 + $0x4ad] sm:$0xff]  ;;  %v4290_v46 = vpack.c.bf16 %v20340_v38, %v20337_v44  ;;  %v9878_v13 = vld [vmem:[%s17923_s28 + $0x4c5] sm:$0xff] }
 0x47a   : > { %v20361_v27 = vld [vmem:[%s17923_s28 + $0x206] sm:$0xff]  ;;  %v20376_v44 = vld [vmem:[%s17923_s28 + $0x216] sm:$0xff] }
 0x47b   : > { %22400 = vst [vmem:[#allocation34_spill] sm:$0xff] %v20361_v27  ;;  %22402 = vst [vmem:[#allocation36_spill] sm:$0xff] %v20376_v44 }
 0x47f   : > { %15460 = vmatmul.mubr.msk.bf16.gmra.mrb[48].mxu1 %vm716_vm1, %v4287_v25  ;;  %v9976_v25 = vpack.c.bf16 %v9876_v35, %v9875_v62  ;;  %v20364_v62 = vld [vmem:[%s17923_s28 + $0x20e] sm:$0xff] }
 0x480   : > { %16240 = vmatmul.mubr.msk.bf16.gmra.mrb[132].mxu0 %vm716_vm1, %v9973_v22  ;;  %15463 = vmatprep.mubr.msk.bf16.mxu1 %vm716_vm1, %v4288_v26  ;;  %v20352_v22 = vld [vmem:[%s17923_s28 + $0x1f6] sm:$0xff]  ;;  %v20355_v26 = vld [vmem:[%s17923_s28 + $0x1fe] sm:$0xff]  ;;  %22401 = vst [vmem:[#allocation35_spill] sm:$0xff] %v20364_v62  ;;  %v9879_v35 = vld [vmem:[%s17923_s28 + $0x4cd] sm:$0xff]  ;;  %v4292_v38 = vpack.c.bf16 %v20364_v62, %v20361_v27 }
 0x481   : > { %16243 = vmatprep.mubr.msk.bf16.mxu0 %vm716_vm1, %v9974_v24  ;;  %22398 = vst [vmem:[#allocation32_spill] sm:$0xff] %v20352_v22  ;;  %22399 = vst [vmem:[#allocation33_spill] sm:$0xff] %v20355_v26  ;;  %v9877_v24 = vld [vmem:[%s17923_s28 + $0x4bd] sm:$0xff] }
 0x482   : > { %v20400_v27 = vld [vmem:[%s17923_s28 + $0x236] sm:$0xff] }
 0x483   : > { %22406 = vst [vmem:[#allocation40_spill] sm:$0xff] %v20400_v27 }
 0x487   : > { %15464 = vmatmul.mubr.msk.bf16.gmra.mrb[52].mxu1 %vm716_vm1, %v4289_v61  ;;  %v9880_v61 = vld [vmem:[%s17923_s28 + $0x4d5] sm:$0xff] }
 0x488   : > { %16244 = vmatmul.mubr.msk.bf16.gmra.mrb[136].mxu0 %vm716_vm1, %v9975_v4  ;;  %15467 = vmatprep.mubr.msk.bf16.mxu1 %vm716_vm1, %v4290_v46  ;;  %v4291_v4 = vpack.c.bf16 %v20355_v26, %v20352_v22  ;;  %v9977_v46 = vpack.c.bf16 %v9878_v13, %v9877_v24  ;;  %v9882_v24 = vld [vmem:[%s17923_s28 + $0x4e5] sm:$0xff]  ;;  %v9885_v22 = vld [vmem:[%s17923_s28 + $0x4fd] sm:$0xff] }
 0x489   : > { %16247 = vmatprep.mubr.msk.bf16.mxu0 %vm716_vm1, %v9976_v25  ;;  %v9978_v25 = vpack.c.bf16 %v9880_v61, %v9879_v35  ;;  %v20385_v13 = vld [vmem:[%s17923_s28 + $0x226] sm:$0xff]  ;;  %v20388_v35 = vld [vmem:[%s17923_s28 + $0x22e] sm:$0xff]  ;;  %v20403_v26 = vld [vmem:[%s17923_s28 + $0x23e] sm:$0xff] }
 0x48a   : > { %22404 = vst [vmem:[#allocation38_spill] sm:$0xff] %v20385_v13  ;;  %22405 = vst [vmem:[#allocation39_spill] sm:$0xff] %v20388_v35  ;;  %v9883_v61 = vld [vmem:[%s17923_s28 + $0x4ed] sm:$0xff]  ;;  %v4294_v62 = vpack.c.bf16 %v20388_v35, %v20385_v13  ;;  %v20424_v13 = vld [vmem:[%s17923_s28 + $0x256] sm:$0xff] }
 0x48b   : > { %22407 = vst [vmem:[#allocation41_spill] sm:$0xff] %v20403_v26  ;;  %22410 = vst [vmem:[#allocation3_spill] sm:$0xff] %v20424_v13 }
 0x48f   : > { %15468 = vmatmul.mubr.msk.bf16.gmra.mrb[56].mxu1 %vm716_vm1, %v4291_v4  ;;  %v4293_v4 = vpack.c.bf16 %v20379_v8, %v20376_v44  ;;  %v20427_v8 = vld [vmem:[%s17923_s28 + $0x25e] sm:$0xff] }
 0x490   : > { %16248 = vmatmul.mubr.msk.bf16.gmra.mrb[140].mxu0 %vm716_vm1, %v9977_v46  ;;  %15471 = vmatprep.mubr.msk.bf16.mxu1 %vm716_vm1, %v4292_v38  ;;  %v9884_v38 = vld [vmem:[%s17923_s28 + $0x4f5] sm:$0xff]  ;;  %v9979_v46 = vpack.c.bf16 %v9882_v24, %v9881_v31  ;;  %v9886_v31 = vld [vmem:[%s17923_s28 + $0x505] sm:$0xff]  ;;  %22411 = vst [vmem:[#allocation44_spill] sm:$0xff] %v20427_v8  ;;  %v9889_v44 = vld [vmem:[%s17923_s28 + $0x51d] sm:$0xff] }
 0x491   : > { %16251 = vmatprep.mubr.msk.bf16.mxu0 %vm716_vm1, %v9978_v25  ;;  %v9980_v25 = vpack.c.bf16 %v9884_v38, %v9883_v61  ;;  %v20409_v24 = vld [vmem:[%s17923_s28 + $0x246] sm:$0xff]  ;;  %v20412_v61 = vld [vmem:[%s17923_s28 + $0x24e] sm:$0xff] }
 0x492   : > { %22408 = vst [vmem:[#allocation42_spill] sm:$0xff] %v20409_v24  ;;  %22409 = vst [vmem:[#allocation43_spill] sm:$0xff] %v20412_v61  ;;  %v9887_v38 = vld [vmem:[%s17923_s28 + $0x50d] sm:$0xff]  ;;  %v4296_v35 = vpack.c.bf16 %v20412_v61, %v20409_v24  ;;  %v20448_v24 = vld [vmem:[%s17923_s28 + $0x276] sm:$0xff] }
 0x493   : > { %22414 = vst [vmem:[#allocation4_spill] sm:$0xff] %v20448_v24 }
 0x497   : > { %15472 = vmatmul.mubr.msk.bf16.gmra.mrb[60].mxu1 %vm716_vm1, %v4293_v4  ;;  %v4295_v4 = vpack.c.bf16 %v20403_v26, %v20400_v27  ;;  %v20451_v26 = vld [vmem:[%s17923_s28 + $0x27e] sm:$0xff] }
 0x498   : > { %16252 = vmatmul.mubr.msk.bf16.gmra.mrb[144].mxu0 %vm716_vm1, %v9979_v46  ;;  %15475 = vmatprep.mubr.msk.bf16.mxu1 %vm716_vm1, %v4294_v62  ;;  %v9888_v62 = vld [vmem:[%s17923_s28 + $0x515] sm:$0xff]  ;;  %v9981_v46 = vpack.c.bf16 %v9886_v31, %v9885_v22  ;;  %v9890_v22 = vld [vmem:[%s17923_s28 + $0x525] sm:$0xff]  ;;  %22415 = vst [vmem:[#allocation5_spill] sm:$0xff] %v20451_v26  ;;  %v9893_v27 = vld [vmem:[%s17923_s28 + $0x53d] sm:$0xff] }
 0x499   : > { %16255 = vmatprep.mubr.msk.bf16.mxu0 %vm716_vm1, %v9980_v25  ;;  %v9982_v25 = vpack.c.bf16 %v9888_v62, %v9887_v38  ;;  %v20433_v31 = vld [vmem:[%s17923_s28 + $0x266] sm:$0xff]  ;;  %v20436_v38 = vld [vmem:[%s17923_s28 + $0x26e] sm:$0xff] }
 0x49a   : > { %22412 = vst [vmem:[#allocation45_spill] sm:$0xff] %v20433_v31  ;;  %22413 = vst [vmem:[#allocation46_spill] sm:$0xff] %v20436_v38  ;;  %v9891_v62 = vld [vmem:[%s17923_s28 + $0x52d] sm:$0xff]  ;;  %v4298_v61 = vpack.c.bf16 %v20436_v38, %v20433_v31  ;;  %v20472_v31 = vld [vmem:[%s17923_s28 + $0x296] sm:$0xff] }
 0x49f   : > { %15476 = vmatmul.mubr.msk.bf16.gmra.mrb[64].mxu1 %vm716_vm1, %v4295_v4  ;;  %v4297_v4 = vpack.c.bf16 %v20427_v8, %v20424_v13  ;;  %v20475_v8 = vld [vmem:[%s17923_s28 + $0x29e] sm:$0xff] }
 0x4a0   : > { %16256 = vmatmul.mubr.msk.bf16.gmra.mrb[148].mxu0 %vm716_vm1, %v9981_v46  ;;  %15479 = vmatprep.mubr.msk.bf16.mxu1 %vm716_vm1, %v4296_v35  ;;  %v9892_v35 = vld [vmem:[%s17923_s28 + $0x535] sm:$0xff]  ;;  %v9983_v46 = vpack.c.bf16 %v9890_v22, %v9889_v44  ;;  %v9894_v44 = vld [vmem:[%s17923_s28 + $0x545] sm:$0xff]  ;;  %22418 = vst [vmem:[#allocation8_spill] sm:$0xff] %v20475_v8  ;;  %v9897_v13 = vld [vmem:[%s17923_s28 + $0x55d] sm:$0xff] }
 0x4a1   : > { %16259 = vmatprep.mubr.msk.bf16.mxu0 %vm716_vm1, %v9982_v25  ;;  %v9984_v25 = vpack.c.bf16 %v9892_v35, %v9891_v62  ;;  %v20457_v22 = vld [vmem:[%s17923_s28 + $0x286] sm:$0xff]  ;;  %v20460_v62 = vld [vmem:[%s17923_s28 + $0x28e] sm:$0xff] }
 0x4a2   : > { %22416 = vst [vmem:[#allocation6_spill] sm:$0xff] %v20457_v22  ;;  %22417 = vst [vmem:[#allocation7_spill] sm:$0xff] %v20460_v62  ;;  %v9895_v35 = vld [vmem:[%s17923_s28 + $0x54d] sm:$0xff]  ;;  %v4300_v38 = vpack.c.bf16 %v20460_v62, %v20457_v22  ;;  %v20496_v22 = vld [vmem:[%s17923_s28 + $0x2b6] sm:$0xff] }
 0x4a7   : > { %15480 = vmatmul.mubr.msk.bf16.gmra.mrb[68].mxu1 %vm716_vm1, %v4297_v4  ;;  %v4299_v4 = vpack.c.bf16 %v20451_v26, %v20448_v24  ;;  %v20499_v26 = vld [vmem:[%s17923_s28 + $0x2be] sm:$0xff] }
 0x4a8   : > { %16260 = vmatmul.mubr.msk.bf16.gmra.mrb[152].mxu0 %vm716_vm1, %v9983_v46  ;;  %15483 = vmatprep.mubr.msk.bf16.mxu1 %vm716_vm1, %v4298_v61  ;;  %v9896_v61 = vld [vmem:[%s17923_s28 + $0x555] sm:$0xff]  ;;  %v9985_v46 = vpack.c.bf16 %v9894_v44, %v9893_v27  ;;  %v9898_v27 = vld [vmem:[%s17923_s28 + $0x565] sm:$0xff]  ;;  %v9901_v24 = vld [vmem:[%s17923_s28 + $0x57d] sm:$0xff] }
 0x4a9   : > { %16263 = vmatprep.mubr.msk.bf16.mxu0 %vm716_vm1, %v9984_v25  ;;  %v9986_v25 = vpack.c.bf16 %v9896_v61, %v9895_v35  ;;  %v20481_v44 = vld [vmem:[%s17923_s28 + $0x2a6] sm:$0xff]  ;;  %v20484_v35 = vld [vmem:[%s17923_s28 + $0x2ae] sm:$0xff] }
 0x4aa   : > { %22419 = vst [vmem:[#allocation9_spill] sm:$0xff] %v20481_v44  ;;  %22420 = vst [vmem:[#allocation10_spill] sm:$0xff] %v20484_v35  ;;  %v9899_v61 = vld [vmem:[%s17923_s28 + $0x56d] sm:$0xff]  ;;  %v4302_v62 = vpack.c.bf16 %v20484_v35, %v20481_v44 }
 0x4af   : > { %15484 = vmatmul.mubr.msk.bf16.gmra.mrb[72].mxu1 %vm716_vm1, %v4299_v4  ;;  %v4301_v4 = vpack.c.bf16 %v20475_v8, %v20472_v31  ;;  %v20523_v8 = vld [vmem:[%s17923_s28 + $0x2de] sm:$0xff] }
 0x4b0   : > { %16264 = vmatmul.mubr.msk.bf16.gmra.mrb[156].mxu0 %vm716_vm1, %v9985_v46  ;;  %15487 = vmatprep.mubr.msk.bf16.mxu1 %vm716_vm1, %v4300_v38  ;;  %v9900_v38 = vld [vmem:[%s17923_s28 + $0x575] sm:$0xff]  ;;  %v9987_v46 = vpack.c.bf16 %v9898_v27, %v9897_v13  ;;  %v9902_v13 = vld [vmem:[%s17923_s28 + $0x585] sm:$0xff]  ;;  %22421 = vst [vmem:[#allocation11_spill] sm:$0xff] %v20523_v8 }
 0x4b1   : > { %16267 = vmatprep.mubr.msk.bf16.mxu0 %vm716_vm1, %v9986_v25  ;;  %v9988_v25 = vpack.c.bf16 %v9900_v38, %v9899_v61  ;;  %v20505_v27 = vld [vmem:[%s17923_s28 + $0x2c6] sm:$0xff]  ;;  %v20508_v61 = vld [vmem:[%s17923_s28 + $0x2ce] sm:$0xff] }
 0x4b2   : > { %v9903_v38 = vld [vmem:[%s17923_s28 + $0x58d] sm:$0xff]  ;;  %v4304_v35 = vpack.c.bf16 %v20508_v61, %v20505_v27 }
 0x4b7   : > { %15488 = vmatmul.mubr.msk.bf16.gmra.mrb[76].mxu1 %vm716_vm1, %v4301_v4  ;;  %v9904_v4 = vld [vmem:[%s17923_s28 + $0x595] sm:$0xff] }
 0x4b8   : > { %16268 = vmatmul.mubr.msk.bf16.gmra.mrb[160].mxu0 %vm716_vm1, %v9987_v46  ;;  %15491 = vmatprep.mubr.msk.bf16.mxu1 %vm716_vm1, %v4302_v62  ;;  %v4303_v62 = vpack.c.bf16 %v20499_v26, %v20496_v22  ;;  %v9989_v46 = vpack.c.bf16 %v9902_v13, %v9901_v24  ;;  %v9990_v44 = vpack.c.bf16 %v9904_v4, %v9903_v38  ;;  %v9905_v24 = vld [vmem:[%s17923_s28 + $0x59d] sm:$0xff]  ;;  %v20528_v13 = vld [vmem:[%s17923_s28 + $0x2e6] sm:$0xff]  ;;  %v20531_v38 = vld [vmem:[%s17923_s28 + $0x2ee] sm:$0xff] }
 0x4b9   : > { %16271 = vmatprep.mubr.msk.bf16.mxu0 %vm716_vm1, %v9988_v25  ;;  %v20520_v25 = vld [vmem:[%s17923_s28 + $0x2d6] sm:$0xff]  ;;  %22422 = vst [vmem:[#allocation12_spill] sm:$0xff] %v20531_v38 }
 0x4ba   : > { %v4305_v4 = vpack.c.bf16 %v20523_v8, %v20520_v25  ;;  %v20546_v8 = vld [vmem:[%s17923_s28 + $0x2fe] sm:$0xff] }
 0x4bf   : > { %15492 = vmatmul.mubr.msk.bf16.gmra.mrb[80].mxu1 %vm716_vm1, %v4303_v62  ;;  %v9991_v62 = vpack.c.bf16 %v9905_v24, %v9905_v24  ;;  %v20550_v24 = vld [vmem:[%s17923_s28 + $0x306] sm:$0xff] }
 0x4c0   : > { %16272 = vmatmul.mubr.msk.bf16.gmra.mrb[164].mxu0 %vm716_vm1, %v9989_v46  ;;  %15495 = vmatprep.mubr.msk.bf16.mxu1 %vm716_vm1, %v4304_v35  ;;  %v4306_v35 = vpack.c.bf16 %v20531_v38, %v20528_v13  ;;  %v11317_v46 = vpack.c.bf16 %v20039_v20, %v20030_v14  ;;  %v20553_v38 = vld [vmem:[%s17923_s28 + $0x30e] sm:$0xff]  ;;  %v11318_v20 = vpack.c.bf16 %v20049_v54, %v20042_v37  ;;  %v20574_v37 = vld [vmem:[%s17923_s28 + $0x326] sm:$0xff] }
 0x4c1   : > { %16275 = vmatprep.mubr.msk.bf16.mxu0 %vm716_vm1, %v9990_v44  ;;  %v20543_v44 = vld [vmem:[%s17923_s28 + $0x2f6] sm:$0xff]  ;;  %v20577_v54 = vld [vmem:[%s17923_s28 + $0x32e] sm:$0xff] }
 0x4c2   : > { %v4307_v14 = vpack.c.bf16 %v20546_v8, %v20543_v44 }
 0x4c7   : > { %15496 = vmatmul.mubr.msk.bf16.gmra.mrb[84].mxu1 %vm716_vm1, %v4305_v4  ;;  %v4308_v4 = vpack.c.bf16 %v20553_v38, %v20550_v24 }
 0x4c8   : > { %16276 = vmatmul.mubr.msk.bf16.gmra.mrb[168].mxu0 %vm716_vm1, %v9991_v62  ;;  %15499 = vmatprep.mubr.msk.bf16.mxu1 %vm716_vm1, %v4306_v35  ;;  %v11319_v62 = vpack.c.bf16 %v20064_v50, %v20052_v11  ;;  %v20567_v35 = vld [vmem:[%s17923_s28 + $0x316] sm:$0xff]  ;;  %v11320_v50 = vpack.c.bf16 %v20073_v6, %v20067_v60  ;;  %v20598_v60 = vld [vmem:[%s17923_s28 + $0x346] sm:$0xff]  ;;  %v20601_v6 = vld [vmem:[%s17923_s28 + $0x34e] sm:$0xff] }
 0x4c9   : > { %16281 = vmatprep.mubr.msk.bf16.mxu0 %vm716_vm1, %v11317_v46  ;;  %v20570_v46 = vld [vmem:[%s17923_s28 + $0x31e] sm:$0xff] }
 0x4ca   : > { %v4309_v11 = vpack.c.bf16 %v20570_v46, %v20567_v35 }
 0x4cf   : > { %15500 = vmatmul.mubr.msk.bf16.gmra.mrb[88].mxu1 %vm716_vm1, %v4307_v14  ;;  %v4310_v14 = vpack.c.bf16 %v20577_v54, %v20574_v37 }
 0x4d0   : > { %16282 = vmatmul.mubr.msk.bf16.vlgmr.msra.gmra.mrb[0].mxu0 %vm716_vm1, %v11318_v20  ;;  %15503 = vmatprep.mubr.msk.bf16.mxu1 %vm716_vm1, %v4308_v4  ;;  %v11321_v20 = vpack.c.bf16 %v20088_v10, %v20076_v18  ;;  %v20591_v4 = vld [vmem:[%s17923_s28 + $0x336] sm:$0xff]  ;;  %v11322_v10 = vpack.c.bf16 %v20097_v23, %v20091_v17  ;;  %v20622_v17 = vld [vmem:[%s17923_s28 + $0x366] sm:$0xff]  ;;  %v20625_v23 = vld [vmem:[%s17923_s28 + $0x36e] sm:$0xff] }
 0x4d1   : > { %16285 = vmatprep.mubr.msk.bf16.mxu0 %vm716_vm1, %v11319_v62  ;;  %v20594_v62 = vld [vmem:[%s17923_s28 + $0x33e] sm:$0xff] }
 0x4d2   : > { %v4311_v18 = vpack.c.bf16 %v20594_v62, %v20591_v4 }
 0x4d7   : > { %15504 = vmatmul.mubr.msk.bf16.gmra.mrb[92].mxu1 %vm716_vm1, %v4309_v11  ;;  %v4312_v11 = vpack.c.bf16 %v20601_v6, %v20598_v60 }
 0x4d8   : > { %16286 = vmatmul.mubr.msk.bf16.gmra.mrb[4].mxu0 %vm716_vm1, %v11320_v50  ;;  %15507 = vmatprep.mubr.msk.bf16.mxu1 %vm716_vm1, %v4310_v14  ;;  %v11323_v50 = vpack.c.bf16 %v20112_v55, %v20100_v41  ;;  %v20615_v14 = vld [vmem:[%s17923_s28 + $0x356] sm:$0xff]  ;;  %v11324_v55 = vpack.c.bf16 %v20121_v40, %v20115_v0  ;;  %v20646_v0 = vld [vmem:[%s17923_s28 + $0x386] sm:$0xff]  ;;  %v20649_v40 = vld [vmem:[%s17923_s28 + $0x38e] sm:$0xff] }
 0x4d9   : > { %16289 = vmatprep.mubr.msk.bf16.mxu0 %vm716_vm1, %v11321_v20  ;;  %v20618_v20 = vld [vmem:[%s17923_s28 + $0x35e] sm:$0xff]  ;;  %22423 = vst [vmem:[#allocation13_spill] sm:$0xff] %v20646_v0  ;;  %22424 = vst [vmem:[#allocation14_spill] sm:$0xff] %v20649_v40 }
 0x4da   : > { %v4313_v41 = vpack.c.bf16 %v20618_v20, %v20615_v14 }
 0x4df   : > { %15508 = vmatmul.mubr.msk.bf16.gmra.mrb[96].mxu1 %vm716_vm1, %v4311_v18  ;;  %v4314_v18 = vpack.c.bf16 %v20625_v23, %v20622_v17 }
 0x4e0   : > { %16290 = vmatmul.mubr.msk.bf16.gmra.mrb[8].mxu0 %vm716_vm1, %v11322_v10  ;;  %15511 = vmatprep.mubr.msk.bf16.mxu1 %vm716_vm1, %v4312_v11  ;;  %v11325_v10 = vpack.c.bf16 %v20136_v59, %v20124_v51  ;;  %v20639_v11 = vld [vmem:[%s17923_s28 + $0x376] sm:$0xff]  ;;  %v11326_v59 = vpack.c.bf16 %v20145_v63, %v20139_v7  ;;  %v20670_v7 = vld [vmem:[%s17923_s28 + $0x3a6] sm:$0xff]  ;;  %v20673_v63 = vld [vmem:[%s17923_s28 + $0x3ae] sm:$0xff] }
 0x4e1   : > { %16293 = vmatprep.mubr.msk.bf16.mxu0 %vm716_vm1, %v11323_v50  ;;  %v20642_v50 = vld [vmem:[%s17923_s28 + $0x37e] sm:$0xff] }
 0x4e2   : > { %v4315_v51 = vpack.c.bf16 %v20642_v50, %v20639_v11 }
 0x4e7   : > { %15512 = vmatmul.mubr.msk.bf16.gmra.mrb[100].mxu1 %vm716_vm1, %v4313_v41  ;;  %v4316_v41 = vpack.c.bf16 %v20649_v40, %v20646_v0  ;;  %v11329_v0 = vpack.c.bf16 %v20184_v5, %v20172_v48 }
 0x4e8   : > { %16294 = vmatmul.mubr.msk.bf16.gmra.mrb[12].mxu0 %vm716_vm1, %v11324_v55  ;;  %15515 = vmatprep.mubr.msk.bf16.mxu1 %vm716_vm1, %v4314_v18  ;;  %v11327_v55 = vpack.c.bf16 %v20160_v12, %v20148_v2  ;;  %v20663_v18 = vld [vmem:[%s17923_s28 + $0x396] sm:$0xff] }
 0x4e9   : > { %16297 = vmatprep.mubr.msk.bf16.mxu0 %vm716_vm1, %v11325_v10  ;;  %v20666_v10 = vld [vmem:[%s17923_s28 + $0x39e] sm:$0xff] }
 0x4ef   : > { %15516 = vmatmul.mubr.msk.bf16.gmra.mrb[104].mxu1 %vm716_vm1, %v4315_v51  ;;  %v4317_v51 = vpack.c.bf16 %v20666_v10, %v20663_v18 }
 0x4f0   : > { %16298 = vmatmul.mubr.msk.bf16.gmra.mrb[16].mxu0 %vm716_vm1, %v11326_v59  ;;  %15519 = vmatprep.mubr.msk.bf16.mxu1 %vm716_vm1, %v4316_v41  ;;  %v11328_v41 = vpack.c.bf16 %v20169_v42, %v20163_v45  ;;  %v20702_v45 = vld [vmem:[%s17923_s28 + $0x3c6] sm:$0xff]  ;;  %v20705_v42 = vld [vmem:[%s17923_s28 + $0x3ce] sm:$0xff] }
 0x4f1   : > { %16301 = vmatprep.mubr.msk.bf16.mxu0 %vm716_vm1, %v11327_v55  ;;  %v4318_v55 = vpack.c.bf16 %v20673_v63, %v20670_v7 }
 0x4f2   : > { %v20675_v2 = vpop.f32.mrb[0].mxu1 }
 0x4f3   : > { %22425 = vst [vmem:[#allocation15_spill] sm:$0xff] %v20675_v2  ;;  %v20677_v12 = vpop.f32.mrb[1].mxu1  ;;  %v11331_v2 = vpack.c.bf16 %v20208_v33, %v20196_v16 }
 0x4f4   : > { %22426 = vst [vmem:[#allocation16_spill] sm:$0xff] %v20677_v12  ;;  %v20681_v59 = vpop.f32.mrb[2].mxu1  ;;  %v20695_v12 = vld [vmem:[%s17923_s28 + $0x3b6] sm:$0xff] }
 0x4f5   : > { %22427 = vst [vmem:[#allocation17_spill] sm:$0xff] %v20681_v59  ;;  %v20687_v40 = vpop.f32.mrb[3].mxu1  ;;  %v20698_v59 = vld [vmem:[%s17923_s28 + $0x3be] sm:$0xff] }
 0x4f6   : > { %22428 = vst [vmem:[#allocation18_spill] sm:$0xff] %v20687_v40 }
 0x4f7   : > { %15520 = vmatmul.mubr.msk.bf16.gmra.mrb[108].mxu1 %vm716_vm1, %v4317_v51  ;;  %v4319_v51 = vpack.c.bf16 %v20698_v59, %v20695_v12 }
 0x4f8   : > { %16302 = vmatmul.mubr.msk.bf16.gmra.mrb[20].mxu0 %vm716_vm1, %v11328_v41  ;;  %15523 = vmatprep.mubr.msk.bf16.mxu1 %vm716_vm1, %v4318_v55  ;;  %v11330_v55 = vpack.c.bf16 %v20193_v29, %v20187_v3  ;;  %v20734_v3 = vld [vmem:[%s17923_s28 + $0x3e6] sm:$0xff]  ;;  %v20737_v29 = vld [vmem:[%s17923_s28 + $0x3ee] sm:$0xff] }
 0x4f9   : > { %16305 = vmatprep.mubr.msk.bf16.mxu0 %vm716_vm1, %v11329_v0  ;;  %v4320_v0 = vpack.c.bf16 %v20705_v42, %v20702_v45 }
 0x4fa   : > { %v20707_v48 = vpop.f32.mrb[4].mxu1 }
 0x4fb   : > { %22429 = vst [vmem:[#allocation19_spill] sm:$0xff] %v20707_v48  ;;  %v20709_v5 = vpop.f32.mrb[5].mxu1  ;;  %v11333_v48 = vpack.c.bf16 %v20232_v15, %v20220_v53 }
 0x4fc   : > { %22430 = vst [vmem:[#allocation20_spill] sm:$0xff] %v20709_v5  ;;  %v20713_v41 = vpop.f32.mrb[6].mxu1  ;;  %v20727_v5 = vld [vmem:[%s17923_s28 + $0x3d6] sm:$0xff] }
 0x4fd   : > { %22431 = vst [vmem:[#allocation21_spill] sm:$0xff] %v20713_v41  ;;  %v20719_v40 = vpop.f32.mrb[7].mxu1  ;;  %v20730_v41 = vld [vmem:[%s17923_s28 + $0x3de] sm:$0xff] }
 0x4fe   : > { %22432 = vst [vmem:[#allocation22_spill] sm:$0xff] %v20719_v40 }
 0x4ff   : > { %15524 = vmatmul.mubr.msk.bf16.gmra.mrb[112].mxu1 %vm716_vm1, %v4319_v51  ;;  %v4321_v51 = vpack.c.bf16 %v20730_v41, %v20727_v5 }
 0x500   : > { %16306 = vmatmul.mubr.msk.bf16.gmra.mrb[24].mxu0 %vm716_vm1, %v11330_v55  ;;  %15527 = vmatprep.mubr.msk.bf16.mxu1 %vm716_vm1, %v4320_v0  ;;  %v11332_v0 = vpack.c.bf16 %v20217_v39, %v20211_v34  ;;  %v20766_v34 = vld [vmem:[%s17923_s28 + $0x406] sm:$0xff]  ;;  %v20769_v39 = vld [vmem:[%s17923_s28 + $0x40e] sm:$0xff] }
 0x501   : > { %16309 = vmatprep.mubr.msk.bf16.mxu0 %vm716_vm1, %v11331_v2  ;;  %v4322_v2 = vpack.c.bf16 %v20737_v29, %v20734_v3 }
 0x502   : > { %v20739_v16 = vpop.f32.mrb[8].mxu1 }
 0x503   : > { %22433 = vst [vmem:[#allocation23_spill] sm:$0xff] %v20739_v16  ;;  %v20741_v33 = vpop.f32.mrb[9].mxu1  ;;  %v11335_v16 = vpack.c.bf16 %v20256_v57, %v20244_v36 }
 0x504   : > { %22434 = vst [vmem:[#allocation24_spill] sm:$0xff] %v20741_v33  ;;  %v20745_v55 = vpop.f32.mrb[10].mxu1  ;;  %v20759_v33 = vld [vmem:[%s17923_s28 + $0x3f6] sm:$0xff] }
 0x505   : > { %22435 = vst [vmem:[#allocation25_spill] sm:$0xff] %v20745_v55  ;;  %v20751_v40 = vpop.f32.mrb[11].mxu1  ;;  %v20762_v55 = vld [vmem:[%s17923_s28 + $0x3fe] sm:$0xff] }
 0x506   : > { %22436 = vst [vmem:[#allocation26_spill] sm:$0xff] %v20751_v40 }
 0x507   : > { %15528 = vmatmul.mubr.msk.bf16.gmra.mrb[116].mxu1 %vm716_vm1, %v4321_v51  ;;  %v4323_v51 = vpack.c.bf16 %v20762_v55, %v20759_v33 }
 0x508   : > { %16310 = vmatmul.mubr.msk.bf16.gmra.mrb[28].mxu0 %vm716_vm1, %v11332_v0  ;;  %15531 = vmatprep.mubr.msk.bf16.mxu1 %vm716_vm1, %v4322_v2  ;;  %v11334_v2 = vpack.c.bf16 %v20241_v28, %v20235_v1  ;;  %v20798_v1 = vld [vmem:[%s17923_s28 + $0x426] sm:$0xff]  ;;  %v4220_v28 = vld [vmem:[%s17923_s28 + $0x42e] sm:$0xff] }
 0x509   : > { %16313 = vmatprep.mubr.msk.bf16.mxu0 %vm716_vm1, %v11333_v48  ;;  %v4324_v48 = vpack.c.bf16 %v20769_v39, %v20766_v34 }
 0x50a   : > { %v20771_v53 = vpop.f32.mrb[12].mxu1 }
 0x50b   : > { %22437 = vst [vmem:[#allocation27_spill] sm:$0xff] %v20771_v53  ;;  %v20773_v15 = vpop.f32.mrb[13].mxu1  ;;  %v11337_v53 = vpack.c.bf16 %v20280_v47, %v20268_v9 }
 0x50c   : > { %22438 = vst [vmem:[#allocation2_spill] sm:$0xff] %v20773_v15  ;;  %v20777_v0 = vpop.f32.mrb[14].mxu1  ;;  %v20791_v15 = vld [vmem:[%s17923_s28 + $0x416] sm:$0xff] }
 0x50d   : > { %22439 = vst [vmem:[#allocation47_spill] sm:$0xff] %v20777_v0  ;;  %v20783_v40 = vpop.f32.mrb[15].mxu1  ;;  %v20794_v0 = vld [vmem:[%s17923_s28 + $0x41e] sm:$0xff] }
 0x50e   : > { %22440 = vst [vmem:[#allocation48_spill] sm:$0xff] %v20783_v40  ;;  %v4326_v40 = vpack.c.bf16 %v4220_v28, %v20798_v1 }
 0x50f   : > { %15532 = vmatmul.mubr.msk.bf16.gmra.mrb[120].mxu1 %vm716_vm1, %v4323_v51  ;;  %v4325_v51 = vpack.c.bf16 %v20794_v0, %v20791_v15 }
 0x510   : > { %16314 = vmatmul.mubr.msk.bf16.gmra.mrb[32].mxu0 %vm716_vm1, %v11334_v2  ;;  %15535 = vmatprep.mubr.msk.bf16.mxu1 %vm716_vm1, %v4324_v48  ;;  %v11336_v48 = vpack.c.bf16 %v20265_v19, %v20259_v30  ;;  %v4223_v30 = vld [vmem:[%s17923_s28 + $0x446] sm:$0xff]  ;;  %v4224_v19 = vld [vmem:[%s17923_s28 + $0x44e] sm:$0xff] }
 0x511   : > { %16317 = vmatprep.mubr.msk.bf16.mxu0 %vm716_vm1, %v11335_v16 }
 0x512   : > { %v20801_v36 = vpop.f32.mrb[16].mxu1 }
 0x513   : > { %22441 = vst [vmem:[#allocation49_spill] sm:$0xff] %v20801_v36  ;;  %v20803_v57 = vpop.f32.mrb[17].mxu1  ;;  %v4222_v36 = vld [vmem:[%s17923_s28 + $0x43e] sm:$0xff] }
 0x514   : > { %22442 = vst [vmem:[#allocation50_spill] sm:$0xff] %v20803_v57  ;;  %v20807_v2 = vpop.f32.mrb[18].mxu1  ;;  %v4221_v57 = vld [vmem:[%s17923_s28 + $0x436] sm:$0xff] }
 0x515   : > { %v20812_v16 = vpop.f32.mrb[19].mxu1  ;;  %v4327_v9 = vpack.c.bf16 %v4222_v36, %v4221_v57  ;;  %v4226_v36 = vld [vmem:[%s17923_s28 + $0x45e] sm:$0xff]  ;;  %v4227_v57 = vld [vmem:[%s17923_s28 + $0x466] sm:$0xff] }
 0x516   : > { %22443 = vst [vmem:[#allocation51_spill] sm:$0xff] %v20812_v16 }
 0x517   : > { %15536 = vmatmul.mubr.msk.bf16.gmra.mrb[124].mxu1 %vm716_vm1, %v4325_v51  ;;  %v4328_v51 = vpack.c.bf16 %v4224_v19, %v4223_v30  ;;  %v11340_v19 = vpack.c.bf16 %v20313_v43, %v20307_v56  ;;  %v4232_v56 = vld [vmem:[%s17923_s28 + $0x48e] sm:$0xff] }
 0x518   : > { %16318 = vmatmul.mubr.msk.bf16.gmra.mrb[36].mxu0 %vm716_vm1, %v11336_v48  ;;  %15539 = vmatprep.mubr.msk.bf16.mxu1 %vm716_vm1, %v4326_v40  ;;  %v11338_v40 = vpack.c.bf16 %v20289_v32, %v20283_v52  ;;  %v4228_v52 = vld [vmem:[%s17923_s28 + $0x46e] sm:$0xff] }
 0x519   : > { %16321 = vmatprep.mubr.msk.bf16.mxu0 %vm716_vm1, %v11337_v53  ;;  %v11339_v53 = vpack.c.bf16 %v20304_v49, %v20292_v58 }
 0x51a   : > { %v20824_v28 = vpop.f32.mrb[20].mxu1 }
 0x51b   : > { %22444 = vst [vmem:[#allocation52_spill] sm:$0xff] %v20824_v28  ;;  %v20826_v16 = vpop.f32.mrb[21].mxu1  ;;  %v4225_v28 = vld [vmem:[%s17923_s28 + $0x456] sm:$0xff] }
 0x51c   : > { %v20828_v47 = vpop.f32.mrb[22].mxu1  ;;  %v4329_v58 = vpack.c.bf16 %v4226_v36, %v4225_v28  ;;  %v4230_v28 = vld [vmem:[%s17923_s28 + $0x47e] sm:$0xff]  ;;  %v4231_v36 = vld [vmem:[%s17923_s28 + $0x486] sm:$0xff] }
 0x51d   : > { %v20832_v48 = vpop.f32.mrb[23].mxu1 }
 0x51f   : > { %15540 = vmatmul.mubr.msk.bf16.gmra.mrb[128].mxu1 %vm716_vm1, %v4327_v9  ;;  %v4330_v9 = vpack.c.bf16 %v4228_v52, %v4227_v57 }
 0x520   : > { %16322 = vmatmul.mubr.msk.bf16.gmra.mrb[40].mxu0 %vm716_vm1, %v11338_v40  ;;  %15543 = vmatprep.mubr.msk.bf16.mxu1 %vm716_vm1, %v4328_v51  ;;  %v22449_v51 = vld [vmem:[#allocation28_spill] sm:$0xff] }
 0x521   : > { %16325 = vmatprep.mubr.msk.bf16.mxu0 %vm716_vm1, %v11339_v53  ;;  %v11341_v53 = vpack.c.bf16 %v22449_v51, %v20316_v21  ;;  %v4332_v51 = vpack.c.bf16 %v4232_v56, %v4231_v36  ;;  %v4236_v36 = vld [vmem:[%s17923_s28 + $0x4ae] sm:$0xff] }
 0x522   : > { %v20844_v32 = vpop.f32.mrb[24].mxu1 }
 0x523   : > { %22445 = vst [vmem:[#allocation53_spill] sm:$0xff] %v20844_v32  ;;  %v20846_v30 = vpop.f32.mrb[25].mxu1  ;;  %v4229_v32 = vld [vmem:[%s17923_s28 + $0x476] sm:$0xff] }
 0x524   : > { %22446 = vst [vmem:[#allocation54_spill] sm:$0xff] %v20846_v30  ;;  %v20848_v49 = vpop.f32.mrb[26].mxu1  ;;  %v4331_v21 = vpack.c.bf16 %v4230_v28, %v4229_v32  ;;  %v22457_v30 = vld [vmem:[#allocation32_spill] sm:$0xff]  ;;  %v4234_v32 = vld [vmem:[%s17923_s28 + $0x49e] sm:$0xff]  ;;  %v4235_v28 = vld [vmem:[%s17923_s28 + $0x4a6] sm:$0xff] }
 0x525   : > { %22447 = vst [vmem:[#allocation55_spill] sm:$0xff] %v20848_v49  ;;  %v20852_v40 = vpop.f32.mrb[27].mxu1  ;;  %v22456_v49 = vld [vmem:[#allocation31_spill] sm:$0xff] }
 0x526   : > { %22448 = vst [vmem:[#allocation56_spill] sm:$0xff] %v20852_v40 }
 0x527   : > { %15544 = vmatmul.mubr.msk.bf16.gmra.mrb[132].mxu1 %vm716_vm1, %v4329_v58  ;;  %v22453_v58 = vld [vmem:[#allocation29_spill] sm:$0xff] }
 0x528   : > { %16326 = vmatmul.mubr.msk.bf16.gmra.mrb[44].mxu0 %vm716_vm1, %v11340_v19  ;;  %15547 = vmatprep.mubr.msk.bf16.mxu1 %vm716_vm1, %v4330_v9  ;;  %v22454_v19 = vld [vmem:[#allocation30_spill] sm:$0xff] }
 0x529   : > { %16329 = vmatprep.mubr.msk.bf16.mxu0 %vm716_vm1, %v11341_v53  ;;  %v11342_v9 = vpack.c.bf16 %v22454_v19, %v22453_v58  ;;  %v11343_v53 = vpack.c.bf16 %v22457_v30, %v22456_v49  ;;  %v22462_v19 = vld [vmem:[#allocation34_spill] sm:$0xff] }
 0x52a   : > { %v20864_v43 = vpop.f32.mrb[28].mxu1 }
 0x52b   : > { %22450 = vst [vmem:[#allocation28_spill] sm:$0xff] %v20864_v43  ;;  %v20866_v57 = vpop.f32.mrb[29].mxu1  ;;  %v4233_v43 = vld [vmem:[%s17923_s28 + $0x496] sm:$0xff] }
 0x52c   : > { %22451 = vst [vmem:[#allocation57_spill] sm:$0xff] %v20866_v57  ;;  %v20868_v52 = vpop.f32.mrb[30].mxu1  ;;  %v4333_v30 = vpack.c.bf16 %v4234_v32, %v4233_v43  ;;  %v22465_v57 = vld [vmem:[#allocation36_spill] sm:$0xff]  ;;  %v4238_v43 = vld [vmem:[%s17923_s28 + $0x4be] sm:$0xff]  ;;  %v4239_v32 = vld [vmem:[%s17923_s28 + $0x4c6] sm:$0xff] }
 0x52d   : > { %22452 = vst [vmem:[#allocation58_spill] sm:$0xff] %v20868_v52  ;;  %v20872_v40 = vpop.f32.mrb[31].mxu1  ;;  %v22464_v52 = vld [vmem:[#allocation35_spill] sm:$0xff] }
 0x52e   : > { %22455 = vst [vmem:[#allocation29_spill] sm:$0xff] %v20872_v40 }
 0x52f   : > { %15548 = vmatmul.mubr.msk.bf16.gmra.mrb[136].mxu1 %vm716_vm1, %v4331_v21  ;;  %v22461_v21 = vld [vmem:[#allocation33_spill] sm:$0xff] }
 0x530   : > { %16330 = vmatmul.mubr.msk.bf16.gmra.mrb[48].mxu0 %vm716_vm1, %v11342_v9  ;;  %15551 = vmatprep.mubr.msk.bf16.mxu1 %vm716_vm1, %v4332_v51  ;;  %v11344_v9 = vpack.c.bf16 %v22462_v19, %v22461_v21  ;;  %v4334_v51 = vpack.c.bf16 %v4236_v36, %v4235_v28  ;;  %v4240_v28 = vld [vmem:[%s17923_s28 + $0x4ce] sm:$0xff]  ;;  %v22470_v19 = vld [vmem:[#allocation38_spill] sm:$0xff] }
 0x531   : > { %16333 = vmatprep.mubr.msk.bf16.mxu0 %vm716_vm1, %v11343_v53  ;;  %v11345_v53 = vpack.c.bf16 %v22465_v57, %v22464_v52 }
 0x532   : > { %v20884_v56 = vpop.f32.mrb[32].mxu1 }
 0x533   : > { %22458 = vst [vmem:[#allocation30_spill] sm:$0xff] %v20884_v56  ;;  %v20886_v58 = vpop.f32.mrb[33].mxu1  ;;  %v4237_v56 = vld [vmem:[%s17923_s28 + $0x4b6] sm:$0xff] }
 0x534   : > { %22459 = vst [vmem:[#allocation31_spill] sm:$0xff] %v20886_v58  ;;  %v20888_v49 = vpop.f32.mrb[34].mxu1  ;;  %v4335_v57 = vpack.c.bf16 %v4238_v43, %v4237_v56  ;;  %v22473_v58 = vld [vmem:[#allocation40_spill] sm:$0xff]  ;;  %v4242_v56 = vld [vmem:[%s17923_s28 + $0x4de] sm:$0xff]  ;;  %v4243_v43 = vld [vmem:[%s17923_s28 + $0x4e6] sm:$0xff] }
 0x535   : > { %22460 = vst [vmem:[#allocation32_spill] sm:$0xff] %v20888_v49  ;;  %v20892_v40 = vpop.f32.mrb[35].mxu1  ;;  %v22472_v49 = vld [vmem:[#allocation39_spill] sm:$0xff] }
 0x536   : > { %22463 = vst [vmem:[#allocation33_spill] sm:$0xff] %v20892_v40 }
 0x537   : > { %15552 = vmatmul.mubr.msk.bf16.gmra.mrb[140].mxu1 %vm716_vm1, %v4333_v30  ;;  %v22469_v30 = vld [vmem:[#allocation37_spill] sm:$0xff] }
 0x538   : > { %16334 = vmatmul.mubr.msk.bf16.gmra.mrb[52].mxu0 %vm716_vm1, %v11344_v9  ;;  %15555 = vmatprep.mubr.msk.bf16.mxu1 %vm716_vm1, %v4334_v51  ;;  %v11346_v9 = vpack.c.bf16 %v22470_v19, %v22469_v30  ;;  %v4336_v51 = vpack.c.bf16 %v4240_v28, %v4239_v32  ;;  %v4244_v32 = vld [vmem:[%s17923_s28 + $0x4ee] sm:$0xff]  ;;  %v22478_v19 = vld [vmem:[#allocation42_spill] sm:$0xff] }
 0x539   : > { %16337 = vmatprep.mubr.msk.bf16.mxu0 %vm716_vm1, %v11345_v53  ;;  %v11347_v53 = vpack.c.bf16 %v22473_v58, %v22472_v49 }
 0x53a   : > { %v20904_v36 = vpop.f32.mrb[36].mxu1 }
 0x53b   : > { %22466 = vst [vmem:[#allocation34_spill] sm:$0xff] %v20904_v36  ;;  %v20906_v21 = vpop.f32.mrb[37].mxu1  ;;  %v4241_v36 = vld [vmem:[%s17923_s28 + $0x4d6] sm:$0xff] }
 0x53c   : > { %22467 = vst [vmem:[#allocation35_spill] sm:$0xff] %v20906_v21  ;;  %v20908_v52 = vpop.f32.mrb[38].mxu1  ;;  %v4337_v58 = vpack.c.bf16 %v4242_v56, %v4241_v36  ;;  %v22481_v21 = vld [vmem:[#allocation3_spill] sm:$0xff]  ;;  %v4246_v36 = vld [vmem:[%s17923_s28 + $0x4fe] sm:$0xff] }
 0x53d   : > { %22468 = vst [vmem:[#allocation36_spill] sm:$0xff] %v20908_v52  ;;  %v20912_v40 = vpop.f32.mrb[39].mxu1  ;;  %v22480_v52 = vld [vmem:[#allocation43_spill] sm:$0xff] }
 0x53e   : > { %22471 = vst [vmem:[#allocation37_spill] sm:$0xff] %v20912_v40  ;;  %v4247_v56 = vld [vmem:[%s17923_s28 + $0x506] sm:$0xff] }
 0x53f   : > { %15556 = vmatmul.mubr.msk.bf16.gmra.mrb[144].mxu1 %vm716_vm1, %v4335_v57  ;;  %v22477_v57 = vld [vmem:[#allocation41_spill] sm:$0xff] }
 0x540   : > { %16338 = vmatmul.mubr.msk.bf16.gmra.mrb[56].mxu0 %vm716_vm1, %v11346_v9  ;;  %15559 = vmatprep.mubr.msk.bf16.mxu1 %vm716_vm1, %v4336_v51  ;;  %v11348_v9 = vpack.c.bf16 %v22478_v19, %v22477_v57  ;;  %v4338_v51 = vpack.c.bf16 %v4244_v32, %v4243_v43  ;;  %v4248_v43 = vld [vmem:[%s17923_s28 + $0x50e] sm:$0xff]  ;;  %v22485_v19 = vld [vmem:[#allocation45_spill] sm:$0xff] }
 0x541   : > { %16341 = vmatprep.mubr.msk.bf16.mxu0 %vm716_vm1, %v11347_v53  ;;  %v11349_v53 = vpack.c.bf16 %v22481_v21, %v22480_v52 }
 0x542   : > { %v20924_v28 = vpop.f32.mrb[40].mxu1 }
 0x543   : > { %22474 = vst [vmem:[#allocation38_spill] sm:$0xff] %v20924_v28  ;;  %v20926_v30 = vpop.f32.mrb[41].mxu1  ;;  %v4245_v28 = vld [vmem:[%s17923_s28 + $0x4f6] sm:$0xff] }
 0x544   : > { %22475 = vst [vmem:[#allocation39_spill] sm:$0xff] %v20926_v30  ;;  %v20928_v49 = vpop.f32.mrb[42].mxu1  ;;  %v4339_v21 = vpack.c.bf16 %v4246_v36, %v4245_v28  ;;  %v22488_v30 = vld [vmem:[#allocation4_spill] sm:$0xff]  ;;  %v4250_v28 = vld [vmem:[%s17923_s28 + $0x51e] sm:$0xff]  ;;  %v4251_v36 = vld [vmem:[%s17923_s28 + $0x526] sm:$0xff] }
 0x545   : > { %22476 = vst [vmem:[#allocation40_spill] sm:$0xff] %v20928_v49  ;;  %v20932_v40 = vpop.f32.mrb[43].mxu1  ;;  %v22487_v49 = vld [vmem:[#allocation46_spill] sm:$0xff] }
 0x546   : > { %22479 = vst [vmem:[#allocation41_spill] sm:$0xff] %v20932_v40 }
 0x547   : > { %15560 = vmatmul.mubr.msk.bf16.gmra.mrb[148].mxu1 %vm716_vm1, %v4337_v58  ;;  %v22484_v58 = vld [vmem:[#allocation44_spill] sm:$0xff] }
 0x548   : > { %16342 = vmatmul.mubr.msk.bf16.gmra.mrb[60].mxu0 %vm716_vm1, %v11348_v9  ;;  %15563 = vmatprep.mubr.msk.bf16.mxu1 %vm716_vm1, %v4338_v51  ;;  %v11350_v9 = vpack.c.bf16 %v22485_v19, %v22484_v58  ;;  %v4340_v51 = vpack.c.bf16 %v4248_v43, %v4247_v56  ;;  %v4252_v56 = vld [vmem:[%s17923_s28 + $0x52e] sm:$0xff]  ;;  %v22492_v19 = vld [vmem:[#allocation6_spill] sm:$0xff] }
 0x549   : > { %16345 = vmatprep.mubr.msk.bf16.mxu0 %vm716_vm1, %v11349_v53  ;;  %v11351_v53 = vpack.c.bf16 %v22488_v30, %v22487_v49 }
 0x54a   : > { %v20944_v32 = vpop.f32.mrb[44].mxu1 }
 0x54b   : > { %22482 = vst [vmem:[#allocation42_spill] sm:$0xff] %v20944_v32  ;;  %v20946_v57 = vpop.f32.mrb[45].mxu1  ;;  %v4249_v32 = vld [vmem:[%s17923_s28 + $0x516] sm:$0xff] }
 0x54c   : > { %v20948_v52 = vpop.f32.mrb[46].mxu1  ;;  %v4341_v30 = vpack.c.bf16 %v4250_v28, %v4249_v32  ;;  %v4254_v32 = vld [vmem:[%s17923_s28 + $0x53e] sm:$0xff]  ;;  %v4255_v28 = vld [vmem:[%s17923_s28 + $0x546] sm:$0xff] }
 0x54d   : > { %22483 = vst [vmem:[#allocation43_spill] sm:$0xff] %v20948_v52  ;;  %v20952_v40 = vpop.f32.mrb[47].mxu1  ;;  %v22494_v52 = vld [vmem:[#allocation7_spill] sm:$0xff] }
 0x54e   : > { %22486 = vst [vmem:[#allocation3_spill] sm:$0xff] %v20952_v40 }
 0x54f   : > { %15564 = vmatmul.mubr.msk.bf16.gmra.mrb[152].mxu1 %vm716_vm1, %v4339_v21  ;;  %v22491_v21 = vld [vmem:[#allocation5_spill] sm:$0xff] }
 0x550   : > { %16346 = vmatmul.mubr.msk.bf16.gmra.mrb[64].mxu0 %vm716_vm1, %v11350_v9  ;;  %15567 = vmatprep.mubr.msk.bf16.mxu1 %vm716_vm1, %v4340_v51  ;;  %v11352_v9 = vpack.c.bf16 %v22492_v19, %v22491_v21  ;;  %v4342_v51 = vpack.c.bf16 %v4252_v56, %v4251_v36  ;;  %v4256_v36 = vld [vmem:[%s17923_s28 + $0x54e] sm:$0xff]  ;;  %v22497_v19 = vld [vmem:[#allocation9_spill] sm:$0xff] }
 0x551   : > { %16349 = vmatprep.mubr.msk.bf16.mxu0 %vm716_vm1, %v11351_v53  ;;  %v11353_v53 = vpack.c.bf16 %v20472_v31, %v22494_v52 }
 0x552   : > { %v20964_v43 = vpop.f32.mrb[48].mxu1 }
 0x553   : > { %22489 = vst [vmem:[#allocation44_spill] sm:$0xff] %v20964_v43  ;;  %v20966_v58 = vpop.f32.mrb[49].mxu1  ;;  %v4253_v43 = vld [vmem:[%s17923_s28 + $0x536] sm:$0xff] }
 0x554   : > { %v20968_v49 = vpop.f32.mrb[50].mxu1  ;;  %v4343_v31 = vpack.c.bf16 %v4254_v32, %v4253_v43  ;;  %v4258_v43 = vld [vmem:[%s17923_s28 + $0x55e] sm:$0xff]  ;;  %v4259_v32 = vld [vmem:[%s17923_s28 + $0x566] sm:$0xff] }
 0x555   : > { %22490 = vst [vmem:[#allocation45_spill] sm:$0xff] %v20968_v49  ;;  %v20972_v40 = vpop.f32.mrb[51].mxu1  ;;  %v22498_v49 = vld [vmem:[#allocation10_spill] sm:$0xff] }
 0x556   : > { %22493 = vst [vmem:[#allocation46_spill] sm:$0xff] %v20972_v40 }
 0x557   : > { %15568 = vmatmul.mubr.msk.bf16.gmra.mrb[156].mxu1 %vm716_vm1, %v4341_v30  ;;  %v22496_v30 = vld [vmem:[#allocation8_spill] sm:$0xff] }
 0x558   : > { %16350 = vmatmul.mubr.msk.bf16.gmra.mrb[68].mxu0 %vm716_vm1, %v11352_v9  ;;  %15571 = vmatprep.mubr.msk.bf16.mxu1 %vm716_vm1, %v4342_v51  ;;  %v11354_v9 = vpack.c.bf16 %v22497_v19, %v22496_v30  ;;  %v4344_v51 = vpack.c.bf16 %v4256_v36, %v4255_v28  ;;  %v4260_v28 = vld [vmem:[%s17923_s28 + $0x56e] sm:$0xff] }
 0x559   : > { %16353 = vmatprep.mubr.msk.bf16.mxu0 %vm716_vm1, %v11353_v53  ;;  %v11355_v53 = vpack.c.bf16 %v20496_v22, %v22498_v49  ;;  %v4346_v19 = vpack.c.bf16 %v4260_v28, %v4259_v32  ;;  %v22501_v32 = vld [vmem:[#allocation11_spill] sm:$0xff] }
 0x55a   : > { %v20984_v56 = vpop.f32.mrb[52].mxu1  ;;  %v11358_v28 = vpack.c.bf16 %v20528_v13, %v22501_v32  ;;  %v5595_v13 = vld [vmem:[%s17923_s28 + $0x30f] sm:$0xff]  ;;  %v11360_v32 = vpack.c.bf16 %v20550_v24, %v20546_v8 }
 0x55b   : > { %22495 = vst [vmem:[#allocation4_spill] sm:$0xff] %v20984_v56  ;;  %v20986_v21 = vpop.f32.mrb[53].mxu1  ;;  %v4257_v56 = vld [vmem:[%s17923_s28 + $0x556] sm:$0xff] }
 0x55c   : > { %v20988_v52 = vpop.f32.mrb[54].mxu1  ;;  %v4345_v22 = vpack.c.bf16 %v4258_v43, %v4257_v56  ;;  %v5590_v56 = vld [vmem:[%s17923_s28 + $0x2e7] sm:$0xff]  ;;  %v5599_v8 = vld [vmem:[%s17923_s28 + $0x32f] sm:$0xff] }
 0x55d   : > { %v20992_v40 = vpop.f32.mrb[55].mxu1 }
 0x55f   : > { %15572 = vmatmul.mubr.msk.bf16.gmra.mrb[160].mxu1 %vm716_vm1, %v4343_v31  ;;  %v11356_v31 = vpack.c.bf16 %v20505_v27, %v20499_v26  ;;  %v5591_v26 = vld [vmem:[%s17923_s28 + $0x2ef] sm:$0xff] }
 0x560   : > { %16354 = vmatmul.mubr.msk.bf16.gmra.mrb[72].mxu0 %vm716_vm1, %v11354_v9  ;;  %15575 = vmatprep.mubr.msk.bf16.mxu1 %vm716_vm1, %v4344_v51  ;;  %v11357_v51 = vpack.c.bf16 %v20520_v25, %v20508_v61 }
 0x561   : > { %16357 = vmatprep.mubr.msk.bf16.mxu0 %vm716_vm1, %v11355_v53  ;;  %v4261_v53 = vld [vmem:[%s17923_s28 + $0x576] sm:$0xff] }
 0x562   : > { %v21004_v36 = vpop.f32.mrb[56].mxu1  ;;  %v4347_v61 = vpack.c.bf16 %v4261_v53, %v4261_v53  ;;  %v5593_v53 = vld [vmem:[%s17923_s28 + $0x2ff] sm:$0xff] }
 0x563   : > { %v21006_v30 = vpop.f32.mrb[57].mxu1 }
 0x564   : > { %v21008_v49 = vpop.f32.mrb[58].mxu1 }
 0x565   : > { %v21012_v9 = vpop.f32.mrb[59].mxu1 }
 0x567   : > { %15576 = vmatmul.mubr.msk.bf16.gmra.mrb[164].mxu1 %vm716_vm1, %v4345_v22  ;;  %v5717_v22 = vpack.c.bf16 %v5591_v26, %v5590_v56 }
 0x568   : > { %16358 = vmatmul.mubr.msk.bf16.gmra.mrb[76].mxu0 %vm716_vm1, %v11356_v31  ;;  %15579 = vmatprep.mubr.msk.bf16.mxu1 %vm716_vm1, %v4346_v19  ;;  %v22502_v19 = vld [vmem:[#allocation12_spill] sm:$0xff] }
 0x569   : > { %16361 = vmatprep.mubr.msk.bf16.mxu0 %vm716_vm1, %v11357_v51  ;;  %v11359_v51 = vpack.c.bf16 %v20543_v44, %v22502_v19  ;;  %v11361_v19 = vpack.c.bf16 %v20567_v35, %v20553_v38 }
 0x56a   : > { %v21023_v27 = vpop.f32.mrb[60].mxu1 }
 0x56b   : > { %22499 = vst [vmem:[#allocation5_spill] sm:$0xff] %v21023_v27  ;;  %v21025_v43 = vpop.f32.mrb[61].mxu1  ;;  %v5592_v27 = vld [vmem:[%s17923_s28 + $0x2f7] sm:$0xff] }
 0x56c   : > { %v21027_v25 = vpop.f32.mrb[62].mxu1  ;;  %v5718_v44 = vpack.c.bf16 %v5593_v53, %v5592_v27  ;;  %v5597_v27 = vld [vmem:[%s17923_s28 + $0x31f] sm:$0xff]  ;;  %v5598_v53 = vld [vmem:[%s17923_s28 + $0x327] sm:$0xff] }
 0x56d   : > { %22500 = vst [vmem:[#allocation6_spill] sm:$0xff] %v21027_v25  ;;  %v21031_v31 = vpop.f32.mrb[63].mxu1  ;;  %v5594_v25 = vld [vmem:[%s17923_s28 + $0x307] sm:$0xff] }
 0x56f   : > { %15580 = vmatmul.mubr.msk.bf16.gmra.mrb[168].mxu1 %vm716_vm1, %v4347_v61 }
 0x570   : > { %16362 = vmatmul.mubr.msk.bf16.gmra.mrb[80].mxu0 %vm716_vm1, %v11358_v28  ;;  %15673 = vmatprep.mubr.msk.bf16.mxu1 %vm716_vm1, %v5717_v22  ;;  %v5719_v28 = vpack.c.bf16 %v5595_v13, %v5594_v25  ;;  %v11362_v13 = vpack.c.bf16 %v20574_v37, %v20570_v46  ;;  %v5603_v46 = vld [vmem:[%s17923_s28 + $0x34f] sm:$0xff] }
 0x571   : > { %16365 = vmatprep.mubr.msk.bf16.mxu0 %vm716_vm1, %v11359_v51  ;;  %v5596_v51 = vld [vmem:[%s17923_s28 + $0x317] sm:$0xff] }
 0x572   : > { %v21043_v56 = vpop.f32.mrb[64].mxu1  ;;  %v5720_v38 = vpack.c.bf16 %v5597_v27, %v5596_v51  ;;  %v5601_v51 = vld [vmem:[%s17923_s28 + $0x33f] sm:$0xff]  ;;  %v5602_v27 = vld [vmem:[%s17923_s28 + $0x347] sm:$0xff] }
 0x573   : > { %v21045_v26 = vpop.f32.mrb[65].mxu1 }
 0x574   : > { %v21047_v61 = vpop.f32.mrb[66].mxu1 }
 0x575   : > { %v21051_v22 = vpop.f32.mrb[67].mxu1 }
 0x577   : > { %15674 = vmatmul.mubr.msk.bf16.vlgmr.msra.gmra.mrb[88].mxu1 %vm716_vm1, %v5718_v44  ;;  %v5721_v44 = vpack.c.bf16 %v5599_v8, %v5598_v53  ;;  %v11364_v8 = vpack.c.bf16 %v20598_v60, %v20594_v62  ;;  %v5607_v62 = vld [vmem:[%s17923_s28 + $0x36f] sm:$0xff] }
 0x578   : > { %16366 = vmatmul.mubr.msk.bf16.gmra.mrb[84].mxu0 %vm716_vm1, %v11360_v32  ;;  %15677 = vmatprep.mubr.msk.bf16.mxu1 %vm716_vm1, %v5719_v28  ;;  %v11363_v28 = vpack.c.bf16 %v20591_v4, %v20577_v54 }
 0x579   : > { %16369 = vmatprep.mubr.msk.bf16.mxu0 %vm716_vm1, %v11361_v19  ;;  %v5600_v19 = vld [vmem:[%s17923_s28 + $0x337] sm:$0xff] }
 0x57a   : > { %v21063_v24 = vpop.f32.mrb[68].mxu1  ;;  %v5722_v54 = vpack.c.bf16 %v5601_v51, %v5600_v19  ;;  %v5605_v19 = vld [vmem:[%s17923_s28 + $0x35f] sm:$0xff]  ;;  %v5606_v51 = vld [vmem:[%s17923_s28 + $0x367] sm:$0xff] }
 0x57b   : > { %v21065_v25 = vpop.f32.mrb[69].mxu1 }
 0x57c   : > { %v21067_v35 = vpop.f32.mrb[70].mxu1 }
 0x57d   : > { %v21071_v32 = vpop.f32.mrb[71].mxu1 }
 0x57f   : > { %15678 = vmatmul.mubr.msk.bf16.gmra.mrb[92].mxu1 %vm716_vm1, %v5720_v38  ;;  %v5723_v38 = vpack.c.bf16 %v5603_v46, %v5602_v27  ;;  %v11366_v46 = vpack.c.bf16 %v20622_v17, %v20618_v20  ;;  %v5611_v20 = vld [vmem:[%s17923_s28 + $0x38f] sm:$0xff] }
 0x580   : > { %16370 = vmatmul.mubr.msk.bf16.gmra.mrb[88].mxu0 %vm716_vm1, %v11362_v13  ;;  %15681 = vmatprep.mubr.msk.bf16.mxu1 %vm716_vm1, %v5721_v44  ;;  %v11365_v44 = vpack.c.bf16 %v20615_v14, %v20601_v6 }
 0x581   : > { %16373 = vmatprep.mubr.msk.bf16.mxu0 %vm716_vm1, %v11363_v28  ;;  %v5604_v28 = vld [vmem:[%s17923_s28 + $0x357] sm:$0xff] }
 0x582   : > { %v21083_v37 = vpop.f32.mrb[72].mxu1  ;;  %v5724_v6 = vpack.c.bf16 %v5605_v19, %v5604_v28  ;;  %v5609_v28 = vld [vmem:[%s17923_s28 + $0x37f] sm:$0xff]  ;;  %v5610_v19 = vld [vmem:[%s17923_s28 + $0x387] sm:$0xff] }
 0x583   : > { %v21085_v53 = vpop.f32.mrb[73].mxu1 }
 0x584   : > { %v21087_v4 = vpop.f32.mrb[74].mxu1 }
 0x585   : > { %v21091_v13 = vpop.f32.mrb[75].mxu1 }
 0x587   : > { %15682 = vmatmul.mubr.msk.bf16.gmra.mrb[96].mxu1 %vm716_vm1, %v5722_v54  ;;  %v5725_v54 = vpack.c.bf16 %v5607_v62, %v5606_v51  ;;  %v22505_v62 = vld [vmem:[#allocation13_spill] sm:$0xff] }
 0x588   : > { %16374 = vmatmul.mubr.msk.bf16.gmra.mrb[92].mxu0 %vm716_vm1, %v11364_v8  ;;  %15685 = vmatprep.mubr.msk.bf16.mxu1 %vm716_vm1, %v5723_v38  ;;  %v11367_v38 = vpack.c.bf16 %v20639_v11, %v20625_v23 }
 0x589   : > { %16377 = vmatprep.mubr.msk.bf16.mxu0 %vm716_vm1, %v11365_v44  ;;  %v5608_v44 = vld [vmem:[%s17923_s28 + $0x377] sm:$0xff] }
 0x58a   : > { %v21103_v60 = vpop.f32.mrb[76].mxu1  ;;  %v5726_v23 = vpack.c.bf16 %v5609_v28, %v5608_v44  ;;  %v5613_v44 = vld [vmem:[%s17923_s28 + $0x39f] sm:$0xff]  ;;  %v5614_v28 = vld [vmem:[%s17923_s28 + $0x3a7] sm:$0xff] }
 0x58b   : > { %v21105_v27 = vpop.f32.mrb[77].mxu1 }
 0x58c   : > { %v21107_v14 = vpop.f32.mrb[78].mxu1 }
 0x58d   : > { %v21111_v8 = vpop.f32.mrb[79].mxu1 }
 0x58e   : > { %22503 = vst [vmem:[#allocation7_spill] sm:$0xff] %v21111_v8  ;;  %v22507_v8 = vld [vmem:[#allocation14_spill] sm:$0xff] }
 0x58f   : > { %15686 = vmatmul.mubr.msk.bf16.gmra.mrb[100].mxu1 %vm716_vm1, %v5724_v6  ;;  %v11368_v6 = vpack.c.bf16 %v22505_v62, %v20642_v50  ;;  %v5615_v50 = vld [vmem:[%s17923_s28 + $0x3af] sm:$0xff] }
 0x590   : > { %16378 = vmatmul.mubr.msk.bf16.gmra.mrb[96].mxu0 %vm716_vm1, %v11366_v46  ;;  %15689 = vmatprep.mubr.msk.bf16.mxu1 %vm716_vm1, %v5725_v54  ;;  %v5727_v46 = vpack.c.bf16 %v5611_v20, %v5610_v19  ;;  %v5729_v62 = vpack.c.bf16 %v5615_v50, %v5614_v28 }
 0x591   : > { %16381 = vmatprep.mubr.msk.bf16.mxu0 %vm716_vm1, %v11367_v38  ;;  %v11369_v38 = vpack.c.bf16 %v20663_v18, %v22507_v8 }
 0x592   : > { %v21123_v17 = vpop.f32.mrb[80].mxu1 }
 0x593   : > { %22504 = vst [vmem:[#allocation8_spill] sm:$0xff] %v21123_v17  ;;  %v21125_v51 = vpop.f32.mrb[81].mxu1  ;;  %v5612_v17 = vld [vmem:[%s17923_s28 + $0x397] sm:$0xff] }
 0x594   : > { %v21127_v11 = vpop.f32.mrb[82].mxu1  ;;  %v5728_v18 = vpack.c.bf16 %v5613_v44, %v5612_v17  ;;  %v5617_v17 = vld [vmem:[%s17923_s28 + $0x3bf] sm:$0xff]  ;;  %v5618_v44 = vld [vmem:[%s17923_s28 + $0x3c7] sm:$0xff] }
 0x595   : > { %v21131_v54 = vpop.f32.mrb[83].mxu1 }
 0x596   : > { %22506 = vst [vmem:[#allocation9_spill] sm:$0xff] %v21131_v54 }
 0x597   : > { %15690 = vmatmul.mubr.msk.bf16.gmra.mrb[104].mxu1 %vm716_vm1, %v5726_v23  ;;  %v11370_v23 = vpack.c.bf16 %v20670_v7, %v20666_v10  ;;  %v21166_v7 = vld [vmem:[%s22150_s2] ss:$0 sm:$0xff] }
 0x598   : > { %16382 = vmatmul.mubr.msk.bf16.gmra.mrb[100].mxu0 %vm716_vm1, %v11368_v6  ;;  %15693 = vmatprep.mubr.msk.bf16.mxu1 %vm716_vm1, %v5727_v46  ;;  %v11371_v46 = vpack.c.bf16 %v20695_v12, %v20673_v63  ;;  %v22512_v12 = vld [vmem:[#allocation15_spill] sm:$0xff] }
 0x599   : > { %16385 = vmatprep.mubr.msk.bf16.mxu0 %vm716_vm1, %v11369_v38  ;;  %v5616_v38 = vld [vmem:[%s17923_s28 + $0x3b7] sm:$0xff] }
 0x59a   : > { %v21143_v19 = vpop.f32.mrb[84].mxu1  ;;  %v5730_v63 = vpack.c.bf16 %v5617_v17, %v5616_v38  ;;  %v11373_v38 = vpack.c.bf16 %v20727_v5, %v20705_v42  ;;  %v5620_v42 = vld [vmem:[%s17923_s28 + $0x3d7] sm:$0xff]  ;;  %v5621_v5 = vld [vmem:[%s17923_s28 + $0x3df] sm:$0xff] }
 0x59b   : > { %22508 = vst [vmem:[#allocation10_spill] sm:$0xff] %v21143_v19  ;;  %v21145_v20 = vpop.f32.mrb[85].mxu1 }
 0x59c   : > { %22509 = vst [vmem:[#allocation11_spill] sm:$0xff] %v21145_v20  ;;  %v21147_v8 = vpop.f32.mrb[86].mxu1 }
 0x59d   : > { %22510 = vst [vmem:[#allocation12_spill] sm:$0xff] %v21147_v8  ;;  %v21151_v6 = vpop.f32.mrb[87].mxu1  ;;  %v5619_v8 = vld [vmem:[%s17923_s28 + $0x3cf] sm:$0xff] }
 0x59e   : > { %22511 = vst [vmem:[#allocation13_spill] sm:$0xff] %v21151_v6 }
 0x59f   : > { %15694 = vmatmul.mubr.msk.bf16.gmra.mrb[108].mxu1 %vm716_vm1, %v5728_v18  ;;  %v11372_v18 = vpack.c.bf16 %v20702_v45, %v20698_v59 }
 0x5a0   : > { %16386 = vmatmul.mubr.msk.bf16.gmra.mrb[104].mxu0 %vm716_vm1, %v11370_v23  ;;  %15697 = vmatprep.mubr.msk.bf16.mxu1 %vm716_vm1, %v5729_v62  ;;  %v5731_v23 = vpack.c.bf16 %v5619_v8, %v5618_v44  ;;  %v21175_v62 = vld [vmem:[%s22151_s3] ss:$0 sm:$0xff] }
 0x5a1   : > { %16389 = vmatprep.mubr.msk.bf16.mxu0 %vm716_vm1, %v11371_v46  ;;  %v22513_v46 = vld [vmem:[#allocation16_spill] sm:$0xff]  ;;  %v22515_v8 = vld [vmem:[#allocation18_spill] sm:$0xff] }
 0x5a3   : > { %v16283_v10 = vpop.f32.mrb[0].mxu0 }
 0x5a4   : > { %v16455_v28 = vadd.f32 %v16283_v10, %v22512_v12  ;;  %v11700_v50 = vpop.f32.mrb[1].mxu0  ;;  %v22514_v10 = vld [vmem:[#allocation17_spill] sm:$0xff] }
 0x5a5   : > { %v16456_v6 = vadd.f32 %v11700_v50, %v22513_v46  ;;  %v16284_v20 = vpop.f32.mrb[2].mxu0 }
 0x5a6   : > { %v12566_v17 = vmul.f32 %v16455_v28, %v21166_v7  ;;  %v16457_v12 = vadd.f32 %v16284_v20, %v22514_v10  ;;  %v11703_v59 = vpop.f32.mrb[3].mxu0  ;;  %v5623_v28 = vld [vmem:[%s17923_s28 + $0x3ef] sm:$0xff] }
 0x5a7   : > { %v12564_v45 = vmul.f32 %v16456_v6, %v21166_v7  ;;  %v16458_v44 = vadd.f32 %v11703_v59, %v22515_v8  ;;  %15698 = vmatmul.mubr.msk.bf16.gmra.mrb[112].mxu1 %vm716_vm1, %v5730_v63  ;;  %v5622_v63 = vld [vmem:[%s17923_s28 + $0x3e7] sm:$0xff] }
 0x5a8   : > { %v12744_v19 = vadd.f32 %v21175_v62, %v12566_v17  ;;  %v12567_v50 = vmul.f32 %v16457_v12, %v21166_v7  ;;  %16390 = vmatmul.mubr.msk.bf16.gmra.mrb[108].mxu0 %vm716_vm1, %v11372_v18  ;;  %15701 = vmatprep.mubr.msk.bf16.mxu1 %vm716_vm1, %v5731_v23  ;;  %v5732_v12 = vpack.c.bf16 %v5621_v5, %v5620_v42 }
 0x5a9   : > { %v12742_v20 = vadd.f32 %v21175_v62, %v12564_v45  ;;  %v12565_v6 = vmul.f32 %v16458_v44, %v21166_v7  ;;  %16393 = vmatprep.mubr.msk.bf16.mxu0 %vm716_vm1, %v11373_v38  ;;  %v22516_v45 = vld [vmem:[#allocation19_spill] sm:$0xff]  ;;  %v11374_v38 = vpack.c.bf16 %v20734_v3, %v20730_v41  ;;  %v5733_v54 = vpack.c.bf16 %v5623_v28, %v5622_v63  ;;  %v22519_v63 = vld [vmem:[#allocation22_spill] sm:$0xff] }
 0x5aa   : > { %v12915_v18 = vmax.f32 %v12744_v19, 0.0  ;;  %v12745_v23 = vadd.f32 %v21175_v62, %v12567_v50  ;;  %v22517_v50 = vld [vmem:[#allocation20_spill] sm:$0xff]  ;;  %v11375_v42 = vpack.c.bf16 %v20759_v33, %v20737_v29 }
 0x5ab   : > { %v12913_v46 = vmax.f32 %v12742_v20, 0.0  ;;  %v12743_v17 = vadd.f32 %v21175_v62, %v12565_v6  ;;  %v16287_v10 = vpop.f32.mrb[4].mxu0  ;;  %v5624_v33 = vld [vmem:[%s17923_s28 + $0x3f7] sm:$0xff] }
 0x5ac   : > { %13087 = vst.msk [vmem:[%s21194_s23 + $0x10] sm:$0xff] %vm13084_vm2, %v12915_v18  ;;  %v12916_v59 = vmax.f32 %v12745_v23, 0.0  ;;  %v16459_v8 = vadd.f32 %v16287_v10, %v22516_v45  ;;  %v11716_v44 = vpop.f32.mrb[5].mxu0  ;;  %v22518_v18 = vld [vmem:[#allocation21_spill] sm:$0xff]  ;;  %v5626_v45 = vld [vmem:[%s17923_s28 + $0x407] sm:$0xff] }
 0x5ad   : > { %13085 = vst.msk [vmem:[%s21194_s23] sm:$0xff] %vm13084_vm2, %v12913_v46  ;;  %v12914_v19 = vmax.f32 %v12743_v17, 0.0  ;;  %v16460_v20 = vadd.f32 %v11716_v44, %v22517_v50  ;;  %v16288_v6 = vpop.f32.mrb[6].mxu0  ;;  %v5625_v17 = vld [vmem:[%s17923_s28 + $0x3ff] sm:$0xff] }
 0x5ae   : > { %13088 = vst.msk [vmem:[%s21194_s23 + $0x18] sm:$0xff] %vm13084_vm2, %v12916_v59  ;;  %v12570_v5 = vmul.f32 %v16459_v8, %v21166_v7  ;;  %v16461_v23 = vadd.f32 %v16288_v6, %v22518_v18  ;;  %v11719_v41 = vpop.f32.mrb[7].mxu0  ;;  %v22520_v6 = vld [vmem:[#allocation23_spill] sm:$0xff] }
 0x5af   : > { %13086 = vst.msk [vmem:[%s21194_s23 + $0x8] sm:$0xff] %vm13084_vm2, %v12914_v19  ;;  %v12568_v3 = vmul.f32 %v16460_v20, %v21166_v7  ;;  %v16462_v28 = vadd.f32 %v11719_v41, %v22519_v63  ;;  %15702 = vmatmul.mubr.msk.bf16.gmra.mrb[116].mxu1 %vm716_vm1, %v5732_v12  ;;  %v5627_v12 = vld [vmem:[%s17923_s28 + $0x40f] sm:$0xff] }
 0x5b0   : > { %v12748_v46 = vadd.f32 %v21175_v62, %v12570_v5  ;;  %v12571_v29 = vmul.f32 %v16461_v23, %v21166_v7  ;;  %16394 = vmatmul.mubr.msk.bf16.gmra.mrb[112].mxu0 %vm716_vm1, %v11374_v38  ;;  %15705 = vmatprep.mubr.msk.bf16.mxu1 %vm716_vm1, %v5733_v54  ;;  %v5734_v54 = vpack.c.bf16 %v5625_v17, %v5624_v33  ;;  %v22522_v33 = vld [vmem:[#allocation25_spill] sm:$0xff] }
 0x5b1   : > { %v12746_v10 = vadd.f32 %v21175_v62, %v12568_v3  ;;  %v12569_v59 = vmul.f32 %v16462_v28, %v21166_v7  ;;  %16397 = vmatprep.mubr.msk.bf16.mxu0 %vm716_vm1, %v11375_v42  ;;  %v11376_v42 = vpack.c.bf16 %v20766_v34, %v20762_v55  ;;  %v5735_v23 = vpack.c.bf16 %v5627_v12, %v5626_v45  ;;  %v22521_v3 = vld [vmem:[#allocation24_spill] sm:$0xff]  ;;  %v5629_v12 = vld [vmem:[%s17923_s28 + $0x41f] sm:$0xff] }
 0x5b2   : > { %v12919_v8 = vmax.f32 %v12748_v46, 0.0  ;;  %v12749_v44 = vadd.f32 %v21175_v62, %v12571_v29  ;;  %v11377_v46 = vpack.c.bf16 %v20791_v15, %v20769_v39  ;;  %v5628_v45 = vld [vmem:[%s17923_s28 + $0x417] sm:$0xff] }
 0x5b3   : > { %v12917_v19 = vmax.f32 %v12746_v10, 0.0  ;;  %v12747_v38 = vadd.f32 %v21175_v62, %v12569_v59  ;;  %v16291_v50 = vpop.f32.mrb[8].mxu0  ;;  %v22523_v10 = vld [vmem:[#allocation26_spill] sm:$0xff] }
 0x5b4   : > { %13091 = vst.msk [vmem:[%s21194_s23 + $0x30] sm:$0xff] %vm13084_vm2, %v12919_v8  ;;  %v12920_v20 = vmax.f32 %v12749_v44, 0.0  ;;  %v16463_v5 = vadd.f32 %v16291_v50, %v22520_v6  ;;  %v11732_v18 = vpop.f32.mrb[9].mxu0  ;;  %v11271_v6 = vld [vmem:[%s17923_s28 + $0x436] sm:$0xff] }
 0x5b5   : > { %13089 = vst.msk [vmem:[%s21194_s23 + $0x20] sm:$0xff] %vm13084_vm2, %v12917_v19  ;;  %v12918_v41 = vmax.f32 %v12747_v38, 0.0  ;;  %v16464_v63 = vadd.f32 %v11732_v18, %v22521_v3  ;;  %v16292_v28 = vpop.f32.mrb[10].mxu0  ;;  %v5630_v19 = vld [vmem:[%s17923_s28 + $0x427] sm:$0xff]  ;;  %v5631_v38 = vld [vmem:[%s17923_s28 + $0x42f] sm:$0xff] }
 0x5b6   : > { %13092 = vst.msk [vmem:[%s21194_s23 + $0x38] sm:$0xff] %vm13084_vm2, %v12920_v20  ;;  %v12574_v29 = vmul.f32 %v16463_v5, %v21166_v7  ;;  %v16465_v17 = vadd.f32 %v16292_v28, %v22522_v33  ;;  %v11735_v55 = vpop.f32.mrb[11].mxu0  ;;  %v11270_v20 = vld [vmem:[%s17923_s28 + $0x42e] sm:$0xff] }
 0x5b7   : > { %13090 = vst.msk [vmem:[%s21194_s23 + $0x28] sm:$0xff] %vm13084_vm2, %v12918_v41  ;;  %v12572_v34 = vmul.f32 %v16464_v63, %v21166_v7  ;;  %v16466_v59 = vadd.f32 %v11735_v55, %v22523_v10  ;;  %15706 = vmatmul.mubr.msk.bf16.gmra.mrb[120].mxu1 %vm716_vm1, %v5734_v54  ;;  %v22524_v3 = vld [vmem:[#allocation27_spill] sm:$0xff]  ;;  %v11379_v10 = vpack.c.bf16 %v11271_v6, %v11270_v20 }
 0x5b8   : > { %v12752_v39 = vadd.f32 %v21175_v62, %v12574_v29  ;;  %v12575_v15 = vmul.f32 %v16465_v17, %v21166_v7  ;;  %16398 = vmatmul.mubr.msk.bf16.gmra.mrb[116].mxu0 %vm716_vm1, %v11376_v42  ;;  %15709 = vmatprep.mubr.msk.bf16.mxu1 %vm716_vm1, %v5735_v23  ;;  %v5736_v23 = vpack.c.bf16 %v5629_v12, %v5628_v45  ;;  %v22525_v17 = vld [vmem:[#allocation2_spill] sm:$0xff] }
 0x5b9   : > { %v12750_v8 = vadd.f32 %v21175_v62, %v12572_v34  ;;  %v12573_v44 = vmul.f32 %v16466_v59, %v21166_v7  ;;  %16401 = vmatprep.mubr.msk.bf16.mxu0 %vm716_vm1, %v11377_v46  ;;  %v11378_v46 = vpack.c.bf16 %v20798_v1, %v20794_v0  ;;  %v5737_v29 = vpack.c.bf16 %v5631_v38, %v5630_v19  ;;  %v22527_v1 = vld [vmem:[#allocation48_spill] sm:$0xff]  ;;  %v5633_v38 = vld [vmem:[%s17923_s28 + $0x43f] sm:$0xff] }
 0x5ba   : > { %v12923_v50 = vmax.f32 %v12752_v39, 0.0  ;;  %v12753_v54 = vadd.f32 %v21175_v62, %v12575_v15  ;;  %v22526_v39 = vld [vmem:[#allocation47_spill] sm:$0xff]  ;;  %v5632_v19 = vld [vmem:[%s17923_s28 + $0x437] sm:$0xff] }
 0x5bb   : > { %v12921_v5 = vmax.f32 %v12750_v8, 0.0  ;;  %v12751_v18 = vadd.f32 %v21175_v62, %v12573_v44  ;;  %v16295_v42 = vpop.f32.mrb[12].mxu0  ;;  %v11273_v6 = vld [vmem:[%s17923_s28 + $0x446] sm:$0xff] }
 0x5bc   : > { %13095 = vst.msk [vmem:[%s21194_s23 + $0x50] sm:$0xff] %vm13084_vm2, %v12923_v50  ;;  %v12924_v41 = vmax.f32 %v12753_v54, 0.0  ;;  %v16467_v63 = vadd.f32 %v16295_v42, %v22524_v3  ;;  %v11748_v28 = vpop.f32.mrb[13].mxu0  ;;  %v11272_v50 = vld [vmem:[%s17923_s28 + $0x43e] sm:$0xff]  ;;  %v11275_v3 = vld [vmem:[%s17923_s28 + $0x456] sm:$0xff] }
 0x5bd   : > { %13093 = vst.msk [vmem:[%s21194_s23 + $0x40] sm:$0xff] %vm13084_vm2, %v12921_v5  ;;  %v12922_v33 = vmax.f32 %v12751_v18, 0.0  ;;  %v16468_v55 = vadd.f32 %v11748_v28, %v22525_v17  ;;  %v16296_v34 = vpop.f32.mrb[14].mxu0  ;;  %v5634_v5 = vld [vmem:[%s17923_s28 + $0x447] sm:$0xff]  ;;  %v5635_v18 = vld [vmem:[%s17923_s28 + $0x44f] sm:$0xff]  ;;  %v22528_v17 = vld [vmem:[#allocation49_spill] sm:$0xff] }
 0x5be   : > { %13096 = vst.msk [vmem:[%s21194_s23 + $0x58] sm:$0xff] %vm13084_vm2, %v12924_v41  ;;  %v12578_v59 = vmul.f32 %v16467_v63, %v21166_v7  ;;  %v16469_v15 = vadd.f32 %v16296_v34, %v22526_v39  ;;  %v11751_v45 = vpop.f32.mrb[15].mxu0  ;;  %v11274_v41 = vld [vmem:[%s17923_s28 + $0x44e] sm:$0xff] }
 0x5bf   : > { %13094 = vst.msk [vmem:[%s21194_s23 + $0x48] sm:$0xff] %vm13084_vm2, %v12922_v33  ;;  %v12576_v0 = vmul.f32 %v16468_v55, %v21166_v7  ;;  %v16470_v12 = vadd.f32 %v11751_v45, %v22527_v1  ;;  %15710 = vmatmul.mubr.msk.bf16.gmra.mrb[124].mxu1 %vm716_vm1, %v5736_v23  ;;  %v11381_v1 = vpack.c.bf16 %v11275_v3, %v11274_v41  ;;  %v5638_v41 = vld [vmem:[%s17923_s28 + $0x467] sm:$0xff]  ;;  %v5639_v3 = vld [vmem:[%s17923_s28 + $0x46f] sm:$0xff] }
 0x5c0   : > { %v12756_v8 = vadd.f32 %v21175_v62, %v12578_v59  ;;  %v12579_v44 = vmul.f32 %v16469_v15, %v21166_v7  ;;  %16402 = vmatmul.mubr.msk.bf16.gmra.mrb[120].mxu0 %vm716_vm1, %v11378_v46  ;;  %15713 = vmatprep.mubr.msk.bf16.mxu1 %vm716_vm1, %v5737_v29  ;;  %v5738_v29 = vpack.c.bf16 %v5633_v38, %v5632_v19  ;;  %v22529_v15 = vld [vmem:[#allocation50_spill] sm:$0xff]  ;;  %v22530_v38 = vld [vmem:[#allocation51_spill] sm:$0xff] }
 0x5c1   : > { %v12754_v54 = vadd.f32 %v21175_v62, %v12576_v0  ;;  %v12577_v20 = vmul.f32 %v16470_v12, %v21166_v7  ;;  %16405 = vmatprep.mubr.msk.bf16.mxu0 %vm716_vm1, %v11379_v10  ;;  %v11380_v10 = vpack.c.bf16 %v11273_v6, %v11272_v50  ;;  %v5739_v59 = vpack.c.bf16 %v5635_v18, %v5634_v5  ;;  %v5637_v6 = vld [vmem:[%s17923_s28 + $0x45f] sm:$0xff] }
 0x5c2   : > { %v12927_v42 = vmax.f32 %v12756_v8, 0.0  ;;  %v12757_v23 = vadd.f32 %v21175_v62, %v12579_v44  ;;  %v11276_v5 = vld [vmem:[%s17923_s28 + $0x45e] sm:$0xff] }
 0x5c3   : > { %v12925_v63 = vmax.f32 %v12754_v54, 0.0  ;;  %v12755_v28 = vadd.f32 %v21175_v62, %v12577_v20  ;;  %v16299_v46 = vpop.f32.mrb[16].mxu0 }
 0x5c4   : > { %13099 = vst.msk [vmem:[%s21194_s23 + $0x70] sm:$0xff] %vm13084_vm2, %v12927_v42  ;;  %v12928_v33 = vmax.f32 %v12757_v23, 0.0  ;;  %v16471_v55 = vadd.f32 %v16299_v46, %v22528_v17  ;;  %v11764_v34 = vpop.f32.mrb[17].mxu0  ;;  %v11277_v23 = vld [vmem:[%s17923_s28 + $0x466] sm:$0xff]  ;;  %v11278_v46 = vld [vmem:[%s17923_s28 + $0x46e] sm:$0xff] }
 0x5c5   : > { %13097 = vst.msk [vmem:[%s21194_s23 + $0x60] sm:$0xff] %vm13084_vm2, %v12925_v63  ;;  %v12926_v39 = vmax.f32 %v12755_v28, 0.0  ;;  %v16472_v45 = vadd.f32 %v11764_v34, %v22529_v15  ;;  %v16300_v0 = vpop.f32.mrb[18].mxu0 }
 0x5c6   : > { %13100 = vst.msk [vmem:[%s21194_s23 + $0x78] sm:$0xff] %vm13084_vm2, %v12928_v33  ;;  %v12582_v12 = vmul.f32 %v16471_v55, %v21166_v7  ;;  %v16473_v8 = vadd.f32 %v16300_v0, %v20807_v2  ;;  %v11767_v44 = vpop.f32.mrb[19].mxu0  ;;  %v5636_v2 = vld [vmem:[%s17923_s28 + $0x457] sm:$0xff]  ;;  %v5741_v0 = vpack.c.bf16 %v5639_v3, %v5638_v41  ;;  %v5643_v41 = vld [vmem:[%s17923_s28 + $0x48f] sm:$0xff] }
 0x5c7   : > { %13098 = vst.msk [vmem:[%s21194_s23 + $0x68] sm:$0xff] %vm13084_vm2, %v12926_v39  ;;  %v12580_v19 = vmul.f32 %v16472_v45, %v21166_v7  ;;  %v16474_v50 = vadd.f32 %v11767_v44, %v22530_v38  ;;  %15714 = vmatmul.mubr.msk.bf16.gmra.mrb[128].mxu1 %vm716_vm1, %v5738_v29  ;;  %v11279_v29 = vld [vmem:[%s17923_s28 + $0x476] sm:$0xff]  ;;  %v5740_v34 = vpack.c.bf16 %v5637_v6, %v5636_v2  ;;  %v5641_v6 = vld [vmem:[%s17923_s28 + $0x47f] sm:$0xff] }
 0x5c8   : > { %v12760_v54 = vadd.f32 %v21175_v62, %v12582_v12  ;;  %v12583_v20 = vmul.f32 %v16473_v8, %v21166_v7  ;;  %16406 = vmatmul.mubr.msk.bf16.gmra.mrb[124].mxu0 %vm716_vm1, %v11380_v10  ;;  %15717 = vmatprep.mubr.msk.bf16.mxu1 %vm716_vm1, %v5739_v59  ;;  %v22531_v59 = vld [vmem:[#allocation52_spill] sm:$0xff]  ;;  %v11382_v45 = vpack.c.bf16 %v11277_v23, %v11276_v5  ;;  %v11280_v5 = vld [vmem:[%s17923_s28 + $0x47e] sm:$0xff]  ;;  %v5642_v23 = vld [vmem:[%s17923_s28 + $0x487] sm:$0xff] }
 0x5c9   : > { %v12758_v18 = vadd.f32 %v21175_v62, %v12580_v19  ;;  %v12581_v42 = vmul.f32 %v16474_v50, %v21166_v7  ;;  %16409 = vmatprep.mubr.msk.bf16.mxu0 %vm716_vm1, %v11381_v1  ;;  %v11383_v44 = vpack.c.bf16 %v11279_v29, %v11278_v46  ;;  %v11283_v46 = vld [vmem:[%s17923_s28 + $0x496] sm:$0xff] }
 0x5ca   : > { %v12931_v63 = vmax.f32 %v12760_v54, 0.0  ;;  %v12761_v28 = vadd.f32 %v21175_v62, %v12583_v20 }
 0x5cb   : > { %v12929_v33 = vmax.f32 %v12758_v18, 0.0  ;;  %v12759_v17 = vadd.f32 %v21175_v62, %v12581_v42  ;;  %v16303_v55 = vpop.f32.mrb[20].mxu0  ;;  %v11281_v42 = vld [vmem:[%s17923_s28 + $0x486] sm:$0xff] }
 0x5cc   : > { %13103 = vst.msk [vmem:[%s21194_s23 + $0x90] sm:$0xff] %vm13084_vm2, %v12931_v63  ;;  %v12932_v10 = vmax.f32 %v12761_v28, 0.0  ;;  %v16475_v39 = vadd.f32 %v16303_v55, %v22531_v59  ;;  %v11780_v15 = vpop.f32.mrb[21].mxu0  ;;  %v11282_v28 = vld [vmem:[%s17923_s28 + $0x48e] sm:$0xff] }
 0x5cd   : > { %13101 = vst.msk [vmem:[%s21194_s23 + $0x80] sm:$0xff] %vm13084_vm2, %v12929_v33  ;;  %v12930_v1 = vmax.f32 %v12759_v17, 0.0  ;;  %v16476_v12 = vadd.f32 %v11780_v15, %v20826_v16  ;;  %v16304_v8 = vpop.f32.mrb[22].mxu0  ;;  %v11384_v15 = vpack.c.bf16 %v11281_v42, %v11280_v5  ;;  %v5644_v5 = vld [vmem:[%s17923_s28 + $0x497] sm:$0xff] }
 0x5ce   : > { %13104 = vst.msk [vmem:[%s21194_s23 + $0x98] sm:$0xff] %vm13084_vm2, %v12932_v10  ;;  %v12586_v19 = vmul.f32 %v16475_v39, %v21166_v7  ;;  %v16477_v38 = vadd.f32 %v16304_v8, %v20828_v47  ;;  %v11783_v50 = vpop.f32.mrb[23].mxu0  ;;  %v5640_v47 = vld [vmem:[%s17923_s28 + $0x477] sm:$0xff] }
 0x5cf   : > { %13102 = vst.msk [vmem:[%s21194_s23 + $0x88] sm:$0xff] %vm13084_vm2, %v12930_v1  ;;  %v12584_v54 = vmul.f32 %v16476_v12, %v21166_v7  ;;  %v16478_v16 = vadd.f32 %v11783_v50, %v20832_v48  ;;  %15718 = vmatmul.mubr.msk.bf16.gmra.mrb[132].mxu1 %vm716_vm1, %v5740_v34  ;;  %v5742_v55 = vpack.c.bf16 %v5641_v6, %v5640_v47  ;;  %v22532_v10 = vld [vmem:[#allocation53_spill] sm:$0xff]  ;;  %v22533_v1 = vld [vmem:[#allocation54_spill] sm:$0xff] }
 0x5d0   : > { %v12764_v20 = vadd.f32 %v21175_v62, %v12586_v19  ;;  %v12587_v2 = vmul.f32 %v16477_v38, %v21166_v7  ;;  %16410 = vmatmul.mubr.msk.bf16.gmra.mrb[128].mxu0 %vm716_vm1, %v11382_v45  ;;  %15721 = vmatprep.mubr.msk.bf16.mxu1 %vm716_vm1, %v5741_v0  ;;  %v5743_v45 = vpack.c.bf16 %v5643_v41, %v5642_v23  ;;  %v22534_v38 = vld [vmem:[#allocation55_spill] sm:$0xff] }
 0x5d1   : > { %v12762_v18 = vadd.f32 %v21175_v62, %v12584_v54  ;;  %v12585_v48 = vmul.f32 %v16478_v16, %v21166_v7  ;;  %16413 = vmatprep.mubr.msk.bf16.mxu0 %vm716_vm1, %v11383_v44  ;;  %v11385_v44 = vpack.c.bf16 %v11283_v46, %v11282_v28  ;;  %v11285_v41 = vld [vmem:[%s17923_s28 + $0x4a6] sm:$0xff] }
 0x5d2   : > { %v12935_v3 = vmax.f32 %v12764_v20, 0.0  ;;  %v12765_v63 = vadd.f32 %v21175_v62, %v12587_v2  ;;  %v22535_v20 = vld [vmem:[#allocation56_spill] sm:$0xff] }
 0x5d3   : > { %v12933_v29 = vmax.f32 %v12762_v18, 0.0  ;;  %v12763_v33 = vadd.f32 %v21175_v62, %v12585_v48  ;;  %v16307_v17 = vpop.f32.mrb[24].mxu0  ;;  %v5645_v18 = vld [vmem:[%s17923_s28 + $0x49f] sm:$0xff] }
 0x5d4   : > { %13107 = vst.msk [vmem:[%s21194_s23 + $0xb0] sm:$0xff] %vm13084_vm2, %v12935_v3  ;;  %v12936_v34 = vmax.f32 %v12765_v63, 0.0  ;;  %v16479_v59 = vadd.f32 %v16307_v17, %v22532_v10  ;;  %v11796_v39 = vpop.f32.mrb[25].mxu0  ;;  %v11284_v48 = vld [vmem:[%s17923_s28 + $0x49e] sm:$0xff]  ;;  %v5646_v3 = vld [vmem:[%s17923_s28 + $0x4a7] sm:$0xff]  ;;  %v5647_v63 = vld [vmem:[%s17923_s28 + $0x4af] sm:$0xff]  ;;  %v5744_v10 = vpack.c.bf16 %v5645_v18, %v5644_v5 }
 0x5d5   : > { %13105 = vst.msk [vmem:[%s21194_s23 + $0xa0] sm:$0xff] %vm13084_vm2, %v12933_v29  ;;  %v12934_v0 = vmax.f32 %v12763_v33, 0.0  ;;  %v16480_v12 = vadd.f32 %v11796_v39, %v22533_v1  ;;  %v16308_v8 = vpop.f32.mrb[26].mxu0  ;;  %v11286_v29 = vld [vmem:[%s17923_s28 + $0x4ae] sm:$0xff]  ;;  %v11287_v33 = vld [vmem:[%s17923_s28 + $0x4b6] sm:$0xff]  ;;  %v5745_v1 = vpack.c.bf16 %v5647_v63, %v5646_v3  ;;  %v11289_v63 = vld [vmem:[%s17923_s28 + $0x4c6] sm:$0xff] }
 0x5d6   : > { %13108 = vst.msk [vmem:[%s21194_s23 + $0xb8] sm:$0xff] %vm13084_vm2, %v12936_v34  ;;  %v12590_v19 = vmul.f32 %v16479_v59, %v21166_v7  ;;  %v16481_v50 = vadd.f32 %v16308_v8, %v22534_v38  ;;  %v11799_v54 = vpop.f32.mrb[27].mxu0  ;;  %v22536_v39 = vld [vmem:[#allocation28_spill] sm:$0xff]  ;;  %v22537_v8 = vld [vmem:[#allocation57_spill] sm:$0xff]  ;;  %v11387_v38 = vpack.c.bf16 %v11287_v33, %v11286_v29 }
 0x5d7   : > { %13106 = vst.msk [vmem:[%s21194_s23 + $0xa8] sm:$0xff] %vm13084_vm2, %v12934_v0  ;;  %v12588_v16 = vmul.f32 %v16480_v12, %v21166_v7  ;;  %v16482_v2 = vadd.f32 %v11799_v54, %v22535_v20  ;;  %15722 = vmatmul.mubr.msk.bf16.gmra.mrb[136].mxu1 %vm716_vm1, %v5742_v55  ;;  %v11386_v0 = vpack.c.bf16 %v11285_v41, %v11284_v48  ;;  %v22538_v54 = vld [vmem:[#allocation58_spill] sm:$0xff]  ;;  %v5648_v48 = vld [vmem:[%s17923_s28 + $0x4b7] sm:$0xff] }
 0x5d8   : > { %v12768_v47 = vadd.f32 %v21175_v62, %v12590_v19  ;;  %v12591_v6 = vmul.f32 %v16481_v50, %v21166_v7  ;;  %16414 = vmatmul.mubr.msk.bf16.gmra.mrb[132].mxu0 %vm716_vm1, %v11384_v15  ;;  %15725 = vmatprep.mubr.msk.bf16.mxu1 %vm716_vm1, %v5743_v45 }
 0x5d9   : > { %v12766_v42 = vadd.f32 %v21175_v62, %v12588_v16  ;;  %v12589_v23 = vmul.f32 %v16482_v2, %v21166_v7  ;;  %16417 = vmatprep.mubr.msk.bf16.mxu0 %vm716_vm1, %v11385_v44 }
 0x5da   : > { %v12939_v28 = vmax.f32 %v12768_v47, 0.0  ;;  %v12769_v46 = vadd.f32 %v21175_v62, %v12591_v6  ;;  %v22539_v47 = vld [vmem:[#allocation29_spill] sm:$0xff] }
 0x5db   : > { %v12937_v17 = vmax.f32 %v12766_v42, 0.0  ;;  %v12767_v55 = vadd.f32 %v21175_v62, %v12589_v23  ;;  %v16311_v34 = vpop.f32.mrb[28].mxu0  ;;  %v5649_v42 = vld [vmem:[%s17923_s28 + $0x4bf] sm:$0xff] }
 0x5dc   : > { %13111 = vst.msk [vmem:[%s21194_s23 + $0xd0] sm:$0xff] %vm13084_vm2, %v12939_v28  ;;  %v12940_v59 = vmax.f32 %v12769_v46, 0.0  ;;  %v16483_v15 = vadd.f32 %v16311_v34, %v22536_v39  ;;  %v11812_v45 = vpop.f32.mrb[29].mxu0  ;;  %v11288_v23 = vld [vmem:[%s17923_s28 + $0x4be] sm:$0xff]  ;;  %v5650_v28 = vld [vmem:[%s17923_s28 + $0x4c7] sm:$0xff]  ;;  %v5651_v46 = vld [vmem:[%s17923_s28 + $0x4cf] sm:$0xff]  ;;  %v5746_v39 = vpack.c.bf16 %v5649_v42, %v5648_v48 }
 0x5dd   : > { %13109 = vst.msk [vmem:[%s21194_s23 + $0xc0] sm:$0xff] %vm13084_vm2, %v12937_v17  ;;  %v12938_v12 = vmax.f32 %v12767_v55, 0.0  ;;  %v16484_v44 = vadd.f32 %v11812_v45, %v22537_v8  ;;  %v16312_v19 = vpop.f32.mrb[30].mxu0  ;;  %v11290_v17 = vld [vmem:[%s17923_s28 + $0x4ce] sm:$0xff]  ;;  %v11291_v55 = vld [vmem:[%s17923_s28 + $0x4d6] sm:$0xff]  ;;  %v22540_v45 = vld [vmem:[#allocation30_spill] sm:$0xff]  ;;  %v5747_v8 = vpack.c.bf16 %v5651_v46, %v5650_v28 }
 0x5de   : > { %13112 = vst.msk [vmem:[%s21194_s23 + $0xd8] sm:$0xff] %vm13084_vm2, %v12940_v59  ;;  %v12594_v50 = vmul.f32 %v16483_v15, %v21166_v7  ;;  %v16485_v16 = vadd.f32 %v16312_v19, %v22538_v54  ;;  %v11815_v20 = vpop.f32.mrb[31].mxu0  ;;  %v22541_v19 = vld [vmem:[#allocation31_spill] sm:$0xff]  ;;  %v11389_v54 = vpack.c.bf16 %v11291_v55, %v11290_v17 }
 0x5df   : > { %13110 = vst.msk [vmem:[%s21194_s23 + $0xc8] sm:$0xff] %vm13084_vm2, %v12938_v12  ;;  %v12592_v2 = vmul.f32 %v16484_v44, %v21166_v7  ;;  %v16486_v6 = vadd.f32 %v11815_v20, %v22539_v47  ;;  %15726 = vmatmul.mubr.msk.bf16.gmra.mrb[140].mxu1 %vm716_vm1, %v5744_v10  ;;  %v11388_v12 = vpack.c.bf16 %v11289_v63, %v11288_v23  ;;  %v22542_v20 = vld [vmem:[#allocation32_spill] sm:$0xff]  ;;  %v11293_v46 = vld [vmem:[%s17923_s28 + $0x4e6] sm:$0xff] }
 0x5e0   : > { %v12772_v5 = vadd.f32 %v21175_v62, %v12594_v50  ;;  %v12595_v18 = vmul.f32 %v16485_v16, %v21166_v7  ;;  %16418 = vmatmul.mubr.msk.bf16.gmra.mrb[136].mxu0 %vm716_vm1, %v11386_v0  ;;  %15729 = vmatprep.mubr.msk.bf16.mxu1 %vm716_vm1, %v5745_v1  ;;  %v5652_v23 = vld [vmem:[%s17923_s28 + $0x4d7] sm:$0xff] }
 0x5e1   : > { %v12770_v41 = vadd.f32 %v21175_v62, %v12592_v2  ;;  %v12593_v3 = vmul.f32 %v16486_v6, %v21166_v7  ;;  %16421 = vmatprep.mubr.msk.bf16.mxu0 %vm716_vm1, %v11387_v38 }
 0x5e2   : > { %v12943_v29 = vmax.f32 %v12772_v5, 0.0  ;;  %v12773_v33 = vadd.f32 %v21175_v62, %v12595_v18  ;;  %v22543_v5 = vld [vmem:[#allocation33_spill] sm:$0xff] }
 0x5e3   : > { %v12941_v34 = vmax.f32 %v12770_v41, 0.0  ;;  %v12771_v10 = vadd.f32 %v21175_v62, %v12593_v3  ;;  %v16315_v59 = vpop.f32.mrb[32].mxu0  ;;  %v5653_v41 = vld [vmem:[%s17923_s28 + $0x4df] sm:$0xff] }
 0x5e4   : > { %13115 = vst.msk [vmem:[%s21194_s23 + $0xf0] sm:$0xff] %vm13084_vm2, %v12943_v29  ;;  %v12944_v15 = vmax.f32 %v12773_v33, 0.0  ;;  %v16487_v0 = vadd.f32 %v16315_v59, %v22540_v45  ;;  %v11828_v1 = vpop.f32.mrb[33].mxu0  ;;  %v11292_v3 = vld [vmem:[%s17923_s28 + $0x4de] sm:$0xff]  ;;  %v5654_v29 = vld [vmem:[%s17923_s28 + $0x4e7] sm:$0xff]  ;;  %v5655_v33 = vld [vmem:[%s17923_s28 + $0x4ef] sm:$0xff]  ;;  %v5748_v45 = vpack.c.bf16 %v5653_v41, %v5652_v23 }
 0x5e5   : > { %13113 = vst.msk [vmem:[%s21194_s23 + $0xe0] sm:$0xff] %vm13084_vm2, %v12941_v34  ;;  %v12942_v44 = vmax.f32 %v12771_v10, 0.0  ;;  %v16488_v38 = vadd.f32 %v11828_v1, %v22541_v19  ;;  %v16316_v50 = vpop.f32.mrb[34].mxu0  ;;  %v11294_v34 = vld [vmem:[%s17923_s28 + $0x4ee] sm:$0xff]  ;;  %v11295_v10 = vld [vmem:[%s17923_s28 + $0x4f6] sm:$0xff]  ;;  %v22544_v1 = vld [vmem:[#allocation34_spill] sm:$0xff]  ;;  %v5749_v19 = vpack.c.bf16 %v5655_v33, %v5654_v29 }
 0x5e6   : > { %13116 = vst.msk [vmem:[%s21194_s23 + $0xf8] sm:$0xff] %vm13084_vm2, %v12944_v15  ;;  %v12598_v16 = vmul.f32 %v16487_v0, %v21166_v7  ;;  %v16489_v2 = vadd.f32 %v16316_v50, %v22542_v20  ;;  %v11831_v47 = vpop.f32.mrb[35].mxu0  ;;  %v22545_v50 = vld [vmem:[#allocation35_spill] sm:$0xff]  ;;  %v11391_v20 = vpack.c.bf16 %v11295_v10, %v11294_v34 }
 0x5e7   : > { %13114 = vst.msk [vmem:[%s21194_s23 + $0xe8] sm:$0xff] %vm13084_vm2, %v12942_v44  ;;  %v12596_v6 = vmul.f32 %v16488_v38, %v21166_v7  ;;  %v16490_v18 = vadd.f32 %v11831_v47, %v22543_v5  ;;  %15730 = vmatmul.mubr.msk.bf16.gmra.mrb[144].mxu1 %vm716_vm1, %v5746_v39  ;;  %v11390_v44 = vpack.c.bf16 %v11293_v46, %v11292_v3  ;;  %v22546_v47 = vld [vmem:[#allocation36_spill] sm:$0xff]  ;;  %v11297_v33 = vld [vmem:[%s17923_s28 + $0x506] sm:$0xff] }
 0x5e8   : > { %v12776_v48 = vadd.f32 %v21175_v62, %v12598_v16  ;;  %v12599_v42 = vmul.f32 %v16489_v2, %v21166_v7  ;;  %16422 = vmatmul.mubr.msk.bf16.gmra.mrb[140].mxu0 %vm716_vm1, %v11388_v12  ;;  %15733 = vmatprep.mubr.msk.bf16.mxu1 %vm716_vm1, %v5747_v8  ;;  %v5656_v3 = vld [vmem:[%s17923_s28 + $0x4f7] sm:$0xff] }
 0x5e9   : > { %v12774_v63 = vadd.f32 %v21175_v62, %v12596_v6  ;;  %v12597_v28 = vmul.f32 %v16490_v18, %v21166_v7  ;;  %16425 = vmatprep.mubr.msk.bf16.mxu0 %vm716_vm1, %v11389_v54 }
 0x5ea   : > { %v12947_v17 = vmax.f32 %v12776_v48, 0.0  ;;  %v12777_v55 = vadd.f32 %v21175_v62, %v12599_v42  ;;  %v22547_v48 = vld [vmem:[#allocation37_spill] sm:$0xff] }
 0x5eb   : > { %v12945_v59 = vmax.f32 %v12774_v63, 0.0  ;;  %v12775_v39 = vadd.f32 %v21175_v62, %v12597_v28  ;;  %v16319_v15 = vpop.f32.mrb[36].mxu0  ;;  %v5657_v63 = vld [vmem:[%s17923_s28 + $0x4ff] sm:$0xff] }
 0x5ec   : > { %13119 = vst.msk [vmem:[%s21194_s23 + $0x110] sm:$0xff] %vm13084_vm2, %v12947_v17  ;;  %v12948_v0 = vmax.f32 %v12777_v55, 0.0  ;;  %v16491_v12 = vadd.f32 %v16319_v15, %v22544_v1  ;;  %v11844_v8 = vpop.f32.mrb[37].mxu0  ;;  %v11296_v28 = vld [vmem:[%s17923_s28 + $0x4fe] sm:$0xff]  ;;  %v5658_v17 = vld [vmem:[%s17923_s28 + $0x507] sm:$0xff]  ;;  %v5659_v55 = vld [vmem:[%s17923_s28 + $0x50f] sm:$0xff]  ;;  %v5750_v1 = vpack.c.bf16 %v5657_v63, %v5656_v3 }
 0x5ed   : > { %13117 = vst.msk [vmem:[%s21194_s23 + $0x100] sm:$0xff] %vm13084_vm2, %v12945_v59  ;;  %v12946_v38 = vmax.f32 %v12775_v39, 0.0  ;;  %v16492_v54 = vadd.f32 %v11844_v8, %v22545_v50  ;;  %v16320_v16 = vpop.f32.mrb[38].mxu0  ;;  %v11298_v59 = vld [vmem:[%s17923_s28 + $0x50e] sm:$0xff]  ;;  %v11299_v39 = vld [vmem:[%s17923_s28 + $0x516] sm:$0xff]  ;;  %v22548_v8 = vld [vmem:[#allocation38_spill] sm:$0xff]  ;;  %v5751_v50 = vpack.c.bf16 %v5659_v55, %v5658_v17 }
 0x5ee   : > { %13120 = vst.msk [vmem:[%s21194_s23 + $0x118] sm:$0xff] %vm13084_vm2, %v12948_v0  ;;  %v12602_v2 = vmul.f32 %v16491_v12, %v21166_v7  ;;  %v16493_v6 = vadd.f32 %v16320_v16, %v22546_v47  ;;  %v11847_v5 = vpop.f32.mrb[39].mxu0  ;;  %v22549_v16 = vld [vmem:[#allocation39_spill] sm:$0xff]  ;;  %v11393_v47 = vpack.c.bf16 %v11299_v39, %v11298_v59 }
 0x5ef   : > { %13118 = vst.msk [vmem:[%s21194_s23 + $0x108] sm:$0xff] %vm13084_vm2, %v12946_v38  ;;  %v12600_v18 = vmul.f32 %v16492_v54, %v21166_v7  ;;  %v16494_v42 = vadd.f32 %v11847_v5, %v22547_v48  ;;  %15734 = vmatmul.mubr.msk.bf16.gmra.mrb[148].mxu1 %vm716_vm1, %v5748_v45  ;;  %v11392_v38 = vpack.c.bf16 %v11297_v33, %v11296_v28  ;;  %v22550_v5 = vld [vmem:[#allocation40_spill] sm:$0xff]  ;;  %v11301_v55 = vld [vmem:[%s17923_s28 + $0x526] sm:$0xff] }
 0x5f0   : > { %v12780_v23 = vadd.f32 %v21175_v62, %v12602_v2  ;;  %v12603_v41 = vmul.f32 %v16493_v6, %v21166_v7  ;;  %16426 = vmatmul.mubr.msk.bf16.gmra.mrb[144].mxu0 %vm716_vm1, %v11390_v44  ;;  %15737 = vmatprep.mubr.msk.bf16.mxu1 %vm716_vm1, %v5749_v19  ;;  %v5660_v28 = vld [vmem:[%s17923_s28 + $0x517] sm:$0xff] }
 0x5f1   : > { %v12778_v46 = vadd.f32 %v21175_v62, %v12600_v18  ;;  %v12601_v29 = vmul.f32 %v16494_v42, %v21166_v7  ;;  %16429 = vmatprep.mubr.msk.bf16.mxu0 %vm716_vm1, %v11391_v20 }
 0x5f2   : > { %v12951_v34 = vmax.f32 %v12780_v23, 0.0  ;;  %v12781_v10 = vadd.f32 %v21175_v62, %v12603_v41  ;;  %v22551_v23 = vld [vmem:[#allocation41_spill] sm:$0xff] }
 0x5f3   : > { %v12949_v15 = vmax.f32 %v12778_v46, 0.0  ;;  %v12779_v45 = vadd.f32 %v21175_v62, %v12601_v29  ;;  %v16323_v0 = vpop.f32.mrb[40].mxu0  ;;  %v5661_v46 = vld [vmem:[%s17923_s28 + $0x51f] sm:$0xff] }
 0x5f4   : > { %13123 = vst.msk [vmem:[%s21194_s23 + $0x130] sm:$0xff] %vm13084_vm2, %v12951_v34  ;;  %v12952_v12 = vmax.f32 %v12781_v10, 0.0  ;;  %v16495_v44 = vadd.f32 %v16323_v0, %v22548_v8  ;;  %v11860_v19 = vpop.f32.mrb[41].mxu0  ;;  %v11300_v29 = vld [vmem:[%s17923_s28 + $0x51e] sm:$0xff]  ;;  %v5662_v34 = vld [vmem:[%s17923_s28 + $0x527] sm:$0xff]  ;;  %v5663_v10 = vld [vmem:[%s17923_s28 + $0x52f] sm:$0xff]  ;;  %v5752_v8 = vpack.c.bf16 %v5661_v46, %v5660_v28 }
 0x5f5   : > { %13121 = vst.msk [vmem:[%s21194_s23 + $0x120] sm:$0xff] %vm13084_vm2, %v12949_v15  ;;  %v12950_v54 = vmax.f32 %v12779_v45, 0.0  ;;  %v16496_v20 = vadd.f32 %v11860_v19, %v22549_v16  ;;  %v16324_v2 = vpop.f32.mrb[42].mxu0  ;;  %v11302_v15 = vld [vmem:[%s17923_s28 + $0x52e] sm:$0xff]  ;;  %v11303_v45 = vld [vmem:[%s17923_s28 + $0x536] sm:$0xff]  ;;  %v22552_v19 = vld [vmem:[#allocation42_spill] sm:$0xff]  ;;  %v5753_v16 = vpack.c.bf16 %v5663_v10, %v5662_v34 }
 0x5f6   : > { %13124 = vst.msk [vmem:[%s21194_s23 + $0x138] sm:$0xff] %vm13084_vm2, %v12952_v12  ;;  %v12606_v6 = vmul.f32 %v16495_v44, %v21166_v7  ;;  %v16497_v18 = vadd.f32 %v16324_v2, %v22550_v5  ;;  %v11863_v48 = vpop.f32.mrb[43].mxu0  ;;  %v5664_v28 = vld [vmem:[%s17923_s28 + $0x537] sm:$0xff]  ;;  %v5665_v46 = vld [vmem:[%s17923_s28 + $0x53f] sm:$0xff]  ;;  %v5666_v34 = vld [vmem:[%s17923_s28 + $0x547] sm:$0xff] }
 0x5f7   : > { %13122 = vst.msk [vmem:[%s21194_s23 + $0x128] sm:$0xff] %vm13084_vm2, %v12950_v54  ;;  %v12604_v42 = vmul.f32 %v16496_v20, %v21166_v7  ;;  %v16498_v41 = vadd.f32 %v11863_v48, %v22551_v23  ;;  %15738 = vmatmul.mubr.msk.bf16.gmra.mrb[152].mxu1 %vm716_vm1, %v5750_v1  ;;  %v11394_v54 = vpack.c.bf16 %v11301_v55, %v11300_v29  ;;  %v11304_v29 = vld [vmem:[%s17923_s28 + $0x53e] sm:$0xff]  ;;  %v11305_v55 = vld [vmem:[%s17923_s28 + $0x546] sm:$0xff]  ;;  %v5667_v10 = vld [vmem:[%s17923_s28 + $0x54f] sm:$0xff] }
 0x5f8   : > { %v12784_v3 = vadd.f32 %v21175_v62, %v12606_v6  ;;  %v12607_v63 = vmul.f32 %v16497_v18, %v21166_v7  ;;  %16430 = vmatmul.mubr.msk.bf16.gmra.mrb[148].mxu0 %vm716_vm1, %v11392_v38  ;;  %15741 = vmatprep.mubr.msk.bf16.mxu1 %vm716_vm1, %v5751_v50  ;;  %v11395_v6 = vpack.c.bf16 %v11303_v45, %v11302_v15  ;;  %v22553_v18 = vld [vmem:[#allocation43_spill] sm:$0xff]  ;;  %v11307_v45 = vld [vmem:[%s17923_s28 + $0x556] sm:$0xff] }
 0x5f9   : > { %v12782_v33 = vadd.f32 %v21175_v62, %v12604_v42  ;;  %v12605_v17 = vmul.f32 %v16498_v41, %v21166_v7  ;;  %16433 = vmatprep.mubr.msk.bf16.mxu0 %vm716_vm1, %v11393_v47  ;;  %v22554_v41 = vld [vmem:[#allocation3_spill] sm:$0xff] }
 0x5fa   : > { %v12955_v59 = vmax.f32 %v12784_v3, 0.0  ;;  %v12785_v39 = vadd.f32 %v21175_v62, %v12607_v63  ;;  %v11306_v15 = vld [vmem:[%s17923_s28 + $0x54e] sm:$0xff] }
 0x5fb   : > { %v12953_v0 = vmax.f32 %v12782_v33, 0.0  ;;  %v12783_v1 = vadd.f32 %v21175_v62, %v12605_v17  ;;  %v16327_v12 = vpop.f32.mrb[44].mxu0 }
 0x5fc   : > { %13127 = vst.msk [vmem:[%s21194_s23 + $0x150] sm:$0xff] %vm13084_vm2, %v12955_v59  ;;  %v12956_v44 = vmax.f32 %v12785_v39, 0.0  ;;  %v16499_v38 = vadd.f32 %v16327_v12, %v22552_v19  ;;  %v11876_v50 = vpop.f32.mrb[45].mxu0  ;;  %v22555_v19 = vld [vmem:[#allocation44_spill] sm:$0xff] }
 0x5fd   : > { %13125 = vst.msk [vmem:[%s21194_s23 + $0x140] sm:$0xff] %vm13084_vm2, %v12953_v0  ;;  %v12954_v20 = vmax.f32 %v12783_v1, 0.0  ;;  %v16500_v2 = vadd.f32 %v11876_v50, %v20946_v57  ;;  %v16328_v47 = vpop.f32.mrb[46].mxu0 }
 0x5fe   : > { %13128 = vst.msk [vmem:[%s21194_s23 + $0x158] sm:$0xff] %vm13084_vm2, %v12956_v44  ;;  %v12610_v5 = vmul.f32 %v16499_v38, %v21166_v7  ;;  %v16501_v48 = vadd.f32 %v16328_v47, %v22553_v18  ;;  %v11879_v42 = vpop.f32.mrb[47].mxu0  ;;  %v22556_v18 = vld [vmem:[#allocation45_spill] sm:$0xff] }
 0x5ff   : > { %13126 = vst.msk [vmem:[%s21194_s23 + $0x148] sm:$0xff] %vm13084_vm2, %v12954_v20  ;;  %v12608_v23 = vmul.f32 %v16500_v2, %v21166_v7  ;;  %v16502_v57 = vadd.f32 %v11879_v42, %v22554_v41  ;;  %15742 = vmatmul.mubr.msk.bf16.gmra.mrb[156].mxu1 %vm716_vm1, %v5752_v8  ;;  %v5754_v8 = vpack.c.bf16 %v5665_v46, %v5664_v28  ;;  %v22557_v41 = vld [vmem:[#allocation46_spill] sm:$0xff] }
 0x600   : > { %v12788_v3 = vadd.f32 %v21175_v62, %v12610_v5  ;;  %v12611_v63 = vmul.f32 %v16501_v48, %v21166_v7  ;;  %16434 = vmatmul.mubr.msk.bf16.gmra.mrb[152].mxu0 %vm716_vm1, %v11394_v54  ;;  %15745 = vmatprep.mubr.msk.bf16.mxu1 %vm716_vm1, %v5753_v16  ;;  %v11396_v54 = vpack.c.bf16 %v11305_v55, %v11304_v29  ;;  %v5669_v28 = vld [vmem:[%s17923_s28 + $0x55f] sm:$0xff]  ;;  %v5670_v55 = vld [vmem:[%s17923_s28 + $0x567] sm:$0xff] }
 0x601   : > { %v12786_v33 = vadd.f32 %v21175_v62, %v12608_v23  ;;  %v12609_v17 = vmul.f32 %v16502_v57, %v21166_v7  ;;  %16437 = vmatprep.mubr.msk.bf16.mxu0 %vm716_vm1, %v11395_v6  ;;  %v5755_v16 = vpack.c.bf16 %v5667_v10, %v5666_v34  ;;  %v11397_v6 = vpack.c.bf16 %v11307_v45, %v11306_v15  ;;  %v11308_v46 = vld [vmem:[%s17923_s28 + $0x55e] sm:$0xff]  ;;  %v5671_v34 = vld [vmem:[%s17923_s28 + $0x56f] sm:$0xff] }
 0x602   : > { %v12959_v59 = vmax.f32 %v12788_v3, 0.0  ;;  %v12789_v39 = vadd.f32 %v21175_v62, %v12611_v63  ;;  %v5668_v63 = vld [vmem:[%s17923_s28 + $0x557] sm:$0xff] }
 0x603   : > { %v12957_v0 = vmax.f32 %v12786_v33, 0.0  ;;  %v12787_v1 = vadd.f32 %v21175_v62, %v12609_v17  ;;  %v16331_v12 = vpop.f32.mrb[48].mxu0  ;;  %v11309_v17 = vld [vmem:[%s17923_s28 + $0x566] sm:$0xff]  ;;  %v11311_v15 = vld [vmem:[%s17923_s28 + $0x576] sm:$0xff] }
 0x604   : > { %13131 = vst.msk [vmem:[%s21194_s23 + $0x170] sm:$0xff] %vm13084_vm2, %v12959_v59  ;;  %v12960_v44 = vmax.f32 %v12789_v39, 0.0  ;;  %v16503_v38 = vadd.f32 %v16331_v12, %v22555_v19  ;;  %v11892_v50 = vpop.f32.mrb[49].mxu0  ;;  %v11310_v39 = vld [vmem:[%s17923_s28 + $0x56e] sm:$0xff]  ;;  %v5756_v12 = vpack.c.bf16 %v5669_v28, %v5668_v63 }
 0x605   : > { %13129 = vst.msk [vmem:[%s21194_s23 + $0x160] sm:$0xff] %vm13084_vm2, %v12957_v0  ;;  %v12958_v20 = vmax.f32 %v12787_v1, 0.0  ;;  %v16504_v2 = vadd.f32 %v11892_v50, %v20966_v58  ;;  %v16332_v47 = vpop.f32.mrb[50].mxu0  ;;  %v5757_v50 = vpack.c.bf16 %v5671_v34, %v5670_v55  ;;  %v11314_v28 = vld [vmem:[%s17923_s28 + $0x58e] sm:$0xff] }
 0x606   : > { %13132 = vst.msk [vmem:[%s21194_s23 + $0x178] sm:$0xff] %vm13084_vm2, %v12960_v44  ;;  %v12614_v5 = vmul.f32 %v16503_v38, %v21166_v7  ;;  %v16505_v48 = vadd.f32 %v16332_v47, %v22556_v18  ;;  %v11895_v42 = vpop.f32.mrb[51].mxu0  ;;  %v11398_v38 = vpack.c.bf16 %v11309_v17, %v11308_v46  ;;  %v11315_v46 = vld [vmem:[%s17923_s28 + $0x596] sm:$0xff] }
 0x607   : > { %13130 = vst.msk [vmem:[%s21194_s23 + $0x168] sm:$0xff] %vm13084_vm2, %v12958_v20  ;;  %v12612_v23 = vmul.f32 %v16504_v2, %v21166_v7  ;;  %v16506_v58 = vadd.f32 %v11895_v42, %v22557_v41  ;;  %15746 = vmatmul.mubr.msk.bf16.gmra.mrb[160].mxu1 %vm716_vm1, %v5754_v8  ;;  %v22558_v8 = vld [vmem:[#allocation4_spill] sm:$0xff]  ;;  %v11399_v2 = vpack.c.bf16 %v11311_v15, %v11310_v39 }
 0x608   : > { %v12792_v57 = vadd.f32 %v21175_v62, %v12614_v5  ;;  %v12615_v3 = vmul.f32 %v16505_v48, %v21166_v7  ;;  %16438 = vmatmul.mubr.msk.bf16.gmra.mrb[156].mxu0 %vm716_vm1, %v11396_v54  ;;  %15749 = vmatprep.mubr.msk.bf16.mxu1 %vm716_vm1, %v5755_v16  ;;  %v21614_v48 = vld [vmem:[%s22151_s3] ss:$0 sm:$0xff] }
 0x609   : > { %v12790_v29 = vadd.f32 %v21175_v62, %v12612_v23  ;;  %v12613_v33 = vmul.f32 %v16506_v58, %v21166_v7  ;;  %16441 = vmatprep.mubr.msk.bf16.mxu0 %vm716_vm1, %v11397_v6  ;;  %v5672_v23 = vld [vmem:[%s17923_s28 + $0x577] sm:$0xff] }
 0x60a   : > { %v12963_v10 = vmax.f32 %v12792_v57, 0.0  ;;  %v12793_v59 = vadd.f32 %v21175_v62, %v12615_v3  ;;  %v11312_v58 = vld [vmem:[%s17923_s28 + $0x57e] sm:$0xff]  ;;  %v11313_v57 = vld [vmem:[%s17923_s28 + $0x586] sm:$0xff]  ;;  %v5758_v55 = vpack.c.bf16 %v5672_v23, %v5672_v23 }
 0x60b   : > { %v12961_v45 = vmax.f32 %v12790_v29, 0.0  ;;  %v12791_v0 = vadd.f32 %v21175_v62, %v12613_v33  ;;  %v16335_v1 = vpop.f32.mrb[52].mxu0  ;;  %v21602_v62 = vld [vmem:[%s22150_s2] ss:$0 sm:$0xff]  ;;  %v11400_v39 = vpack.c.bf16 %v11313_v57, %v11312_v58 }
 0x60c   : > { %13135 = vst.msk [vmem:[%s21194_s23 + $0x190] sm:$0xff] %vm13084_vm2, %v12963_v10  ;;  %v12964_v7 = vmax.f32 %v12793_v59, 0.0  ;;  %v16507_v44 = vadd.f32 %v16335_v1, %v22558_v8  ;;  %v11908_v19 = vpop.f32.mrb[53].mxu0  ;;  %v11401_v1 = vpack.c.bf16 %v11315_v46, %v11314_v28 }
 0x60d   : > { %13133 = vst.msk [vmem:[%s21194_s23 + $0x180] sm:$0xff] %vm13084_vm2, %v12961_v45  ;;  %v12962_v54 = vmax.f32 %v12791_v0, 0.0  ;;  %v16508_v16 = vadd.f32 %v11908_v19, %v20986_v21  ;;  %v16336_v20 = vpop.f32.mrb[54].mxu0 }
 0x60e   : > { %13136 = vst.msk [vmem:[%s21194_s23 + $0x198] sm:$0xff] %vm13084_vm2, %v12964_v7  ;;  %v12618_v47 = vmul.f32 %v21602_v62, %v16507_v44  ;;  %v16509_v6 = vadd.f32 %v16336_v20, %v20988_v52  ;;  %v11911_v5 = vpop.f32.mrb[55].mxu0 }
 0x60f   : > { %13134 = vst.msk [vmem:[%s21194_s23 + $0x188] sm:$0xff] %vm13084_vm2, %v12962_v54  ;;  %v12616_v21 = vmul.f32 %v21602_v62, %v16508_v16  ;;  %v16510_v18 = vadd.f32 %v11911_v5, %v20992_v40  ;;  %15750 = vmatmul.mubr.msk.bf16.gmra.mrb[164].mxu1 %vm716_vm1, %v5756_v12 }
 0x610   : > { %v12796_v42 = vadd.f32 %v21614_v48, %v12618_v47  ;;  %v12619_v52 = vmul.f32 %v21602_v62, %v16509_v6  ;;  %16442 = vmatmul.mubr.msk.bf16.gmra.mrb[160].mxu0 %vm716_vm1, %v11398_v38  ;;  %15753 = vmatprep.mubr.msk.bf16.mxu1 %vm716_vm1, %v5757_v50  ;;  %v11316_v50 = vld [vmem:[%s17923_s28 + $0x59e] sm:$0xff] }
 0x611   : > { %v12794_v40 = vadd.f32 %v21614_v48, %v12616_v21  ;;  %v12617_v41 = vmul.f32 %v21602_v62, %v16510_v18  ;;  %16445 = vmatprep.mubr.msk.bf16.mxu0 %vm716_vm1, %v11399_v2  ;;  %v22559_v6 = vld [vmem:[#allocation5_spill] sm:$0xff]  ;;  %v11402_v18 = vpack.c.bf16 %v11316_v50, %v11316_v50 }
 0x612   : > { %v12967_v3 = vmax.f32 %v12796_v42, 0.0  ;;  %v12797_v63 = vadd.f32 %v21614_v48, %v12619_v52 }
 0x613   : > { %v12965_v29 = vmax.f32 %v12794_v40, 0.0  ;;  %v12795_v33 = vadd.f32 %v21614_v48, %v12617_v41  ;;  %v16339_v17 = vpop.f32.mrb[56].mxu0  ;;  %v22560_v41 = vld [vmem:[#allocation6_spill] sm:$0xff] }
 0x614   : > { %13139 = vst.msk [vmem:[%s21194_s23 + $0x1b0] sm:$0xff] %vm13084_vm2, %v12967_v3  ;;  %v12968_v34 = vmax.f32 %v12797_v63, 0.0  ;;  %v16511_v10 = vadd.f32 %v16339_v17, %v21004_v36  ;;  %v11924_v59 = vpop.f32.mrb[57].mxu0 }
 0x615   : > { %13137 = vst.msk [vmem:[%s21194_s23 + $0x1a0] sm:$0xff] %vm13084_vm2, %v12965_v29  ;;  %v12966_v15 = vmax.f32 %v12795_v33, 0.0  ;;  %v16512_v45 = vadd.f32 %v11924_v59, %v21006_v30  ;;  %v16340_v0 = vpop.f32.mrb[58].mxu0 }
 0x616   : > { %13140 = vst.msk [vmem:[%s21194_s23 + $0x1b8] sm:$0xff] %vm13084_vm2, %v12968_v34  ;;  %v12622_v12 = vmul.f32 %v21602_v62, %v16511_v10  ;;  %v16513_v7 = vadd.f32 %v16340_v0, %v21008_v49  ;;  %v11927_v8 = vpop.f32.mrb[59].mxu0 }
 0x617   : > { %13138 = vst.msk [vmem:[%s21194_s23 + $0x1a8] sm:$0xff] %vm13084_vm2, %v12966_v15  ;;  %v12620_v36 = vmul.f32 %v21602_v62, %v16512_v45  ;;  %v16514_v44 = vadd.f32 %v11927_v8, %v21012_v9  ;;  %15754 = vmatmul.mubr.msk.bf16.gmra.mrb[168].mxu1 %vm716_vm1, %v5758_v55 }
 0x618   : > { %v12800_v30 = vadd.f32 %v21614_v48, %v12622_v12  ;;  %v12623_v19 = vmul.f32 %v21602_v62, %v16513_v7  ;;  %16446 = vmatmul.mubr.msk.bf16.gmra.mrb[164].mxu0 %vm716_vm1, %v11400_v39 }
 0x619   : > { %v12798_v38 = vadd.f32 %v21614_v48, %v12620_v36  ;;  %v12621_v49 = vmul.f32 %v21602_v62, %v16514_v44  ;;  %16449 = vmatprep.mubr.msk.bf16.mxu0 %vm716_vm1, %v11401_v1 }
 0x61a   : > { %v12971_v54 = vmax.f32 %v12800_v30, 0.0  ;;  %v12801_v9 = vadd.f32 %v21614_v48, %v12623_v19 }
 0x61b   : > { %v12969_v16 = vmax.f32 %v12798_v38, 0.0  ;;  %v12799_v20 = vadd.f32 %v21614_v48, %v12621_v49  ;;  %v16343_v2 = vpop.f32.mrb[60].mxu0 }
 0x61c   : > { %13143 = vst.msk [vmem:[%s21194_s23 + $0x1d0] sm:$0xff] %vm13084_vm2, %v12971_v54  ;;  %v12972_v47 = vmax.f32 %v12801_v9, 0.0  ;;  %v16515_v5 = vadd.f32 %v16343_v2, %v22559_v6  ;;  %v11940_v21 = vpop.f32.mrb[61].mxu0 }
 0x61d   : > { %13141 = vst.msk [vmem:[%s21194_s23 + $0x1c0] sm:$0xff] %vm13084_vm2, %v12969_v16  ;;  %v12970_v42 = vmax.f32 %v12799_v20, 0.0  ;;  %v16516_v52 = vadd.f32 %v11940_v21, %v21025_v43  ;;  %v16344_v23 = vpop.f32.mrb[62].mxu0 }
 0x61e   : > { %13144 = vst.msk [vmem:[%s21194_s23 + $0x1d8] sm:$0xff] %vm13084_vm2, %v12972_v47  ;;  %v12626_v40 = vmul.f32 %v21602_v62, %v16515_v5  ;;  %v16517_v58 = vadd.f32 %v16344_v23, %v22560_v41  ;;  %v11943_v57 = vpop.f32.mrb[63].mxu0 }
 0x61f   : > { %13142 = vst.msk [vmem:[%s21194_s23 + $0x1c8] sm:$0xff] %vm13084_vm2, %v12970_v42  ;;  %v12624_v3 = vmul.f32 %v21602_v62, %v16516_v52  ;;  %v16518_v63 = vadd.f32 %v11943_v57, %v21031_v31 }
 0x620   : > { %v12804_v28 = vadd.f32 %v21614_v48, %v12626_v40  ;;  %v12627_v43 = vmul.f32 %v21602_v62, %v16517_v58  ;;  %16450 = vmatmul.mubr.msk.bf16.gmra.mrb[168].mxu0 %vm716_vm1, %v11402_v18 }
 0x621   : > { %v12802_v46 = vadd.f32 %v21614_v48, %v12624_v3  ;;  %v12625_v29 = vmul.f32 %v21602_v62, %v16518_v63 }
 0x622   : > { %v12975_v33 = vmax.f32 %v12804_v28, 0.0  ;;  %v12805_v17 = vadd.f32 %v21614_v48, %v12627_v43 }
 0x623   : > { %v12973_v55 = vmax.f32 %v12802_v46, 0.0  ;;  %v12803_v34 = vadd.f32 %v21614_v48, %v12625_v29  ;;  %v16347_v10 = vpop.f32.mrb[64].mxu0 }
 0x624   : > { %13147 = vst.msk [vmem:[%s21194_s23 + $0x1f0] sm:$0xff] %vm13084_vm2, %v12975_v33  ;;  %v12976_v31 = vmax.f32 %v12805_v17, 0.0  ;;  %v16519_v59 = vadd.f32 %v16347_v10, %v21043_v56  ;;  %v11956_v39 = vpop.f32.mrb[65].mxu0 }
 0x625   : > { %13145 = vst.msk [vmem:[%s21194_s23 + $0x1e0] sm:$0xff] %vm13084_vm2, %v12973_v55  ;;  %v12974_v15 = vmax.f32 %v12803_v34, 0.0  ;;  %v16520_v45 = vadd.f32 %v11956_v39, %v21045_v26  ;;  %v16348_v0 = vpop.f32.mrb[66].mxu0 }
 0x626   : > { %13148 = vst.msk [vmem:[%s21194_s23 + $0x1f8] sm:$0xff] %vm13084_vm2, %v12976_v31  ;;  %v12630_v1 = vmul.f32 %v21602_v62, %v16519_v59  ;;  %v16521_v12 = vadd.f32 %v16348_v0, %v21047_v61  ;;  %v11959_v7 = vpop.f32.mrb[67].mxu0 }
 0x627   : > { %13146 = vst.msk [vmem:[%s21194_s23 + $0x1e8] sm:$0xff] %vm13084_vm2, %v12974_v15  ;;  %v12628_v56 = vmul.f32 %v21602_v62, %v16520_v45  ;;  %v16522_v8 = vadd.f32 %v11959_v7, %v21051_v22 }
 0x628   : > { %v12808_v36 = vadd.f32 %v21614_v48, %v12630_v1  ;;  %v12631_v26 = vmul.f32 %v21602_v62, %v16521_v12 }
 0x629   : > { %v12806_v44 = vadd.f32 %v21614_v48, %v12628_v56  ;;  %v12629_v30 = vmul.f32 %v21602_v62, %v16522_v8 }
 0x62a   : > { %v12979_v19 = vmax.f32 %v12808_v36, 0.0  ;;  %v12809_v61 = vadd.f32 %v21614_v48, %v12631_v26  ;;  %v22561_v26 = vld [vmem:[#allocation7_spill] sm:$0xff] }
 0x62b   : > { %v12977_v38 = vmax.f32 %v12806_v44, 0.0  ;;  %v12807_v49 = vadd.f32 %v21614_v48, %v12629_v30  ;;  %v16351_v50 = vpop.f32.mrb[68].mxu0 }
 0x62c   : > { %13151 = vst.msk [vmem:[%s21194_s23 + $0x210] sm:$0xff] %vm13084_vm2, %v12979_v19  ;;  %v12980_v22 = vmax.f32 %v12809_v61, 0.0  ;;  %v16523_v54 = vadd.f32 %v16351_v50, %v21063_v24  ;;  %v11972_v9 = vpop.f32.mrb[69].mxu0 }
 0x62d   : > { %13149 = vst.msk [vmem:[%s21194_s23 + $0x200] sm:$0xff] %vm13084_vm2, %v12977_v38  ;;  %v12978_v16 = vmax.f32 %v12807_v49, 0.0  ;;  %v16524_v20 = vadd.f32 %v11972_v9, %v21065_v25  ;;  %v16352_v2 = vpop.f32.mrb[70].mxu0  ;;  %v22562_v9 = vld [vmem:[#allocation8_spill] sm:$0xff] }
 0x62e   : > { %13152 = vst.msk [vmem:[%s21194_s23 + $0x218] sm:$0xff] %vm13084_vm2, %v12980_v22  ;;  %v12634_v47 = vmul.f32 %v21602_v62, %v16523_v54  ;;  %v16525_v6 = vadd.f32 %v16352_v2, %v21067_v35  ;;  %v11975_v5 = vpop.f32.mrb[71].mxu0 }
 0x62f   : > { %13150 = vst.msk [vmem:[%s21194_s23 + $0x208] sm:$0xff] %vm13084_vm2, %v12978_v16  ;;  %v12632_v24 = vmul.f32 %v21602_v62, %v16524_v20  ;;  %v16526_v21 = vadd.f32 %v11975_v5, %v21071_v32 }
 0x630   : > { %v12812_v18 = vadd.f32 %v21614_v48, %v12634_v47  ;;  %v12635_v25 = vmul.f32 %v21602_v62, %v16525_v6 }
 0x631   : > { %v12810_v42 = vadd.f32 %v21614_v48, %v12632_v24  ;;  %v12633_v52 = vmul.f32 %v21602_v62, %v16526_v21 }
 0x632   : > { %v12983_v23 = vmax.f32 %v12812_v18, 0.0  ;;  %v12813_v35 = vadd.f32 %v21614_v48, %v12635_v25  ;;  %v22563_v25 = vld [vmem:[#allocation9_spill] sm:$0xff] }
 0x633   : > { %v12981_v40 = vmax.f32 %v12810_v42, 0.0  ;;  %v12811_v41 = vadd.f32 %v21614_v48, %v12633_v52  ;;  %v16355_v58 = vpop.f32.mrb[72].mxu0 }
 0x634   : > { %13155 = vst.msk [vmem:[%s21194_s23 + $0x230] sm:$0xff] %vm13084_vm2, %v12983_v23  ;;  %v12984_v32 = vmax.f32 %v12813_v35, 0.0  ;;  %v16527_v57 = vadd.f32 %v16355_v58, %v21083_v37  ;;  %v11988_v3 = vpop.f32.mrb[73].mxu0 }
 0x635   : > { %13153 = vst.msk [vmem:[%s21194_s23 + $0x220] sm:$0xff] %vm13084_vm2, %v12981_v40  ;;  %v12982_v63 = vmax.f32 %v12811_v41, 0.0  ;;  %v16528_v28 = vadd.f32 %v11988_v3, %v21085_v53  ;;  %v16356_v43 = vpop.f32.mrb[74].mxu0 }
 0x636   : > { %13156 = vst.msk [vmem:[%s21194_s23 + $0x238] sm:$0xff] %vm13084_vm2, %v12984_v32  ;;  %v12638_v46 = vmul.f32 %v21602_v62, %v16527_v57  ;;  %v16529_v29 = vadd.f32 %v16356_v43, %v21087_v4  ;;  %v11991_v33 = vpop.f32.mrb[75].mxu0 }
 0x637   : > { %13154 = vst.msk [vmem:[%s21194_s23 + $0x228] sm:$0xff] %vm13084_vm2, %v12982_v63  ;;  %v12636_v37 = vmul.f32 %v21602_v62, %v16528_v28  ;;  %v16530_v17 = vadd.f32 %v11991_v33, %v21091_v13  ;;  %v22564_v28 = vld [vmem:[#allocation10_spill] sm:$0xff] }
 0x638   : > { %v12816_v55 = vadd.f32 %v21614_v48, %v12638_v46  ;;  %v12639_v53 = vmul.f32 %v21602_v62, %v16529_v29 }
 0x639   : > { %v12814_v34 = vadd.f32 %v21614_v48, %v12636_v37  ;;  %v12637_v10 = vmul.f32 %v21602_v62, %v16530_v17  ;;  %v22565_v37 = vld [vmem:[#allocation11_spill] sm:$0xff] }
 0x63a   : > { %v12987_v31 = vmax.f32 %v12816_v55, 0.0  ;;  %v12817_v4 = vadd.f32 %v21614_v48, %v12639_v53 }
 0x63b   : > { %v12985_v59 = vmax.f32 %v12814_v34, 0.0  ;;  %v12815_v39 = vadd.f32 %v21614_v48, %v12637_v10  ;;  %v16359_v15 = vpop.f32.mrb[76].mxu0  ;;  %v22566_v10 = vld [vmem:[#allocation12_spill] sm:$0xff] }
 0x63c   : > { %13159 = vst.msk [vmem:[%s21194_s23 + $0x250] sm:$0xff] %vm13084_vm2, %v12987_v31  ;;  %v12988_v13 = vmax.f32 %v12817_v4, 0.0  ;;  %v16531_v45 = vadd.f32 %v16359_v15, %v21103_v60  ;;  %v12004_v0 = vpop.f32.mrb[77].mxu0 }
 0x63d   : > { %13157 = vst.msk [vmem:[%s21194_s23 + $0x240] sm:$0xff] %vm13084_vm2, %v12985_v59  ;;  %v12986_v1 = vmax.f32 %v12815_v39, 0.0  ;;  %v16532_v12 = vadd.f32 %v12004_v0, %v21105_v27  ;;  %v16360_v7 = vpop.f32.mrb[78].mxu0  ;;  %v22567_v39 = vld [vmem:[#allocation13_spill] sm:$0xff] }
 0x63e   : > { %13160 = vst.msk [vmem:[%s21194_s23 + $0x258] sm:$0xff] %vm13084_vm2, %v12988_v13  ;;  %v12642_v56 = vmul.f32 %v21602_v62, %v16531_v45  ;;  %v16533_v8 = vadd.f32 %v16360_v7, %v21107_v14  ;;  %v12007_v36 = vpop.f32.mrb[79].mxu0 }
 0x63f   : > { %13158 = vst.msk [vmem:[%s21194_s23 + $0x248] sm:$0xff] %vm13084_vm2, %v12986_v1  ;;  %v12640_v60 = vmul.f32 %v21602_v62, %v16532_v12  ;;  %v16534_v44 = vadd.f32 %v12007_v36, %v22561_v26 }
 0x640   : > { %v12820_v30 = vadd.f32 %v21614_v48, %v12642_v56  ;;  %v12643_v27 = vmul.f32 %v21602_v62, %v16533_v8 }
 0x641   : > { %v12818_v19 = vadd.f32 %v21614_v48, %v12640_v60  ;;  %v12641_v61 = vmul.f32 %v21602_v62, %v16534_v44 }
 0x642   : > { %v12991_v38 = vmax.f32 %v12820_v30, 0.0  ;;  %v12821_v14 = vadd.f32 %v21614_v48, %v12643_v27 }
 0x643   : > { %v12989_v49 = vmax.f32 %v12818_v19, 0.0  ;;  %v12819_v50 = vadd.f32 %v21614_v48, %v12641_v61  ;;  %v16363_v22 = vpop.f32.mrb[80].mxu0 }
 0x644   : > { %13163 = vst.msk [vmem:[%s21194_s23 + $0x270] sm:$0xff] %vm13084_vm2, %v12991_v38  ;;  %v12992_v54 = vmax.f32 %v12821_v14, 0.0  ;;  %v16535_v16 = vadd.f32 %v16363_v22, %v22562_v9  ;;  %v12020_v20 = vpop.f32.mrb[81].mxu0 }
 0x645   : > { %13161 = vst.msk [vmem:[%s21194_s23 + $0x260] sm:$0xff] %vm13084_vm2, %v12989_v49  ;;  %v12990_v2 = vmax.f32 %v12819_v50, 0.0  ;;  %v16536_v47 = vadd.f32 %v12020_v20, %v21125_v51  ;;  %v16364_v6 = vpop.f32.mrb[82].mxu0 }
 0x646   : > { %13164 = vst.msk [vmem:[%s21194_s23 + $0x278] sm:$0xff] %vm13084_vm2, %v12992_v54  ;;  %v12646_v5 = vmul.f32 %v21602_v62, %v16535_v16  ;;  %v16537_v24 = vadd.f32 %v16364_v6, %v21127_v11  ;;  %v12023_v21 = vpop.f32.mrb[83].mxu0 }
 0x647   : > { %13162 = vst.msk [vmem:[%s21194_s23 + $0x268] sm:$0xff] %vm13084_vm2, %v12990_v2  ;;  %v12644_v18 = vmul.f32 %v21602_v62, %v16536_v47  ;;  %v16538_v42 = vadd.f32 %v12023_v21, %v22563_v25 }
 0x648   : > { %v12824_v52 = vadd.f32 %v21614_v48, %v12646_v5  ;;  %v12647_v51 = vmul.f32 %v21602_v62, %v16537_v24 }
 0x649   : > { %v12822_v23 = vadd.f32 %v21614_v48, %v12644_v18  ;;  %v12645_v35 = vmul.f32 %v21602_v62, %v16538_v42 }
 0x64a   : > { %v12995_v40 = vmax.f32 %v12824_v52, 0.0  ;;  %v12825_v11 = vadd.f32 %v21614_v48, %v12647_v51  ;;  %v15675_v41 = vpop.f32.mrb[88].mxu1 }
 0x64b   : > { %v12993_v58 = vmax.f32 %v12822_v23, 0.0  ;;  %v12823_v32 = vadd.f32 %v21614_v48, %v12645_v35  ;;  %v16367_v57 = vpop.f32.mrb[84].mxu0  ;;  %v6408_v3 = vpop.f32.mrb[89].mxu1 }
 0x64c   : > { %13167 = vst.msk [vmem:[%s21194_s23 + $0x290] sm:$0xff] %vm13084_vm2, %v12995_v40  ;;  %v12996_v63 = vmax.f32 %v12825_v11, 0.0  ;;  %v16539_v43 = vadd.f32 %v16367_v57, %v22564_v28  ;;  %v12036_v46 = vpop.f32.mrb[85].mxu0  ;;  %v15676_v29 = vpop.f32.mrb[90].mxu1 }
 0x64d   : > { %13165 = vst.msk [vmem:[%s21194_s23 + $0x280] sm:$0xff] %vm13084_vm2, %v12993_v58  ;;  %v12994_v33 = vmax.f32 %v12823_v32, 0.0  ;;  %v16540_v17 = vadd.f32 %v12036_v46, %v22565_v37  ;;  %v16368_v55 = vpop.f32.mrb[86].mxu0  ;;  %v6411_v53 = vpop.f32.mrb[91].mxu1 }
 0x64e   : > { %13168 = vst.msk [vmem:[%s21194_s23 + $0x298] sm:$0xff] %vm13084_vm2, %v12996_v63  ;;  %v12650_v34 = vmul.f32 %v21602_v62, %v16539_v43  ;;  %v16541_v31 = vadd.f32 %v16368_v55, %v22566_v10  ;;  %v12039_v4 = vpop.f32.mrb[87].mxu0 }
 0x64f   : > { %13166 = vst.msk [vmem:[%s21194_s23 + $0x288] sm:$0xff] %vm13084_vm2, %v12994_v33  ;;  %v12648_v59 = vmul.f32 %v21602_v62, %v16540_v17  ;;  %v16542_v15 = vadd.f32 %v12039_v4, %v22567_v39 }
 0x650   : > { %v12828_v13 = vadd.f32 %v21614_v48, %v12650_v34  ;;  %v12651_v45 = vmul.f32 %v21602_v62, %v16541_v31 }
 0x651   : > { %v12826_v0 = vadd.f32 %v21614_v48, %v12648_v59  ;;  %v12649_v1 = vmul.f32 %v21602_v62, %v16542_v15 }
 0x652   : > { %v12999_v12 = vmax.f32 %v12828_v13, 0.0  ;;  %v12829_v7 = vadd.f32 %v21614_v48, %v12651_v45  ;;  %v15679_v56 = vpop.f32.mrb[92].mxu1 }
 0x653   : > { %v12997_v8 = vmax.f32 %v12826_v0, 0.0  ;;  %v12827_v36 = vadd.f32 %v21614_v48, %v12649_v1  ;;  %v16371_v60 = vpop.f32.mrb[88].mxu0  ;;  %v6424_v26 = vpop.f32.mrb[93].mxu1 }
 0x654   : > { %13171 = vst.msk [vmem:[%s21194_s23 + $0x2b0] sm:$0xff] %vm13084_vm2, %v12999_v12  ;;  %v13000_v44 = vmax.f32 %v12829_v7, 0.0  ;;  %v16543_v30 = vadd.f32 %v16371_v60, %v15675_v41  ;;  %v12052_v27 = vpop.f32.mrb[89].mxu0  ;;  %v15680_v19 = vpop.f32.mrb[94].mxu1 }
 0x655   : > { %13169 = vst.msk [vmem:[%s21194_s23 + $0x2a0] sm:$0xff] %vm13084_vm2, %v12997_v8  ;;  %v12998_v61 = vmax.f32 %v12827_v36, 0.0  ;;  %v16544_v38 = vadd.f32 %v12052_v27, %v6408_v3  ;;  %v16372_v14 = vpop.f32.mrb[90].mxu0  ;;  %v6427_v49 = vpop.f32.mrb[95].mxu1 }
 0x656   : > { %13172 = vst.msk [vmem:[%s21194_s23 + $0x2b8] sm:$0xff] %vm13084_vm2, %v13000_v44  ;;  %v12654_v50 = vmul.f32 %v21602_v62, %v16543_v30  ;;  %v16545_v22 = vadd.f32 %v16372_v14, %v15676_v29  ;;  %v12055_v54 = vpop.f32.mrb[91].mxu0 }
 0x657   : > { %13170 = vst.msk [vmem:[%s21194_s23 + $0x2a8] sm:$0xff] %vm13084_vm2, %v12998_v61  ;;  %v12652_v9 = vmul.f32 %v21602_v62, %v16544_v38  ;;  %v16546_v16 = vadd.f32 %v12055_v54, %v6411_v53 }
 0x658   : > { %v12832_v20 = vadd.f32 %v21614_v48, %v12654_v50  ;;  %v12655_v2 = vmul.f32 %v21602_v62, %v16545_v22 }
 0x659   : > { %v12830_v47 = vadd.f32 %v21614_v48, %v12652_v9  ;;  %v12653_v6 = vmul.f32 %v21602_v62, %v16546_v16 }
 0x65a   : > { %v13003_v5 = vmax.f32 %v12832_v20, 0.0  ;;  %v12833_v24 = vadd.f32 %v21614_v48, %v12655_v2  ;;  %v15683_v21 = vpop.f32.mrb[96].mxu1 }
 0x65b   : > { %v13001_v18 = vmax.f32 %v12830_v47, 0.0  ;;  %v12831_v25 = vadd.f32 %v21614_v48, %v12653_v6  ;;  %v16375_v42 = vpop.f32.mrb[92].mxu0  ;;  %v6440_v52 = vpop.f32.mrb[97].mxu1 }
 0x65c   : > { %13175 = vst.msk [vmem:[%s21194_s23 + $0x2d0] sm:$0xff] %vm13084_vm2, %v13003_v5  ;;  %v13004_v51 = vmax.f32 %v12833_v24, 0.0  ;;  %v16547_v23 = vadd.f32 %v16375_v42, %v15679_v56  ;;  %v12068_v35 = vpop.f32.mrb[93].mxu0  ;;  %v15684_v40 = vpop.f32.mrb[98].mxu1 }
 0x65d   : > { %13173 = vst.msk [vmem:[%s21194_s23 + $0x2c0] sm:$0xff] %vm13084_vm2, %v13001_v18  ;;  %v13002_v11 = vmax.f32 %v12831_v25, 0.0  ;;  %v16548_v41 = vadd.f32 %v12068_v35, %v6424_v26  ;;  %v16376_v58 = vpop.f32.mrb[94].mxu0  ;;  %v6443_v32 = vpop.f32.mrb[99].mxu1 }
 0x65e   : > { %13176 = vst.msk [vmem:[%s21194_s23 + $0x2d8] sm:$0xff] %vm13084_vm2, %v13004_v51  ;;  %v12658_v57 = vmul.f32 %v21602_v62, %v16547_v23  ;;  %v16549_v3 = vadd.f32 %v16376_v58, %v15680_v19  ;;  %v12071_v63 = vpop.f32.mrb[95].mxu0 }
 0x65f   : > { %13174 = vst.msk [vmem:[%s21194_s23 + $0x2c8] sm:$0xff] %vm13084_vm2, %v13002_v11  ;;  %v12656_v28 = vmul.f32 %v21602_v62, %v16548_v41  ;;  %v16550_v43 = vadd.f32 %v12071_v63, %v6427_v49 }
 0x660   : > { %v12836_v46 = vadd.f32 %v21614_v48, %v12658_v57  ;;  %v12659_v29 = vmul.f32 %v21602_v62, %v16549_v3 }
 0x661   : > { %v12834_v33 = vadd.f32 %v21614_v48, %v12656_v28  ;;  %v12657_v37 = vmul.f32 %v21602_v62, %v16550_v43 }
 0x662   : > { %v13007_v17 = vmax.f32 %v12836_v46, 0.0  ;;  %v12837_v55 = vadd.f32 %v21614_v48, %v12659_v29  ;;  %v15687_v53 = vpop.f32.mrb[100].mxu1 }
 0x663   : > { %v13005_v34 = vmax.f32 %v12834_v33, 0.0  ;;  %v12835_v10 = vadd.f32 %v21614_v48, %v12657_v37  ;;  %v16379_v31 = vpop.f32.mrb[96].mxu0  ;;  %v6456_v4 = vpop.f32.mrb[101].mxu1 }
 0x664   : > { %13179 = vst.msk [vmem:[%s21194_s23 + $0x2f0] sm:$0xff] %vm13084_vm2, %v13007_v17  ;;  %v13008_v59 = vmax.f32 %v12837_v55, 0.0  ;;  %v16551_v39 = vadd.f32 %v16379_v31, %v15683_v21  ;;  %v12084_v15 = vpop.f32.mrb[97].mxu0  ;;  %v15688_v13 = vpop.f32.mrb[102].mxu1 }
 0x665   : > { %13177 = vst.msk [vmem:[%s21194_s23 + $0x2e0] sm:$0xff] %vm13084_vm2, %v13005_v34  ;;  %v13006_v45 = vmax.f32 %v12835_v10, 0.0  ;;  %v16552_v0 = vadd.f32 %v12084_v15, %v6440_v52  ;;  %v16380_v1 = vpop.f32.mrb[98].mxu0  ;;  %v6459_v12 = vpop.f32.mrb[103].mxu1 }
 0x666   : > { %13180 = vst.msk [vmem:[%s21194_s23 + $0x2f8] sm:$0xff] %vm13084_vm2, %v13008_v59  ;;  %v12662_v7 = vmul.f32 %v21602_v62, %v16551_v39  ;;  %v16553_v56 = vadd.f32 %v16380_v1, %v15684_v40  ;;  %v12087_v8 = vpop.f32.mrb[99].mxu0 }
 0x667   : > { %13178 = vst.msk [vmem:[%s21194_s23 + $0x2e8] sm:$0xff] %vm13084_vm2, %v13006_v45  ;;  %v12660_v36 = vmul.f32 %v21602_v62, %v16552_v0  ;;  %v16554_v60 = vadd.f32 %v12087_v8, %v6443_v32 }
 0x668   : > { %v12840_v26 = vadd.f32 %v21614_v48, %v12662_v7  ;;  %v12663_v44 = vmul.f32 %v21602_v62, %v16553_v56 }
 0x669   : > { %v12838_v30 = vadd.f32 %v21614_v48, %v12660_v36  ;;  %v12661_v27 = vmul.f32 %v21602_v62, %v16554_v60 }
 0x66a   : > { %v13011_v19 = vmax.f32 %v12840_v26, 0.0  ;;  %v12841_v61 = vadd.f32 %v21614_v48, %v12663_v44  ;;  %v15691_v38 = vpop.f32.mrb[104].mxu1 }
 0x66b   : > { %v13009_v14 = vmax.f32 %v12838_v30, 0.0  ;;  %v12839_v49 = vadd.f32 %v21614_v48, %v12661_v27  ;;  %v16383_v50 = vpop.f32.mrb[100].mxu0  ;;  %v6472_v22 = vpop.f32.mrb[105].mxu1 }
 0x66c   : > { %13183 = vst.msk [vmem:[%s21194_s23 + $0x310] sm:$0xff] %vm13084_vm2, %v13011_v19  ;;  %v13012_v54 = vmax.f32 %v12841_v61, 0.0  ;;  %v16555_v9 = vadd.f32 %v16383_v50, %v15687_v53  ;;  %v12100_v16 = vpop.f32.mrb[101].mxu0  ;;  %v15692_v20 = vpop.f32.mrb[106].mxu1 }
 0x66d   : > { %13181 = vst.msk [vmem:[%s21194_s23 + $0x300] sm:$0xff] %vm13084_vm2, %v13009_v14  ;;  %v13010_v2 = vmax.f32 %v12839_v49, 0.0  ;;  %v16556_v47 = vadd.f32 %v12100_v16, %v6456_v4  ;;  %v16384_v6 = vpop.f32.mrb[102].mxu0  ;;  %v6475_v5 = vpop.f32.mrb[107].mxu1 }
 0x66e   : > { %13184 = vst.msk [vmem:[%s21194_s23 + $0x318] sm:$0xff] %vm13084_vm2, %v13012_v54  ;;  %v12666_v24 = vmul.f32 %v21602_v62, %v16555_v9  ;;  %v16557_v21 = vadd.f32 %v16384_v6, %v15688_v13  ;;  %v12103_v18 = vpop.f32.mrb[103].mxu0 }
 0x66f   : > { %13182 = vst.msk [vmem:[%s21194_s23 + $0x308] sm:$0xff] %vm13084_vm2, %v13010_v2  ;;  %v12664_v25 = vmul.f32 %v21602_v62, %v16556_v47  ;;  %v16558_v42 = vadd.f32 %v12103_v18, %v6459_v12 }
 0x670   : > { %v12844_v52 = vadd.f32 %v21614_v48, %v12666_v24  ;;  %v12667_v51 = vmul.f32 %v21602_v62, %v16557_v21 }
 0x671   : > { %v12842_v23 = vadd.f32 %v21614_v48, %v12664_v25  ;;  %v12665_v35 = vmul.f32 %v21602_v62, %v16558_v42 }
 0x672   : > { %v13015_v40 = vmax.f32 %v12844_v52, 0.0  ;;  %v12845_v11 = vadd.f32 %v21614_v48, %v12667_v51  ;;  %v15695_v41 = vpop.f32.mrb[108].mxu1 }
 0x673   : > { %v13013_v58 = vmax.f32 %v12842_v23, 0.0  ;;  %v12843_v32 = vadd.f32 %v21614_v48, %v12665_v35  ;;  %v16387_v57 = vpop.f32.mrb[104].mxu0  ;;  %v6488_v3 = vpop.f32.mrb[109].mxu1 }
 0x674   : > { %13187 = vst.msk [vmem:[%s21194_s23 + $0x330] sm:$0xff] %vm13084_vm2, %v13015_v40  ;;  %v13016_v63 = vmax.f32 %v12845_v11, 0.0  ;;  %v16559_v28 = vadd.f32 %v16387_v57, %v15691_v38  ;;  %v12116_v43 = vpop.f32.mrb[105].mxu0  ;;  %v15696_v46 = vpop.f32.mrb[110].mxu1 }
 0x675   : > { %13185 = vst.msk [vmem:[%s21194_s23 + $0x320] sm:$0xff] %vm13084_vm2, %v13013_v58  ;;  %v13014_v29 = vmax.f32 %v12843_v32, 0.0  ;;  %v16560_v33 = vadd.f32 %v12116_v43, %v6472_v22  ;;  %v16388_v37 = vpop.f32.mrb[106].mxu0  ;;  %v6491_v17 = vpop.f32.mrb[111].mxu1 }
 0x676   : > { %13188 = vst.msk [vmem:[%s21194_s23 + $0x338] sm:$0xff] %vm13084_vm2, %v13016_v63  ;;  %v12670_v55 = vmul.f32 %v21602_v62, %v16559_v28  ;;  %v16561_v53 = vadd.f32 %v16388_v37, %v15692_v20  ;;  %v12119_v34 = vpop.f32.mrb[107].mxu0 }
 0x677   : > { %13186 = vst.msk [vmem:[%s21194_s23 + $0x328] sm:$0xff] %vm13084_vm2, %v13014_v29  ;;  %v12668_v10 = vmul.f32 %v21602_v62, %v16560_v33  ;;  %v16562_v31 = vadd.f32 %v12119_v34, %v6475_v5 }
 0x678   : > { %v12848_v4 = vadd.f32 %v21614_v48, %v12670_v55  ;;  %v12671_v59 = vmul.f32 %v21602_v62, %v16561_v53 }
 0x679   : > { %v12846_v39 = vadd.f32 %v21614_v48, %v12668_v10  ;;  %v12669_v15 = vmul.f32 %v21602_v62, %v16562_v31 }
 0x67a   : > { %v13019_v13 = vmax.f32 %v12848_v4, 0.0  ;;  %v12849_v45 = vadd.f32 %v21614_v48, %v12671_v59  ;;  %v15699_v0 = vpop.f32.mrb[112].mxu1 }
 0x67b   : > { %v13017_v1 = vmax.f32 %v12846_v39, 0.0  ;;  %v12847_v12 = vadd.f32 %v21614_v48, %v12669_v15  ;;  %v16391_v7 = vpop.f32.mrb[108].mxu0  ;;  %v6504_v56 = vpop.f32.mrb[113].mxu1 }
 0x67c   : > { %13191 = vst.msk [vmem:[%s21194_s23 + $0x350] sm:$0xff] %vm13084_vm2, %v13019_v13  ;;  %v13020_v8 = vmax.f32 %v12849_v45, 0.0  ;;  %v16563_v36 = vadd.f32 %v16391_v7, %v15695_v41  ;;  %v12132_v60 = vpop.f32.mrb[109].mxu0  ;;  %v15700_v26 = vpop.f32.mrb[114].mxu1 }
 0x67d   : > { %13189 = vst.msk [vmem:[%s21194_s23 + $0x340] sm:$0xff] %vm13084_vm2, %v13017_v1  ;;  %v13018_v44 = vmax.f32 %v12847_v12, 0.0  ;;  %v16564_v30 = vadd.f32 %v12132_v60, %v6488_v3  ;;  %v16392_v27 = vpop.f32.mrb[110].mxu0  ;;  %v6507_v19 = vpop.f32.mrb[115].mxu1 }
 0x67e   : > { %13192 = vst.msk [vmem:[%s21194_s23 + $0x358] sm:$0xff] %vm13084_vm2, %v13020_v8  ;;  %v12674_v61 = vmul.f32 %v21602_v62, %v16563_v36  ;;  %v16565_v38 = vadd.f32 %v16392_v27, %v15696_v46  ;;  %v12135_v14 = vpop.f32.mrb[111].mxu0 }
 0x67f   : > { %13190 = vst.msk [vmem:[%s21194_s23 + $0x348] sm:$0xff] %vm13084_vm2, %v13018_v44  ;;  %v12672_v49 = vmul.f32 %v21602_v62, %v16564_v30  ;;  %v16566_v50 = vadd.f32 %v12135_v14, %v6491_v17 }
 0x680   : > { %v12852_v22 = vadd.f32 %v21614_v48, %v12674_v61  ;;  %v12675_v54 = vmul.f32 %v21602_v62, %v16565_v38 }
 0x681   : > { %v12850_v9 = vadd.f32 %v21614_v48, %v12672_v49  ;;  %v12673_v16 = vmul.f32 %v21602_v62, %v16566_v50 }
 0x682   : > { %v13023_v20 = vmax.f32 %v12852_v22, 0.0  ;;  %v12853_v2 = vadd.f32 %v21614_v48, %v12675_v54  ;;  %v15703_v47 = vpop.f32.mrb[116].mxu1 }
 0x683   : > { %v13021_v6 = vmax.f32 %v12850_v9, 0.0  ;;  %v12851_v5 = vadd.f32 %v21614_v48, %v12673_v16  ;;  %v16395_v24 = vpop.f32.mrb[112].mxu0  ;;  %v6520_v21 = vpop.f32.mrb[117].mxu1 }
 0x684   : > { %13195 = vst.msk [vmem:[%s21194_s23 + $0x370] sm:$0xff] %vm13084_vm2, %v13023_v20  ;;  %v13024_v18 = vmax.f32 %v12853_v2, 0.0  ;;  %v16567_v25 = vadd.f32 %v16395_v24, %v15699_v0  ;;  %v12148_v42 = vpop.f32.mrb[113].mxu0  ;;  %v15704_v52 = vpop.f32.mrb[118].mxu1 }
 0x685   : > { %13193 = vst.msk [vmem:[%s21194_s23 + $0x360] sm:$0xff] %vm13084_vm2, %v13021_v6  ;;  %v13022_v51 = vmax.f32 %v12851_v5, 0.0  ;;  %v16568_v23 = vadd.f32 %v12148_v42, %v6504_v56  ;;  %v16396_v35 = vpop.f32.mrb[114].mxu0  ;;  %v6523_v40 = vpop.f32.mrb[119].mxu1 }
 0x686   : > { %13196 = vst.msk [vmem:[%s21194_s23 + $0x378] sm:$0xff] %vm13084_vm2, %v13024_v18  ;;  %v12678_v11 = vmul.f32 %v21602_v62, %v16567_v25  ;;  %v16569_v41 = vadd.f32 %v16396_v35, %v15700_v26  ;;  %v12151_v58 = vpop.f32.mrb[115].mxu0 }
 0x687   : > { %13194 = vst.msk [vmem:[%s21194_s23 + $0x368] sm:$0xff] %vm13084_vm2, %v13022_v51  ;;  %v12676_v32 = vmul.f32 %v21602_v62, %v16568_v23  ;;  %v16570_v57 = vadd.f32 %v12151_v58, %v6507_v19 }
 0x688   : > { %v12856_v3 = vadd.f32 %v21614_v48, %v12678_v11  ;;  %v12679_v63 = vmul.f32 %v21602_v62, %v16569_v41 }
 0x689   : > { %v12854_v28 = vadd.f32 %v21614_v48, %v12676_v32  ;;  %v12677_v43 = vmul.f32 %v21602_v62, %v16570_v57 }
 0x68a   : > { %v13027_v46 = vmax.f32 %v12856_v3, 0.0  ;;  %v12857_v29 = vadd.f32 %v21614_v48, %v12679_v63  ;;  %v15707_v33 = vpop.f32.mrb[120].mxu1 }
 0x68b   : > { %v13025_v37 = vmax.f32 %v12854_v28, 0.0  ;;  %v12855_v17 = vadd.f32 %v21614_v48, %v12677_v43  ;;  %v16399_v55 = vpop.f32.mrb[116].mxu0  ;;  %v6536_v53 = vpop.f32.mrb[121].mxu1 }
 0x68c   : > { %13199 = vst.msk [vmem:[%s21194_s23 + $0x390] sm:$0xff] %vm13084_vm2, %v13027_v46  ;;  %v13028_v34 = vmax.f32 %v12857_v29, 0.0  ;;  %v16571_v10 = vadd.f32 %v16399_v55, %v15703_v47  ;;  %v12164_v31 = vpop.f32.mrb[117].mxu0  ;;  %v15708_v4 = vpop.f32.mrb[122].mxu1 }
 0x68d   : > { %13197 = vst.msk [vmem:[%s21194_s23 + $0x380] sm:$0xff] %vm13084_vm2, %v13025_v37  ;;  %v13026_v59 = vmax.f32 %v12855_v17, 0.0  ;;  %v16572_v39 = vadd.f32 %v12164_v31, %v6520_v21  ;;  %v16400_v15 = vpop.f32.mrb[118].mxu0  ;;  %v6539_v13 = vpop.f32.mrb[123].mxu1 }
 0x68e   : > { %13200 = vst.msk [vmem:[%s21194_s23 + $0x398] sm:$0xff] %vm13084_vm2, %v13028_v34  ;;  %v12682_v45 = vmul.f32 %v21602_v62, %v16571_v10  ;;  %v16573_v0 = vadd.f32 %v16400_v15, %v15704_v52  ;;  %v12167_v1 = vpop.f32.mrb[119].mxu0 }
 0x68f   : > { %13198 = vst.msk [vmem:[%s21194_s23 + $0x388] sm:$0xff] %vm13084_vm2, %v13026_v59  ;;  %v12680_v12 = vmul.f32 %v21602_v62, %v16572_v39  ;;  %v16574_v7 = vadd.f32 %v12167_v1, %v6523_v40 }
 0x690   : > { %v12860_v56 = vadd.f32 %v21614_v48, %v12682_v45  ;;  %v12683_v8 = vmul.f32 %v21602_v62, %v16573_v0 }
 0x691   : > { %v12858_v36 = vadd.f32 %v21614_v48, %v12680_v12  ;;  %v12681_v60 = vmul.f32 %v21602_v62, %v16574_v7 }
 0x692   : > { %v13031_v26 = vmax.f32 %v12860_v56, 0.0  ;;  %v12861_v44 = vadd.f32 %v21614_v48, %v12683_v8  ;;  %v15711_v30 = vpop.f32.mrb[124].mxu1 }
 0x693   : > { %v13029_v27 = vmax.f32 %v12858_v36, 0.0  ;;  %v12859_v19 = vadd.f32 %v21614_v48, %v12681_v60  ;;  %v16403_v61 = vpop.f32.mrb[120].mxu0  ;;  %v6552_v38 = vpop.f32.mrb[125].mxu1 }
 0x694   : > { %13203 = vst.msk [vmem:[%s21194_s23 + $0x3b0] sm:$0xff] %vm13084_vm2, %v13031_v26  ;;  %v13032_v14 = vmax.f32 %v12861_v44, 0.0  ;;  %v16575_v49 = vadd.f32 %v16403_v61, %v15707_v33  ;;  %v12180_v50 = vpop.f32.mrb[121].mxu0  ;;  %v15712_v22 = vpop.f32.mrb[126].mxu1  ;;  %v21973_v61 = vld [vmem:[%s22151_s3] ss:$0 sm:$0xff] }
 0x695   : > { %13201 = vst.msk [vmem:[%s21194_s23 + $0x3a0] sm:$0xff] %vm13084_vm2, %v13029_v27  ;;  %v13030_v54 = vmax.f32 %v12859_v19, 0.0  ;;  %v16576_v9 = vadd.f32 %v12180_v50, %v6536_v53  ;;  %v16404_v16 = vpop.f32.mrb[122].mxu0  ;;  %v6555_v20 = vpop.f32.mrb[127].mxu1 }
 0x696   : > { %13204 = vst.msk [vmem:[%s21194_s23 + $0x3b8] sm:$0xff] %vm13084_vm2, %v13032_v14  ;;  %v12686_v2 = vmul.f32 %v21602_v62, %v16575_v49  ;;  %v16577_v47 = vadd.f32 %v16404_v16, %v15708_v4  ;;  %v12183_v6 = vpop.f32.mrb[123].mxu0 }
 0x697   : > { %13202 = vst.msk [vmem:[%s21194_s23 + $0x3a8] sm:$0xff] %vm13084_vm2, %v13030_v54  ;;  %v12684_v5 = vmul.f32 %v21602_v62, %v16576_v9  ;;  %v16578_v24 = vadd.f32 %v12183_v6, %v6539_v13 }
 0x698   : > { %v12864_v21 = vadd.f32 %v21614_v48, %v12686_v2  ;;  %v12687_v18 = vmul.f32 %v21602_v62, %v16577_v47 }
 0x699   : > { %v12862_v25 = vadd.f32 %v21614_v48, %v12684_v5  ;;  %v12685_v42 = vmul.f32 %v21602_v62, %v16578_v24 }
 0x69a   : > { %v13035_v52 = vmax.f32 %v12864_v21, 0.0  ;;  %v12865_v51 = vadd.f32 %v21614_v48, %v12687_v18  ;;  %v15715_v23 = vpop.f32.mrb[128].mxu1 }
 0x69b   : > { %v13033_v35 = vmax.f32 %v12862_v25, 0.0  ;;  %v12863_v40 = vadd.f32 %v21614_v48, %v12685_v42  ;;  %v16407_v11 = vpop.f32.mrb[124].mxu0  ;;  %v6568_v41 = vpop.f32.mrb[129].mxu1 }
 0x69c   : > { %13207 = vst.msk [vmem:[%s21194_s23 + $0x3d0] sm:$0xff] %vm13084_vm2, %v13035_v52  ;;  %v13036_v58 = vmax.f32 %v12865_v51, 0.0  ;;  %v16579_v32 = vadd.f32 %v16407_v11, %v15711_v30  ;;  %v12196_v57 = vpop.f32.mrb[125].mxu0  ;;  %v15716_v3 = vpop.f32.mrb[130].mxu1 }
 0x69d   : > { %13205 = vst.msk [vmem:[%s21194_s23 + $0x3c0] sm:$0xff] %vm13084_vm2, %v13033_v35  ;;  %v13034_v63 = vmax.f32 %v12863_v40, 0.0  ;;  %v16580_v28 = vadd.f32 %v12196_v57, %v6552_v38  ;;  %v16408_v43 = vpop.f32.mrb[126].mxu0  ;;  %v6571_v46 = vpop.f32.mrb[131].mxu1 }
 0x69e   : > { %13208 = vst.msk [vmem:[%s21194_s23 + $0x3d8] sm:$0xff] %vm13084_vm2, %v13036_v58  ;;  %v12690_v29 = vmul.f32 %v21602_v62, %v16579_v32  ;;  %v16581_v33 = vadd.f32 %v16408_v43, %v15712_v22  ;;  %v12199_v37 = vpop.f32.mrb[127].mxu0 }
 0x69f   : > { %13206 = vst.msk [vmem:[%s21194_s23 + $0x3c8] sm:$0xff] %vm13084_vm2, %v13034_v63  ;;  %v12688_v17 = vmul.f32 %v21602_v62, %v16580_v28  ;;  %v16582_v55 = vadd.f32 %v12199_v37, %v6555_v20 }
 0x6a0   : > { %v12868_v53 = vadd.f32 %v21614_v48, %v12690_v29  ;;  %v12691_v34 = vmul.f32 %v21602_v62, %v16581_v33 }
 0x6a1   : > { %v12866_v10 = vadd.f32 %v21614_v48, %v12688_v17  ;;  %v12689_v31 = vmul.f32 %v21602_v62, %v16582_v55 }
 0x6a2   : > { %v13039_v4 = vmax.f32 %v12868_v53, 0.0  ;;  %v12869_v59 = vadd.f32 %v21614_v48, %v12691_v34  ;;  %v15719_v39 = vpop.f32.mrb[132].mxu1 }
 0x6a3   : > { %v13037_v15 = vmax.f32 %v12866_v10, 0.0  ;;  %v12867_v13 = vadd.f32 %v21614_v48, %v12689_v31  ;;  %v16411_v45 = vpop.f32.mrb[128].mxu0  ;;  %v6584_v0 = vpop.f32.mrb[133].mxu1  ;;  %v21964_v48 = vld [vmem:[%s22150_s2] ss:$0 sm:$0xff] }
 0x6a4   : > { %13211 = vst.msk [vmem:[%s21194_s23 + $0x3f0] sm:$0xff] %vm13084_vm2, %v13039_v4  ;;  %v13040_v1 = vmax.f32 %v12869_v59, 0.0  ;;  %v16583_v12 = vadd.f32 %v16411_v45, %v15715_v23  ;;  %v12212_v7 = vpop.f32.mrb[129].mxu0  ;;  %v15720_v56 = vpop.f32.mrb[134].mxu1 }
 0x6a5   : > { %13209 = vst.msk [vmem:[%s21194_s23 + $0x3e0] sm:$0xff] %vm13084_vm2, %v13037_v15  ;;  %v13038_v62 = vmax.f32 %v12867_v13, 0.0  ;;  %v16584_v8 = vadd.f32 %v12212_v7, %v6568_v41  ;;  %v16412_v36 = vpop.f32.mrb[130].mxu0  ;;  %v6587_v60 = vpop.f32.mrb[135].mxu1 }
 0x6a6   : > { %13212 = vst.msk [vmem:[%s21194_s23 + $0x3f8] sm:$0xff] %vm13084_vm2, %v13040_v1  ;;  %v12694_v26 = vmul.f32 %v21964_v48, %v16583_v12  ;;  %v16585_v44 = vadd.f32 %v16412_v36, %v15716_v3  ;;  %v12215_v30 = vpop.f32.mrb[131].mxu0 }
 0x6a7   : > { %13210 = vst.msk [vmem:[%s21194_s23 + $0x3e8] sm:$0xff] %vm13084_vm2, %v13038_v62  ;;  %v12692_v27 = vmul.f32 %v21964_v48, %v16584_v8  ;;  %v16586_v19 = vadd.f32 %v12215_v30, %v6571_v46 }
 0x6a8   : > { %v12872_v38 = vadd.f32 %v21973_v61, %v12694_v26  ;;  %v12695_v14 = vmul.f32 %v21964_v48, %v16585_v44 }
 0x6a9   : > { %v12870_v49 = vadd.f32 %v21973_v61, %v12692_v27  ;;  %v12693_v50 = vmul.f32 %v21964_v48, %v16586_v19 }
 0x6aa   : > { %v13043_v22 = vmax.f32 %v12872_v38, 0.0  ;;  %v12873_v54 = vadd.f32 %v21973_v61, %v12695_v14  ;;  %v15723_v9 = vpop.f32.mrb[136].mxu1 }
 0x6ab   : > { %v13041_v16 = vmax.f32 %v12870_v49, 0.0  ;;  %v12871_v20 = vadd.f32 %v21973_v61, %v12693_v50  ;;  %v16415_v2 = vpop.f32.mrb[132].mxu0  ;;  %v6600_v47 = vpop.f32.mrb[137].mxu1 }
 0x6ac   : > { %13215 = vst.msk [vmem:[%s21194_s23 + $0x410] sm:$0xff] %vm13084_vm2, %v13043_v22  ;;  %v13044_v6 = vmax.f32 %v12873_v54, 0.0  ;;  %v16587_v5 = vadd.f32 %v16415_v2, %v15719_v39  ;;  %v12228_v24 = vpop.f32.mrb[133].mxu0  ;;  %v15724_v21 = vpop.f32.mrb[138].mxu1 }
 0x6ad   : > { %13213 = vst.msk [vmem:[%s21194_s23 + $0x400] sm:$0xff] %vm13084_vm2, %v13041_v16  ;;  %v13042_v18 = vmax.f32 %v12871_v20, 0.0  ;;  %v16588_v25 = vadd.f32 %v12228_v24, %v6584_v0  ;;  %v16416_v42 = vpop.f32.mrb[134].mxu0  ;;  %v6603_v52 = vpop.f32.mrb[139].mxu1 }
 0x6ae   : > { %13216 = vst.msk [vmem:[%s21194_s23 + $0x418] sm:$0xff] %vm13084_vm2, %v13044_v6  ;;  %v12698_v51 = vmul.f32 %v21964_v48, %v16587_v5  ;;  %v16589_v23 = vadd.f32 %v16416_v42, %v15720_v56  ;;  %v12231_v35 = vpop.f32.mrb[135].mxu0 }
 0x6af   : > { %13214 = vst.msk [vmem:[%s21194_s23 + $0x408] sm:$0xff] %vm13084_vm2, %v13042_v18  ;;  %v12696_v40 = vmul.f32 %v21964_v48, %v16588_v25  ;;  %v16590_v11 = vadd.f32 %v12231_v35, %v6587_v60 }
 0x6b0   : > { %v12876_v41 = vadd.f32 %v21973_v61, %v12698_v51  ;;  %v12699_v58 = vmul.f32 %v21964_v48, %v16589_v23 }
 0x6b1   : > { %v12874_v32 = vadd.f32 %v21973_v61, %v12696_v40  ;;  %v12697_v57 = vmul.f32 %v21964_v48, %v16590_v11 }
 0x6b2   : > { %v13047_v3 = vmax.f32 %v12876_v41, 0.0  ;;  %v12877_v63 = vadd.f32 %v21973_v61, %v12699_v58  ;;  %v15727_v28 = vpop.f32.mrb[140].mxu1 }
 0x6b3   : > { %v13045_v43 = vmax.f32 %v12874_v32, 0.0  ;;  %v12875_v46 = vadd.f32 %v21973_v61, %v12697_v57  ;;  %v16419_v29 = vpop.f32.mrb[136].mxu0  ;;  %v6616_v33 = vpop.f32.mrb[141].mxu1 }
 0x6b4   : > { %13219 = vst.msk [vmem:[%s21194_s23 + $0x430] sm:$0xff] %vm13084_vm2, %v13047_v3  ;;  %v13048_v37 = vmax.f32 %v12877_v63, 0.0  ;;  %v16591_v17 = vadd.f32 %v16419_v29, %v15723_v9  ;;  %v12244_v55 = vpop.f32.mrb[137].mxu0  ;;  %v15728_v53 = vpop.f32.mrb[142].mxu1 }
 0x6b5   : > { %13217 = vst.msk [vmem:[%s21194_s23 + $0x420] sm:$0xff] %vm13084_vm2, %v13045_v43  ;;  %v13046_v34 = vmax.f32 %v12875_v46, 0.0  ;;  %v16592_v10 = vadd.f32 %v12244_v55, %v6600_v47  ;;  %v16420_v31 = vpop.f32.mrb[138].mxu0  ;;  %v6619_v4 = vpop.f32.mrb[143].mxu1 }
 0x6b6   : > { %13220 = vst.msk [vmem:[%s21194_s23 + $0x438] sm:$0xff] %vm13084_vm2, %v13048_v37  ;;  %v12702_v59 = vmul.f32 %v21964_v48, %v16591_v17  ;;  %v16593_v39 = vadd.f32 %v16420_v31, %v15724_v21  ;;  %v12247_v15 = vpop.f32.mrb[139].mxu0 }
 0x6b7   : > { %13218 = vst.msk [vmem:[%s21194_s23 + $0x428] sm:$0xff] %vm13084_vm2, %v13046_v34  ;;  %v12700_v13 = vmul.f32 %v21964_v48, %v16592_v10  ;;  %v16594_v45 = vadd.f32 %v12247_v15, %v6603_v52 }
 0x6b8   : > { %v12880_v0 = vadd.f32 %v21973_v61, %v12702_v59  ;;  %v12703_v1 = vmul.f32 %v21964_v48, %v16593_v39 }
 0x6b9   : > { %v12878_v12 = vadd.f32 %v21973_v61, %v12700_v13  ;;  %v12701_v7 = vmul.f32 %v21964_v48, %v16594_v45 }
 0x6ba   : > { %v13051_v56 = vmax.f32 %v12880_v0, 0.0  ;;  %v12881_v62 = vadd.f32 %v21973_v61, %v12703_v1  ;;  %v15731_v8 = vpop.f32.mrb[144].mxu1 }
 0x6bb   : > { %v13049_v36 = vmax.f32 %v12878_v12, 0.0  ;;  %v12879_v60 = vadd.f32 %v21973_v61, %v12701_v7  ;;  %v16423_v26 = vpop.f32.mrb[140].mxu0  ;;  %v6632_v44 = vpop.f32.mrb[145].mxu1 }
 0x6bc   : > { %13223 = vst.msk [vmem:[%s21194_s23 + $0x450] sm:$0xff] %vm13084_vm2, %v13051_v56  ;;  %v13052_v30 = vmax.f32 %v12881_v62, 0.0  ;;  %v16595_v27 = vadd.f32 %v16423_v26, %v15727_v28  ;;  %v12260_v19 = vpop.f32.mrb[141].mxu0  ;;  %v15732_v38 = vpop.f32.mrb[146].mxu1 }
 0x6bd   : > { %13221 = vst.msk [vmem:[%s21194_s23 + $0x440] sm:$0xff] %vm13084_vm2, %v13049_v36  ;;  %v13050_v14 = vmax.f32 %v12879_v60, 0.0  ;;  %v16596_v49 = vadd.f32 %v12260_v19, %v6616_v33  ;;  %v16424_v50 = vpop.f32.mrb[142].mxu0  ;;  %v6635_v22 = vpop.f32.mrb[147].mxu1 }
 0x6be   : > { %13224 = vst.msk [vmem:[%s21194_s23 + $0x458] sm:$0xff] %vm13084_vm2, %v13052_v30  ;;  %v12706_v54 = vmul.f32 %v21964_v48, %v16595_v27  ;;  %v16597_v9 = vadd.f32 %v16424_v50, %v15728_v53  ;;  %v12263_v16 = vpop.f32.mrb[143].mxu0 }
 0x6bf   : > { %13222 = vst.msk [vmem:[%s21194_s23 + $0x448] sm:$0xff] %vm13084_vm2, %v13050_v14  ;;  %v12704_v20 = vmul.f32 %v21964_v48, %v16596_v49  ;;  %v16598_v2 = vadd.f32 %v12263_v16, %v6619_v4 }
 0x6c0   : > { %v12884_v47 = vadd.f32 %v21973_v61, %v12706_v54  ;;  %v12707_v6 = vmul.f32 %v21964_v48, %v16597_v9 }
 0x6c1   : > { %v12882_v5 = vadd.f32 %v21973_v61, %v12704_v20  ;;  %v12705_v24 = vmul.f32 %v21964_v48, %v16598_v2 }
 0x6c2   : > { %v13055_v21 = vmax.f32 %v12884_v47, 0.0  ;;  %v12885_v18 = vadd.f32 %v21973_v61, %v12707_v6  ;;  %v15735_v25 = vpop.f32.mrb[148].mxu1 }
 0x6c3   : > { %v13053_v42 = vmax.f32 %v12882_v5, 0.0  ;;  %v12883_v52 = vadd.f32 %v21973_v61, %v12705_v24  ;;  %v16427_v51 = vpop.f32.mrb[144].mxu0  ;;  %v6648_v23 = vpop.f32.mrb[149].mxu1 }
 0x6c4   : > { %13227 = vst.msk [vmem:[%s21194_s23 + $0x470] sm:$0xff] %vm13084_vm2, %v13055_v21  ;;  %v13056_v35 = vmax.f32 %v12885_v18, 0.0  ;;  %v16599_v40 = vadd.f32 %v16427_v51, %v15731_v8  ;;  %v12276_v11 = vpop.f32.mrb[145].mxu0  ;;  %v15736_v41 = vpop.f32.mrb[150].mxu1 }
 0x6c5   : > { %13225 = vst.msk [vmem:[%s21194_s23 + $0x460] sm:$0xff] %vm13084_vm2, %v13053_v42  ;;  %v13054_v58 = vmax.f32 %v12883_v52, 0.0  ;;  %v16600_v32 = vadd.f32 %v12276_v11, %v6632_v44  ;;  %v16428_v57 = vpop.f32.mrb[146].mxu0  ;;  %v6651_v3 = vpop.f32.mrb[151].mxu1 }
 0x6c6   : > { %13228 = vst.msk [vmem:[%s21194_s23 + $0x478] sm:$0xff] %vm13084_vm2, %v13056_v35  ;;  %v12710_v63 = vmul.f32 %v21964_v48, %v16599_v40  ;;  %v16601_v28 = vadd.f32 %v16428_v57, %v15732_v38  ;;  %v12279_v43 = vpop.f32.mrb[147].mxu0 }
 0x6c7   : > { %13226 = vst.msk [vmem:[%s21194_s23 + $0x468] sm:$0xff] %vm13084_vm2, %v13054_v58  ;;  %v12708_v46 = vmul.f32 %v21964_v48, %v16600_v32  ;;  %v16602_v29 = vadd.f32 %v12279_v43, %v6635_v22 }
 0x6c8   : > { %v12888_v33 = vadd.f32 %v21973_v61, %v12710_v63  ;;  %v12711_v37 = vmul.f32 %v21964_v48, %v16601_v28 }
 0x6c9   : > { %v12886_v17 = vadd.f32 %v21973_v61, %v12708_v46  ;;  %v12709_v55 = vmul.f32 %v21964_v48, %v16602_v29 }
 0x6ca   : > { %v13059_v53 = vmax.f32 %v12888_v33, 0.0  ;;  %v12889_v34 = vadd.f32 %v21973_v61, %v12711_v37  ;;  %v15739_v10 = vpop.f32.mrb[152].mxu1 }
 0x6cb   : > { %v13057_v31 = vmax.f32 %v12886_v17, 0.0  ;;  %v12887_v4 = vadd.f32 %v21973_v61, %v12709_v55  ;;  %v16431_v59 = vpop.f32.mrb[148].mxu0  ;;  %v6664_v39 = vpop.f32.mrb[153].mxu1 }
 0x6cc   : > { %13231 = vst.msk [vmem:[%s21194_s23 + $0x490] sm:$0xff] %vm13084_vm2, %v13059_v53  ;;  %v13060_v15 = vmax.f32 %v12889_v34, 0.0  ;;  %v16603_v13 = vadd.f32 %v16431_v59, %v15735_v25  ;;  %v12292_v45 = vpop.f32.mrb[149].mxu0  ;;  %v15740_v0 = vpop.f32.mrb[154].mxu1 }
 0x6cd   : > { %13229 = vst.msk [vmem:[%s21194_s23 + $0x480] sm:$0xff] %vm13084_vm2, %v13057_v31  ;;  %v13058_v1 = vmax.f32 %v12887_v4, 0.0  ;;  %v16604_v12 = vadd.f32 %v12292_v45, %v6648_v23  ;;  %v16432_v7 = vpop.f32.mrb[150].mxu0  ;;  %v6667_v56 = vpop.f32.mrb[155].mxu1 }
 0x6ce   : > { %13232 = vst.msk [vmem:[%s21194_s23 + $0x498] sm:$0xff] %vm13084_vm2, %v13060_v15  ;;  %v12714_v62 = vmul.f32 %v21964_v48, %v16603_v13  ;;  %v16605_v8 = vadd.f32 %v16432_v7, %v15736_v41  ;;  %v12295_v36 = vpop.f32.mrb[151].mxu0 }
 0x6cf   : > { %13230 = vst.msk [vmem:[%s21194_s23 + $0x488] sm:$0xff] %vm13084_vm2, %v13058_v1  ;;  %v12712_v60 = vmul.f32 %v21964_v48, %v16604_v12  ;;  %v16606_v26 = vadd.f32 %v12295_v36, %v6651_v3 }
 0x6d0   : > { %v12892_v44 = vadd.f32 %v21973_v61, %v12714_v62  ;;  %v12715_v30 = vmul.f32 %v21964_v48, %v16605_v8 }
 0x6d1   : > { %v12890_v27 = vadd.f32 %v21973_v61, %v12712_v60  ;;  %v12713_v19 = vmul.f32 %v21964_v48, %v16606_v26 }
 0x6d2   : > { %v13063_v38 = vmax.f32 %v12892_v44, 0.0  ;;  %v12893_v14 = vadd.f32 %v21973_v61, %v12715_v30  ;;  %v15743_v49 = vpop.f32.mrb[156].mxu1 }
 0x6d3   : > { %v13061_v50 = vmax.f32 %v12890_v27, 0.0  ;;  %v12891_v22 = vadd.f32 %v21973_v61, %v12713_v19  ;;  %v16435_v54 = vpop.f32.mrb[152].mxu0  ;;  %v6680_v9 = vpop.f32.mrb[157].mxu1 }
 0x6d4   : > { %13235 = vst.msk [vmem:[%s21194_s23 + $0x4b0] sm:$0xff] %vm13084_vm2, %v13063_v38  ;;  %v13064_v16 = vmax.f32 %v12893_v14, 0.0  ;;  %v16607_v20 = vadd.f32 %v16435_v54, %v15739_v10  ;;  %v12308_v2 = vpop.f32.mrb[153].mxu0  ;;  %v15744_v47 = vpop.f32.mrb[158].mxu1 }
 0x6d5   : > { %13233 = vst.msk [vmem:[%s21194_s23 + $0x4a0] sm:$0xff] %vm13084_vm2, %v13061_v50  ;;  %v13062_v6 = vmax.f32 %v12891_v22, 0.0  ;;  %v16608_v5 = vadd.f32 %v12308_v2, %v6664_v39  ;;  %v16436_v24 = vpop.f32.mrb[154].mxu0  ;;  %v6683_v21 = vpop.f32.mrb[159].mxu1 }
 0x6d6   : > { %13236 = vst.msk [vmem:[%s21194_s23 + $0x4b8] sm:$0xff] %vm13084_vm2, %v13064_v16  ;;  %v12718_v18 = vmul.f32 %v21964_v48, %v16607_v20  ;;  %v16609_v25 = vadd.f32 %v16436_v24, %v15740_v0  ;;  %v12311_v42 = vpop.f32.mrb[155].mxu0 }
 0x6d7   : > { %13234 = vst.msk [vmem:[%s21194_s23 + $0x4a8] sm:$0xff] %vm13084_vm2, %v13062_v6  ;;  %v12716_v52 = vmul.f32 %v21964_v48, %v16608_v5  ;;  %v16610_v51 = vadd.f32 %v12311_v42, %v6667_v56 }
 0x6d8   : > { %v12896_v23 = vadd.f32 %v21973_v61, %v12718_v18  ;;  %v12719_v35 = vmul.f32 %v21964_v48, %v16609_v25 }
 0x6d9   : > { %v12894_v40 = vadd.f32 %v21973_v61, %v12716_v52  ;;  %v12717_v11 = vmul.f32 %v21964_v48, %v16610_v51 }
 0x6da   : > { %v13067_v41 = vmax.f32 %v12896_v23, 0.0  ;;  %v12897_v58 = vadd.f32 %v21973_v61, %v12719_v35  ;;  %v15747_v32 = vpop.f32.mrb[160].mxu1 }
 0x6db   : > { %v13065_v57 = vmax.f32 %v12894_v40, 0.0  ;;  %v12895_v3 = vadd.f32 %v21973_v61, %v12717_v11  ;;  %v16439_v63 = vpop.f32.mrb[156].mxu0  ;;  %v6696_v28 = vpop.f32.mrb[161].mxu1 }
 0x6dc   : > { %13239 = vst.msk [vmem:[%s21194_s23 + $0x4d0] sm:$0xff] %vm13084_vm2, %v13067_v41  ;;  %v13068_v43 = vmax.f32 %v12897_v58, 0.0  ;;  %v16611_v46 = vadd.f32 %v16439_v63, %v15743_v49  ;;  %v12324_v29 = vpop.f32.mrb[157].mxu0  ;;  %v15748_v33 = vpop.f32.mrb[162].mxu1 }
 0x6dd   : > { %13237 = vst.msk [vmem:[%s21194_s23 + $0x4c0] sm:$0xff] %vm13084_vm2, %v13065_v57  ;;  %v13066_v37 = vmax.f32 %v12895_v3, 0.0  ;;  %v16612_v17 = vadd.f32 %v12324_v29, %v6680_v9  ;;  %v16440_v55 = vpop.f32.mrb[158].mxu0  ;;  %v6699_v53 = vpop.f32.mrb[163].mxu1 }
 0x6de   : > { %13240 = vst.msk [vmem:[%s21194_s23 + $0x4d8] sm:$0xff] %vm13084_vm2, %v13068_v43  ;;  %v12722_v34 = vmul.f32 %v21964_v48, %v16611_v46  ;;  %v16613_v10 = vadd.f32 %v16440_v55, %v15744_v47  ;;  %v12327_v31 = vpop.f32.mrb[159].mxu0 }
 0x6df   : > { %13238 = vst.msk [vmem:[%s21194_s23 + $0x4c8] sm:$0xff] %vm13084_vm2, %v13066_v37  ;;  %v12720_v4 = vmul.f32 %v21964_v48, %v16612_v17  ;;  %v16614_v59 = vadd.f32 %v12327_v31, %v6683_v21 }
 0x6e0   : > { %v12900_v39 = vadd.f32 %v21973_v61, %v12722_v34  ;;  %v12723_v15 = vmul.f32 %v21964_v48, %v16613_v10 }
 0x6e1   : > { %v12898_v13 = vadd.f32 %v21973_v61, %v12720_v4  ;;  %v12721_v45 = vmul.f32 %v21964_v48, %v16614_v59 }
 0x6e2   : > { %v13071_v0 = vmax.f32 %v12900_v39, 0.0  ;;  %v12901_v1 = vadd.f32 %v21973_v61, %v12723_v15  ;;  %v15751_v12 = vpop.f32.mrb[164].mxu1 }
 0x6e3   : > { %v13069_v7 = vmax.f32 %v12898_v13, 0.0  ;;  %v12899_v56 = vadd.f32 %v21973_v61, %v12721_v45  ;;  %v16443_v62 = vpop.f32.mrb[160].mxu0  ;;  %v6712_v8 = vpop.f32.mrb[165].mxu1 }
 0x6e4   : > { %13243 = vst.msk [vmem:[%s21194_s23 + $0x4f0] sm:$0xff] %vm13084_vm2, %v13071_v0  ;;  %v13072_v36 = vmax.f32 %v12901_v1, 0.0  ;;  %v16615_v60 = vadd.f32 %v16443_v62, %v15747_v32  ;;  %v12340_v26 = vpop.f32.mrb[161].mxu0  ;;  %v15752_v44 = vpop.f32.mrb[166].mxu1 }
 0x6e5   : > { %13241 = vst.msk [vmem:[%s21194_s23 + $0x4e0] sm:$0xff] %vm13084_vm2, %v13069_v7  ;;  %v13070_v30 = vmax.f32 %v12899_v56, 0.0  ;;  %v16616_v27 = vadd.f32 %v12340_v26, %v6696_v28  ;;  %v16444_v19 = vpop.f32.mrb[162].mxu0  ;;  %v6715_v38 = vpop.f32.mrb[167].mxu1 }
 0x6e6   : > { %13244 = vst.msk [vmem:[%s21194_s23 + $0x4f8] sm:$0xff] %vm13084_vm2, %v13072_v36  ;;  %v12726_v14 = vmul.f32 %v21964_v48, %v16615_v60  ;;  %v16617_v49 = vadd.f32 %v16444_v19, %v15748_v33  ;;  %v12343_v50 = vpop.f32.mrb[163].mxu0 }
 0x6e7   : > { %13242 = vst.msk [vmem:[%s21194_s23 + $0x4e8] sm:$0xff] %vm13084_vm2, %v13070_v30  ;;  %v12724_v22 = vmul.f32 %v21964_v48, %v16616_v27  ;;  %v16618_v54 = vadd.f32 %v12343_v50, %v6699_v53 }
 0x6e8   : > { %v12904_v9 = vadd.f32 %v21973_v61, %v12726_v14  ;;  %v12727_v16 = vmul.f32 %v21964_v48, %v16617_v49 }
 0x6e9   : > { %v12902_v20 = vadd.f32 %v21973_v61, %v12724_v22  ;;  %v12725_v2 = vmul.f32 %v21964_v48, %v16618_v54 }
 0x6ea   : > { %v13075_v47 = vmax.f32 %v12904_v9, 0.0  ;;  %v12905_v6 = vadd.f32 %v21973_v61, %v12727_v16  ;;  %v15755_v5 = vpop.f32.mrb[168].mxu1 }
 0x6eb   : > { %v13073_v24 = vmax.f32 %v12902_v20, 0.0  ;;  %v12903_v21 = vadd.f32 %v21973_v61, %v12725_v2  ;;  %v16447_v18 = vpop.f32.mrb[164].mxu0  ;;  %v6728_v25 = vpop.f32.mrb[169].mxu1 }
 0x6ec   : > { %13247 = vst.msk [vmem:[%s21194_s23 + $0x510] sm:$0xff] %vm13084_vm2, %v13075_v47  ;;  %v13076_v42 = vmax.f32 %v12905_v6, 0.0  ;;  %v16619_v52 = vadd.f32 %v16447_v18, %v15751_v12  ;;  %v12356_v51 = vpop.f32.mrb[165].mxu0  ;;  %v15756_v23 = vpop.f32.mrb[170].mxu1 }
 0x6ed   : > { %13245 = vst.msk [vmem:[%s21194_s23 + $0x500] sm:$0xff] %vm13084_vm2, %v13073_v24  ;;  %v13074_v35 = vmax.f32 %v12903_v21, 0.0  ;;  %v16620_v40 = vadd.f32 %v12356_v51, %v6712_v8  ;;  %v16448_v11 = vpop.f32.mrb[166].mxu0  ;;  %v6731_v41 = vpop.f32.mrb[171].mxu1 }
 0x6ee   : > { %13248 = vst.msk [vmem:[%s21194_s23 + $0x518] sm:$0xff] %vm13084_vm2, %v13076_v42  ;;  %v12730_v58 = vmul.f32 %v21964_v48, %v16619_v52  ;;  %v16621_v32 = vadd.f32 %v16448_v11, %v15752_v44  ;;  %v12359_v57 = vpop.f32.mrb[167].mxu0 }
 0x6ef   : > { %13246 = vst.msk [vmem:[%s21194_s23 + $0x508] sm:$0xff] %vm13084_vm2, %v13074_v35  ;;  %v12728_v3 = vmul.f32 %v21964_v48, %v16620_v40  ;;  %v16622_v63 = vadd.f32 %v12359_v57, %v6715_v38 }
 0x6f0   : > { %v12908_v28 = vadd.f32 %v21973_v61, %v12730_v58  ;;  %v12731_v43 = vmul.f32 %v21964_v48, %v16621_v32 }
 0x6f1   : > { %v12906_v46 = vadd.f32 %v21973_v61, %v12728_v3  ;;  %v12729_v29 = vmul.f32 %v21964_v48, %v16622_v63 }
 0x6f2   : > { %v13079_v33 = vmax.f32 %v12908_v28, 0.0  ;;  %v12909_v37 = vadd.f32 %v21973_v61, %v12731_v43 }
 0x6f3   : > { %v13077_v17 = vmax.f32 %v12906_v46, 0.0  ;;  %v12907_v55 = vadd.f32 %v21973_v61, %v12729_v29  ;;  %v16451_v53 = vpop.f32.mrb[168].mxu0 }
 0x6f4   : > { %13251 = vst.msk [vmem:[%s21194_s23 + $0x530] sm:$0xff] %vm13084_vm2, %v13079_v33  ;;  %v13080_v34 = vmax.f32 %v12909_v37, 0.0  ;;  %v16623_v10 = vadd.f32 %v16451_v53, %v15755_v5  ;;  %v12372_v31 = vpop.f32.mrb[169].mxu0 }
 0x6f5   : > { %13249 = vst.msk [vmem:[%s21194_s23 + $0x520] sm:$0xff] %vm13084_vm2, %v13077_v17  ;;  %v13078_v4 = vmax.f32 %v12907_v55, 0.0  ;;  %v16624_v59 = vadd.f32 %v12372_v31, %v6728_v25  ;;  %v16452_v39 = vpop.f32.mrb[170].mxu0 }
 0x6f6   : > { %13252 = vst.msk [vmem:[%s21194_s23 + $0x538] sm:$0xff] %vm13084_vm2, %v13080_v34  ;;  %v12734_v15 = vmul.f32 %v21964_v48, %v16623_v10  ;;  %v12375_v13 = vpop.f32.mrb[171].mxu0 }
 0x6f7   : > { %13250 = vst.msk [vmem:[%s21194_s23 + $0x528] sm:$0xff] %vm13084_vm2, %v13078_v4  ;;  %v12732_v45 = vmul.f32 %v21964_v48, %v16624_v59  ;;  %v16625_v0 = vadd.f32 %v12375_v13, %v6731_v41 }
 0x6f8   : > { %v12912_v1 = vadd.f32 %v21973_v61, %v12734_v15 }
 0x6f9   : > { %v12910_v12 = vadd.f32 %v21973_v61, %v12732_v45  ;;  %v12733_v7 = vmul.f32 %v21964_v48, %v16625_v0 }
 0x6fa   : > { %v13083_v56 = vmax.f32 %v12912_v1, 0.0 }
 0x6fb   : > { %v13081_v62 = vmax.f32 %v12910_v12, 0.0  ;;  %v12911_v8 = vadd.f32 %v21973_v61, %v12733_v7 }
 0x6fc   : > { %13255 = vst.msk [vmem:[%s21194_s23 + $0x550] sm:$0xff] %vm13084_vm2, %v13083_v56 }
 0x6fd   : > { %13253 = vst.msk [vmem:[%s21194_s23 + $0x540] sm:$0xff] %vm13084_vm2, %v13081_v62  ;;  %v13082_v36 = vmax.f32 %v12911_v8, 0.0 }
 0x6ff   : > { %13254 = vst.msk [vmem:[%s21194_s23 + $0x548] sm:$0xff] %vm13084_vm2, %v13082_v36 }
 0x700 PF: > { %s14_s15 = sadd.s32 1, %s17861_s15  }
 0x701   : > { %p11_p4 = scmp.ge.s32.totalorder %s14_s15, 4  }
 0x703   :  { %13 = sbr.rel (!%p11_p4) target bundleno = 1 (0x1), region = 74 }

</bundles_post_ra>
